<compile_context>
chip_gen: v7x
topology: tpu7x:2x2x1
jax: 0.10.0
libtpu: 0.0.40
codegen_flags: <defaults>
</compile_context>

<pallas_src>
import functools

import jax
import jax.numpy as jnp
from jax.experimental import pallas as pl
from jax.experimental.pallas import tpu as pltpu


_LANE = 128                       # lane width; Cout padded to a multiple of this
_COUT_TILE = 128                  # per-grid-step output-channel tile
_VMEM_LIMIT = 64 * 1024 * 1024    # fits v7x physical VMEM; well under v5e/v6e


def _round_up(x, m):
    return ((x + m - 1) // m) * m


# ----------------------------------------------------------------------------
# Per-output-row conv accumulation: sum of k*k tap matmuls, f32 accumulator.
#   x_ref : (1, rows, ws, cin) bf16  (stride-2 layers: 2x2 space-to-depth,
#           merged row index = i*4 + py*2 + px; stride-1: plain padded NHWC)
#   w_ref : (k*k, cin, ct)     bf16  (tap index = dy*k + dx)
# Returns (wo, ct) f32.
# ----------------------------------------------------------------------------
def _accumulate_row(x_ref, w_ref, oy, *, k, stride, wo):
    ns = stride * stride
    acc = None
    for dy in range(k):
        for dx in range(k):
            roff = dy // stride
            sub = (dy % stride) * stride + (dx % stride)
            col = dx // stride
            idx = (oy + roff) * ns + sub
            lhs = x_ref[0, idx, pl.ds(col, wo), :]                # (wo, cin) bf16
            t = jnp.dot(lhs, w_ref[dy * k + dx],
                        preferred_element_type=jnp.float32)       # (wo, ct) f32
            acc = t if acc is None else acc + t
    return acc


# ----------------------------------------------------------------------------
# Kernel A: layer WITHOUT InstanceNorm (conv0, conv4).  grid=(N, n_ct), both
# "parallel".  Bias added, optional LeakyReLU, bf16 store.
# ----------------------------------------------------------------------------
def _conv_nonorm_kernel(x_ref, w_ref, b_ref, o_ref, *, k, stride, ho, wo, use_act):
    bias = jnp.broadcast_to(b_ref[...], (wo, b_ref.shape[-1]))    # hoisted once

    @pl.loop(0, ho)
    def _(oy):
        acc = _accumulate_row(x_ref, w_ref, oy, k=k, stride=stride, wo=wo) + bias
        if use_act:
            acc = jnp.where(acc >= 0.0, acc, 0.2 * acc)           # LeakyReLU(0.2)
        o_ref[0, oy] = acc.astype(o_ref.dtype)


# ----------------------------------------------------------------------------
# Kernel B: layer WITH InstanceNorm (conv1..conv3).  grid=(N, n_ct), both
# "parallel" (each step is self-contained).  Pre-norm rows kept in an f32 VMEM
# scratch; per-channel sum / sum-of-squares accumulated incrementally; bias
# skipped (cancelled by mean subtraction).  bf16 store after normalize + act.
# ----------------------------------------------------------------------------
def _conv_norm_kernel(x_ref, w_ref, o_ref, acc_ref, sum_ref, ssq_ref, *,
                      k, stride, ho, wo, use_act):
    sum_ref[...] = jnp.zeros_like(sum_ref)
    ssq_ref[...] = jnp.zeros_like(ssq_ref)

    @pl.loop(0, ho)
    def _(oy):
        row = _accumulate_row(x_ref, w_ref, oy, k=k, stride=stride, wo=wo)
        acc_ref[oy] = row
        sum_ref[...] += jnp.sum(row, axis=0, keepdims=True)
        ssq_ref[...] += jnp.sum(row * row, axis=0, keepdims=True)

    inv_n = 1.0 / float(ho * wo)
    mean = sum_ref[...] * inv_n                                   # (1, ct) f32
    # One-pass variance, clamped at 0 to avoid NaN from cancellation.
    var = jnp.maximum(ssq_ref[...] * inv_n - mean * mean, 0.0)
    scale = jax.lax.rsqrt(var + 1e-5)

    @pl.loop(0, ho)
    def _(oy):
        y = (acc_ref[oy] - mean) * scale
        if use_act:
            y = jnp.where(y >= 0.0, y, 0.2 * y)                   # LeakyReLU(0.2)
        o_ref[0, oy] = y.astype(o_ref.dtype)


# ----------------------------------------------------------------------------
# Host-side input prep: bf16 cast + zero pad; stride-2 layers additionally get
# a 2x2 space-to-depth so every conv tap is a contiguous (Wo, Cin) slice.
# Same total bytes as the input -- NOT an im2col (no duplication).
# ----------------------------------------------------------------------------
def _prep_input(x, k, stride, pad):
    n, h, w, c = x.shape
    ho = (h + 2 * pad - k) // stride + 1
    wo = (w + 2 * pad - k) // stride + 1
    x = x.astype(jnp.bfloat16)
    if stride == 1:
        xp = jnp.pad(x, ((0, 0), (pad, pad), (pad, pad), (0, 0)))
        return xp, ho, wo

    # stride 2: pad spatial dims to even, then 2x2 space-to-depth.
    hp, wp = h + 2 * pad, w + 2 * pad
    hp2, wp2 = hp + (hp % 2), wp + (wp % 2)
    xp = jnp.pad(x, ((0, 0), (pad, pad + hp2 - hp), (pad, pad + wp2 - wp), (0, 0)))
    xr = xp.reshape(n, hp2 // 2, 2, wp2 // 2, 2, c)               # (n,i,py,j,px,c)
    xr = xr.transpose(0, 1, 2, 4, 3, 5)                           # (n,i,py,px,j,c)
    x_prep = xr.reshape(n, (hp2 // 2) * 4, wp2 // 2, c)           # row = i*4+py*2+px
    return x_prep, ho, wo


def _conv_layer(x_nhwc, w_taps, bias, k, stride, pad, use_norm, use_act):
    """One DownConv layer.  w_taps: (k*k, Cin, Cout) f32, tap index dy*k+dx."""
    x_prep, ho, wo = _prep_input(x_nhwc, k, stride, pad)
    n, rows, ws, cin = x_prep.shape
    cout = w_taps.shape[-1]
    cout_pad = _round_up(cout, _LANE)
    ct = min(cout_pad, _COUT_TILE)
    n_ct = cout_pad // ct

    w_p = jnp.pad(w_taps, ((0, 0), (0, 0), (0, cout_pad - cout))).astype(jnp.bfloat16)

    x_spec = pl.BlockSpec((1, rows, ws, cin), lambda b, j: (b, 0, 0, 0))
    w_spec = pl.BlockSpec((k * k, cin, ct), lambda b, j: (0, 0, j))
    o_spec = pl.BlockSpec((1, ho, wo, ct), lambda b, j: (b, 0, 0, j))
    out_shape = jax.ShapeDtypeStruct((n, ho, wo, cout_pad), jnp.bfloat16)
    compiler_params = pltpu.CompilerParams(
        dimension_semantics=("parallel", "parallel"),
        vmem_limit_bytes=_VMEM_LIMIT,
    )

    if use_norm:
        kernel = functools.partial(_conv_norm_kernel, k=k, stride=stride,
                                   ho=ho, wo=wo, use_act=use_act)
        out = pl.pallas_call(
            kernel,
            out_shape=out_shape,
            grid_spec=pltpu.PrefetchScalarGridSpec(
                num_scalar_prefetch=0,
                grid=(n, n_ct),
                in_specs=[x_spec, w_spec],
                out_specs=o_spec,
                scratch_shapes=[pltpu.VMEM((ho, wo, ct), jnp.float32),
                                pltpu.VMEM((1, ct), jnp.float32),
                                pltpu.VMEM((1, ct), jnp.float32)]),
            compiler_params=compiler_params,
        )(x_prep, w_p)
    else:
        b_p = jnp.pad(bias, (0, cout_pad - cout)).reshape(1, cout_pad)
        b_p = b_p.astype(jnp.float32)
        b_spec = pl.BlockSpec((1, ct), lambda b, j: (0, j))
        kernel = functools.partial(_conv_nonorm_kernel, k=k, stride=stride,
                                   ho=ho, wo=wo, use_act=use_act)
        out = pl.pallas_call(
            kernel,
            out_shape=out_shape,
            grid_spec=pltpu.PrefetchScalarGridSpec(
                num_scalar_prefetch=0,
                grid=(n, n_ct),
                in_specs=[x_spec, w_spec, b_spec],
                out_specs=o_spec),
            compiler_params=compiler_params,
        )(x_prep, w_p, b_p)

    return out[:, :, :, :cout]                                    # bf16, NHWC


# ----------------------------------------------------------------------------
# Parameter construction (deterministic, synthetic).
# Weights stored as (k*k, Cin, Cout) tap matrices (tap index = dy*k + dx).
# ----------------------------------------------------------------------------
def init_discriminator_params(key, in_channels=6, features=32, k=4):
    layer_defs = [
        # (cin,          cout,         stride, pad, norm,  act)
        (in_channels,    features,     2,      1,   False, True),
        (features,       features * 2, 2,      1,   True,  True),
        (features * 2,   features * 4, 2,      1,   True,  True),
        (features * 4,   features * 8, 1,      1,   True,  True),
        (features * 8,   1,            1,      1,   False, False),
    ]
    params = []
    for i, (cin, cout, stride, pad, norm, act) in enumerate(layer_defs):
        kw, kb = jax.random.split(jax.random.fold_in(key, i))
        w = jax.random.normal(kw, (k, k, cin, cout), jnp.float32) * 0.05
        b = jax.random.normal(kb, (cout,), jnp.float32) * 0.01
        params.append(dict(w=w.reshape(k * k, cin, cout), b=b,
                           k=k, stride=stride, pad=pad, norm=norm, act=act))
    return params


def discriminator_forward(params, x_nchw, y_nchw):
    # torch.cat([x, y], dim=1), then NCHW -> NHWC.
    out = jnp.concatenate([x_nchw, y_nchw], axis=1)
    out = jnp.transpose(out, (0, 2, 3, 1))
    for lp in params:
        out = _conv_layer(out, lp["w"], lp["b"], lp["k"], lp["stride"],
                          lp["pad"], lp["norm"], lp["act"])
    # back to NCHW (f32) to match the PyTorch module's output convention.
    return jnp.transpose(out, (0, 3, 1, 2)).astype(jnp.float32)


if __name__ == "__main__":
    key = jax.random.PRNGKey(0)
    kx, ky, kp = jax.random.split(key, 3)

    # Small shapes: batch=2, 3-channel x and y (concat -> 6), 32x32 spatial,
    # features=8 -> final output shape (2, 1, 2, 2).
    batch, c_half, hw, features = 2, 3, 32, 8
    x = jax.random.normal(kx, (batch, c_half, hw, hw), jnp.float32)
    y = jax.random.normal(ky, (batch, c_half, hw, hw), jnp.float32)

    params = init_discriminator_params(kp, in_channels=2 * c_half, features=features)

    fwd = jax.jit(lambda a, b: discriminator_forward(params, a, b))
    out = fwd(x, y)
    jax.block_until_ready(out)

    expected_shape = (batch, 1, 2, 2)
    assert out.shape == expected_shape, (out.shape, expected_shape)
    assert jnp.all(jnp.isfinite(out))
    print("KERNEL_OK")
</pallas_src>

<mosaic_0001>
module attributes {stable_mosaic.version = 11 : i64} {
  func.func @_conv_nonorm_kernel(%arg0: i32, %arg1: i32, %arg2: memref<1x68x17x6xbf16, #tpu.memory_space<vmem>>, %arg3: memref<16x6x128xbf16, #tpu.memory_space<vmem>>, %arg4: memref<1x128xf32, #tpu.memory_space<vmem>>, %arg5: memref<1x16x16x128xbf16, #tpu.memory_space<vmem>>) attributes {dimension_semantics = [#tpu.dimension_semantics<parallel>, #tpu.dimension_semantics<parallel>], iteration_bounds = array<i64: 2, 1>, scalar_prefetch = 0 : i64, scratch_operands = 0 : i64, tpu.core_type = #tpu.core_type<tc>, window_params = [{transform_indices = @transform_0, window_bounds = array<i64: 1, 68, 17, 6>}, {transform_indices = @transform_1, window_bounds = array<i64: 16, 6, 128>}, {transform_indices = @transform_2, window_bounds = array<i64: 1, 128>}, {transform_indices = @transform_3, window_bounds = array<i64: 1, 16, 16, 128>}]} {
    %c0 = arith.constant 0 : index
    %c0_0 = arith.constant 0 : index
    %0 = vector.load %arg4[%c0, %c0_0] : memref<1x128xf32, #tpu.memory_space<vmem>>, vector<1x128xf32>
    %1 = vector.shape_cast %0 : vector<1x128xf32> to vector<1x128xf32>
    %2 = vector.broadcast %1 : vector<1x128xf32> to vector<16x128xf32>
    %c0_i32 = arith.constant 0 : i32
    %c16_i32 = arith.constant 16 : i32
    %3 = arith.addi %c0_i32, %c16_i32 : i32
    %c1_i32 = arith.constant 1 : i32
    scf.for %arg6 = %c0_i32 to %3 step %c1_i32  : i32 {
      %c1_i32_2 = arith.constant 1 : i32
      %4 = arith.muli %arg6, %c1_i32_2 : i32
      %c0_i32_3 = arith.constant 0 : i32
      %5 = arith.addi %c0_i32_3, %4 : i32
      %c0_i32_4 = arith.constant 0 : i32
      %6 = arith.addi %5, %c0_i32_4 : i32
      %c4_i32 = arith.constant 4 : i32
      %7 = arith.muli %6, %c4_i32 : i32
      %c0_i32_5 = arith.constant 0 : i32
      %8 = arith.addi %7, %c0_i32_5 : i32
      %c0_6 = arith.constant 0 : index
      %9 = arith.index_cast %8 : i32 to index
      %c0_7 = arith.constant 0 : index
      %c0_8 = arith.constant 0 : index
      %10 = vector.load %arg2[%c0_6, %9, %c0_7, %c0_8] : memref<1x68x17x6xbf16, #tpu.memory_space<vmem>>, vector<1x1x16x6xbf16>
      %11 = vector.shape_cast %10 : vector<1x1x16x6xbf16> to vector<16x6xbf16>
      %c0_9 = arith.constant 0 : index
      %c0_10 = arith.constant 0 : index
      %c0_11 = arith.constant 0 : index
      %12 = vector.load %arg3[%c0_9, %c0_10, %c0_11] : memref<16x6x128xbf16, #tpu.memory_space<vmem>>, vector<1x6x128xbf16>
      %13 = vector.shape_cast %12 : vector<1x6x128xbf16> to vector<6x128xbf16>
      %cst = arith.constant dense<0.000000e+00> : vector<16x128xf32>
      %14 = tpu.matmul %11, %13, %cst {dimension_numbers = #tpu.dot_dimension_numbers<[1], [0], [0], [1], [0, 0, 1, 1], [], []>} : vector<16x6xbf16>, vector<6x128xbf16>, vector<16x128xf32> -> vector<16x128xf32>
      %c0_i32_12 = arith.constant 0 : i32
      %15 = arith.addi %5, %c0_i32_12 : i32
      %c4_i32_13 = arith.constant 4 : i32
      %16 = arith.muli %15, %c4_i32_13 : i32
      %c1_i32_14 = arith.constant 1 : i32
      %17 = arith.addi %16, %c1_i32_14 : i32
      %c0_15 = arith.constant 0 : index
      %18 = arith.index_cast %17 : i32 to index
      %c0_16 = arith.constant 0 : index
      %c0_17 = arith.constant 0 : index
      %19 = vector.load %arg2[%c0_15, %18, %c0_16, %c0_17] : memref<1x68x17x6xbf16, #tpu.memory_space<vmem>>, vector<1x1x16x6xbf16>
      %20 = vector.shape_cast %19 : vector<1x1x16x6xbf16> to vector<16x6xbf16>
      %c1 = arith.constant 1 : index
      %c0_18 = arith.constant 0 : index
      %c0_19 = arith.constant 0 : index
      %21 = vector.load %arg3[%c1, %c0_18, %c0_19] : memref<16x6x128xbf16, #tpu.memory_space<vmem>>, vector<1x6x128xbf16>
      %22 = vector.shape_cast %21 : vector<1x6x128xbf16> to vector<6x128xbf16>
      %cst_20 = arith.constant dense<0.000000e+00> : vector<16x128xf32>
      %23 = tpu.matmul %20, %22, %cst_20 {dimension_numbers = #tpu.dot_dimension_numbers<[1], [0], [0], [1], [0, 0, 1, 1], [], []>} : vector<16x6xbf16>, vector<6x128xbf16>, vector<16x128xf32> -> vector<16x128xf32>
      %24 = arith.addf %14, %23 : vector<16x128xf32>
      %c0_i32_21 = arith.constant 0 : i32
      %25 = arith.addi %5, %c0_i32_21 : i32
      %c4_i32_22 = arith.constant 4 : i32
      %26 = arith.muli %25, %c4_i32_22 : i32
      %c0_i32_23 = arith.constant 0 : i32
      %27 = arith.addi %26, %c0_i32_23 : i32
      %c0_24 = arith.constant 0 : index
      %28 = arith.index_cast %27 : i32 to index
      %c1_25 = arith.constant 1 : index
      %c0_26 = arith.constant 0 : index
      %29 = vector.load %arg2[%c0_24, %28, %c1_25, %c0_26] : memref<1x68x17x6xbf16, #tpu.memory_space<vmem>>, vector<1x1x16x6xbf16>
      %30 = vector.shape_cast %29 : vector<1x1x16x6xbf16> to vector<16x6xbf16>
      %c2 = arith.constant 2 : index
      %c0_27 = arith.constant 0 : index
      %c0_28 = arith.constant 0 : index
      %31 = vector.load %arg3[%c2, %c0_27, %c0_28] : memref<16x6x128xbf16, #tpu.memory_space<vmem>>, vector<1x6x128xbf16>
      %32 = vector.shape_cast %31 : vector<1x6x128xbf16> to vector<6x128xbf16>
      %cst_29 = arith.constant dense<0.000000e+00> : vector<16x128xf32>
      %33 = tpu.matmul %30, %32, %cst_29 {dimension_numbers = #tpu.dot_dimension_numbers<[1], [0], [0], [1], [0, 0, 1, 1], [], []>} : vector<16x6xbf16>, vector<6x128xbf16>, vector<16x128xf32> -> vector<16x128xf32>
      %34 = arith.addf %24, %33 : vector<16x128xf32>
      %c0_i32_30 = arith.constant 0 : i32
      %35 = arith.addi %5, %c0_i32_30 : i32
      %c4_i32_31 = arith.constant 4 : i32
      %36 = arith.muli %35, %c4_i32_31 : i32
      %c1_i32_32 = arith.constant 1 : i32
      %37 = arith.addi %36, %c1_i32_32 : i32
      %c0_33 = arith.constant 0 : index
      %38 = arith.index_cast %37 : i32 to index
      %c1_34 = arith.constant 1 : index
      %c0_35 = arith.constant 0 : index
      %39 = vector.load %arg2[%c0_33, %38, %c1_34, %c0_35] : memref<1x68x17x6xbf16, #tpu.memory_space<vmem>>, vector<1x1x16x6xbf16>
      %40 = vector.shape_cast %39 : vector<1x1x16x6xbf16> to vector<16x6xbf16>
      %c3 = arith.constant 3 : index
      %c0_36 = arith.constant 0 : index
      %c0_37 = arith.constant 0 : index
      %41 = vector.load %arg3[%c3, %c0_36, %c0_37] : memref<16x6x128xbf16, #tpu.memory_space<vmem>>, vector<1x6x128xbf16>
      %42 = vector.shape_cast %41 : vector<1x6x128xbf16> to vector<6x128xbf16>
      %cst_38 = arith.constant dense<0.000000e+00> : vector<16x128xf32>
      %43 = tpu.matmul %40, %42, %cst_38 {dimension_numbers = #tpu.dot_dimension_numbers<[1], [0], [0], [1], [0, 0, 1, 1], [], []>} : vector<16x6xbf16>, vector<6x128xbf16>, vector<16x128xf32> -> vector<16x128xf32>
      %44 = arith.addf %34, %43 : vector<16x128xf32>
      %c0_i32_39 = arith.constant 0 : i32
      %45 = arith.addi %5, %c0_i32_39 : i32
      %c4_i32_40 = arith.constant 4 : i32
      %46 = arith.muli %45, %c4_i32_40 : i32
      %c2_i32 = arith.constant 2 : i32
      %47 = arith.addi %46, %c2_i32 : i32
      %c0_41 = arith.constant 0 : index
      %48 = arith.index_cast %47 : i32 to index
      %c0_42 = arith.constant 0 : index
      %c0_43 = arith.constant 0 : index
      %49 = vector.load %arg2[%c0_41, %48, %c0_42, %c0_43] : memref<1x68x17x6xbf16, #tpu.memory_space<vmem>>, vector<1x1x16x6xbf16>
      %50 = vector.shape_cast %49 : vector<1x1x16x6xbf16> to vector<16x6xbf16>
      %c4 = arith.constant 4 : index
      %c0_44 = arith.constant 0 : index
      %c0_45 = arith.constant 0 : index
      %51 = vector.load %arg3[%c4, %c0_44, %c0_45] : memref<16x6x128xbf16, #tpu.memory_space<vmem>>, vector<1x6x128xbf16>
      %52 = vector.shape_cast %51 : vector<1x6x128xbf16> to vector<6x128xbf16>
      %cst_46 = arith.constant dense<0.000000e+00> : vector<16x128xf32>
      %53 = tpu.matmul %50, %52, %cst_46 {dimension_numbers = #tpu.dot_dimension_numbers<[1], [0], [0], [1], [0, 0, 1, 1], [], []>} : vector<16x6xbf16>, vector<6x128xbf16>, vector<16x128xf32> -> vector<16x128xf32>
      %54 = arith.addf %44, %53 : vector<16x128xf32>
      %c0_i32_47 = arith.constant 0 : i32
      %55 = arith.addi %5, %c0_i32_47 : i32
      %c4_i32_48 = arith.constant 4 : i32
      %56 = arith.muli %55, %c4_i32_48 : i32
      %c3_i32 = arith.constant 3 : i32
      %57 = arith.addi %56, %c3_i32 : i32
      %c0_49 = arith.constant 0 : index
      %58 = arith.index_cast %57 : i32 to index
      %c0_50 = arith.constant 0 : index
      %c0_51 = arith.constant 0 : index
      %59 = vector.load %arg2[%c0_49, %58, %c0_50, %c0_51] : memref<1x68x17x6xbf16, #tpu.memory_space<vmem>>, vector<1x1x16x6xbf16>
      %60 = vector.shape_cast %59 : vector<1x1x16x6xbf16> to vector<16x6xbf16>
      %c5 = arith.constant 5 : index
      %c0_52 = arith.constant 0 : index
      %c0_53 = arith.constant 0 : index
      %61 = vector.load %arg3[%c5, %c0_52, %c0_53] : memref<16x6x128xbf16, #tpu.memory_space<vmem>>, vector<1x6x128xbf16>
      %62 = vector.shape_cast %61 : vector<1x6x128xbf16> to vector<6x128xbf16>
      %cst_54 = arith.constant dense<0.000000e+00> : vector<16x128xf32>
      %63 = tpu.matmul %60, %62, %cst_54 {dimension_numbers = #tpu.dot_dimension_numbers<[1], [0], [0], [1], [0, 0, 1, 1], [], []>} : vector<16x6xbf16>, vector<6x128xbf16>, vector<16x128xf32> -> vector<16x128xf32>
      %64 = arith.addf %54, %63 : vector<16x128xf32>
      %c0_i32_55 = arith.constant 0 : i32
      %65 = arith.addi %5, %c0_i32_55 : i32
      %c4_i32_56 = arith.constant 4 : i32
      %66 = arith.muli %65, %c4_i32_56 : i32
      %c2_i32_57 = arith.constant 2 : i32
      %67 = arith.addi %66, %c2_i32_57 : i32
      %c0_58 = arith.constant 0 : index
      %68 = arith.index_cast %67 : i32 to index
      %c1_59 = arith.constant 1 : index
      %c0_60 = arith.constant 0 : index
      %69 = vector.load %arg2[%c0_58, %68, %c1_59, %c0_60] : memref<1x68x17x6xbf16, #tpu.memory_space<vmem>>, vector<1x1x16x6xbf16>
      %70 = vector.shape_cast %69 : vector<1x1x16x6xbf16> to vector<16x6xbf16>
      %c6 = arith.constant 6 : index
      %c0_61 = arith.constant 0 : index
      %c0_62 = arith.constant 0 : index
      %71 = vector.load %arg3[%c6, %c0_61, %c0_62] : memref<16x6x128xbf16, #tpu.memory_space<vmem>>, vector<1x6x128xbf16>
      %72 = vector.shape_cast %71 : vector<1x6x128xbf16> to vector<6x128xbf16>
      %cst_63 = arith.constant dense<0.000000e+00> : vector<16x128xf32>
      %73 = tpu.matmul %70, %72, %cst_63 {dimension_numbers = #tpu.dot_dimension_numbers<[1], [0], [0], [1], [0, 0, 1, 1], [], []>} : vector<16x6xbf16>, vector<6x128xbf16>, vector<16x128xf32> -> vector<16x128xf32>
      %74 = arith.addf %64, %73 : vector<16x128xf32>
      %c0_i32_64 = arith.constant 0 : i32
      %75 = arith.addi %5, %c0_i32_64 : i32
      %c4_i32_65 = arith.constant 4 : i32
      %76 = arith.muli %75, %c4_i32_65 : i32
      %c3_i32_66 = arith.constant 3 : i32
      %77 = arith.addi %76, %c3_i32_66 : i32
      %c0_67 = arith.constant 0 : index
      %78 = arith.index_cast %77 : i32 to index
      %c1_68 = arith.constant 1 : index
      %c0_69 = arith.constant 0 : index
      %79 = vector.load %arg2[%c0_67, %78, %c1_68, %c0_69] : memref<1x68x17x6xbf16, #tpu.memory_space<vmem>>, vector<1x1x16x6xbf16>
      %80 = vector.shape_cast %79 : vector<1x1x16x6xbf16> to vector<16x6xbf16>
      %c7 = arith.constant 7 : index
      %c0_70 = arith.constant 0 : index
      %c0_71 = arith.constant 0 : index
      %81 = vector.load %arg3[%c7, %c0_70, %c0_71] : memref<16x6x128xbf16, #tpu.memory_space<vmem>>, vector<1x6x128xbf16>
      %82 = vector.shape_cast %81 : vector<1x6x128xbf16> to vector<6x128xbf16>
      %cst_72 = arith.constant dense<0.000000e+00> : vector<16x128xf32>
      %83 = tpu.matmul %80, %82, %cst_72 {dimension_numbers = #tpu.dot_dimension_numbers<[1], [0], [0], [1], [0, 0, 1, 1], [], []>} : vector<16x6xbf16>, vector<6x128xbf16>, vector<16x128xf32> -> vector<16x128xf32>
      %84 = arith.addf %74, %83 : vector<16x128xf32>
      %c1_i32_73 = arith.constant 1 : i32
      %85 = arith.addi %5, %c1_i32_73 : i32
      %c4_i32_74 = arith.constant 4 : i32
      %86 = arith.muli %85, %c4_i32_74 : i32
      %c0_i32_75 = arith.constant 0 : i32
      %87 = arith.addi %86, %c0_i32_75 : i32
      %c0_76 = arith.constant 0 : index
      %88 = arith.index_cast %87 : i32 to index
      %c0_77 = arith.constant 0 : index
      %c0_78 = arith.constant 0 : index
      %89 = vector.load %arg2[%c0_76, %88, %c0_77, %c0_78] : memref<1x68x17x6xbf16, #tpu.memory_space<vmem>>, vector<1x1x16x6xbf16>
      %90 = vector.shape_cast %89 : vector<1x1x16x6xbf16> to vector<16x6xbf16>
      %c8 = arith.constant 8 : index
      %c0_79 = arith.constant 0 : index
      %c0_80 = arith.constant 0 : index
      %91 = vector.load %arg3[%c8, %c0_79, %c0_80] : memref<16x6x128xbf16, #tpu.memory_space<vmem>>, vector<1x6x128xbf16>
      %92 = vector.shape_cast %91 : vector<1x6x128xbf16> to vector<6x128xbf16>
      %cst_81 = arith.constant dense<0.000000e+00> : vector<16x128xf32>
      %93 = tpu.matmul %90, %92, %cst_81 {dimension_numbers = #tpu.dot_dimension_numbers<[1], [0], [0], [1], [0, 0, 1, 1], [], []>} : vector<16x6xbf16>, vector<6x128xbf16>, vector<16x128xf32> -> vector<16x128xf32>
      %94 = arith.addf %84, %93 : vector<16x128xf32>
      %c1_i32_82 = arith.constant 1 : i32
      %95 = arith.addi %5, %c1_i32_82 : i32
      %c4_i32_83 = arith.constant 4 : i32
      %96 = arith.muli %95, %c4_i32_83 : i32
      %c1_i32_84 = arith.constant 1 : i32
      %97 = arith.addi %96, %c1_i32_84 : i32
      %c0_85 = arith.constant 0 : index
      %98 = arith.index_cast %97 : i32 to index
      %c0_86 = arith.constant 0 : index
      %c0_87 = arith.constant 0 : index
      %99 = vector.load %arg2[%c0_85, %98, %c0_86, %c0_87] : memref<1x68x17x6xbf16, #tpu.memory_space<vmem>>, vector<1x1x16x6xbf16>
      %100 = vector.shape_cast %99 : vector<1x1x16x6xbf16> to vector<16x6xbf16>
      %c9 = arith.constant 9 : index
      %c0_88 = arith.constant 0 : index
      %c0_89 = arith.constant 0 : index
      %101 = vector.load %arg3[%c9, %c0_88, %c0_89] : memref<16x6x128xbf16, #tpu.memory_space<vmem>>, vector<1x6x128xbf16>
      %102 = vector.shape_cast %101 : vector<1x6x128xbf16> to vector<6x128xbf16>
      %cst_90 = arith.constant dense<0.000000e+00> : vector<16x128xf32>
      %103 = tpu.matmul %100, %102, %cst_90 {dimension_numbers = #tpu.dot_dimension_numbers<[1], [0], [0], [1], [0, 0, 1, 1], [], []>} : vector<16x6xbf16>, vector<6x128xbf16>, vector<16x128xf32> -> vector<16x128xf32>
      %104 = arith.addf %94, %103 : vector<16x128xf32>
      %c1_i32_91 = arith.constant 1 : i32
      %105 = arith.addi %5, %c1_i32_91 : i32
      %c4_i32_92 = arith.constant 4 : i32
      %106 = arith.muli %105, %c4_i32_92 : i32
      %c0_i32_93 = arith.constant 0 : i32
      %107 = arith.addi %106, %c0_i32_93 : i32
      %c0_94 = arith.constant 0 : index
      %108 = arith.index_cast %107 : i32 to index
      %c1_95 = arith.constant 1 : index
      %c0_96 = arith.constant 0 : index
      %109 = vector.load %arg2[%c0_94, %108, %c1_95, %c0_96] : memref<1x68x17x6xbf16, #tpu.memory_space<vmem>>, vector<1x1x16x6xbf16>
      %110 = vector.shape_cast %109 : vector<1x1x16x6xbf16> to vector<16x6xbf16>
      %c10 = arith.constant 10 : index
      %c0_97 = arith.constant 0 : index
      %c0_98 = arith.constant 0 : index
      %111 = vector.load %arg3[%c10, %c0_97, %c0_98] : memref<16x6x128xbf16, #tpu.memory_space<vmem>>, vector<1x6x128xbf16>
      %112 = vector.shape_cast %111 : vector<1x6x128xbf16> to vector<6x128xbf16>
      %cst_99 = arith.constant dense<0.000000e+00> : vector<16x128xf32>
      %113 = tpu.matmul %110, %112, %cst_99 {dimension_numbers = #tpu.dot_dimension_numbers<[1], [0], [0], [1], [0, 0, 1, 1], [], []>} : vector<16x6xbf16>, vector<6x128xbf16>, vector<16x128xf32> -> vector<16x128xf32>
      %114 = arith.addf %104, %113 : vector<16x128xf32>
      %c1_i32_100 = arith.constant 1 : i32
      %115 = arith.addi %5, %c1_i32_100 : i32
      %c4_i32_101 = arith.constant 4 : i32
      %116 = arith.muli %115, %c4_i32_101 : i32
      %c1_i32_102 = arith.constant 1 : i32
      %117 = arith.addi %116, %c1_i32_102 : i32
      %c0_103 = arith.constant 0 : index
      %118 = arith.index_cast %117 : i32 to index
      %c1_104 = arith.constant 1 : index
      %c0_105 = arith.constant 0 : index
      %119 = vector.load %arg2[%c0_103, %118, %c1_104, %c0_105] : memref<1x68x17x6xbf16, #tpu.memory_space<vmem>>, vector<1x1x16x6xbf16>
      %120 = vector.shape_cast %119 : vector<1x1x16x6xbf16> to vector<16x6xbf16>
      %c11 = arith.constant 11 : index
      %c0_106 = arith.constant 0 : index
      %c0_107 = arith.constant 0 : index
      %121 = vector.load %arg3[%c11, %c0_106, %c0_107] : memref<16x6x128xbf16, #tpu.memory_space<vmem>>, vector<1x6x128xbf16>
      %122 = vector.shape_cast %121 : vector<1x6x128xbf16> to vector<6x128xbf16>
      %cst_108 = arith.constant dense<0.000000e+00> : vector<16x128xf32>
      %123 = tpu.matmul %120, %122, %cst_108 {dimension_numbers = #tpu.dot_dimension_numbers<[1], [0], [0], [1], [0, 0, 1, 1], [], []>} : vector<16x6xbf16>, vector<6x128xbf16>, vector<16x128xf32> -> vector<16x128xf32>
      %124 = arith.addf %114, %123 : vector<16x128xf32>
      %c1_i32_109 = arith.constant 1 : i32
      %125 = arith.addi %5, %c1_i32_109 : i32
      %c4_i32_110 = arith.constant 4 : i32
      %126 = arith.muli %125, %c4_i32_110 : i32
      %c2_i32_111 = arith.constant 2 : i32
      %127 = arith.addi %126, %c2_i32_111 : i32
      %c0_112 = arith.constant 0 : index
      %128 = arith.index_cast %127 : i32 to index
      %c0_113 = arith.constant 0 : index
      %c0_114 = arith.constant 0 : index
      %129 = vector.load %arg2[%c0_112, %128, %c0_113, %c0_114] : memref<1x68x17x6xbf16, #tpu.memory_space<vmem>>, vector<1x1x16x6xbf16>
      %130 = vector.shape_cast %129 : vector<1x1x16x6xbf16> to vector<16x6xbf16>
      %c12 = arith.constant 12 : index
      %c0_115 = arith.constant 0 : index
      %c0_116 = arith.constant 0 : index
      %131 = vector.load %arg3[%c12, %c0_115, %c0_116] : memref<16x6x128xbf16, #tpu.memory_space<vmem>>, vector<1x6x128xbf16>
      %132 = vector.shape_cast %131 : vector<1x6x128xbf16> to vector<6x128xbf16>
      %cst_117 = arith.constant dense<0.000000e+00> : vector<16x128xf32>
      %133 = tpu.matmul %130, %132, %cst_117 {dimension_numbers = #tpu.dot_dimension_numbers<[1], [0], [0], [1], [0, 0, 1, 1], [], []>} : vector<16x6xbf16>, vector<6x128xbf16>, vector<16x128xf32> -> vector<16x128xf32>
      %134 = arith.addf %124, %133 : vector<16x128xf32>
      %c1_i32_118 = arith.constant 1 : i32
      %135 = arith.addi %5, %c1_i32_118 : i32
      %c4_i32_119 = arith.constant 4 : i32
      %136 = arith.muli %135, %c4_i32_119 : i32
      %c3_i32_120 = arith.constant 3 : i32
      %137 = arith.addi %136, %c3_i32_120 : i32
      %c0_121 = arith.constant 0 : index
      %138 = arith.index_cast %137 : i32 to index
      %c0_122 = arith.constant 0 : index
      %c0_123 = arith.constant 0 : index
      %139 = vector.load %arg2[%c0_121, %138, %c0_122, %c0_123] : memref<1x68x17x6xbf16, #tpu.memory_space<vmem>>, vector<1x1x16x6xbf16>
      %140 = vector.shape_cast %139 : vector<1x1x16x6xbf16> to vector<16x6xbf16>
      %c13 = arith.constant 13 : index
      %c0_124 = arith.constant 0 : index
      %c0_125 = arith.constant 0 : index
      %141 = vector.load %arg3[%c13, %c0_124, %c0_125] : memref<16x6x128xbf16, #tpu.memory_space<vmem>>, vector<1x6x128xbf16>
      %142 = vector.shape_cast %141 : vector<1x6x128xbf16> to vector<6x128xbf16>
      %cst_126 = arith.constant dense<0.000000e+00> : vector<16x128xf32>
      %143 = tpu.matmul %140, %142, %cst_126 {dimension_numbers = #tpu.dot_dimension_numbers<[1], [0], [0], [1], [0, 0, 1, 1], [], []>} : vector<16x6xbf16>, vector<6x128xbf16>, vector<16x128xf32> -> vector<16x128xf32>
      %144 = arith.addf %134, %143 : vector<16x128xf32>
      %c1_i32_127 = arith.constant 1 : i32
      %145 = arith.addi %5, %c1_i32_127 : i32
      %c4_i32_128 = arith.constant 4 : i32
      %146 = arith.muli %145, %c4_i32_128 : i32
      %c2_i32_129 = arith.constant 2 : i32
      %147 = arith.addi %146, %c2_i32_129 : i32
      %c0_130 = arith.constant 0 : index
      %148 = arith.index_cast %147 : i32 to index
      %c1_131 = arith.constant 1 : index
      %c0_132 = arith.constant 0 : index
      %149 = vector.load %arg2[%c0_130, %148, %c1_131, %c0_132] : memref<1x68x17x6xbf16, #tpu.memory_space<vmem>>, vector<1x1x16x6xbf16>
      %150 = vector.shape_cast %149 : vector<1x1x16x6xbf16> to vector<16x6xbf16>
      %c14 = arith.constant 14 : index
      %c0_133 = arith.constant 0 : index
      %c0_134 = arith.constant 0 : index
      %151 = vector.load %arg3[%c14, %c0_133, %c0_134] : memref<16x6x128xbf16, #tpu.memory_space<vmem>>, vector<1x6x128xbf16>
      %152 = vector.shape_cast %151 : vector<1x6x128xbf16> to vector<6x128xbf16>
      %cst_135 = arith.constant dense<0.000000e+00> : vector<16x128xf32>
      %153 = tpu.matmul %150, %152, %cst_135 {dimension_numbers = #tpu.dot_dimension_numbers<[1], [0], [0], [1], [0, 0, 1, 1], [], []>} : vector<16x6xbf16>, vector<6x128xbf16>, vector<16x128xf32> -> vector<16x128xf32>
      %154 = arith.addf %144, %153 : vector<16x128xf32>
      %c1_i32_136 = arith.constant 1 : i32
      %155 = arith.addi %5, %c1_i32_136 : i32
      %c4_i32_137 = arith.constant 4 : i32
      %156 = arith.muli %155, %c4_i32_137 : i32
      %c3_i32_138 = arith.constant 3 : i32
      %157 = arith.addi %156, %c3_i32_138 : i32
      %c0_139 = arith.constant 0 : index
      %158 = arith.index_cast %157 : i32 to index
      %c1_140 = arith.constant 1 : index
      %c0_141 = arith.constant 0 : index
      %159 = vector.load %arg2[%c0_139, %158, %c1_140, %c0_141] : memref<1x68x17x6xbf16, #tpu.memory_space<vmem>>, vector<1x1x16x6xbf16>
      %160 = vector.shape_cast %159 : vector<1x1x16x6xbf16> to vector<16x6xbf16>
      %c15 = arith.constant 15 : index
      %c0_142 = arith.constant 0 : index
      %c0_143 = arith.constant 0 : index
      %161 = vector.load %arg3[%c15, %c0_142, %c0_143] : memref<16x6x128xbf16, #tpu.memory_space<vmem>>, vector<1x6x128xbf16>
      %162 = vector.shape_cast %161 : vector<1x6x128xbf16> to vector<6x128xbf16>
      %cst_144 = arith.constant dense<0.000000e+00> : vector<16x128xf32>
      %163 = tpu.matmul %160, %162, %cst_144 {dimension_numbers = #tpu.dot_dimension_numbers<[1], [0], [0], [1], [0, 0, 1, 1], [], []>} : vector<16x6xbf16>, vector<6x128xbf16>, vector<16x128xf32> -> vector<16x128xf32>
      %164 = arith.addf %154, %163 : vector<16x128xf32>
      %165 = arith.addf %164, %2 : vector<16x128xf32>
      %cst_145 = arith.constant 0.000000e+00 : f32
      %166 = vector.broadcast %cst_145 : f32 to vector<16x128xf32>
      %167 = arith.cmpf oge, %165, %166 : vector<16x128xf32>
      %cst_146 = arith.constant 2.000000e-01 : f32
      %168 = vector.broadcast %cst_146 : f32 to vector<16x128xf32>
      %169 = arith.mulf %168, %165 : vector<16x128xf32>
      %170 = arith.select %167, %165, %169 : vector<16x128xi1>, vector<16x128xf32>
      %171 = arith.truncf %170 : vector<16x128xf32> to vector<16x128xbf16>
      %c0_147 = arith.constant 0 : index
      %172 = arith.index_cast %5 : i32 to index
      %c0_148 = arith.constant 0 : index
      %c0_149 = arith.constant 0 : index
      %173 = vector.load %arg5[%c0_147, %172, %c0_148, %c0_149] : memref<1x16x16x128xbf16, #tpu.memory_space<vmem>>, vector<1x1x16x128xbf16>
      %174 = vector.shape_cast %173 : vector<1x1x16x128xbf16> to vector<16x128xbf16>
      %175 = vector.shape_cast %171 : vector<16x128xbf16> to vector<1x1x16x128xbf16>
      tpu.vector_store %arg5[%c0_147, %172, %c0_148, %c0_149], %175 {strides = array<i32>} : memref<1x16x16x128xbf16, #tpu.memory_space<vmem>>, vector<1x1x16x128xbf16>,
    }
    %c16_i32_1 = arith.constant 16 : i32
    return
  }
  func.func @transform_0(%arg0: i32, %arg1: i32) -> (i32, i32, i32, i32) {
    %c0_i32 = arith.constant 0 : i32
    %c0_i32_0 = arith.constant 0 : i32
    %c0_i32_1 = arith.constant 0 : i32
    %c0_i32_2 = arith.constant 0 : i32
    return %arg0, %c0_i32, %c0_i32_0, %c0_i32_1 : i32, i32, i32, i32
  }
  func.func @transform_1(%arg0: i32, %arg1: i32) -> (i32, i32, i32) {
    %c0_i32 = arith.constant 0 : i32
    %c0_i32_0 = arith.constant 0 : i32
    %c0_i32_1 = arith.constant 0 : i32
    return %c0_i32, %c0_i32_0, %arg1 : i32, i32, i32
  }
  func.func @transform_2(%arg0: i32, %arg1: i32) -> (i32, i32) {
    %c0_i32 = arith.constant 0 : i32
    %c0_i32_0 = arith.constant 0 : i32
    return %c0_i32, %arg1 : i32, i32
  }
  func.func @transform_3(%arg0: i32, %arg1: i32) -> (i32, i32, i32, i32) {
    %c0_i32 = arith.constant 0 : i32
    %c0_i32_0 = arith.constant 0 : i32
    %c0_i32_1 = arith.constant 0 : i32
    return %arg0, %c0_i32, %c0_i32_0, %arg1 : i32, i32, i32, i32
  }
}

module attributes {stable_mosaic.version = 11 : i64} {
  func.func @_conv_norm_kernel(%arg0: i32, %arg1: i32, %arg2: memref<1x36x9x8xbf16, #tpu.memory_space<vmem>>, %arg3: memref<16x8x128xbf16, #tpu.memory_space<vmem>>, %arg4: memref<1x8x8x128xbf16, #tpu.memory_space<vmem>>, %arg5: memref<8x8x128xf32, #tpu.memory_space<vmem>>, %arg6: memref<1x128xf32, #tpu.memory_space<vmem>>, %arg7: memref<1x128xf32, #tpu.memory_space<vmem>>) attributes {dimension_semantics = [#tpu.dimension_semantics<parallel>, #tpu.dimension_semantics<parallel>], iteration_bounds = array<i64: 2, 1>, scalar_prefetch = 0 : i64, scratch_operands = 3 : i64, tpu.core_type = #tpu.core_type<tc>, window_params = [{transform_indices = @transform_0, window_bounds = array<i64: 1, 36, 9, 8>}, {transform_indices = @transform_1, window_bounds = array<i64: 16, 8, 128>}, {transform_indices = @transform_2, window_bounds = array<i64: 1, 8, 8, 128>}]} {
    %cst = arith.constant 0.000000e+00 : f32
    %0 = vector.broadcast %cst : f32 to vector<1x128xf32>
    %c0 = arith.constant 0 : index
    %c0_0 = arith.constant 0 : index
    %1 = vector.load %arg6[%c0, %c0_0] : memref<1x128xf32, #tpu.memory_space<vmem>>, vector<1x128xf32>
    tpu.vector_store %arg6[%c0, %c0_0], %0 {strides = array<i32>} : memref<1x128xf32, #tpu.memory_space<vmem>>, vector<1x128xf32>,
    %cst_1 = arith.constant 0.000000e+00 : f32
    %2 = vector.broadcast %cst_1 : f32 to vector<1x128xf32>
    %c0_2 = arith.constant 0 : index
    %c0_3 = arith.constant 0 : index
    %3 = vector.load %arg7[%c0_2, %c0_3] : memref<1x128xf32, #tpu.memory_space<vmem>>, vector<1x128xf32>
    tpu.vector_store %arg7[%c0_2, %c0_3], %2 {strides = array<i32>} : memref<1x128xf32, #tpu.memory_space<vmem>>, vector<1x128xf32>,
    %c0_i32 = arith.constant 0 : i32
    %c8_i32 = arith.constant 8 : i32
    %4 = arith.addi %c0_i32, %c8_i32 : i32
    %c1_i32 = arith.constant 1 : i32
    scf.for %arg8 = %c0_i32 to %4 step %c1_i32  : i32 {
      %c1_i32_17 = arith.constant 1 : i32
      %19 = arith.muli %arg8, %c1_i32_17 : i32
      %c0_i32_18 = arith.constant 0 : i32
      %20 = arith.addi %c0_i32_18, %19 : i32
      %c0_i32_19 = arith.constant 0 : i32
      %21 = arith.addi %20, %c0_i32_19 : i32
      %c4_i32 = arith.constant 4 : i32
      %22 = arith.muli %21, %c4_i32 : i32
      %c0_i32_20 = arith.constant 0 : i32
      %23 = arith.addi %22, %c0_i32_20 : i32
      %c0_21 = arith.constant 0 : index
      %24 = arith.index_cast %23 : i32 to index
      %c0_22 = arith.constant 0 : index
      %c0_23 = arith.constant 0 : index
      %25 = vector.load %arg2[%c0_21, %24, %c0_22, %c0_23] : memref<1x36x9x8xbf16, #tpu.memory_space<vmem>>, vector<1x1x8x8xbf16>
      %26 = vector.shape_cast %25 : vector<1x1x8x8xbf16> to vector<8x8xbf16>
      %c0_24 = arith.constant 0 : index
      %c0_25 = arith.constant 0 : index
      %c0_26 = arith.constant 0 : index
      %27 = vector.load %arg3[%c0_24, %c0_25, %c0_26] : memref<16x8x128xbf16, #tpu.memory_space<vmem>>, vector<1x8x128xbf16>
      %28 = vector.shape_cast %27 : vector<1x8x128xbf16> to vector<8x128xbf16>
      %cst_27 = arith.constant dense<0.000000e+00> : vector<8x128xf32>
      %29 = tpu.matmul %26, %28, %cst_27 {dimension_numbers = #tpu.dot_dimension_numbers<[1], [0], [0], [1], [0, 0, 1, 1], [], []>} : vector<8x8xbf16>, vector<8x128xbf16>, vector<8x128xf32> -> vector<8x128xf32>
      %c0_i32_28 = arith.constant 0 : i32
      %30 = arith.addi %20, %c0_i32_28 : i32
      %c4_i32_29 = arith.constant 4 : i32
      %31 = arith.muli %30, %c4_i32_29 : i32
      %c1_i32_30 = arith.constant 1 : i32
      %32 = arith.addi %31, %c1_i32_30 : i32
      %c0_31 = arith.constant 0 : index
      %33 = arith.index_cast %32 : i32 to index
      %c0_32 = arith.constant 0 : index
      %c0_33 = arith.constant 0 : index
      %34 = vector.load %arg2[%c0_31, %33, %c0_32, %c0_33] : memref<1x36x9x8xbf16, #tpu.memory_space<vmem>>, vector<1x1x8x8xbf16>
      %35 = vector.shape_cast %34 : vector<1x1x8x8xbf16> to vector<8x8xbf16>
      %c1 = arith.constant 1 : index
      %c0_34 = arith.constant 0 : index
      %c0_35 = arith.constant 0 : index
      %36 = vector.load %arg3[%c1, %c0_34, %c0_35] : memref<16x8x128xbf16, #tpu.memory_space<vmem>>, vector<1x8x128xbf16>
      %37 = vector.shape_cast %36 : vector<1x8x128xbf16> to vector<8x128xbf16>
      %cst_36 = arith.constant dense<0.000000e+00> : vector<8x128xf32>
      %38 = tpu.matmul %35, %37, %cst_36 {dimension_numbers = #tpu.dot_dimension_numbers<[1], [0], [0], [1], [0, 0, 1, 1], [], []>} : vector<8x8xbf16>, vector<8x128xbf16>, vector<8x128xf32> -> vector<8x128xf32>
      %39 = arith.addf %29, %38 : vector<8x128xf32>
      %c0_i32_37 = arith.constant 0 : i32
      %40 = arith.addi %20, %c0_i32_37 : i32
      %c4_i32_38 = arith.constant 4 : i32
      %41 = arith.muli %40, %c4_i32_38 : i32
      %c0_i32_39 = arith.constant 0 : i32
      %42 = arith.addi %41, %c0_i32_39 : i32
      %c0_40 = arith.constant 0 : index
      %43 = arith.index_cast %42 : i32 to index
      %c1_41 = arith.constant 1 : index
      %c0_42 = arith.constant 0 : index
      %44 = vector.load %arg2[%c0_40, %43, %c1_41, %c0_42] : memref<1x36x9x8xbf16, #tpu.memory_space<vmem>>, vector<1x1x8x8xbf16>
      %45 = vector.shape_cast %44 : vector<1x1x8x8xbf16> to vector<8x8xbf16>
      %c2 = arith.constant 2 : index
      %c0_43 = arith.constant 0 : index
      %c0_44 = arith.constant 0 : index
      %46 = vector.load %arg3[%c2, %c0_43, %c0_44] : memref<16x8x128xbf16, #tpu.memory_space<vmem>>, vector<1x8x128xbf16>
      %47 = vector.shape_cast %46 : vector<1x8x128xbf16> to vector<8x128xbf16>
      %cst_45 = arith.constant dense<0.000000e+00> : vector<8x128xf32>
      %48 = tpu.matmul %45, %47, %cst_45 {dimension_numbers = #tpu.dot_dimension_numbers<[1], [0], [0], [1], [0, 0, 1, 1], [], []>} : vector<8x8xbf16>, vector<8x128xbf16>, vector<8x128xf32> -> vector<8x128xf32>
      %49 = arith.addf %39, %48 : vector<8x128xf32>
      %c0_i32_46 = arith.constant 0 : i32
      %50 = arith.addi %20, %c0_i32_46 : i32
      %c4_i32_47 = arith.constant 4 : i32
      %51 = arith.muli %50, %c4_i32_47 : i32
      %c1_i32_48 = arith.constant 1 : i32
      %52 = arith.addi %51, %c1_i32_48 : i32
      %c0_49 = arith.constant 0 : index
      %53 = arith.index_cast %52 : i32 to index
      %c1_50 = arith.constant 1 : index
      %c0_51 = arith.constant 0 : index
      %54 = vector.load %arg2[%c0_49, %53, %c1_50, %c0_51] : memref<1x36x9x8xbf16, #tpu.memory_space<vmem>>, vector<1x1x8x8xbf16>
      %55 = vector.shape_cast %54 : vector<1x1x8x8xbf16> to vector<8x8xbf16>
      %c3 = arith.constant 3 : index
      %c0_52 = arith.constant 0 : index
      %c0_53 = arith.constant 0 : index
      %56 = vector.load %arg3[%c3, %c0_52, %c0_53] : memref<16x8x128xbf16, #tpu.memory_space<vmem>>, vector<1x8x128xbf16>
      %57 = vector.shape_cast %56 : vector<1x8x128xbf16> to vector<8x128xbf16>
      %cst_54 = arith.constant dense<0.000000e+00> : vector<8x128xf32>
      %58 = tpu.matmul %55, %57, %cst_54 {dimension_numbers = #tpu.dot_dimension_numbers<[1], [0], [0], [1], [0, 0, 1, 1], [], []>} : vector<8x8xbf16>, vector<8x128xbf16>, vector<8x128xf32> -> vector<8x128xf32>
      %59 = arith.addf %49, %58 : vector<8x128xf32>
      %c0_i32_55 = arith.constant 0 : i32
      %60 = arith.addi %20, %c0_i32_55 : i32
      %c4_i32_56 = arith.constant 4 : i32
      %61 = arith.muli %60, %c4_i32_56 : i32
      %c2_i32 = arith.constant 2 : i32
      %62 = arith.addi %61, %c2_i32 : i32
      %c0_57 = arith.constant 0 : index
      %63 = arith.index_cast %62 : i32 to index
      %c0_58 = arith.constant 0 : index
      %c0_59 = arith.constant 0 : index
      %64 = vector.load %arg2[%c0_57, %63, %c0_58, %c0_59] : memref<1x36x9x8xbf16, #tpu.memory_space<vmem>>, vector<1x1x8x8xbf16>
      %65 = vector.shape_cast %64 : vector<1x1x8x8xbf16> to vector<8x8xbf16>
      %c4 = arith.constant 4 : index
      %c0_60 = arith.constant 0 : index
      %c0_61 = arith.constant 0 : index
      %66 = vector.load %arg3[%c4, %c0_60, %c0_61] : memref<16x8x128xbf16, #tpu.memory_space<vmem>>, vector<1x8x128xbf16>
      %67 = vector.shape_cast %66 : vector<1x8x128xbf16> to vector<8x128xbf16>
      %cst_62 = arith.constant dense<0.000000e+00> : vector<8x128xf32>
      %68 = tpu.matmul %65, %67, %cst_62 {dimension_numbers = #tpu.dot_dimension_numbers<[1], [0], [0], [1], [0, 0, 1, 1], [], []>} : vector<8x8xbf16>, vector<8x128xbf16>, vector<8x128xf32> -> vector<8x128xf32>
      %69 = arith.addf %59, %68 : vector<8x128xf32>
      %c0_i32_63 = arith.constant 0 : i32
      %70 = arith.addi %20, %c0_i32_63 : i32
      %c4_i32_64 = arith.constant 4 : i32
      %71 = arith.muli %70, %c4_i32_64 : i32
      %c3_i32 = arith.constant 3 : i32
      %72 = arith.addi %71, %c3_i32 : i32
      %c0_65 = arith.constant 0 : index
      %73 = arith.index_cast %72 : i32 to index
      %c0_66 = arith.constant 0 : index
      %c0_67 = arith.constant 0 : index
      %74 = vector.load %arg2[%c0_65, %73, %c0_66, %c0_67] : memref<1x36x9x8xbf16, #tpu.memory_space<vmem>>, vector<1x1x8x8xbf16>
      %75 = vector.shape_cast %74 : vector<1x1x8x8xbf16> to vector<8x8xbf16>
      %c5 = arith.constant 5 : index
      %c0_68 = arith.constant 0 : index
      %c0_69 = arith.constant 0 : index
      %76 = vector.load %arg3[%c5, %c0_68, %c0_69] : memref<16x8x128xbf16, #tpu.memory_space<vmem>>, vector<1x8x128xbf16>
      %77 = vector.shape_cast %76 : vector<1x8x128xbf16> to vector<8x128xbf16>
      %cst_70 = arith.constant dense<0.000000e+00> : vector<8x128xf32>
      %78 = tpu.matmul %75, %77, %cst_70 {dimension_numbers = #tpu.dot_dimension_numbers<[1], [0], [0], [1], [0, 0, 1, 1], [], []>} : vector<8x8xbf16>, vector<8x128xbf16>, vector<8x128xf32> -> vector<8x128xf32>
      %79 = arith.addf %69, %78 : vector<8x128xf32>
      %c0_i32_71 = arith.constant 0 : i32
      %80 = arith.addi %20, %c0_i32_71 : i32
      %c4_i32_72 = arith.constant 4 : i32
      %81 = arith.muli %80, %c4_i32_72 : i32
      %c2_i32_73 = arith.constant 2 : i32
      %82 = arith.addi %81, %c2_i32_73 : i32
      %c0_74 = arith.constant 0 : index
      %83 = arith.index_cast %82 : i32 to index
      %c1_75 = arith.constant 1 : index
      %c0_76 = arith.constant 0 : index
      %84 = vector.load %arg2[%c0_74, %83, %c1_75, %c0_76] : memref<1x36x9x8xbf16, #tpu.memory_space<vmem>>, vector<1x1x8x8xbf16>
      %85 = vector.shape_cast %84 : vector<1x1x8x8xbf16> to vector<8x8xbf16>
      %c6 = arith.constant 6 : index
      %c0_77 = arith.constant 0 : index
      %c0_78 = arith.constant 0 : index
      %86 = vector.load %arg3[%c6, %c0_77, %c0_78] : memref<16x8x128xbf16, #tpu.memory_space<vmem>>, vector<1x8x128xbf16>
      %87 = vector.shape_cast %86 : vector<1x8x128xbf16> to vector<8x128xbf16>
      %cst_79 = arith.constant dense<0.000000e+00> : vector<8x128xf32>
      %88 = tpu.matmul %85, %87, %cst_79 {dimension_numbers = #tpu.dot_dimension_numbers<[1], [0], [0], [1], [0, 0, 1, 1], [], []>} : vector<8x8xbf16>, vector<8x128xbf16>, vector<8x128xf32> -> vector<8x128xf32>
      %89 = arith.addf %79, %88 : vector<8x128xf32>
      %c0_i32_80 = arith.constant 0 : i32
      %90 = arith.addi %20, %c0_i32_80 : i32
      %c4_i32_81 = arith.constant 4 : i32
      %91 = arith.muli %90, %c4_i32_81 : i32
      %c3_i32_82 = arith.constant 3 : i32
      %92 = arith.addi %91, %c3_i32_82 : i32
      %c0_83 = arith.constant 0 : index
      %93 = arith.index_cast %92 : i32 to index
      %c1_84 = arith.constant 1 : index
      %c0_85 = arith.constant 0 : index
      %94 = vector.load %arg2[%c0_83, %93, %c1_84, %c0_85] : memref<1x36x9x8xbf16, #tpu.memory_space<vmem>>, vector<1x1x8x8xbf16>
      %95 = vector.shape_cast %94 : vector<1x1x8x8xbf16> to vector<8x8xbf16>
      %c7 = arith.constant 7 : index
      %c0_86 = arith.constant 0 : index
      %c0_87 = arith.constant 0 : index
      %96 = vector.load %arg3[%c7, %c0_86, %c0_87] : memref<16x8x128xbf16, #tpu.memory_space<vmem>>, vector<1x8x128xbf16>
      %97 = vector.shape_cast %96 : vector<1x8x128xbf16> to vector<8x128xbf16>
      %cst_88 = arith.constant dense<0.000000e+00> : vector<8x128xf32>
      %98 = tpu.matmul %95, %97, %cst_88 {dimension_numbers = #tpu.dot_dimension_numbers<[1], [0], [0], [1], [0, 0, 1, 1], [], []>} : vector<8x8xbf16>, vector<8x128xbf16>, vector<8x128xf32> -> vector<8x128xf32>
      %99 = arith.addf %89, %98 : vector<8x128xf32>
      %c1_i32_89 = arith.constant 1 : i32
      %100 = arith.addi %20, %c1_i32_89 : i32
      %c4_i32_90 = arith.constant 4 : i32
      %101 = arith.muli %100, %c4_i32_90 : i32
      %c0_i32_91 = arith.constant 0 : i32
      %102 = arith.addi %101, %c0_i32_91 : i32
      %c0_92 = arith.constant 0 : index
      %103 = arith.index_cast %102 : i32 to index
      %c0_93 = arith.constant 0 : index
      %c0_94 = arith.constant 0 : index
      %104 = vector.load %arg2[%c0_92, %103, %c0_93, %c0_94] : memref<1x36x9x8xbf16, #tpu.memory_space<vmem>>, vector<1x1x8x8xbf16>
      %105 = vector.shape_cast %104 : vector<1x1x8x8xbf16> to vector<8x8xbf16>
      %c8 = arith.constant 8 : index
      %c0_95 = arith.constant 0 : index
      %c0_96 = arith.constant 0 : index
      %106 = vector.load %arg3[%c8, %c0_95, %c0_96] : memref<16x8x128xbf16, #tpu.memory_space<vmem>>, vector<1x8x128xbf16>
      %107 = vector.shape_cast %106 : vector<1x8x128xbf16> to vector<8x128xbf16>
      %cst_97 = arith.constant dense<0.000000e+00> : vector<8x128xf32>
      %108 = tpu.matmul %105, %107, %cst_97 {dimension_numbers = #tpu.dot_dimension_numbers<[1], [0], [0], [1], [0, 0, 1, 1], [], []>} : vector<8x8xbf16>, vector<8x128xbf16>, vector<8x128xf32> -> vector<8x128xf32>
      %109 = arith.addf %99, %108 : vector<8x128xf32>
      %c1_i32_98 = arith.constant 1 : i32
      %110 = arith.addi %20, %c1_i32_98 : i32
      %c4_i32_99 = arith.constant 4 : i32
      %111 = arith.muli %110, %c4_i32_99 : i32
      %c1_i32_100 = arith.constant 1 : i32
      %112 = arith.addi %111, %c1_i32_100 : i32
      %c0_101 = arith.constant 0 : index
      %113 = arith.index_cast %112 : i32 to index
      %c0_102 = arith.constant 0 : index
      %c0_103 = arith.constant 0 : index
      %114 = vector.load %arg2[%c0_101, %113, %c0_102, %c0_103] : memref<1x36x9x8xbf16, #tpu.memory_space<vmem>>, vector<1x1x8x8xbf16>
      %115 = vector.shape_cast %114 : vector<1x1x8x8xbf16> to vector<8x8xbf16>
      %c9 = arith.constant 9 : index
      %c0_104 = arith.constant 0 : index
      %c0_105 = arith.constant 0 : index
      %116 = vector.load %arg3[%c9, %c0_104, %c0_105] : memref<16x8x128xbf16, #tpu.memory_space<vmem>>, vector<1x8x128xbf16>
      %117 = vector.shape_cast %116 : vector<1x8x128xbf16> to vector<8x128xbf16>
      %cst_106 = arith.constant dense<0.000000e+00> : vector<8x128xf32>
      %118 = tpu.matmul %115, %117, %cst_106 {dimension_numbers = #tpu.dot_dimension_numbers<[1], [0], [0], [1], [0, 0, 1, 1], [], []>} : vector<8x8xbf16>, vector<8x128xbf16>, vector<8x128xf32> -> vector<8x128xf32>
      %119 = arith.addf %109, %118 : vector<8x128xf32>
      %c1_i32_107 = arith.constant 1 : i32
      %120 = arith.addi %20, %c1_i32_107 : i32
      %c4_i32_108 = arith.constant 4 : i32
      %121 = arith.muli %120, %c4_i32_108 : i32
      %c0_i32_109 = arith.constant 0 : i32
      %122 = arith.addi %121, %c0_i32_109 : i32
      %c0_110 = arith.constant 0 : index
      %123 = arith.index_cast %122 : i32 to index
      %c1_111 = arith.constant 1 : index
      %c0_112 = arith.constant 0 : index
      %124 = vector.load %arg2[%c0_110, %123, %c1_111, %c0_112] : memref<1x36x9x8xbf16, #tpu.memory_space<vmem>>, vector<1x1x8x8xbf16>
      %125 = vector.shape_cast %124 : vector<1x1x8x8xbf16> to vector<8x8xbf16>
      %c10 = arith.constant 10 : index
      %c0_113 = arith.constant 0 : index
      %c0_114 = arith.constant 0 : index
      %126 = vector.load %arg3[%c10, %c0_113, %c0_114] : memref<16x8x128xbf16, #tpu.memory_space<vmem>>, vector<1x8x128xbf16>
      %127 = vector.shape_cast %126 : vector<1x8x128xbf16> to vector<8x128xbf16>
      %cst_115 = arith.constant dense<0.000000e+00> : vector<8x128xf32>
      %128 = tpu.matmul %125, %127, %cst_115 {dimension_numbers = #tpu.dot_dimension_numbers<[1], [0], [0], [1], [0, 0, 1, 1], [], []>} : vector<8x8xbf16>, vector<8x128xbf16>, vector<8x128xf32> -> vector<8x128xf32>
      %129 = arith.addf %119, %128 : vector<8x128xf32>
      %c1_i32_116 = arith.constant 1 : i32
      %130 = arith.addi %20, %c1_i32_116 : i32
      %c4_i32_117 = arith.constant 4 : i32
      %131 = arith.muli %130, %c4_i32_117 : i32
      %c1_i32_118 = arith.constant 1 : i32
      %132 = arith.addi %131, %c1_i32_118 : i32
      %c0_119 = arith.constant 0 : index
      %133 = arith.index_cast %132 : i32 to index
      %c1_120 = arith.constant 1 : index
      %c0_121 = arith.constant 0 : index
      %134 = vector.load %arg2[%c0_119, %133, %c1_120, %c0_121] : memref<1x36x9x8xbf16, #tpu.memory_space<vmem>>, vector<1x1x8x8xbf16>
      %135 = vector.shape_cast %134 : vector<1x1x8x8xbf16> to vector<8x8xbf16>
      %c11 = arith.constant 11 : index
      %c0_122 = arith.constant 0 : index
      %c0_123 = arith.constant 0 : index
      %136 = vector.load %arg3[%c11, %c0_122, %c0_123] : memref<16x8x128xbf16, #tpu.memory_space<vmem>>, vector<1x8x128xbf16>
      %137 = vector.shape_cast %136 : vector<1x8x128xbf16> to vector<8x128xbf16>
      %cst_124 = arith.constant dense<0.000000e+00> : vector<8x128xf32>
      %138 = tpu.matmul %135, %137, %cst_124 {dimension_numbers = #tpu.dot_dimension_numbers<[1], [0], [0], [1], [0, 0, 1, 1], [], []>} : vector<8x8xbf16>, vector<8x128xbf16>, vector<8x128xf32> -> vector<8x128xf32>
      %139 = arith.addf %129, %138 : vector<8x128xf32>
      %c1_i32_125 = arith.constant 1 : i32
      %140 = arith.addi %20, %c1_i32_125 : i32
      %c4_i32_126 = arith.constant 4 : i32
      %141 = arith.muli %140, %c4_i32_126 : i32
      %c2_i32_127 = arith.constant 2 : i32
      %142 = arith.addi %141, %c2_i32_127 : i32
      %c0_128 = arith.constant 0 : index
      %143 = arith.index_cast %142 : i32 to index
      %c0_129 = arith.constant 0 : index
      %c0_130 = arith.constant 0 : index
      %144 = vector.load %arg2[%c0_128, %143, %c0_129, %c0_130] : memref<1x36x9x8xbf16, #tpu.memory_space<vmem>>, vector<1x1x8x8xbf16>
      %145 = vector.shape_cast %144 : vector<1x1x8x8xbf16> to vector<8x8xbf16>
      %c12 = arith.constant 12 : index
      %c0_131 = arith.constant 0 : index
      %c0_132 = arith.constant 0 : index
      %146 = vector.load %arg3[%c12, %c0_131, %c0_132] : memref<16x8x128xbf16, #tpu.memory_space<vmem>>, vector<1x8x128xbf16>
      %147 = vector.shape_cast %146 : vector<1x8x128xbf16> to vector<8x128xbf16>
      %cst_133 = arith.constant dense<0.000000e+00> : vector<8x128xf32>
      %148 = tpu.matmul %145, %147, %cst_133 {dimension_numbers = #tpu.dot_dimension_numbers<[1], [0], [0], [1], [0, 0, 1, 1], [], []>} : vector<8x8xbf16>, vector<8x128xbf16>, vector<8x128xf32> -> vector<8x128xf32>
      %149 = arith.addf %139, %148 : vector<8x128xf32>
      %c1_i32_134 = arith.constant 1 : i32
      %150 = arith.addi %20, %c1_i32_134 : i32
      %c4_i32_135 = arith.constant 4 : i32
      %151 = arith.muli %150, %c4_i32_135 : i32
      %c3_i32_136 = arith.constant 3 : i32
      %152 = arith.addi %151, %c3_i32_136 : i32
      %c0_137 = arith.constant 0 : index
      %153 = arith.index_cast %152 : i32 to index
      %c0_138 = arith.constant 0 : index
      %c0_139 = arith.constant 0 : index
      %154 = vector.load %arg2[%c0_137, %153, %c0_138, %c0_139] : memref<1x36x9x8xbf16, #tpu.memory_space<vmem>>, vector<1x1x8x8xbf16>
      %155 = vector.shape_cast %154 : vector<1x1x8x8xbf16> to vector<8x8xbf16>
      %c13 = arith.constant 13 : index
      %c0_140 = arith.constant 0 : index
      %c0_141 = arith.constant 0 : index
      %156 = vector.load %arg3[%c13, %c0_140, %c0_141] : memref<16x8x128xbf16, #tpu.memory_space<vmem>>, vector<1x8x128xbf16>
      %157 = vector.shape_cast %156 : vector<1x8x128xbf16> to vector<8x128xbf16>
      %cst_142 = arith.constant dense<0.000000e+00> : vector<8x128xf32>
      %158 = tpu.matmul %155, %157, %cst_142 {dimension_numbers = #tpu.dot_dimension_numbers<[1], [0], [0], [1], [0, 0, 1, 1], [], []>} : vector<8x8xbf16>, vector<8x128xbf16>, vector<8x128xf32> -> vector<8x128xf32>
      %159 = arith.addf %149, %158 : vector<8x128xf32>
      %c1_i32_143 = arith.constant 1 : i32
      %160 = arith.addi %20, %c1_i32_143 : i32
      %c4_i32_144 = arith.constant 4 : i32
      %161 = arith.muli %160, %c4_i32_144 : i32
      %c2_i32_145 = arith.constant 2 : i32
      %162 = arith.addi %161, %c2_i32_145 : i32
      %c0_146 = arith.constant 0 : index
      %163 = arith.index_cast %162 : i32 to index
      %c1_147 = arith.constant 1 : index
      %c0_148 = arith.constant 0 : index
      %164 = vector.load %arg2[%c0_146, %163, %c1_147, %c0_148] : memref<1x36x9x8xbf16, #tpu.memory_space<vmem>>, vector<1x1x8x8xbf16>
      %165 = vector.shape_cast %164 : vector<1x1x8x8xbf16> to vector<8x8xbf16>
      %c14 = arith.constant 14 : index
      %c0_149 = arith.constant 0 : index
      %c0_150 = arith.constant 0 : index
      %166 = vector.load %arg3[%c14, %c0_149, %c0_150] : memref<16x8x128xbf16, #tpu.memory_space<vmem>>, vector<1x8x128xbf16>
      %167 = vector.shape_cast %166 : vector<1x8x128xbf16> to vector<8x128xbf16>
      %cst_151 = arith.constant dense<0.000000e+00> : vector<8x128xf32>
      %168 = tpu.matmul %165, %167, %cst_151 {dimension_numbers = #tpu.dot_dimension_numbers<[1], [0], [0], [1], [0, 0, 1, 1], [], []>} : vector<8x8xbf16>, vector<8x128xbf16>, vector<8x128xf32> -> vector<8x128xf32>
      %169 = arith.addf %159, %168 : vector<8x128xf32>
      %c1_i32_152 = arith.constant 1 : i32
      %170 = arith.addi %20, %c1_i32_152 : i32
      %c4_i32_153 = arith.constant 4 : i32
      %171 = arith.muli %170, %c4_i32_153 : i32
      %c3_i32_154 = arith.constant 3 : i32
      %172 = arith.addi %171, %c3_i32_154 : i32
      %c0_155 = arith.constant 0 : index
      %173 = arith.index_cast %172 : i32 to index
      %c1_156 = arith.constant 1 : index
      %c0_157 = arith.constant 0 : index
      %174 = vector.load %arg2[%c0_155, %173, %c1_156, %c0_157] : memref<1x36x9x8xbf16, #tpu.memory_space<vmem>>, vector<1x1x8x8xbf16>
      %175 = vector.shape_cast %174 : vector<1x1x8x8xbf16> to vector<8x8xbf16>
      %c15 = arith.constant 15 : index
      %c0_158 = arith.constant 0 : index
      %c0_159 = arith.constant 0 : index
      %176 = vector.load %arg3[%c15, %c0_158, %c0_159] : memref<16x8x128xbf16, #tpu.memory_space<vmem>>, vector<1x8x128xbf16>
      %177 = vector.shape_cast %176 : vector<1x8x128xbf16> to vector<8x128xbf16>
      %cst_160 = arith.constant dense<0.000000e+00> : vector<8x128xf32>
      %178 = tpu.matmul %175, %177, %cst_160 {dimension_numbers = #tpu.dot_dimension_numbers<[1], [0], [0], [1], [0, 0, 1, 1], [], []>} : vector<8x8xbf16>, vector<8x128xbf16>, vector<8x128xf32> -> vector<8x128xf32>
      %179 = arith.addf %169, %178 : vector<8x128xf32>
      %180 = arith.index_cast %20 : i32 to index
      %c0_161 = arith.constant 0 : index
      %c0_162 = arith.constant 0 : index
      %181 = vector.load %arg5[%180, %c0_161, %c0_162] : memref<8x8x128xf32, #tpu.memory_space<vmem>>, vector<1x8x128xf32>
      %182 = vector.shape_cast %181 : vector<1x8x128xf32> to vector<8x128xf32>
      %183 = vector.shape_cast %179 : vector<8x128xf32> to vector<1x8x128xf32>
      tpu.vector_store %arg5[%180, %c0_161, %c0_162], %183 {strides = array<i32>} : memref<8x8x128xf32, #tpu.memory_space<vmem>>, vector<1x8x128xf32>,
      %c0_163 = arith.constant 0 : index
      %c0_164 = arith.constant 0 : index
      %184 = vector.load %arg6[%c0_163, %c0_164] : memref<1x128xf32, #tpu.memory_space<vmem>>, vector<1x128xf32>
      %cst_165 = arith.constant dense<0.000000e+00> : vector<128xf32>
      %185 = vector.multi_reduction <add>, %179, %cst_165 [0] : vector<8x128xf32> to vector<128xf32>
      %186 = vector.shape_cast %185 : vector<128xf32> to vector<1x128xf32>
      %187 = arith.addf %184, %186 : vector<1x128xf32>
      %c0_166 = arith.constant 0 : index
      %c0_167 = arith.constant 0 : index
      %188 = vector.load %arg6[%c0_166, %c0_167] : memref<1x128xf32, #tpu.memory_space<vmem>>, vector<1x128xf32>
      tpu.vector_store %arg6[%c0_166, %c0_167], %187 {strides = array<i32>} : memref<1x128xf32, #tpu.memory_space<vmem>>, vector<1x128xf32>,
      %c0_168 = arith.constant 0 : index
      %c0_169 = arith.constant 0 : index
      %189 = vector.load %arg7[%c0_168, %c0_169] : memref<1x128xf32, #tpu.memory_space<vmem>>, vector<1x128xf32>
      %190 = arith.mulf %179, %179 : vector<8x128xf32>
      %cst_170 = arith.constant dense<0.000000e+00> : vector<128xf32>
      %191 = vector.multi_reduction <add>, %190, %cst_170 [0] : vector<8x128xf32> to vector<128xf32>
      %192 = vector.shape_cast %191 : vector<128xf32> to vector<1x128xf32>
      %193 = arith.addf %189, %192 : vector<1x128xf32>
      %c0_171 = arith.constant 0 : index
      %c0_172 = arith.constant 0 : index
      %194 = vector.load %arg7[%c0_171, %c0_172] : memref<1x128xf32, #tpu.memory_space<vmem>>, vector<1x128xf32>
      tpu.vector_store %arg7[%c0_171, %c0_172], %193 {strides = array<i32>} : memref<1x128xf32, #tpu.memory_space<vmem>>, vector<1x128xf32>,
    }
    %c8_i32_4 = arith.constant 8 : i32
    %c0_5 = arith.constant 0 : index
    %c0_6 = arith.constant 0 : index
    %5 = vector.load %arg6[%c0_5, %c0_6] : memref<1x128xf32, #tpu.memory_space<vmem>>, vector<1x128xf32>
    %cst_7 = arith.constant 1.562500e-02 : f32
    %6 = vector.broadcast %cst_7 : f32 to vector<1x128xf32>
    %7 = arith.mulf %5, %6 : vector<1x128xf32>
    %c0_8 = arith.constant 0 : index
    %c0_9 = arith.constant 0 : index
    %8 = vector.load %arg7[%c0_8, %c0_9] : memref<1x128xf32, #tpu.memory_space<vmem>>, vector<1x128xf32>
    %cst_10 = arith.constant 1.562500e-02 : f32
    %9 = vector.broadcast %cst_10 : f32 to vector<1x128xf32>
    %10 = arith.mulf %8, %9 : vector<1x128xf32>
    %11 = arith.mulf %7, %7 : vector<1x128xf32>
    %12 = arith.subf %10, %11 : vector<1x128xf32>
    %cst_11 = arith.constant 0.000000e+00 : f32
    %13 = vector.broadcast %cst_11 : f32 to vector<1x128xf32>
    %14 = arith.maximumf %12, %13 : vector<1x128xf32>
    %cst_12 = arith.constant 9.99999974E-6 : f32
    %15 = vector.broadcast %cst_12 : f32 to vector<1x128xf32>
    %16 = arith.addf %14, %15 : vector<1x128xf32>
    %17 = math.rsqrt %16 : vector<1x128xf32>
    %c0_i32_13 = arith.constant 0 : i32
    %c8_i32_14 = arith.constant 8 : i32
    %18 = arith.addi %c0_i32_13, %c8_i32_14 : i32
    %c1_i32_15 = arith.constant 1 : i32
    scf.for %arg8 = %c0_i32_13 to %18 step %c1_i32_15  : i32 {
      %c1_i32_17 = arith.constant 1 : i32
      %19 = arith.muli %arg8, %c1_i32_17 : i32
      %c0_i32_18 = arith.constant 0 : i32
      %20 = arith.addi %c0_i32_18, %19 : i32
      %21 = arith.index_cast %20 : i32 to index
      %c0_19 = arith.constant 0 : index
      %c0_20 = arith.constant 0 : index
      %22 = vector.load %arg5[%21, %c0_19, %c0_20] : memref<8x8x128xf32, #tpu.memory_space<vmem>>, vector<1x8x128xf32>
      %23 = vector.shape_cast %22 : vector<1x8x128xf32> to vector<8x128xf32>
      %24 = vector.broadcast %7 : vector<1x128xf32> to vector<8x128xf32>
      %25 = arith.subf %23, %24 : vector<8x128xf32>
      %26 = vector.broadcast %17 : vector<1x128xf32> to vector<8x128xf32>
      %27 = arith.mulf %25, %26 : vector<8x128xf32>
      %cst_21 = arith.constant 0.000000e+00 : f32
      %28 = vector.broadcast %cst_21 : f32 to vector<8x128xf32>
      %29 = arith.cmpf oge, %27, %28 : vector<8x128xf32>
      %cst_22 = arith.constant 2.000000e-01 : f32
      %30 = vector.broadcast %cst_22 : f32 to vector<8x128xf32>
      %31 = arith.mulf %30, %27 : vector<8x128xf32>
      %32 = arith.select %29, %27, %31 : vector<8x128xi1>, vector<8x128xf32>
      %33 = arith.truncf %32 : vector<8x128xf32> to vector<8x128xbf16>
      %c0_23 = arith.constant 0 : index
      %34 = arith.index_cast %20 : i32 to index
      %c0_24 = arith.constant 0 : index
      %c0_25 = arith.constant 0 : index
      %35 = vector.load %arg4[%c0_23, %34, %c0_24, %c0_25] : memref<1x8x8x128xbf16, #tpu.memory_space<vmem>>, vector<1x1x8x128xbf16>
      %36 = vector.shape_cast %35 : vector<1x1x8x128xbf16> to vector<8x128xbf16>
      %37 = vector.shape_cast %33 : vector<8x128xbf16> to vector<1x1x8x128xbf16>
      tpu.vector_store %arg4[%c0_23, %34, %c0_24, %c0_25], %37 {strides = array<i32>} : memref<1x8x8x128xbf16, #tpu.memory_space<vmem>>, vector<1x1x8x128xbf16>,
    }
    %c8_i32_16 = arith.constant 8 : i32
    return
  }
  func.func @transform_0(%arg0: i32, %arg1: i32) -> (i32, i32, i32, i32) {
    %c0_i32 = arith.constant 0 : i32
    %c0_i32_0 = arith.constant 0 : i32
    %c0_i32_1 = arith.constant 0 : i32
    %c0_i32_2 = arith.constant 0 : i32
    return %arg0, %c0_i32, %c0_i32_0, %c0_i32_1 : i32, i32, i32, i32
  }
  func.func @transform_1(%arg0: i32, %arg1: i32) -> (i32, i32, i32) {
    %c0_i32 = arith.constant 0 : i32
    %c0_i32_0 = arith.constant 0 : i32
    %c0_i32_1 = arith.constant 0 : i32
    return %c0_i32, %c0_i32_0, %arg1 : i32, i32, i32
  }
  func.func @transform_2(%arg0: i32, %arg1: i32) -> (i32, i32, i32, i32) {
    %c0_i32 = arith.constant 0 : i32
    %c0_i32_0 = arith.constant 0 : i32
    %c0_i32_1 = arith.constant 0 : i32
    return %arg0, %c0_i32, %c0_i32_0, %arg1 : i32, i32, i32, i32
  }
}

module attributes {stable_mosaic.version = 11 : i64} {
  func.func @_conv_norm_kernel(%arg0: i32, %arg1: i32, %arg2: memref<1x20x5x16xbf16, #tpu.memory_space<vmem>>, %arg3: memref<16x16x128xbf16, #tpu.memory_space<vmem>>, %arg4: memref<1x4x4x128xbf16, #tpu.memory_space<vmem>>, %arg5: memref<4x4x128xf32, #tpu.memory_space<vmem>>, %arg6: memref<1x128xf32, #tpu.memory_space<vmem>>, %arg7: memref<1x128xf32, #tpu.memory_space<vmem>>) attributes {dimension_semantics = [#tpu.dimension_semantics<parallel>, #tpu.dimension_semantics<parallel>], iteration_bounds = array<i64: 2, 1>, scalar_prefetch = 0 : i64, scratch_operands = 3 : i64, tpu.core_type = #tpu.core_type<tc>, window_params = [{transform_indices = @transform_0, window_bounds = array<i64: 1, 20, 5, 16>}, {transform_indices = @transform_1, window_bounds = array<i64: 16, 16, 128>}, {transform_indices = @transform_2, window_bounds = array<i64: 1, 4, 4, 128>}]} {
    %cst = arith.constant 0.000000e+00 : f32
    %0 = vector.broadcast %cst : f32 to vector<1x128xf32>
    %c0 = arith.constant 0 : index
    %c0_0 = arith.constant 0 : index
    %1 = vector.load %arg6[%c0, %c0_0] : memref<1x128xf32, #tpu.memory_space<vmem>>, vector<1x128xf32>
    tpu.vector_store %arg6[%c0, %c0_0], %0 {strides = array<i32>} : memref<1x128xf32, #tpu.memory_space<vmem>>, vector<1x128xf32>,
    %cst_1 = arith.constant 0.000000e+00 : f32
    %2 = vector.broadcast %cst_1 : f32 to vector<1x128xf32>
    %c0_2 = arith.constant 0 : index
    %c0_3 = arith.constant 0 : index
    %3 = vector.load %arg7[%c0_2, %c0_3] : memref<1x128xf32, #tpu.memory_space<vmem>>, vector<1x128xf32>
    tpu.vector_store %arg7[%c0_2, %c0_3], %2 {strides = array<i32>} : memref<1x128xf32, #tpu.memory_space<vmem>>, vector<1x128xf32>,
    %c0_i32 = arith.constant 0 : i32
    %c4_i32 = arith.constant 4 : i32
    %4 = arith.addi %c0_i32, %c4_i32 : i32
    %c1_i32 = arith.constant 1 : i32
    scf.for %arg8 = %c0_i32 to %4 step %c1_i32  : i32 {
      %c1_i32_17 = arith.constant 1 : i32
      %19 = arith.muli %arg8, %c1_i32_17 : i32
      %c0_i32_18 = arith.constant 0 : i32
      %20 = arith.addi %c0_i32_18, %19 : i32
      %c0_i32_19 = arith.constant 0 : i32
      %21 = arith.addi %20, %c0_i32_19 : i32
      %c4_i32_20 = arith.constant 4 : i32
      %22 = arith.muli %21, %c4_i32_20 : i32
      %c0_i32_21 = arith.constant 0 : i32
      %23 = arith.addi %22, %c0_i32_21 : i32
      %c0_22 = arith.constant 0 : index
      %24 = arith.index_cast %23 : i32 to index
      %c0_23 = arith.constant 0 : index
      %c0_24 = arith.constant 0 : index
      %25 = vector.load %arg2[%c0_22, %24, %c0_23, %c0_24] : memref<1x20x5x16xbf16, #tpu.memory_space<vmem>>, vector<1x1x4x16xbf16>
      %26 = vector.shape_cast %25 : vector<1x1x4x16xbf16> to vector<4x16xbf16>
      %c0_25 = arith.constant 0 : index
      %c0_26 = arith.constant 0 : index
      %c0_27 = arith.constant 0 : index
      %27 = vector.load %arg3[%c0_25, %c0_26, %c0_27] : memref<16x16x128xbf16, #tpu.memory_space<vmem>>, vector<1x16x128xbf16>
      %28 = vector.shape_cast %27 : vector<1x16x128xbf16> to vector<16x128xbf16>
      %cst_28 = arith.constant dense<0.000000e+00> : vector<4x128xf32>
      %29 = tpu.matmul %26, %28, %cst_28 {dimension_numbers = #tpu.dot_dimension_numbers<[1], [0], [0], [1], [0, 0, 1, 1], [], []>} : vector<4x16xbf16>, vector<16x128xbf16>, vector<4x128xf32> -> vector<4x128xf32>
      %c0_i32_29 = arith.constant 0 : i32
      %30 = arith.addi %20, %c0_i32_29 : i32
      %c4_i32_30 = arith.constant 4 : i32
      %31 = arith.muli %30, %c4_i32_30 : i32
      %c1_i32_31 = arith.constant 1 : i32
      %32 = arith.addi %31, %c1_i32_31 : i32
      %c0_32 = arith.constant 0 : index
      %33 = arith.index_cast %32 : i32 to index
      %c0_33 = arith.constant 0 : index
      %c0_34 = arith.constant 0 : index
      %34 = vector.load %arg2[%c0_32, %33, %c0_33, %c0_34] : memref<1x20x5x16xbf16, #tpu.memory_space<vmem>>, vector<1x1x4x16xbf16>
      %35 = vector.shape_cast %34 : vector<1x1x4x16xbf16> to vector<4x16xbf16>
      %c1 = arith.constant 1 : index
      %c0_35 = arith.constant 0 : index
      %c0_36 = arith.constant 0 : index
      %36 = vector.load %arg3[%c1, %c0_35, %c0_36] : memref<16x16x128xbf16, #tpu.memory_space<vmem>>, vector<1x16x128xbf16>
      %37 = vector.shape_cast %36 : vector<1x16x128xbf16> to vector<16x128xbf16>
      %cst_37 = arith.constant dense<0.000000e+00> : vector<4x128xf32>
      %38 = tpu.matmul %35, %37, %cst_37 {dimension_numbers = #tpu.dot_dimension_numbers<[1], [0], [0], [1], [0, 0, 1, 1], [], []>} : vector<4x16xbf16>, vector<16x128xbf16>, vector<4x128xf32> -> vector<4x128xf32>
      %39 = arith.addf %29, %38 : vector<4x128xf32>
      %c0_i32_38 = arith.constant 0 : i32
      %40 = arith.addi %20, %c0_i32_38 : i32
      %c4_i32_39 = arith.constant 4 : i32
      %41 = arith.muli %40, %c4_i32_39 : i32
      %c0_i32_40 = arith.constant 0 : i32
      %42 = arith.addi %41, %c0_i32_40 : i32
      %c0_41 = arith.constant 0 : index
      %43 = arith.index_cast %42 : i32 to index
      %c1_42 = arith.constant 1 : index
      %c0_43 = arith.constant 0 : index
      %44 = vector.load %arg2[%c0_41, %43, %c1_42, %c0_43] : memref<1x20x5x16xbf16, #tpu.memory_space<vmem>>, vector<1x1x4x16xbf16>
      %45 = vector.shape_cast %44 : vector<1x1x4x16xbf16> to vector<4x16xbf16>
      %c2 = arith.constant 2 : index
      %c0_44 = arith.constant 0 : index
      %c0_45 = arith.constant 0 : index
      %46 = vector.load %arg3[%c2, %c0_44, %c0_45] : memref<16x16x128xbf16, #tpu.memory_space<vmem>>, vector<1x16x128xbf16>
      %47 = vector.shape_cast %46 : vector<1x16x128xbf16> to vector<16x128xbf16>
      %cst_46 = arith.constant dense<0.000000e+00> : vector<4x128xf32>
      %48 = tpu.matmul %45, %47, %cst_46 {dimension_numbers = #tpu.dot_dimension_numbers<[1], [0], [0], [1], [0, 0, 1, 1], [], []>} : vector<4x16xbf16>, vector<16x128xbf16>, vector<4x128xf32> -> vector<4x128xf32>
      %49 = arith.addf %39, %48 : vector<4x128xf32>
      %c0_i32_47 = arith.constant 0 : i32
      %50 = arith.addi %20, %c0_i32_47 : i32
      %c4_i32_48 = arith.constant 4 : i32
      %51 = arith.muli %50, %c4_i32_48 : i32
      %c1_i32_49 = arith.constant 1 : i32
      %52 = arith.addi %51, %c1_i32_49 : i32
      %c0_50 = arith.constant 0 : index
      %53 = arith.index_cast %52 : i32 to index
      %c1_51 = arith.constant 1 : index
      %c0_52 = arith.constant 0 : index
      %54 = vector.load %arg2[%c0_50, %53, %c1_51, %c0_52] : memref<1x20x5x16xbf16, #tpu.memory_space<vmem>>, vector<1x1x4x16xbf16>
      %55 = vector.shape_cast %54 : vector<1x1x4x16xbf16> to vector<4x16xbf16>
      %c3 = arith.constant 3 : index
      %c0_53 = arith.constant 0 : index
      %c0_54 = arith.constant 0 : index
      %56 = vector.load %arg3[%c3, %c0_53, %c0_54] : memref<16x16x128xbf16, #tpu.memory_space<vmem>>, vector<1x16x128xbf16>
      %57 = vector.shape_cast %56 : vector<1x16x128xbf16> to vector<16x128xbf16>
      %cst_55 = arith.constant dense<0.000000e+00> : vector<4x128xf32>
      %58 = tpu.matmul %55, %57, %cst_55 {dimension_numbers = #tpu.dot_dimension_numbers<[1], [0], [0], [1], [0, 0, 1, 1], [], []>} : vector<4x16xbf16>, vector<16x128xbf16>, vector<4x128xf32> -> vector<4x128xf32>
      %59 = arith.addf %49, %58 : vector<4x128xf32>
      %c0_i32_56 = arith.constant 0 : i32
      %60 = arith.addi %20, %c0_i32_56 : i32
      %c4_i32_57 = arith.constant 4 : i32
      %61 = arith.muli %60, %c4_i32_57 : i32
      %c2_i32 = arith.constant 2 : i32
      %62 = arith.addi %61, %c2_i32 : i32
      %c0_58 = arith.constant 0 : index
      %63 = arith.index_cast %62 : i32 to index
      %c0_59 = arith.constant 0 : index
      %c0_60 = arith.constant 0 : index
      %64 = vector.load %arg2[%c0_58, %63, %c0_59, %c0_60] : memref<1x20x5x16xbf16, #tpu.memory_space<vmem>>, vector<1x1x4x16xbf16>
      %65 = vector.shape_cast %64 : vector<1x1x4x16xbf16> to vector<4x16xbf16>
      %c4 = arith.constant 4 : index
      %c0_61 = arith.constant 0 : index
      %c0_62 = arith.constant 0 : index
      %66 = vector.load %arg3[%c4, %c0_61, %c0_62] : memref<16x16x128xbf16, #tpu.memory_space<vmem>>, vector<1x16x128xbf16>
      %67 = vector.shape_cast %66 : vector<1x16x128xbf16> to vector<16x128xbf16>
      %cst_63 = arith.constant dense<0.000000e+00> : vector<4x128xf32>
      %68 = tpu.matmul %65, %67, %cst_63 {dimension_numbers = #tpu.dot_dimension_numbers<[1], [0], [0], [1], [0, 0, 1, 1], [], []>} : vector<4x16xbf16>, vector<16x128xbf16>, vector<4x128xf32> -> vector<4x128xf32>
      %69 = arith.addf %59, %68 : vector<4x128xf32>
      %c0_i32_64 = arith.constant 0 : i32
      %70 = arith.addi %20, %c0_i32_64 : i32
      %c4_i32_65 = arith.constant 4 : i32
      %71 = arith.muli %70, %c4_i32_65 : i32
      %c3_i32 = arith.constant 3 : i32
      %72 = arith.addi %71, %c3_i32 : i32
      %c0_66 = arith.constant 0 : index
      %73 = arith.index_cast %72 : i32 to index
      %c0_67 = arith.constant 0 : index
      %c0_68 = arith.constant 0 : index
      %74 = vector.load %arg2[%c0_66, %73, %c0_67, %c0_68] : memref<1x20x5x16xbf16, #tpu.memory_space<vmem>>, vector<1x1x4x16xbf16>
      %75 = vector.shape_cast %74 : vector<1x1x4x16xbf16> to vector<4x16xbf16>
      %c5 = arith.constant 5 : index
      %c0_69 = arith.constant 0 : index
      %c0_70 = arith.constant 0 : index
      %76 = vector.load %arg3[%c5, %c0_69, %c0_70] : memref<16x16x128xbf16, #tpu.memory_space<vmem>>, vector<1x16x128xbf16>
      %77 = vector.shape_cast %76 : vector<1x16x128xbf16> to vector<16x128xbf16>
      %cst_71 = arith.constant dense<0.000000e+00> : vector<4x128xf32>
      %78 = tpu.matmul %75, %77, %cst_71 {dimension_numbers = #tpu.dot_dimension_numbers<[1], [0], [0], [1], [0, 0, 1, 1], [], []>} : vector<4x16xbf16>, vector<16x128xbf16>, vector<4x128xf32> -> vector<4x128xf32>
      %79 = arith.addf %69, %78 : vector<4x128xf32>
      %c0_i32_72 = arith.constant 0 : i32
      %80 = arith.addi %20, %c0_i32_72 : i32
      %c4_i32_73 = arith.constant 4 : i32
      %81 = arith.muli %80, %c4_i32_73 : i32
      %c2_i32_74 = arith.constant 2 : i32
      %82 = arith.addi %81, %c2_i32_74 : i32
      %c0_75 = arith.constant 0 : index
      %83 = arith.index_cast %82 : i32 to index
      %c1_76 = arith.constant 1 : index
      %c0_77 = arith.constant 0 : index
      %84 = vector.load %arg2[%c0_75, %83, %c1_76, %c0_77] : memref<1x20x5x16xbf16, #tpu.memory_space<vmem>>, vector<1x1x4x16xbf16>
      %85 = vector.shape_cast %84 : vector<1x1x4x16xbf16> to vector<4x16xbf16>
      %c6 = arith.constant 6 : index
      %c0_78 = arith.constant 0 : index
      %c0_79 = arith.constant 0 : index
      %86 = vector.load %arg3[%c6, %c0_78, %c0_79] : memref<16x16x128xbf16, #tpu.memory_space<vmem>>, vector<1x16x128xbf16>
      %87 = vector.shape_cast %86 : vector<1x16x128xbf16> to vector<16x128xbf16>
      %cst_80 = arith.constant dense<0.000000e+00> : vector<4x128xf32>
      %88 = tpu.matmul %85, %87, %cst_80 {dimension_numbers = #tpu.dot_dimension_numbers<[1], [0], [0], [1], [0, 0, 1, 1], [], []>} : vector<4x16xbf16>, vector<16x128xbf16>, vector<4x128xf32> -> vector<4x128xf32>
      %89 = arith.addf %79, %88 : vector<4x128xf32>
      %c0_i32_81 = arith.constant 0 : i32
      %90 = arith.addi %20, %c0_i32_81 : i32
      %c4_i32_82 = arith.constant 4 : i32
      %91 = arith.muli %90, %c4_i32_82 : i32
      %c3_i32_83 = arith.constant 3 : i32
      %92 = arith.addi %91, %c3_i32_83 : i32
      %c0_84 = arith.constant 0 : index
      %93 = arith.index_cast %92 : i32 to index
      %c1_85 = arith.constant 1 : index
      %c0_86 = arith.constant 0 : index
      %94 = vector.load %arg2[%c0_84, %93, %c1_85, %c0_86] : memref<1x20x5x16xbf16, #tpu.memory_space<vmem>>, vector<1x1x4x16xbf16>
      %95 = vector.shape_cast %94 : vector<1x1x4x16xbf16> to vector<4x16xbf16>
      %c7 = arith.constant 7 : index
      %c0_87 = arith.constant 0 : index
      %c0_88 = arith.constant 0 : index
      %96 = vector.load %arg3[%c7, %c0_87, %c0_88] : memref<16x16x128xbf16, #tpu.memory_space<vmem>>, vector<1x16x128xbf16>
      %97 = vector.shape_cast %96 : vector<1x16x128xbf16> to vector<16x128xbf16>
      %cst_89 = arith.constant dense<0.000000e+00> : vector<4x128xf32>
      %98 = tpu.matmul %95, %97, %cst_89 {dimension_numbers = #tpu.dot_dimension_numbers<[1], [0], [0], [1], [0, 0, 1, 1], [], []>} : vector<4x16xbf16>, vector<16x128xbf16>, vector<4x128xf32> -> vector<4x128xf32>
      %99 = arith.addf %89, %98 : vector<4x128xf32>
      %c1_i32_90 = arith.constant 1 : i32
      %100 = arith.addi %20, %c1_i32_90 : i32
      %c4_i32_91 = arith.constant 4 : i32
      %101 = arith.muli %100, %c4_i32_91 : i32
      %c0_i32_92 = arith.constant 0 : i32
      %102 = arith.addi %101, %c0_i32_92 : i32
      %c0_93 = arith.constant 0 : index
      %103 = arith.index_cast %102 : i32 to index
      %c0_94 = arith.constant 0 : index
      %c0_95 = arith.constant 0 : index
      %104 = vector.load %arg2[%c0_93, %103, %c0_94, %c0_95] : memref<1x20x5x16xbf16, #tpu.memory_space<vmem>>, vector<1x1x4x16xbf16>
      %105 = vector.shape_cast %104 : vector<1x1x4x16xbf16> to vector<4x16xbf16>
      %c8 = arith.constant 8 : index
      %c0_96 = arith.constant 0 : index
      %c0_97 = arith.constant 0 : index
      %106 = vector.load %arg3[%c8, %c0_96, %c0_97] : memref<16x16x128xbf16, #tpu.memory_space<vmem>>, vector<1x16x128xbf16>
      %107 = vector.shape_cast %106 : vector<1x16x128xbf16> to vector<16x128xbf16>
      %cst_98 = arith.constant dense<0.000000e+00> : vector<4x128xf32>
      %108 = tpu.matmul %105, %107, %cst_98 {dimension_numbers = #tpu.dot_dimension_numbers<[1], [0], [0], [1], [0, 0, 1, 1], [], []>} : vector<4x16xbf16>, vector<16x128xbf16>, vector<4x128xf32> -> vector<4x128xf32>
      %109 = arith.addf %99, %108 : vector<4x128xf32>
      %c1_i32_99 = arith.constant 1 : i32
      %110 = arith.addi %20, %c1_i32_99 : i32
      %c4_i32_100 = arith.constant 4 : i32
      %111 = arith.muli %110, %c4_i32_100 : i32
      %c1_i32_101 = arith.constant 1 : i32
      %112 = arith.addi %111, %c1_i32_101 : i32
      %c0_102 = arith.constant 0 : index
      %113 = arith.index_cast %112 : i32 to index
      %c0_103 = arith.constant 0 : index
      %c0_104 = arith.constant 0 : index
      %114 = vector.load %arg2[%c0_102, %113, %c0_103, %c0_104] : memref<1x20x5x16xbf16, #tpu.memory_space<vmem>>, vector<1x1x4x16xbf16>
      %115 = vector.shape_cast %114 : vector<1x1x4x16xbf16> to vector<4x16xbf16>
      %c9 = arith.constant 9 : index
      %c0_105 = arith.constant 0 : index
      %c0_106 = arith.constant 0 : index
      %116 = vector.load %arg3[%c9, %c0_105, %c0_106] : memref<16x16x128xbf16, #tpu.memory_space<vmem>>, vector<1x16x128xbf16>
      %117 = vector.shape_cast %116 : vector<1x16x128xbf16> to vector<16x128xbf16>
      %cst_107 = arith.constant dense<0.000000e+00> : vector<4x128xf32>
      %118 = tpu.matmul %115, %117, %cst_107 {dimension_numbers = #tpu.dot_dimension_numbers<[1], [0], [0], [1], [0, 0, 1, 1], [], []>} : vector<4x16xbf16>, vector<16x128xbf16>, vector<4x128xf32> -> vector<4x128xf32>
      %119 = arith.addf %109, %118 : vector<4x128xf32>
      %c1_i32_108 = arith.constant 1 : i32
      %120 = arith.addi %20, %c1_i32_108 : i32
      %c4_i32_109 = arith.constant 4 : i32
      %121 = arith.muli %120, %c4_i32_109 : i32
      %c0_i32_110 = arith.constant 0 : i32
      %122 = arith.addi %121, %c0_i32_110 : i32
      %c0_111 = arith.constant 0 : index
      %123 = arith.index_cast %122 : i32 to index
      %c1_112 = arith.constant 1 : index
      %c0_113 = arith.constant 0 : index
      %124 = vector.load %arg2[%c0_111, %123, %c1_112, %c0_113] : memref<1x20x5x16xbf16, #tpu.memory_space<vmem>>, vector<1x1x4x16xbf16>
      %125 = vector.shape_cast %124 : vector<1x1x4x16xbf16> to vector<4x16xbf16>
      %c10 = arith.constant 10 : index
      %c0_114 = arith.constant 0 : index
      %c0_115 = arith.constant 0 : index
      %126 = vector.load %arg3[%c10, %c0_114, %c0_115] : memref<16x16x128xbf16, #tpu.memory_space<vmem>>, vector<1x16x128xbf16>
      %127 = vector.shape_cast %126 : vector<1x16x128xbf16> to vector<16x128xbf16>
      %cst_116 = arith.constant dense<0.000000e+00> : vector<4x128xf32>
      %128 = tpu.matmul %125, %127, %cst_116 {dimension_numbers = #tpu.dot_dimension_numbers<[1], [0], [0], [1], [0, 0, 1, 1], [], []>} : vector<4x16xbf16>, vector<16x128xbf16>, vector<4x128xf32> -> vector<4x128xf32>
      %129 = arith.addf %119, %128 : vector<4x128xf32>
      %c1_i32_117 = arith.constant 1 : i32
      %130 = arith.addi %20, %c1_i32_117 : i32
      %c4_i32_118 = arith.constant 4 : i32
      %131 = arith.muli %130, %c4_i32_118 : i32
      %c1_i32_119 = arith.constant 1 : i32
      %132 = arith.addi %131, %c1_i32_119 : i32
      %c0_120 = arith.constant 0 : index
      %133 = arith.index_cast %132 : i32 to index
      %c1_121 = arith.constant 1 : index
      %c0_122 = arith.constant 0 : index
      %134 = vector.load %arg2[%c0_120, %133, %c1_121, %c0_122] : memref<1x20x5x16xbf16, #tpu.memory_space<vmem>>, vector<1x1x4x16xbf16>
      %135 = vector.shape_cast %134 : vector<1x1x4x16xbf16> to vector<4x16xbf16>
      %c11 = arith.constant 11 : index
      %c0_123 = arith.constant 0 : index
      %c0_124 = arith.constant 0 : index
      %136 = vector.load %arg3[%c11, %c0_123, %c0_124] : memref<16x16x128xbf16, #tpu.memory_space<vmem>>, vector<1x16x128xbf16>
      %137 = vector.shape_cast %136 : vector<1x16x128xbf16> to vector<16x128xbf16>
      %cst_125 = arith.constant dense<0.000000e+00> : vector<4x128xf32>
      %138 = tpu.matmul %135, %137, %cst_125 {dimension_numbers = #tpu.dot_dimension_numbers<[1], [0], [0], [1], [0, 0, 1, 1], [], []>} : vector<4x16xbf16>, vector<16x128xbf16>, vector<4x128xf32> -> vector<4x128xf32>
      %139 = arith.addf %129, %138 : vector<4x128xf32>
      %c1_i32_126 = arith.constant 1 : i32
      %140 = arith.addi %20, %c1_i32_126 : i32
      %c4_i32_127 = arith.constant 4 : i32
      %141 = arith.muli %140, %c4_i32_127 : i32
      %c2_i32_128 = arith.constant 2 : i32
      %142 = arith.addi %141, %c2_i32_128 : i32
      %c0_129 = arith.constant 0 : index
      %143 = arith.index_cast %142 : i32 to index
      %c0_130 = arith.constant 0 : index
      %c0_131 = arith.constant 0 : index
      %144 = vector.load %arg2[%c0_129, %143, %c0_130, %c0_131] : memref<1x20x5x16xbf16, #tpu.memory_space<vmem>>, vector<1x1x4x16xbf16>
      %145 = vector.shape_cast %144 : vector<1x1x4x16xbf16> to vector<4x16xbf16>
      %c12 = arith.constant 12 : index
      %c0_132 = arith.constant 0 : index
      %c0_133 = arith.constant 0 : index
      %146 = vector.load %arg3[%c12, %c0_132, %c0_133] : memref<16x16x128xbf16, #tpu.memory_space<vmem>>, vector<1x16x128xbf16>
      %147 = vector.shape_cast %146 : vector<1x16x128xbf16> to vector<16x128xbf16>
      %cst_134 = arith.constant dense<0.000000e+00> : vector<4x128xf32>
      %148 = tpu.matmul %145, %147, %cst_134 {dimension_numbers = #tpu.dot_dimension_numbers<[1], [0], [0], [1], [0, 0, 1, 1], [], []>} : vector<4x16xbf16>, vector<16x128xbf16>, vector<4x128xf32> -> vector<4x128xf32>
      %149 = arith.addf %139, %148 : vector<4x128xf32>
      %c1_i32_135 = arith.constant 1 : i32
      %150 = arith.addi %20, %c1_i32_135 : i32
      %c4_i32_136 = arith.constant 4 : i32
      %151 = arith.muli %150, %c4_i32_136 : i32
      %c3_i32_137 = arith.constant 3 : i32
      %152 = arith.addi %151, %c3_i32_137 : i32
      %c0_138 = arith.constant 0 : index
      %153 = arith.index_cast %152 : i32 to index
      %c0_139 = arith.constant 0 : index
      %c0_140 = arith.constant 0 : index
      %154 = vector.load %arg2[%c0_138, %153, %c0_139, %c0_140] : memref<1x20x5x16xbf16, #tpu.memory_space<vmem>>, vector<1x1x4x16xbf16>
      %155 = vector.shape_cast %154 : vector<1x1x4x16xbf16> to vector<4x16xbf16>
      %c13 = arith.constant 13 : index
      %c0_141 = arith.constant 0 : index
      %c0_142 = arith.constant 0 : index
      %156 = vector.load %arg3[%c13, %c0_141, %c0_142] : memref<16x16x128xbf16, #tpu.memory_space<vmem>>, vector<1x16x128xbf16>
      %157 = vector.shape_cast %156 : vector<1x16x128xbf16> to vector<16x128xbf16>
      %cst_143 = arith.constant dense<0.000000e+00> : vector<4x128xf32>
      %158 = tpu.matmul %155, %157, %cst_143 {dimension_numbers = #tpu.dot_dimension_numbers<[1], [0], [0], [1], [0, 0, 1, 1], [], []>} : vector<4x16xbf16>, vector<16x128xbf16>, vector<4x128xf32> -> vector<4x128xf32>
      %159 = arith.addf %149, %158 : vector<4x128xf32>
      %c1_i32_144 = arith.constant 1 : i32
      %160 = arith.addi %20, %c1_i32_144 : i32
      %c4_i32_145 = arith.constant 4 : i32
      %161 = arith.muli %160, %c4_i32_145 : i32
      %c2_i32_146 = arith.constant 2 : i32
      %162 = arith.addi %161, %c2_i32_146 : i32
      %c0_147 = arith.constant 0 : index
      %163 = arith.index_cast %162 : i32 to index
      %c1_148 = arith.constant 1 : index
      %c0_149 = arith.constant 0 : index
      %164 = vector.load %arg2[%c0_147, %163, %c1_148, %c0_149] : memref<1x20x5x16xbf16, #tpu.memory_space<vmem>>, vector<1x1x4x16xbf16>
      %165 = vector.shape_cast %164 : vector<1x1x4x16xbf16> to vector<4x16xbf16>
      %c14 = arith.constant 14 : index
      %c0_150 = arith.constant 0 : index
      %c0_151 = arith.constant 0 : index
      %166 = vector.load %arg3[%c14, %c0_150, %c0_151] : memref<16x16x128xbf16, #tpu.memory_space<vmem>>, vector<1x16x128xbf16>
      %167 = vector.shape_cast %166 : vector<1x16x128xbf16> to vector<16x128xbf16>
      %cst_152 = arith.constant dense<0.000000e+00> : vector<4x128xf32>
      %168 = tpu.matmul %165, %167, %cst_152 {dimension_numbers = #tpu.dot_dimension_numbers<[1], [0], [0], [1], [0, 0, 1, 1], [], []>} : vector<4x16xbf16>, vector<16x128xbf16>, vector<4x128xf32> -> vector<4x128xf32>
      %169 = arith.addf %159, %168 : vector<4x128xf32>
      %c1_i32_153 = arith.constant 1 : i32
      %170 = arith.addi %20, %c1_i32_153 : i32
      %c4_i32_154 = arith.constant 4 : i32
      %171 = arith.muli %170, %c4_i32_154 : i32
      %c3_i32_155 = arith.constant 3 : i32
      %172 = arith.addi %171, %c3_i32_155 : i32
      %c0_156 = arith.constant 0 : index
      %173 = arith.index_cast %172 : i32 to index
      %c1_157 = arith.constant 1 : index
      %c0_158 = arith.constant 0 : index
      %174 = vector.load %arg2[%c0_156, %173, %c1_157, %c0_158] : memref<1x20x5x16xbf16, #tpu.memory_space<vmem>>, vector<1x1x4x16xbf16>
      %175 = vector.shape_cast %174 : vector<1x1x4x16xbf16> to vector<4x16xbf16>
      %c15 = arith.constant 15 : index
      %c0_159 = arith.constant 0 : index
      %c0_160 = arith.constant 0 : index
      %176 = vector.load %arg3[%c15, %c0_159, %c0_160] : memref<16x16x128xbf16, #tpu.memory_space<vmem>>, vector<1x16x128xbf16>
      %177 = vector.shape_cast %176 : vector<1x16x128xbf16> to vector<16x128xbf16>
      %cst_161 = arith.constant dense<0.000000e+00> : vector<4x128xf32>
      %178 = tpu.matmul %175, %177, %cst_161 {dimension_numbers = #tpu.dot_dimension_numbers<[1], [0], [0], [1], [0, 0, 1, 1], [], []>} : vector<4x16xbf16>, vector<16x128xbf16>, vector<4x128xf32> -> vector<4x128xf32>
      %179 = arith.addf %169, %178 : vector<4x128xf32>
      %180 = arith.index_cast %20 : i32 to index
      %c0_162 = arith.constant 0 : index
      %c0_163 = arith.constant 0 : index
      %181 = vector.load %arg5[%180, %c0_162, %c0_163] : memref<4x4x128xf32, #tpu.memory_space<vmem>>, vector<1x4x128xf32>
      %182 = vector.shape_cast %181 : vector<1x4x128xf32> to vector<4x128xf32>
      %183 = vector.shape_cast %179 : vector<4x128xf32> to vector<1x4x128xf32>
      tpu.vector_store %arg5[%180, %c0_162, %c0_163], %183 {strides = array<i32>} : memref<4x4x128xf32, #tpu.memory_space<vmem>>, vector<1x4x128xf32>,
      %c0_164 = arith.constant 0 : index
      %c0_165 = arith.constant 0 : index
      %184 = vector.load %arg6[%c0_164, %c0_165] : memref<1x128xf32, #tpu.memory_space<vmem>>, vector<1x128xf32>
      %cst_166 = arith.constant dense<0.000000e+00> : vector<128xf32>
      %185 = vector.multi_reduction <add>, %179, %cst_166 [0] : vector<4x128xf32> to vector<128xf32>
      %186 = vector.shape_cast %185 : vector<128xf32> to vector<1x128xf32>
      %187 = arith.addf %184, %186 : vector<1x128xf32>
      %c0_167 = arith.constant 0 : index
      %c0_168 = arith.constant 0 : index
      %188 = vector.load %arg6[%c0_167, %c0_168] : memref<1x128xf32, #tpu.memory_space<vmem>>, vector<1x128xf32>
      tpu.vector_store %arg6[%c0_167, %c0_168], %187 {strides = array<i32>} : memref<1x128xf32, #tpu.memory_space<vmem>>, vector<1x128xf32>,
      %c0_169 = arith.constant 0 : index
      %c0_170 = arith.constant 0 : index
      %189 = vector.load %arg7[%c0_169, %c0_170] : memref<1x128xf32, #tpu.memory_space<vmem>>, vector<1x128xf32>
      %190 = arith.mulf %179, %179 : vector<4x128xf32>
      %cst_171 = arith.constant dense<0.000000e+00> : vector<128xf32>
      %191 = vector.multi_reduction <add>, %190, %cst_171 [0] : vector<4x128xf32> to vector<128xf32>
      %192 = vector.shape_cast %191 : vector<128xf32> to vector<1x128xf32>
      %193 = arith.addf %189, %192 : vector<1x128xf32>
      %c0_172 = arith.constant 0 : index
      %c0_173 = arith.constant 0 : index
      %194 = vector.load %arg7[%c0_172, %c0_173] : memref<1x128xf32, #tpu.memory_space<vmem>>, vector<1x128xf32>
      tpu.vector_store %arg7[%c0_172, %c0_173], %193 {strides = array<i32>} : memref<1x128xf32, #tpu.memory_space<vmem>>, vector<1x128xf32>,
    }
    %c4_i32_4 = arith.constant 4 : i32
    %c0_5 = arith.constant 0 : index
    %c0_6 = arith.constant 0 : index
    %5 = vector.load %arg6[%c0_5, %c0_6] : memref<1x128xf32, #tpu.memory_space<vmem>>, vector<1x128xf32>
    %cst_7 = arith.constant 6.250000e-02 : f32
    %6 = vector.broadcast %cst_7 : f32 to vector<1x128xf32>
    %7 = arith.mulf %5, %6 : vector<1x128xf32>
    %c0_8 = arith.constant 0 : index
    %c0_9 = arith.constant 0 : index
    %8 = vector.load %arg7[%c0_8, %c0_9] : memref<1x128xf32, #tpu.memory_space<vmem>>, vector<1x128xf32>
    %cst_10 = arith.constant 6.250000e-02 : f32
    %9 = vector.broadcast %cst_10 : f32 to vector<1x128xf32>
    %10 = arith.mulf %8, %9 : vector<1x128xf32>
    %11 = arith.mulf %7, %7 : vector<1x128xf32>
    %12 = arith.subf %10, %11 : vector<1x128xf32>
    %cst_11 = arith.constant 0.000000e+00 : f32
    %13 = vector.broadcast %cst_11 : f32 to vector<1x128xf32>
    %14 = arith.maximumf %12, %13 : vector<1x128xf32>
    %cst_12 = arith.constant 9.99999974E-6 : f32
    %15 = vector.broadcast %cst_12 : f32 to vector<1x128xf32>
    %16 = arith.addf %14, %15 : vector<1x128xf32>
    %17 = math.rsqrt %16 : vector<1x128xf32>
    %c0_i32_13 = arith.constant 0 : i32
    %c4_i32_14 = arith.constant 4 : i32
    %18 = arith.addi %c0_i32_13, %c4_i32_14 : i32
    %c1_i32_15 = arith.constant 1 : i32
    scf.for %arg8 = %c0_i32_13 to %18 step %c1_i32_15  : i32 {
      %c1_i32_17 = arith.constant 1 : i32
      %19 = arith.muli %arg8, %c1_i32_17 : i32
      %c0_i32_18 = arith.constant 0 : i32
      %20 = arith.addi %c0_i32_18, %19 : i32
      %21 = arith.index_cast %20 : i32 to index
      %c0_19 = arith.constant 0 : index
      %c0_20 = arith.constant 0 : index
      %22 = vector.load %arg5[%21, %c0_19, %c0_20] : memref<4x4x128xf32, #tpu.memory_space<vmem>>, vector<1x4x128xf32>
      %23 = vector.shape_cast %22 : vector<1x4x128xf32> to vector<4x128xf32>
      %24 = vector.broadcast %7 : vector<1x128xf32> to vector<4x128xf32>
      %25 = arith.subf %23, %24 : vector<4x128xf32>
      %26 = vector.broadcast %17 : vector<1x128xf32> to vector<4x128xf32>
      %27 = arith.mulf %25, %26 : vector<4x128xf32>
      %cst_21 = arith.constant 0.000000e+00 : f32
      %28 = vector.broadcast %cst_21 : f32 to vector<4x128xf32>
      %29 = arith.cmpf oge, %27, %28 : vector<4x128xf32>
      %cst_22 = arith.constant 2.000000e-01 : f32
      %30 = vector.broadcast %cst_22 : f32 to vector<4x128xf32>
      %31 = arith.mulf %30, %27 : vector<4x128xf32>
      %32 = arith.select %29, %27, %31 : vector<4x128xi1>, vector<4x128xf32>
      %33 = arith.truncf %32 : vector<4x128xf32> to vector<4x128xbf16>
      %c0_23 = arith.constant 0 : index
      %34 = arith.index_cast %20 : i32 to index
      %c0_24 = arith.constant 0 : index
      %c0_25 = arith.constant 0 : index
      %35 = vector.load %arg4[%c0_23, %34, %c0_24, %c0_25] : memref<1x4x4x128xbf16, #tpu.memory_space<vmem>>, vector<1x1x4x128xbf16>
      %36 = vector.shape_cast %35 : vector<1x1x4x128xbf16> to vector<4x128xbf16>
      %37 = vector.shape_cast %33 : vector<4x128xbf16> to vector<1x1x4x128xbf16>
      tpu.vector_store %arg4[%c0_23, %34, %c0_24, %c0_25], %37 {strides = array<i32>} : memref<1x4x4x128xbf16, #tpu.memory_space<vmem>>, vector<1x1x4x128xbf16>,
    }
    %c4_i32_16 = arith.constant 4 : i32
    return
  }
  func.func @transform_0(%arg0: i32, %arg1: i32) -> (i32, i32, i32, i32) {
    %c0_i32 = arith.constant 0 : i32
    %c0_i32_0 = arith.constant 0 : i32
    %c0_i32_1 = arith.constant 0 : i32
    %c0_i32_2 = arith.constant 0 : i32
    return %arg0, %c0_i32, %c0_i32_0, %c0_i32_1 : i32, i32, i32, i32
  }
  func.func @transform_1(%arg0: i32, %arg1: i32) -> (i32, i32, i32) {
    %c0_i32 = arith.constant 0 : i32
    %c0_i32_0 = arith.constant 0 : i32
    %c0_i32_1 = arith.constant 0 : i32
    return %c0_i32, %c0_i32_0, %arg1 : i32, i32, i32
  }
  func.func @transform_2(%arg0: i32, %arg1: i32) -> (i32, i32, i32, i32) {
    %c0_i32 = arith.constant 0 : i32
    %c0_i32_0 = arith.constant 0 : i32
    %c0_i32_1 = arith.constant 0 : i32
    return %arg0, %c0_i32, %c0_i32_0, %arg1 : i32, i32, i32, i32
  }
}

module attributes {stable_mosaic.version = 11 : i64} {
  func.func @_conv_norm_kernel(%arg0: i32, %arg1: i32, %arg2: memref<1x6x6x32xbf16, #tpu.memory_space<vmem>>, %arg3: memref<16x32x128xbf16, #tpu.memory_space<vmem>>, %arg4: memref<1x3x3x128xbf16, #tpu.memory_space<vmem>>, %arg5: memref<3x3x128xf32, #tpu.memory_space<vmem>>, %arg6: memref<1x128xf32, #tpu.memory_space<vmem>>, %arg7: memref<1x128xf32, #tpu.memory_space<vmem>>) attributes {dimension_semantics = [#tpu.dimension_semantics<parallel>, #tpu.dimension_semantics<parallel>], iteration_bounds = array<i64: 2, 1>, scalar_prefetch = 0 : i64, scratch_operands = 3 : i64, tpu.core_type = #tpu.core_type<tc>, window_params = [{transform_indices = @transform_0, window_bounds = array<i64: 1, 6, 6, 32>}, {transform_indices = @transform_1, window_bounds = array<i64: 16, 32, 128>}, {transform_indices = @transform_2, window_bounds = array<i64: 1, 3, 3, 128>}]} {
    %cst = arith.constant 0.000000e+00 : f32
    %0 = vector.broadcast %cst : f32 to vector<1x128xf32>
    %c0 = arith.constant 0 : index
    %c0_0 = arith.constant 0 : index
    %1 = vector.load %arg6[%c0, %c0_0] : memref<1x128xf32, #tpu.memory_space<vmem>>, vector<1x128xf32>
    tpu.vector_store %arg6[%c0, %c0_0], %0 {strides = array<i32>} : memref<1x128xf32, #tpu.memory_space<vmem>>, vector<1x128xf32>,
    %cst_1 = arith.constant 0.000000e+00 : f32
    %2 = vector.broadcast %cst_1 : f32 to vector<1x128xf32>
    %c0_2 = arith.constant 0 : index
    %c0_3 = arith.constant 0 : index
    %3 = vector.load %arg7[%c0_2, %c0_3] : memref<1x128xf32, #tpu.memory_space<vmem>>, vector<1x128xf32>
    tpu.vector_store %arg7[%c0_2, %c0_3], %2 {strides = array<i32>} : memref<1x128xf32, #tpu.memory_space<vmem>>, vector<1x128xf32>,
    %c0_i32 = arith.constant 0 : i32
    %c3_i32 = arith.constant 3 : i32
    %4 = arith.addi %c0_i32, %c3_i32 : i32
    %c1_i32 = arith.constant 1 : i32
    scf.for %arg8 = %c0_i32 to %4 step %c1_i32  : i32 {
      %c1_i32_17 = arith.constant 1 : i32
      %19 = arith.muli %arg8, %c1_i32_17 : i32
      %c0_i32_18 = arith.constant 0 : i32
      %20 = arith.addi %c0_i32_18, %19 : i32
      %c0_i32_19 = arith.constant 0 : i32
      %21 = arith.addi %20, %c0_i32_19 : i32
      %c1_i32_20 = arith.constant 1 : i32
      %22 = arith.muli %21, %c1_i32_20 : i32
      %c0_i32_21 = arith.constant 0 : i32
      %23 = arith.addi %22, %c0_i32_21 : i32
      %c0_22 = arith.constant 0 : index
      %24 = arith.index_cast %23 : i32 to index
      %c0_23 = arith.constant 0 : index
      %c0_24 = arith.constant 0 : index
      %25 = vector.load %arg2[%c0_22, %24, %c0_23, %c0_24] : memref<1x6x6x32xbf16, #tpu.memory_space<vmem>>, vector<1x1x3x32xbf16>
      %26 = vector.shape_cast %25 : vector<1x1x3x32xbf16> to vector<3x32xbf16>
      %c0_25 = arith.constant 0 : index
      %c0_26 = arith.constant 0 : index
      %c0_27 = arith.constant 0 : index
      %27 = vector.load %arg3[%c0_25, %c0_26, %c0_27] : memref<16x32x128xbf16, #tpu.memory_space<vmem>>, vector<1x32x128xbf16>
      %28 = vector.shape_cast %27 : vector<1x32x128xbf16> to vector<32x128xbf16>
      %cst_28 = arith.constant dense<0.000000e+00> : vector<3x128xf32>
      %29 = tpu.matmul %26, %28, %cst_28 {dimension_numbers = #tpu.dot_dimension_numbers<[1], [0], [0], [1], [0, 0, 1, 1], [], []>} : vector<3x32xbf16>, vector<32x128xbf16>, vector<3x128xf32> -> vector<3x128xf32>
      %c0_i32_29 = arith.constant 0 : i32
      %30 = arith.addi %20, %c0_i32_29 : i32
      %c1_i32_30 = arith.constant 1 : i32
      %31 = arith.muli %30, %c1_i32_30 : i32
      %c0_i32_31 = arith.constant 0 : i32
      %32 = arith.addi %31, %c0_i32_31 : i32
      %c0_32 = arith.constant 0 : index
      %33 = arith.index_cast %32 : i32 to index
      %c1 = arith.constant 1 : index
      %c0_33 = arith.constant 0 : index
      %34 = vector.load %arg2[%c0_32, %33, %c1, %c0_33] : memref<1x6x6x32xbf16, #tpu.memory_space<vmem>>, vector<1x1x3x32xbf16>
      %35 = vector.shape_cast %34 : vector<1x1x3x32xbf16> to vector<3x32xbf16>
      %c1_34 = arith.constant 1 : index
      %c0_35 = arith.constant 0 : index
      %c0_36 = arith.constant 0 : index
      %36 = vector.load %arg3[%c1_34, %c0_35, %c0_36] : memref<16x32x128xbf16, #tpu.memory_space<vmem>>, vector<1x32x128xbf16>
      %37 = vector.shape_cast %36 : vector<1x32x128xbf16> to vector<32x128xbf16>
      %cst_37 = arith.constant dense<0.000000e+00> : vector<3x128xf32>
      %38 = tpu.matmul %35, %37, %cst_37 {dimension_numbers = #tpu.dot_dimension_numbers<[1], [0], [0], [1], [0, 0, 1, 1], [], []>} : vector<3x32xbf16>, vector<32x128xbf16>, vector<3x128xf32> -> vector<3x128xf32>
      %39 = arith.addf %29, %38 : vector<3x128xf32>
      %c0_i32_38 = arith.constant 0 : i32
      %40 = arith.addi %20, %c0_i32_38 : i32
      %c1_i32_39 = arith.constant 1 : i32
      %41 = arith.muli %40, %c1_i32_39 : i32
      %c0_i32_40 = arith.constant 0 : i32
      %42 = arith.addi %41, %c0_i32_40 : i32
      %c0_41 = arith.constant 0 : index
      %43 = arith.index_cast %42 : i32 to index
      %c2 = arith.constant 2 : index
      %c0_42 = arith.constant 0 : index
      %44 = vector.load %arg2[%c0_41, %43, %c2, %c0_42] : memref<1x6x6x32xbf16, #tpu.memory_space<vmem>>, vector<1x1x3x32xbf16>
      %45 = vector.shape_cast %44 : vector<1x1x3x32xbf16> to vector<3x32xbf16>
      %c2_43 = arith.constant 2 : index
      %c0_44 = arith.constant 0 : index
      %c0_45 = arith.constant 0 : index
      %46 = vector.load %arg3[%c2_43, %c0_44, %c0_45] : memref<16x32x128xbf16, #tpu.memory_space<vmem>>, vector<1x32x128xbf16>
      %47 = vector.shape_cast %46 : vector<1x32x128xbf16> to vector<32x128xbf16>
      %cst_46 = arith.constant dense<0.000000e+00> : vector<3x128xf32>
      %48 = tpu.matmul %45, %47, %cst_46 {dimension_numbers = #tpu.dot_dimension_numbers<[1], [0], [0], [1], [0, 0, 1, 1], [], []>} : vector<3x32xbf16>, vector<32x128xbf16>, vector<3x128xf32> -> vector<3x128xf32>
      %49 = arith.addf %39, %48 : vector<3x128xf32>
      %c0_i32_47 = arith.constant 0 : i32
      %50 = arith.addi %20, %c0_i32_47 : i32
      %c1_i32_48 = arith.constant 1 : i32
      %51 = arith.muli %50, %c1_i32_48 : i32
      %c0_i32_49 = arith.constant 0 : i32
      %52 = arith.addi %51, %c0_i32_49 : i32
      %c0_50 = arith.constant 0 : index
      %53 = arith.index_cast %52 : i32 to index
      %c3 = arith.constant 3 : index
      %c0_51 = arith.constant 0 : index
      %54 = vector.load %arg2[%c0_50, %53, %c3, %c0_51] : memref<1x6x6x32xbf16, #tpu.memory_space<vmem>>, vector<1x1x3x32xbf16>
      %55 = vector.shape_cast %54 : vector<1x1x3x32xbf16> to vector<3x32xbf16>
      %c3_52 = arith.constant 3 : index
      %c0_53 = arith.constant 0 : index
      %c0_54 = arith.constant 0 : index
      %56 = vector.load %arg3[%c3_52, %c0_53, %c0_54] : memref<16x32x128xbf16, #tpu.memory_space<vmem>>, vector<1x32x128xbf16>
      %57 = vector.shape_cast %56 : vector<1x32x128xbf16> to vector<32x128xbf16>
      %cst_55 = arith.constant dense<0.000000e+00> : vector<3x128xf32>
      %58 = tpu.matmul %55, %57, %cst_55 {dimension_numbers = #tpu.dot_dimension_numbers<[1], [0], [0], [1], [0, 0, 1, 1], [], []>} : vector<3x32xbf16>, vector<32x128xbf16>, vector<3x128xf32> -> vector<3x128xf32>
      %59 = arith.addf %49, %58 : vector<3x128xf32>
      %c1_i32_56 = arith.constant 1 : i32
      %60 = arith.addi %20, %c1_i32_56 : i32
      %c1_i32_57 = arith.constant 1 : i32
      %61 = arith.muli %60, %c1_i32_57 : i32
      %c0_i32_58 = arith.constant 0 : i32
      %62 = arith.addi %61, %c0_i32_58 : i32
      %c0_59 = arith.constant 0 : index
      %63 = arith.index_cast %62 : i32 to index
      %c0_60 = arith.constant 0 : index
      %c0_61 = arith.constant 0 : index
      %64 = vector.load %arg2[%c0_59, %63, %c0_60, %c0_61] : memref<1x6x6x32xbf16, #tpu.memory_space<vmem>>, vector<1x1x3x32xbf16>
      %65 = vector.shape_cast %64 : vector<1x1x3x32xbf16> to vector<3x32xbf16>
      %c4 = arith.constant 4 : index
      %c0_62 = arith.constant 0 : index
      %c0_63 = arith.constant 0 : index
      %66 = vector.load %arg3[%c4, %c0_62, %c0_63] : memref<16x32x128xbf16, #tpu.memory_space<vmem>>, vector<1x32x128xbf16>
      %67 = vector.shape_cast %66 : vector<1x32x128xbf16> to vector<32x128xbf16>
      %cst_64 = arith.constant dense<0.000000e+00> : vector<3x128xf32>
      %68 = tpu.matmul %65, %67, %cst_64 {dimension_numbers = #tpu.dot_dimension_numbers<[1], [0], [0], [1], [0, 0, 1, 1], [], []>} : vector<3x32xbf16>, vector<32x128xbf16>, vector<3x128xf32> -> vector<3x128xf32>
      %69 = arith.addf %59, %68 : vector<3x128xf32>
      %c1_i32_65 = arith.constant 1 : i32
      %70 = arith.addi %20, %c1_i32_65 : i32
      %c1_i32_66 = arith.constant 1 : i32
      %71 = arith.muli %70, %c1_i32_66 : i32
      %c0_i32_67 = arith.constant 0 : i32
      %72 = arith.addi %71, %c0_i32_67 : i32
      %c0_68 = arith.constant 0 : index
      %73 = arith.index_cast %72 : i32 to index
      %c1_69 = arith.constant 1 : index
      %c0_70 = arith.constant 0 : index
      %74 = vector.load %arg2[%c0_68, %73, %c1_69, %c0_70] : memref<1x6x6x32xbf16, #tpu.memory_space<vmem>>, vector<1x1x3x32xbf16>
      %75 = vector.shape_cast %74 : vector<1x1x3x32xbf16> to vector<3x32xbf16>
      %c5 = arith.constant 5 : index
      %c0_71 = arith.constant 0 : index
      %c0_72 = arith.constant 0 : index
      %76 = vector.load %arg3[%c5, %c0_71, %c0_72] : memref<16x32x128xbf16, #tpu.memory_space<vmem>>, vector<1x32x128xbf16>
      %77 = vector.shape_cast %76 : vector<1x32x128xbf16> to vector<32x128xbf16>
      %cst_73 = arith.constant dense<0.000000e+00> : vector<3x128xf32>
      %78 = tpu.matmul %75, %77, %cst_73 {dimension_numbers = #tpu.dot_dimension_numbers<[1], [0], [0], [1], [0, 0, 1, 1], [], []>} : vector<3x32xbf16>, vector<32x128xbf16>, vector<3x128xf32> -> vector<3x128xf32>
      %79 = arith.addf %69, %78 : vector<3x128xf32>
      %c1_i32_74 = arith.constant 1 : i32
      %80 = arith.addi %20, %c1_i32_74 : i32
      %c1_i32_75 = arith.constant 1 : i32
      %81 = arith.muli %80, %c1_i32_75 : i32
      %c0_i32_76 = arith.constant 0 : i32
      %82 = arith.addi %81, %c0_i32_76 : i32
      %c0_77 = arith.constant 0 : index
      %83 = arith.index_cast %82 : i32 to index
      %c2_78 = arith.constant 2 : index
      %c0_79 = arith.constant 0 : index
      %84 = vector.load %arg2[%c0_77, %83, %c2_78, %c0_79] : memref<1x6x6x32xbf16, #tpu.memory_space<vmem>>, vector<1x1x3x32xbf16>
      %85 = vector.shape_cast %84 : vector<1x1x3x32xbf16> to vector<3x32xbf16>
      %c6 = arith.constant 6 : index
      %c0_80 = arith.constant 0 : index
      %c0_81 = arith.constant 0 : index
      %86 = vector.load %arg3[%c6, %c0_80, %c0_81] : memref<16x32x128xbf16, #tpu.memory_space<vmem>>, vector<1x32x128xbf16>
      %87 = vector.shape_cast %86 : vector<1x32x128xbf16> to vector<32x128xbf16>
      %cst_82 = arith.constant dense<0.000000e+00> : vector<3x128xf32>
      %88 = tpu.matmul %85, %87, %cst_82 {dimension_numbers = #tpu.dot_dimension_numbers<[1], [0], [0], [1], [0, 0, 1, 1], [], []>} : vector<3x32xbf16>, vector<32x128xbf16>, vector<3x128xf32> -> vector<3x128xf32>
      %89 = arith.addf %79, %88 : vector<3x128xf32>
      %c1_i32_83 = arith.constant 1 : i32
      %90 = arith.addi %20, %c1_i32_83 : i32
      %c1_i32_84 = arith.constant 1 : i32
      %91 = arith.muli %90, %c1_i32_84 : i32
      %c0_i32_85 = arith.constant 0 : i32
      %92 = arith.addi %91, %c0_i32_85 : i32
      %c0_86 = arith.constant 0 : index
      %93 = arith.index_cast %92 : i32 to index
      %c3_87 = arith.constant 3 : index
      %c0_88 = arith.constant 0 : index
      %94 = vector.load %arg2[%c0_86, %93, %c3_87, %c0_88] : memref<1x6x6x32xbf16, #tpu.memory_space<vmem>>, vector<1x1x3x32xbf16>
      %95 = vector.shape_cast %94 : vector<1x1x3x32xbf16> to vector<3x32xbf16>
      %c7 = arith.constant 7 : index
      %c0_89 = arith.constant 0 : index
      %c0_90 = arith.constant 0 : index
      %96 = vector.load %arg3[%c7, %c0_89, %c0_90] : memref<16x32x128xbf16, #tpu.memory_space<vmem>>, vector<1x32x128xbf16>
      %97 = vector.shape_cast %96 : vector<1x32x128xbf16> to vector<32x128xbf16>
      %cst_91 = arith.constant dense<0.000000e+00> : vector<3x128xf32>
      %98 = tpu.matmul %95, %97, %cst_91 {dimension_numbers = #tpu.dot_dimension_numbers<[1], [0], [0], [1], [0, 0, 1, 1], [], []>} : vector<3x32xbf16>, vector<32x128xbf16>, vector<3x128xf32> -> vector<3x128xf32>
      %99 = arith.addf %89, %98 : vector<3x128xf32>
      %c2_i32 = arith.constant 2 : i32
      %100 = arith.addi %20, %c2_i32 : i32
      %c1_i32_92 = arith.constant 1 : i32
      %101 = arith.muli %100, %c1_i32_92 : i32
      %c0_i32_93 = arith.constant 0 : i32
      %102 = arith.addi %101, %c0_i32_93 : i32
      %c0_94 = arith.constant 0 : index
      %103 = arith.index_cast %102 : i32 to index
      %c0_95 = arith.constant 0 : index
      %c0_96 = arith.constant 0 : index
      %104 = vector.load %arg2[%c0_94, %103, %c0_95, %c0_96] : memref<1x6x6x32xbf16, #tpu.memory_space<vmem>>, vector<1x1x3x32xbf16>
      %105 = vector.shape_cast %104 : vector<1x1x3x32xbf16> to vector<3x32xbf16>
      %c8 = arith.constant 8 : index
      %c0_97 = arith.constant 0 : index
      %c0_98 = arith.constant 0 : index
      %106 = vector.load %arg3[%c8, %c0_97, %c0_98] : memref<16x32x128xbf16, #tpu.memory_space<vmem>>, vector<1x32x128xbf16>
      %107 = vector.shape_cast %106 : vector<1x32x128xbf16> to vector<32x128xbf16>
      %cst_99 = arith.constant dense<0.000000e+00> : vector<3x128xf32>
      %108 = tpu.matmul %105, %107, %cst_99 {dimension_numbers = #tpu.dot_dimension_numbers<[1], [0], [0], [1], [0, 0, 1, 1], [], []>} : vector<3x32xbf16>, vector<32x128xbf16>, vector<3x128xf32> -> vector<3x128xf32>
      %109 = arith.addf %99, %108 : vector<3x128xf32>
      %c2_i32_100 = arith.constant 2 : i32
      %110 = arith.addi %20, %c2_i32_100 : i32
      %c1_i32_101 = arith.constant 1 : i32
      %111 = arith.muli %110, %c1_i32_101 : i32
      %c0_i32_102 = arith.constant 0 : i32
      %112 = arith.addi %111, %c0_i32_102 : i32
      %c0_103 = arith.constant 0 : index
      %113 = arith.index_cast %112 : i32 to index
      %c1_104 = arith.constant 1 : index
      %c0_105 = arith.constant 0 : index
      %114 = vector.load %arg2[%c0_103, %113, %c1_104, %c0_105] : memref<1x6x6x32xbf16, #tpu.memory_space<vmem>>, vector<1x1x3x32xbf16>
      %115 = vector.shape_cast %114 : vector<1x1x3x32xbf16> to vector<3x32xbf16>
      %c9 = arith.constant 9 : index
      %c0_106 = arith.constant 0 : index
      %c0_107 = arith.constant 0 : index
      %116 = vector.load %arg3[%c9, %c0_106, %c0_107] : memref<16x32x128xbf16, #tpu.memory_space<vmem>>, vector<1x32x128xbf16>
      %117 = vector.shape_cast %116 : vector<1x32x128xbf16> to vector<32x128xbf16>
      %cst_108 = arith.constant dense<0.000000e+00> : vector<3x128xf32>
      %118 = tpu.matmul %115, %117, %cst_108 {dimension_numbers = #tpu.dot_dimension_numbers<[1], [0], [0], [1], [0, 0, 1, 1], [], []>} : vector<3x32xbf16>, vector<32x128xbf16>, vector<3x128xf32> -> vector<3x128xf32>
      %119 = arith.addf %109, %118 : vector<3x128xf32>
      %c2_i32_109 = arith.constant 2 : i32
      %120 = arith.addi %20, %c2_i32_109 : i32
      %c1_i32_110 = arith.constant 1 : i32
      %121 = arith.muli %120, %c1_i32_110 : i32
      %c0_i32_111 = arith.constant 0 : i32
      %122 = arith.addi %121, %c0_i32_111 : i32
      %c0_112 = arith.constant 0 : index
      %123 = arith.index_cast %122 : i32 to index
      %c2_113 = arith.constant 2 : index
      %c0_114 = arith.constant 0 : index
      %124 = vector.load %arg2[%c0_112, %123, %c2_113, %c0_114] : memref<1x6x6x32xbf16, #tpu.memory_space<vmem>>, vector<1x1x3x32xbf16>
      %125 = vector.shape_cast %124 : vector<1x1x3x32xbf16> to vector<3x32xbf16>
      %c10 = arith.constant 10 : index
      %c0_115 = arith.constant 0 : index
      %c0_116 = arith.constant 0 : index
      %126 = vector.load %arg3[%c10, %c0_115, %c0_116] : memref<16x32x128xbf16, #tpu.memory_space<vmem>>, vector<1x32x128xbf16>
      %127 = vector.shape_cast %126 : vector<1x32x128xbf16> to vector<32x128xbf16>
      %cst_117 = arith.constant dense<0.000000e+00> : vector<3x128xf32>
      %128 = tpu.matmul %125, %127, %cst_117 {dimension_numbers = #tpu.dot_dimension_numbers<[1], [0], [0], [1], [0, 0, 1, 1], [], []>} : vector<3x32xbf16>, vector<32x128xbf16>, vector<3x128xf32> -> vector<3x128xf32>
      %129 = arith.addf %119, %128 : vector<3x128xf32>
      %c2_i32_118 = arith.constant 2 : i32
      %130 = arith.addi %20, %c2_i32_118 : i32
      %c1_i32_119 = arith.constant 1 : i32
      %131 = arith.muli %130, %c1_i32_119 : i32
      %c0_i32_120 = arith.constant 0 : i32
      %132 = arith.addi %131, %c0_i32_120 : i32
      %c0_121 = arith.constant 0 : index
      %133 = arith.index_cast %132 : i32 to index
      %c3_122 = arith.constant 3 : index
      %c0_123 = arith.constant 0 : index
      %134 = vector.load %arg2[%c0_121, %133, %c3_122, %c0_123] : memref<1x6x6x32xbf16, #tpu.memory_space<vmem>>, vector<1x1x3x32xbf16>
      %135 = vector.shape_cast %134 : vector<1x1x3x32xbf16> to vector<3x32xbf16>
      %c11 = arith.constant 11 : index
      %c0_124 = arith.constant 0 : index
      %c0_125 = arith.constant 0 : index
      %136 = vector.load %arg3[%c11, %c0_124, %c0_125] : memref<16x32x128xbf16, #tpu.memory_space<vmem>>, vector<1x32x128xbf16>
      %137 = vector.shape_cast %136 : vector<1x32x128xbf16> to vector<32x128xbf16>
      %cst_126 = arith.constant dense<0.000000e+00> : vector<3x128xf32>
      %138 = tpu.matmul %135, %137, %cst_126 {dimension_numbers = #tpu.dot_dimension_numbers<[1], [0], [0], [1], [0, 0, 1, 1], [], []>} : vector<3x32xbf16>, vector<32x128xbf16>, vector<3x128xf32> -> vector<3x128xf32>
      %139 = arith.addf %129, %138 : vector<3x128xf32>
      %c3_i32_127 = arith.constant 3 : i32
      %140 = arith.addi %20, %c3_i32_127 : i32
      %c1_i32_128 = arith.constant 1 : i32
      %141 = arith.muli %140, %c1_i32_128 : i32
      %c0_i32_129 = arith.constant 0 : i32
      %142 = arith.addi %141, %c0_i32_129 : i32
      %c0_130 = arith.constant 0 : index
      %143 = arith.index_cast %142 : i32 to index
      %c0_131 = arith.constant 0 : index
      %c0_132 = arith.constant 0 : index
      %144 = vector.load %arg2[%c0_130, %143, %c0_131, %c0_132] : memref<1x6x6x32xbf16, #tpu.memory_space<vmem>>, vector<1x1x3x32xbf16>
      %145 = vector.shape_cast %144 : vector<1x1x3x32xbf16> to vector<3x32xbf16>
      %c12 = arith.constant 12 : index
      %c0_133 = arith.constant 0 : index
      %c0_134 = arith.constant 0 : index
      %146 = vector.load %arg3[%c12, %c0_133, %c0_134] : memref<16x32x128xbf16, #tpu.memory_space<vmem>>, vector<1x32x128xbf16>
      %147 = vector.shape_cast %146 : vector<1x32x128xbf16> to vector<32x128xbf16>
      %cst_135 = arith.constant dense<0.000000e+00> : vector<3x128xf32>
      %148 = tpu.matmul %145, %147, %cst_135 {dimension_numbers = #tpu.dot_dimension_numbers<[1], [0], [0], [1], [0, 0, 1, 1], [], []>} : vector<3x32xbf16>, vector<32x128xbf16>, vector<3x128xf32> -> vector<3x128xf32>
      %149 = arith.addf %139, %148 : vector<3x128xf32>
      %c3_i32_136 = arith.constant 3 : i32
      %150 = arith.addi %20, %c3_i32_136 : i32
      %c1_i32_137 = arith.constant 1 : i32
      %151 = arith.muli %150, %c1_i32_137 : i32
      %c0_i32_138 = arith.constant 0 : i32
      %152 = arith.addi %151, %c0_i32_138 : i32
      %c0_139 = arith.constant 0 : index
      %153 = arith.index_cast %152 : i32 to index
      %c1_140 = arith.constant 1 : index
      %c0_141 = arith.constant 0 : index
      %154 = vector.load %arg2[%c0_139, %153, %c1_140, %c0_141] : memref<1x6x6x32xbf16, #tpu.memory_space<vmem>>, vector<1x1x3x32xbf16>
      %155 = vector.shape_cast %154 : vector<1x1x3x32xbf16> to vector<3x32xbf16>
      %c13 = arith.constant 13 : index
      %c0_142 = arith.constant 0 : index
      %c0_143 = arith.constant 0 : index
      %156 = vector.load %arg3[%c13, %c0_142, %c0_143] : memref<16x32x128xbf16, #tpu.memory_space<vmem>>, vector<1x32x128xbf16>
      %157 = vector.shape_cast %156 : vector<1x32x128xbf16> to vector<32x128xbf16>
      %cst_144 = arith.constant dense<0.000000e+00> : vector<3x128xf32>
      %158 = tpu.matmul %155, %157, %cst_144 {dimension_numbers = #tpu.dot_dimension_numbers<[1], [0], [0], [1], [0, 0, 1, 1], [], []>} : vector<3x32xbf16>, vector<32x128xbf16>, vector<3x128xf32> -> vector<3x128xf32>
      %159 = arith.addf %149, %158 : vector<3x128xf32>
      %c3_i32_145 = arith.constant 3 : i32
      %160 = arith.addi %20, %c3_i32_145 : i32
      %c1_i32_146 = arith.constant 1 : i32
      %161 = arith.muli %160, %c1_i32_146 : i32
      %c0_i32_147 = arith.constant 0 : i32
      %162 = arith.addi %161, %c0_i32_147 : i32
      %c0_148 = arith.constant 0 : index
      %163 = arith.index_cast %162 : i32 to index
      %c2_149 = arith.constant 2 : index
      %c0_150 = arith.constant 0 : index
      %164 = vector.load %arg2[%c0_148, %163, %c2_149, %c0_150] : memref<1x6x6x32xbf16, #tpu.memory_space<vmem>>, vector<1x1x3x32xbf16>
      %165 = vector.shape_cast %164 : vector<1x1x3x32xbf16> to vector<3x32xbf16>
      %c14 = arith.constant 14 : index
      %c0_151 = arith.constant 0 : index
      %c0_152 = arith.constant 0 : index
      %166 = vector.load %arg3[%c14, %c0_151, %c0_152] : memref<16x32x128xbf16, #tpu.memory_space<vmem>>, vector<1x32x128xbf16>
      %167 = vector.shape_cast %166 : vector<1x32x128xbf16> to vector<32x128xbf16>
      %cst_153 = arith.constant dense<0.000000e+00> : vector<3x128xf32>
      %168 = tpu.matmul %165, %167, %cst_153 {dimension_numbers = #tpu.dot_dimension_numbers<[1], [0], [0], [1], [0, 0, 1, 1], [], []>} : vector<3x32xbf16>, vector<32x128xbf16>, vector<3x128xf32> -> vector<3x128xf32>
      %169 = arith.addf %159, %168 : vector<3x128xf32>
      %c3_i32_154 = arith.constant 3 : i32
      %170 = arith.addi %20, %c3_i32_154 : i32
      %c1_i32_155 = arith.constant 1 : i32
      %171 = arith.muli %170, %c1_i32_155 : i32
      %c0_i32_156 = arith.constant 0 : i32
      %172 = arith.addi %171, %c0_i32_156 : i32
      %c0_157 = arith.constant 0 : index
      %173 = arith.index_cast %172 : i32 to index
      %c3_158 = arith.constant 3 : index
      %c0_159 = arith.constant 0 : index
      %174 = vector.load %arg2[%c0_157, %173, %c3_158, %c0_159] : memref<1x6x6x32xbf16, #tpu.memory_space<vmem>>, vector<1x1x3x32xbf16>
      %175 = vector.shape_cast %174 : vector<1x1x3x32xbf16> to vector<3x32xbf16>
      %c15 = arith.constant 15 : index
      %c0_160 = arith.constant 0 : index
      %c0_161 = arith.constant 0 : index
      %176 = vector.load %arg3[%c15, %c0_160, %c0_161] : memref<16x32x128xbf16, #tpu.memory_space<vmem>>, vector<1x32x128xbf16>
      %177 = vector.shape_cast %176 : vector<1x32x128xbf16> to vector<32x128xbf16>
      %cst_162 = arith.constant dense<0.000000e+00> : vector<3x128xf32>
      %178 = tpu.matmul %175, %177, %cst_162 {dimension_numbers = #tpu.dot_dimension_numbers<[1], [0], [0], [1], [0, 0, 1, 1], [], []>} : vector<3x32xbf16>, vector<32x128xbf16>, vector<3x128xf32> -> vector<3x128xf32>
      %179 = arith.addf %169, %178 : vector<3x128xf32>
      %180 = arith.index_cast %20 : i32 to index
      %c0_163 = arith.constant 0 : index
      %c0_164 = arith.constant 0 : index
      %181 = vector.load %arg5[%180, %c0_163, %c0_164] : memref<3x3x128xf32, #tpu.memory_space<vmem>>, vector<1x3x128xf32>
      %182 = vector.shape_cast %181 : vector<1x3x128xf32> to vector<3x128xf32>
      %183 = vector.shape_cast %179 : vector<3x128xf32> to vector<1x3x128xf32>
      tpu.vector_store %arg5[%180, %c0_163, %c0_164], %183 {strides = array<i32>} : memref<3x3x128xf32, #tpu.memory_space<vmem>>, vector<1x3x128xf32>,
      %c0_165 = arith.constant 0 : index
      %c0_166 = arith.constant 0 : index
      %184 = vector.load %arg6[%c0_165, %c0_166] : memref<1x128xf32, #tpu.memory_space<vmem>>, vector<1x128xf32>
      %cst_167 = arith.constant dense<0.000000e+00> : vector<128xf32>
      %185 = vector.multi_reduction <add>, %179, %cst_167 [0] : vector<3x128xf32> to vector<128xf32>
      %186 = vector.shape_cast %185 : vector<128xf32> to vector<1x128xf32>
      %187 = arith.addf %184, %186 : vector<1x128xf32>
      %c0_168 = arith.constant 0 : index
      %c0_169 = arith.constant 0 : index
      %188 = vector.load %arg6[%c0_168, %c0_169] : memref<1x128xf32, #tpu.memory_space<vmem>>, vector<1x128xf32>
      tpu.vector_store %arg6[%c0_168, %c0_169], %187 {strides = array<i32>} : memref<1x128xf32, #tpu.memory_space<vmem>>, vector<1x128xf32>,
      %c0_170 = arith.constant 0 : index
      %c0_171 = arith.constant 0 : index
      %189 = vector.load %arg7[%c0_170, %c0_171] : memref<1x128xf32, #tpu.memory_space<vmem>>, vector<1x128xf32>
      %190 = arith.mulf %179, %179 : vector<3x128xf32>
      %cst_172 = arith.constant dense<0.000000e+00> : vector<128xf32>
      %191 = vector.multi_reduction <add>, %190, %cst_172 [0] : vector<3x128xf32> to vector<128xf32>
      %192 = vector.shape_cast %191 : vector<128xf32> to vector<1x128xf32>
      %193 = arith.addf %189, %192 : vector<1x128xf32>
      %c0_173 = arith.constant 0 : index
      %c0_174 = arith.constant 0 : index
      %194 = vector.load %arg7[%c0_173, %c0_174] : memref<1x128xf32, #tpu.memory_space<vmem>>, vector<1x128xf32>
      tpu.vector_store %arg7[%c0_173, %c0_174], %193 {strides = array<i32>} : memref<1x128xf32, #tpu.memory_space<vmem>>, vector<1x128xf32>,
    }
    %c3_i32_4 = arith.constant 3 : i32
    %c0_5 = arith.constant 0 : index
    %c0_6 = arith.constant 0 : index
    %5 = vector.load %arg6[%c0_5, %c0_6] : memref<1x128xf32, #tpu.memory_space<vmem>>, vector<1x128xf32>
    %cst_7 = arith.constant 0.111111112 : f32
    %6 = vector.broadcast %cst_7 : f32 to vector<1x128xf32>
    %7 = arith.mulf %5, %6 : vector<1x128xf32>
    %c0_8 = arith.constant 0 : index
    %c0_9 = arith.constant 0 : index
    %8 = vector.load %arg7[%c0_8, %c0_9] : memref<1x128xf32, #tpu.memory_space<vmem>>, vector<1x128xf32>
    %cst_10 = arith.constant 0.111111112 : f32
    %9 = vector.broadcast %cst_10 : f32 to vector<1x128xf32>
    %10 = arith.mulf %8, %9 : vector<1x128xf32>
    %11 = arith.mulf %7, %7 : vector<1x128xf32>
    %12 = arith.subf %10, %11 : vector<1x128xf32>
    %cst_11 = arith.constant 0.000000e+00 : f32
    %13 = vector.broadcast %cst_11 : f32 to vector<1x128xf32>
    %14 = arith.maximumf %12, %13 : vector<1x128xf32>
    %cst_12 = arith.constant 9.99999974E-6 : f32
    %15 = vector.broadcast %cst_12 : f32 to vector<1x128xf32>
    %16 = arith.addf %14, %15 : vector<1x128xf32>
    %17 = math.rsqrt %16 : vector<1x128xf32>
    %c0_i32_13 = arith.constant 0 : i32
    %c3_i32_14 = arith.constant 3 : i32
    %18 = arith.addi %c0_i32_13, %c3_i32_14 : i32
    %c1_i32_15 = arith.constant 1 : i32
    scf.for %arg8 = %c0_i32_13 to %18 step %c1_i32_15  : i32 {
      %c1_i32_17 = arith.constant 1 : i32
      %19 = arith.muli %arg8, %c1_i32_17 : i32
      %c0_i32_18 = arith.constant 0 : i32
      %20 = arith.addi %c0_i32_18, %19 : i32
      %21 = arith.index_cast %20 : i32 to index
      %c0_19 = arith.constant 0 : index
      %c0_20 = arith.constant 0 : index
      %22 = vector.load %arg5[%21, %c0_19, %c0_20] : memref<3x3x128xf32, #tpu.memory_space<vmem>>, vector<1x3x128xf32>
      %23 = vector.shape_cast %22 : vector<1x3x128xf32> to vector<3x128xf32>
      %24 = vector.broadcast %7 : vector<1x128xf32> to vector<3x128xf32>
      %25 = arith.subf %23, %24 : vector<3x128xf32>
      %26 = vector.broadcast %17 : vector<1x128xf32> to vector<3x128xf32>
      %27 = arith.mulf %25, %26 : vector<3x128xf32>
      %cst_21 = arith.constant 0.000000e+00 : f32
      %28 = vector.broadcast %cst_21 : f32 to vector<3x128xf32>
      %29 = arith.cmpf oge, %27, %28 : vector<3x128xf32>
      %cst_22 = arith.constant 2.000000e-01 : f32
      %30 = vector.broadcast %cst_22 : f32 to vector<3x128xf32>
      %31 = arith.mulf %30, %27 : vector<3x128xf32>
      %32 = arith.select %29, %27, %31 : vector<3x128xi1>, vector<3x128xf32>
      %33 = arith.truncf %32 : vector<3x128xf32> to vector<3x128xbf16>
      %c0_23 = arith.constant 0 : index
      %34 = arith.index_cast %20 : i32 to index
      %c0_24 = arith.constant 0 : index
      %c0_25 = arith.constant 0 : index
      %35 = vector.load %arg4[%c0_23, %34, %c0_24, %c0_25] : memref<1x3x3x128xbf16, #tpu.memory_space<vmem>>, vector<1x1x3x128xbf16>
      %36 = vector.shape_cast %35 : vector<1x1x3x128xbf16> to vector<3x128xbf16>
      %37 = vector.shape_cast %33 : vector<3x128xbf16> to vector<1x1x3x128xbf16>
      tpu.vector_store %arg4[%c0_23, %34, %c0_24, %c0_25], %37 {strides = array<i32>} : memref<1x3x3x128xbf16, #tpu.memory_space<vmem>>, vector<1x1x3x128xbf16>,
    }
    %c3_i32_16 = arith.constant 3 : i32
    return
  }
  func.func @transform_0(%arg0: i32, %arg1: i32) -> (i32, i32, i32, i32) {
    %c0_i32 = arith.constant 0 : i32
    %c0_i32_0 = arith.constant 0 : i32
    %c0_i32_1 = arith.constant 0 : i32
    %c0_i32_2 = arith.constant 0 : i32
    return %arg0, %c0_i32, %c0_i32_0, %c0_i32_1 : i32, i32, i32, i32
  }
  func.func @transform_1(%arg0: i32, %arg1: i32) -> (i32, i32, i32) {
    %c0_i32 = arith.constant 0 : i32
    %c0_i32_0 = arith.constant 0 : i32
    %c0_i32_1 = arith.constant 0 : i32
    return %c0_i32, %c0_i32_0, %arg1 : i32, i32, i32
  }
  func.func @transform_2(%arg0: i32, %arg1: i32) -> (i32, i32, i32, i32) {
    %c0_i32 = arith.constant 0 : i32
    %c0_i32_0 = arith.constant 0 : i32
    %c0_i32_1 = arith.constant 0 : i32
    return %arg0, %c0_i32, %c0_i32_0, %arg1 : i32, i32, i32, i32
  }
}

module attributes {stable_mosaic.version = 11 : i64} {
  func.func @_conv_nonorm_kernel(%arg0: i32, %arg1: i32, %arg2: memref<1x5x5x64xbf16, #tpu.memory_space<vmem>>, %arg3: memref<16x64x128xbf16, #tpu.memory_space<vmem>>, %arg4: memref<1x128xf32, #tpu.memory_space<vmem>>, %arg5: memref<1x2x2x128xbf16, #tpu.memory_space<vmem>>) attributes {dimension_semantics = [#tpu.dimension_semantics<parallel>, #tpu.dimension_semantics<parallel>], iteration_bounds = array<i64: 2, 1>, scalar_prefetch = 0 : i64, scratch_operands = 0 : i64, tpu.core_type = #tpu.core_type<tc>, window_params = [{transform_indices = @transform_0, window_bounds = array<i64: 1, 5, 5, 64>}, {transform_indices = @transform_1, window_bounds = array<i64: 16, 64, 128>}, {transform_indices = @transform_2, window_bounds = array<i64: 1, 128>}, {transform_indices = @transform_3, window_bounds = array<i64: 1, 2, 2, 128>}]} {
    %c0 = arith.constant 0 : index
    %c0_0 = arith.constant 0 : index
    %0 = vector.load %arg4[%c0, %c0_0] : memref<1x128xf32, #tpu.memory_space<vmem>>, vector<1x128xf32>
    %1 = vector.shape_cast %0 : vector<1x128xf32> to vector<1x128xf32>
    %2 = vector.broadcast %1 : vector<1x128xf32> to vector<2x128xf32>
    %c0_i32 = arith.constant 0 : i32
    %c2_i32 = arith.constant 2 : i32
    %3 = arith.addi %c0_i32, %c2_i32 : i32
    %c1_i32 = arith.constant 1 : i32
    scf.for %arg6 = %c0_i32 to %3 step %c1_i32  : i32 {
      %c1_i32_2 = arith.constant 1 : i32
      %4 = arith.muli %arg6, %c1_i32_2 : i32
      %c0_i32_3 = arith.constant 0 : i32
      %5 = arith.addi %c0_i32_3, %4 : i32
      %c0_i32_4 = arith.constant 0 : i32
      %6 = arith.addi %5, %c0_i32_4 : i32
      %c1_i32_5 = arith.constant 1 : i32
      %7 = arith.muli %6, %c1_i32_5 : i32
      %c0_i32_6 = arith.constant 0 : i32
      %8 = arith.addi %7, %c0_i32_6 : i32
      %c0_7 = arith.constant 0 : index
      %9 = arith.index_cast %8 : i32 to index
      %c0_8 = arith.constant 0 : index
      %c0_9 = arith.constant 0 : index
      %10 = vector.load %arg2[%c0_7, %9, %c0_8, %c0_9] : memref<1x5x5x64xbf16, #tpu.memory_space<vmem>>, vector<1x1x2x64xbf16>
      %11 = vector.shape_cast %10 : vector<1x1x2x64xbf16> to vector<2x64xbf16>
      %c0_10 = arith.constant 0 : index
      %c0_11 = arith.constant 0 : index
      %c0_12 = arith.constant 0 : index
      %12 = vector.load %arg3[%c0_10, %c0_11, %c0_12] : memref<16x64x128xbf16, #tpu.memory_space<vmem>>, vector<1x64x128xbf16>
      %13 = vector.shape_cast %12 : vector<1x64x128xbf16> to vector<64x128xbf16>
      %cst = arith.constant dense<0.000000e+00> : vector<2x128xf32>
      %14 = tpu.matmul %11, %13, %cst {dimension_numbers = #tpu.dot_dimension_numbers<[1], [0], [0], [1], [0, 0, 1, 1], [], []>} : vector<2x64xbf16>, vector<64x128xbf16>, vector<2x128xf32> -> vector<2x128xf32>
      %c0_i32_13 = arith.constant 0 : i32
      %15 = arith.addi %5, %c0_i32_13 : i32
      %c1_i32_14 = arith.constant 1 : i32
      %16 = arith.muli %15, %c1_i32_14 : i32
      %c0_i32_15 = arith.constant 0 : i32
      %17 = arith.addi %16, %c0_i32_15 : i32
      %c0_16 = arith.constant 0 : index
      %18 = arith.index_cast %17 : i32 to index
      %c1 = arith.constant 1 : index
      %c0_17 = arith.constant 0 : index
      %19 = vector.load %arg2[%c0_16, %18, %c1, %c0_17] : memref<1x5x5x64xbf16, #tpu.memory_space<vmem>>, vector<1x1x2x64xbf16>
      %20 = vector.shape_cast %19 : vector<1x1x2x64xbf16> to vector<2x64xbf16>
      %c1_18 = arith.constant 1 : index
      %c0_19 = arith.constant 0 : index
      %c0_20 = arith.constant 0 : index
      %21 = vector.load %arg3[%c1_18, %c0_19, %c0_20] : memref<16x64x128xbf16, #tpu.memory_space<vmem>>, vector<1x64x128xbf16>
      %22 = vector.shape_cast %21 : vector<1x64x128xbf16> to vector<64x128xbf16>
      %cst_21 = arith.constant dense<0.000000e+00> : vector<2x128xf32>
      %23 = tpu.matmul %20, %22, %cst_21 {dimension_numbers = #tpu.dot_dimension_numbers<[1], [0], [0], [1], [0, 0, 1, 1], [], []>} : vector<2x64xbf16>, vector<64x128xbf16>, vector<2x128xf32> -> vector<2x128xf32>
      %24 = arith.addf %14, %23 : vector<2x128xf32>
      %c0_i32_22 = arith.constant 0 : i32
      %25 = arith.addi %5, %c0_i32_22 : i32
      %c1_i32_23 = arith.constant 1 : i32
      %26 = arith.muli %25, %c1_i32_23 : i32
      %c0_i32_24 = arith.constant 0 : i32
      %27 = arith.addi %26, %c0_i32_24 : i32
      %c0_25 = arith.constant 0 : index
      %28 = arith.index_cast %27 : i32 to index
      %c2 = arith.constant 2 : index
      %c0_26 = arith.constant 0 : index
      %29 = vector.load %arg2[%c0_25, %28, %c2, %c0_26] : memref<1x5x5x64xbf16, #tpu.memory_space<vmem>>, vector<1x1x2x64xbf16>
      %30 = vector.shape_cast %29 : vector<1x1x2x64xbf16> to vector<2x64xbf16>
      %c2_27 = arith.constant 2 : index
      %c0_28 = arith.constant 0 : index
      %c0_29 = arith.constant 0 : index
      %31 = vector.load %arg3[%c2_27, %c0_28, %c0_29] : memref<16x64x128xbf16, #tpu.memory_space<vmem>>, vector<1x64x128xbf16>
      %32 = vector.shape_cast %31 : vector<1x64x128xbf16> to vector<64x128xbf16>
      %cst_30 = arith.constant dense<0.000000e+00> : vector<2x128xf32>
      %33 = tpu.matmul %30, %32, %cst_30 {dimension_numbers = #tpu.dot_dimension_numbers<[1], [0], [0], [1], [0, 0, 1, 1], [], []>} : vector<2x64xbf16>, vector<64x128xbf16>, vector<2x128xf32> -> vector<2x128xf32>
      %34 = arith.addf %24, %33 : vector<2x128xf32>
      %c0_i32_31 = arith.constant 0 : i32
      %35 = arith.addi %5, %c0_i32_31 : i32
      %c1_i32_32 = arith.constant 1 : i32
      %36 = arith.muli %35, %c1_i32_32 : i32
      %c0_i32_33 = arith.constant 0 : i32
      %37 = arith.addi %36, %c0_i32_33 : i32
      %c0_34 = arith.constant 0 : index
      %38 = arith.index_cast %37 : i32 to index
      %c3 = arith.constant 3 : index
      %c0_35 = arith.constant 0 : index
      %39 = vector.load %arg2[%c0_34, %38, %c3, %c0_35] : memref<1x5x5x64xbf16, #tpu.memory_space<vmem>>, vector<1x1x2x64xbf16>
      %40 = vector.shape_cast %39 : vector<1x1x2x64xbf16> to vector<2x64xbf16>
      %c3_36 = arith.constant 3 : index
      %c0_37 = arith.constant 0 : index
      %c0_38 = arith.constant 0 : index
      %41 = vector.load %arg3[%c3_36, %c0_37, %c0_38] : memref<16x64x128xbf16, #tpu.memory_space<vmem>>, vector<1x64x128xbf16>
      %42 = vector.shape_cast %41 : vector<1x64x128xbf16> to vector<64x128xbf16>
      %cst_39 = arith.constant dense<0.000000e+00> : vector<2x128xf32>
      %43 = tpu.matmul %40, %42, %cst_39 {dimension_numbers = #tpu.dot_dimension_numbers<[1], [0], [0], [1], [0, 0, 1, 1], [], []>} : vector<2x64xbf16>, vector<64x128xbf16>, vector<2x128xf32> -> vector<2x128xf32>
      %44 = arith.addf %34, %43 : vector<2x128xf32>
      %c1_i32_40 = arith.constant 1 : i32
      %45 = arith.addi %5, %c1_i32_40 : i32
      %c1_i32_41 = arith.constant 1 : i32
      %46 = arith.muli %45, %c1_i32_41 : i32
      %c0_i32_42 = arith.constant 0 : i32
      %47 = arith.addi %46, %c0_i32_42 : i32
      %c0_43 = arith.constant 0 : index
      %48 = arith.index_cast %47 : i32 to index
      %c0_44 = arith.constant 0 : index
      %c0_45 = arith.constant 0 : index
      %49 = vector.load %arg2[%c0_43, %48, %c0_44, %c0_45] : memref<1x5x5x64xbf16, #tpu.memory_space<vmem>>, vector<1x1x2x64xbf16>
      %50 = vector.shape_cast %49 : vector<1x1x2x64xbf16> to vector<2x64xbf16>
      %c4 = arith.constant 4 : index
      %c0_46 = arith.constant 0 : index
      %c0_47 = arith.constant 0 : index
      %51 = vector.load %arg3[%c4, %c0_46, %c0_47] : memref<16x64x128xbf16, #tpu.memory_space<vmem>>, vector<1x64x128xbf16>
      %52 = vector.shape_cast %51 : vector<1x64x128xbf16> to vector<64x128xbf16>
      %cst_48 = arith.constant dense<0.000000e+00> : vector<2x128xf32>
      %53 = tpu.matmul %50, %52, %cst_48 {dimension_numbers = #tpu.dot_dimension_numbers<[1], [0], [0], [1], [0, 0, 1, 1], [], []>} : vector<2x64xbf16>, vector<64x128xbf16>, vector<2x128xf32> -> vector<2x128xf32>
      %54 = arith.addf %44, %53 : vector<2x128xf32>
      %c1_i32_49 = arith.constant 1 : i32
      %55 = arith.addi %5, %c1_i32_49 : i32
      %c1_i32_50 = arith.constant 1 : i32
      %56 = arith.muli %55, %c1_i32_50 : i32
      %c0_i32_51 = arith.constant 0 : i32
      %57 = arith.addi %56, %c0_i32_51 : i32
      %c0_52 = arith.constant 0 : index
      %58 = arith.index_cast %57 : i32 to index
      %c1_53 = arith.constant 1 : index
      %c0_54 = arith.constant 0 : index
      %59 = vector.load %arg2[%c0_52, %58, %c1_53, %c0_54] : memref<1x5x5x64xbf16, #tpu.memory_space<vmem>>, vector<1x1x2x64xbf16>
      %60 = vector.shape_cast %59 : vector<1x1x2x64xbf16> to vector<2x64xbf16>
      %c5 = arith.constant 5 : index
      %c0_55 = arith.constant 0 : index
      %c0_56 = arith.constant 0 : index
      %61 = vector.load %arg3[%c5, %c0_55, %c0_56] : memref<16x64x128xbf16, #tpu.memory_space<vmem>>, vector<1x64x128xbf16>
      %62 = vector.shape_cast %61 : vector<1x64x128xbf16> to vector<64x128xbf16>
      %cst_57 = arith.constant dense<0.000000e+00> : vector<2x128xf32>
      %63 = tpu.matmul %60, %62, %cst_57 {dimension_numbers = #tpu.dot_dimension_numbers<[1], [0], [0], [1], [0, 0, 1, 1], [], []>} : vector<2x64xbf16>, vector<64x128xbf16>, vector<2x128xf32> -> vector<2x128xf32>
      %64 = arith.addf %54, %63 : vector<2x128xf32>
      %c1_i32_58 = arith.constant 1 : i32
      %65 = arith.addi %5, %c1_i32_58 : i32
      %c1_i32_59 = arith.constant 1 : i32
      %66 = arith.muli %65, %c1_i32_59 : i32
      %c0_i32_60 = arith.constant 0 : i32
      %67 = arith.addi %66, %c0_i32_60 : i32
      %c0_61 = arith.constant 0 : index
      %68 = arith.index_cast %67 : i32 to index
      %c2_62 = arith.constant 2 : index
      %c0_63 = arith.constant 0 : index
      %69 = vector.load %arg2[%c0_61, %68, %c2_62, %c0_63] : memref<1x5x5x64xbf16, #tpu.memory_space<vmem>>, vector<1x1x2x64xbf16>
      %70 = vector.shape_cast %69 : vector<1x1x2x64xbf16> to vector<2x64xbf16>
      %c6 = arith.constant 6 : index
      %c0_64 = arith.constant 0 : index
      %c0_65 = arith.constant 0 : index
      %71 = vector.load %arg3[%c6, %c0_64, %c0_65] : memref<16x64x128xbf16, #tpu.memory_space<vmem>>, vector<1x64x128xbf16>
      %72 = vector.shape_cast %71 : vector<1x64x128xbf16> to vector<64x128xbf16>
      %cst_66 = arith.constant dense<0.000000e+00> : vector<2x128xf32>
      %73 = tpu.matmul %70, %72, %cst_66 {dimension_numbers = #tpu.dot_dimension_numbers<[1], [0], [0], [1], [0, 0, 1, 1], [], []>} : vector<2x64xbf16>, vector<64x128xbf16>, vector<2x128xf32> -> vector<2x128xf32>
      %74 = arith.addf %64, %73 : vector<2x128xf32>
      %c1_i32_67 = arith.constant 1 : i32
      %75 = arith.addi %5, %c1_i32_67 : i32
      %c1_i32_68 = arith.constant 1 : i32
      %76 = arith.muli %75, %c1_i32_68 : i32
      %c0_i32_69 = arith.constant 0 : i32
      %77 = arith.addi %76, %c0_i32_69 : i32
      %c0_70 = arith.constant 0 : index
      %78 = arith.index_cast %77 : i32 to index
      %c3_71 = arith.constant 3 : index
      %c0_72 = arith.constant 0 : index
      %79 = vector.load %arg2[%c0_70, %78, %c3_71, %c0_72] : memref<1x5x5x64xbf16, #tpu.memory_space<vmem>>, vector<1x1x2x64xbf16>
      %80 = vector.shape_cast %79 : vector<1x1x2x64xbf16> to vector<2x64xbf16>
      %c7 = arith.constant 7 : index
      %c0_73 = arith.constant 0 : index
      %c0_74 = arith.constant 0 : index
      %81 = vector.load %arg3[%c7, %c0_73, %c0_74] : memref<16x64x128xbf16, #tpu.memory_space<vmem>>, vector<1x64x128xbf16>
      %82 = vector.shape_cast %81 : vector<1x64x128xbf16> to vector<64x128xbf16>
      %cst_75 = arith.constant dense<0.000000e+00> : vector<2x128xf32>
      %83 = tpu.matmul %80, %82, %cst_75 {dimension_numbers = #tpu.dot_dimension_numbers<[1], [0], [0], [1], [0, 0, 1, 1], [], []>} : vector<2x64xbf16>, vector<64x128xbf16>, vector<2x128xf32> -> vector<2x128xf32>
      %84 = arith.addf %74, %83 : vector<2x128xf32>
      %c2_i32_76 = arith.constant 2 : i32
      %85 = arith.addi %5, %c2_i32_76 : i32
      %c1_i32_77 = arith.constant 1 : i32
      %86 = arith.muli %85, %c1_i32_77 : i32
      %c0_i32_78 = arith.constant 0 : i32
      %87 = arith.addi %86, %c0_i32_78 : i32
      %c0_79 = arith.constant 0 : index
      %88 = arith.index_cast %87 : i32 to index
      %c0_80 = arith.constant 0 : index
      %c0_81 = arith.constant 0 : index
      %89 = vector.load %arg2[%c0_79, %88, %c0_80, %c0_81] : memref<1x5x5x64xbf16, #tpu.memory_space<vmem>>, vector<1x1x2x64xbf16>
      %90 = vector.shape_cast %89 : vector<1x1x2x64xbf16> to vector<2x64xbf16>
      %c8 = arith.constant 8 : index
      %c0_82 = arith.constant 0 : index
      %c0_83 = arith.constant 0 : index
      %91 = vector.load %arg3[%c8, %c0_82, %c0_83] : memref<16x64x128xbf16, #tpu.memory_space<vmem>>, vector<1x64x128xbf16>
      %92 = vector.shape_cast %91 : vector<1x64x128xbf16> to vector<64x128xbf16>
      %cst_84 = arith.constant dense<0.000000e+00> : vector<2x128xf32>
      %93 = tpu.matmul %90, %92, %cst_84 {dimension_numbers = #tpu.dot_dimension_numbers<[1], [0], [0], [1], [0, 0, 1, 1], [], []>} : vector<2x64xbf16>, vector<64x128xbf16>, vector<2x128xf32> -> vector<2x128xf32>
      %94 = arith.addf %84, %93 : vector<2x128xf32>
      %c2_i32_85 = arith.constant 2 : i32
      %95 = arith.addi %5, %c2_i32_85 : i32
      %c1_i32_86 = arith.constant 1 : i32
      %96 = arith.muli %95, %c1_i32_86 : i32
      %c0_i32_87 = arith.constant 0 : i32
      %97 = arith.addi %96, %c0_i32_87 : i32
      %c0_88 = arith.constant 0 : index
      %98 = arith.index_cast %97 : i32 to index
      %c1_89 = arith.constant 1 : index
      %c0_90 = arith.constant 0 : index
      %99 = vector.load %arg2[%c0_88, %98, %c1_89, %c0_90] : memref<1x5x5x64xbf16, #tpu.memory_space<vmem>>, vector<1x1x2x64xbf16>
      %100 = vector.shape_cast %99 : vector<1x1x2x64xbf16> to vector<2x64xbf16>
      %c9 = arith.constant 9 : index
      %c0_91 = arith.constant 0 : index
      %c0_92 = arith.constant 0 : index
      %101 = vector.load %arg3[%c9, %c0_91, %c0_92] : memref<16x64x128xbf16, #tpu.memory_space<vmem>>, vector<1x64x128xbf16>
      %102 = vector.shape_cast %101 : vector<1x64x128xbf16> to vector<64x128xbf16>
      %cst_93 = arith.constant dense<0.000000e+00> : vector<2x128xf32>
      %103 = tpu.matmul %100, %102, %cst_93 {dimension_numbers = #tpu.dot_dimension_numbers<[1], [0], [0], [1], [0, 0, 1, 1], [], []>} : vector<2x64xbf16>, vector<64x128xbf16>, vector<2x128xf32> -> vector<2x128xf32>
      %104 = arith.addf %94, %103 : vector<2x128xf32>
      %c2_i32_94 = arith.constant 2 : i32
      %105 = arith.addi %5, %c2_i32_94 : i32
      %c1_i32_95 = arith.constant 1 : i32
      %106 = arith.muli %105, %c1_i32_95 : i32
      %c0_i32_96 = arith.constant 0 : i32
      %107 = arith.addi %106, %c0_i32_96 : i32
      %c0_97 = arith.constant 0 : index
      %108 = arith.index_cast %107 : i32 to index
      %c2_98 = arith.constant 2 : index
      %c0_99 = arith.constant 0 : index
      %109 = vector.load %arg2[%c0_97, %108, %c2_98, %c0_99] : memref<1x5x5x64xbf16, #tpu.memory_space<vmem>>, vector<1x1x2x64xbf16>
      %110 = vector.shape_cast %109 : vector<1x1x2x64xbf16> to vector<2x64xbf16>
      %c10 = arith.constant 10 : index
      %c0_100 = arith.constant 0 : index
      %c0_101 = arith.constant 0 : index
      %111 = vector.load %arg3[%c10, %c0_100, %c0_101] : memref<16x64x128xbf16, #tpu.memory_space<vmem>>, vector<1x64x128xbf16>
      %112 = vector.shape_cast %111 : vector<1x64x128xbf16> to vector<64x128xbf16>
      %cst_102 = arith.constant dense<0.000000e+00> : vector<2x128xf32>
      %113 = tpu.matmul %110, %112, %cst_102 {dimension_numbers = #tpu.dot_dimension_numbers<[1], [0], [0], [1], [0, 0, 1, 1], [], []>} : vector<2x64xbf16>, vector<64x128xbf16>, vector<2x128xf32> -> vector<2x128xf32>
      %114 = arith.addf %104, %113 : vector<2x128xf32>
      %c2_i32_103 = arith.constant 2 : i32
      %115 = arith.addi %5, %c2_i32_103 : i32
      %c1_i32_104 = arith.constant 1 : i32
      %116 = arith.muli %115, %c1_i32_104 : i32
      %c0_i32_105 = arith.constant 0 : i32
      %117 = arith.addi %116, %c0_i32_105 : i32
      %c0_106 = arith.constant 0 : index
      %118 = arith.index_cast %117 : i32 to index
      %c3_107 = arith.constant 3 : index
      %c0_108 = arith.constant 0 : index
      %119 = vector.load %arg2[%c0_106, %118, %c3_107, %c0_108] : memref<1x5x5x64xbf16, #tpu.memory_space<vmem>>, vector<1x1x2x64xbf16>
      %120 = vector.shape_cast %119 : vector<1x1x2x64xbf16> to vector<2x64xbf16>
      %c11 = arith.constant 11 : index
      %c0_109 = arith.constant 0 : index
      %c0_110 = arith.constant 0 : index
      %121 = vector.load %arg3[%c11, %c0_109, %c0_110] : memref<16x64x128xbf16, #tpu.memory_space<vmem>>, vector<1x64x128xbf16>
      %122 = vector.shape_cast %121 : vector<1x64x128xbf16> to vector<64x128xbf16>
      %cst_111 = arith.constant dense<0.000000e+00> : vector<2x128xf32>
      %123 = tpu.matmul %120, %122, %cst_111 {dimension_numbers = #tpu.dot_dimension_numbers<[1], [0], [0], [1], [0, 0, 1, 1], [], []>} : vector<2x64xbf16>, vector<64x128xbf16>, vector<2x128xf32> -> vector<2x128xf32>
      %124 = arith.addf %114, %123 : vector<2x128xf32>
      %c3_i32 = arith.constant 3 : i32
      %125 = arith.addi %5, %c3_i32 : i32
      %c1_i32_112 = arith.constant 1 : i32
      %126 = arith.muli %125, %c1_i32_112 : i32
      %c0_i32_113 = arith.constant 0 : i32
      %127 = arith.addi %126, %c0_i32_113 : i32
      %c0_114 = arith.constant 0 : index
      %128 = arith.index_cast %127 : i32 to index
      %c0_115 = arith.constant 0 : index
      %c0_116 = arith.constant 0 : index
      %129 = vector.load %arg2[%c0_114, %128, %c0_115, %c0_116] : memref<1x5x5x64xbf16, #tpu.memory_space<vmem>>, vector<1x1x2x64xbf16>
      %130 = vector.shape_cast %129 : vector<1x1x2x64xbf16> to vector<2x64xbf16>
      %c12 = arith.constant 12 : index
      %c0_117 = arith.constant 0 : index
      %c0_118 = arith.constant 0 : index
      %131 = vector.load %arg3[%c12, %c0_117, %c0_118] : memref<16x64x128xbf16, #tpu.memory_space<vmem>>, vector<1x64x128xbf16>
      %132 = vector.shape_cast %131 : vector<1x64x128xbf16> to vector<64x128xbf16>
      %cst_119 = arith.constant dense<0.000000e+00> : vector<2x128xf32>
      %133 = tpu.matmul %130, %132, %cst_119 {dimension_numbers = #tpu.dot_dimension_numbers<[1], [0], [0], [1], [0, 0, 1, 1], [], []>} : vector<2x64xbf16>, vector<64x128xbf16>, vector<2x128xf32> -> vector<2x128xf32>
      %134 = arith.addf %124, %133 : vector<2x128xf32>
      %c3_i32_120 = arith.constant 3 : i32
      %135 = arith.addi %5, %c3_i32_120 : i32
      %c1_i32_121 = arith.constant 1 : i32
      %136 = arith.muli %135, %c1_i32_121 : i32
      %c0_i32_122 = arith.constant 0 : i32
      %137 = arith.addi %136, %c0_i32_122 : i32
      %c0_123 = arith.constant 0 : index
      %138 = arith.index_cast %137 : i32 to index
      %c1_124 = arith.constant 1 : index
      %c0_125 = arith.constant 0 : index
      %139 = vector.load %arg2[%c0_123, %138, %c1_124, %c0_125] : memref<1x5x5x64xbf16, #tpu.memory_space<vmem>>, vector<1x1x2x64xbf16>
      %140 = vector.shape_cast %139 : vector<1x1x2x64xbf16> to vector<2x64xbf16>
      %c13 = arith.constant 13 : index
      %c0_126 = arith.constant 0 : index
      %c0_127 = arith.constant 0 : index
      %141 = vector.load %arg3[%c13, %c0_126, %c0_127] : memref<16x64x128xbf16, #tpu.memory_space<vmem>>, vector<1x64x128xbf16>
      %142 = vector.shape_cast %141 : vector<1x64x128xbf16> to vector<64x128xbf16>
      %cst_128 = arith.constant dense<0.000000e+00> : vector<2x128xf32>
      %143 = tpu.matmul %140, %142, %cst_128 {dimension_numbers = #tpu.dot_dimension_numbers<[1], [0], [0], [1], [0, 0, 1, 1], [], []>} : vector<2x64xbf16>, vector<64x128xbf16>, vector<2x128xf32> -> vector<2x128xf32>
      %144 = arith.addf %134, %143 : vector<2x128xf32>
      %c3_i32_129 = arith.constant 3 : i32
      %145 = arith.addi %5, %c3_i32_129 : i32
      %c1_i32_130 = arith.constant 1 : i32
      %146 = arith.muli %145, %c1_i32_130 : i32
      %c0_i32_131 = arith.constant 0 : i32
      %147 = arith.addi %146, %c0_i32_131 : i32
      %c0_132 = arith.constant 0 : index
      %148 = arith.index_cast %147 : i32 to index
      %c2_133 = arith.constant 2 : index
      %c0_134 = arith.constant 0 : index
      %149 = vector.load %arg2[%c0_132, %148, %c2_133, %c0_134] : memref<1x5x5x64xbf16, #tpu.memory_space<vmem>>, vector<1x1x2x64xbf16>
      %150 = vector.shape_cast %149 : vector<1x1x2x64xbf16> to vector<2x64xbf16>
      %c14 = arith.constant 14 : index
      %c0_135 = arith.constant 0 : index
      %c0_136 = arith.constant 0 : index
      %151 = vector.load %arg3[%c14, %c0_135, %c0_136] : memref<16x64x128xbf16, #tpu.memory_space<vmem>>, vector<1x64x128xbf16>
      %152 = vector.shape_cast %151 : vector<1x64x128xbf16> to vector<64x128xbf16>
      %cst_137 = arith.constant dense<0.000000e+00> : vector<2x128xf32>
      %153 = tpu.matmul %150, %152, %cst_137 {dimension_numbers = #tpu.dot_dimension_numbers<[1], [0], [0], [1], [0, 0, 1, 1], [], []>} : vector<2x64xbf16>, vector<64x128xbf16>, vector<2x128xf32> -> vector<2x128xf32>
      %154 = arith.addf %144, %153 : vector<2x128xf32>
      %c3_i32_138 = arith.constant 3 : i32
      %155 = arith.addi %5, %c3_i32_138 : i32
      %c1_i32_139 = arith.constant 1 : i32
      %156 = arith.muli %155, %c1_i32_139 : i32
      %c0_i32_140 = arith.constant 0 : i32
      %157 = arith.addi %156, %c0_i32_140 : i32
      %c0_141 = arith.constant 0 : index
      %158 = arith.index_cast %157 : i32 to index
      %c3_142 = arith.constant 3 : index
      %c0_143 = arith.constant 0 : index
      %159 = vector.load %arg2[%c0_141, %158, %c3_142, %c0_143] : memref<1x5x5x64xbf16, #tpu.memory_space<vmem>>, vector<1x1x2x64xbf16>
      %160 = vector.shape_cast %159 : vector<1x1x2x64xbf16> to vector<2x64xbf16>
      %c15 = arith.constant 15 : index
      %c0_144 = arith.constant 0 : index
      %c0_145 = arith.constant 0 : index
      %161 = vector.load %arg3[%c15, %c0_144, %c0_145] : memref<16x64x128xbf16, #tpu.memory_space<vmem>>, vector<1x64x128xbf16>
      %162 = vector.shape_cast %161 : vector<1x64x128xbf16> to vector<64x128xbf16>
      %cst_146 = arith.constant dense<0.000000e+00> : vector<2x128xf32>
      %163 = tpu.matmul %160, %162, %cst_146 {dimension_numbers = #tpu.dot_dimension_numbers<[1], [0], [0], [1], [0, 0, 1, 1], [], []>} : vector<2x64xbf16>, vector<64x128xbf16>, vector<2x128xf32> -> vector<2x128xf32>
      %164 = arith.addf %154, %163 : vector<2x128xf32>
      %165 = arith.addf %164, %2 : vector<2x128xf32>
      %166 = arith.truncf %165 : vector<2x128xf32> to vector<2x128xbf16>
      %c0_147 = arith.constant 0 : index
      %167 = arith.index_cast %5 : i32 to index
      %c0_148 = arith.constant 0 : index
      %c0_149 = arith.constant 0 : index
      %168 = vector.load %arg5[%c0_147, %167, %c0_148, %c0_149] : memref<1x2x2x128xbf16, #tpu.memory_space<vmem>>, vector<1x1x2x128xbf16>
      %169 = vector.shape_cast %168 : vector<1x1x2x128xbf16> to vector<2x128xbf16>
      %170 = vector.shape_cast %166 : vector<2x128xbf16> to vector<1x1x2x128xbf16>
      tpu.vector_store %arg5[%c0_147, %167, %c0_148, %c0_149], %170 {strides = array<i32>} : memref<1x2x2x128xbf16, #tpu.memory_space<vmem>>, vector<1x1x2x128xbf16>,
    }
    %c2_i32_1 = arith.constant 2 : i32
    return
  }
  func.func @transform_0(%arg0: i32, %arg1: i32) -> (i32, i32, i32, i32) {
    %c0_i32 = arith.constant 0 : i32
    %c0_i32_0 = arith.constant 0 : i32
    %c0_i32_1 = arith.constant 0 : i32
    %c0_i32_2 = arith.constant 0 : i32
    return %arg0, %c0_i32, %c0_i32_0, %c0_i32_1 : i32, i32, i32, i32
  }
  func.func @transform_1(%arg0: i32, %arg1: i32) -> (i32, i32, i32) {
    %c0_i32 = arith.constant 0 : i32
    %c0_i32_0 = arith.constant 0 : i32
    %c0_i32_1 = arith.constant 0 : i32
    return %c0_i32, %c0_i32_0, %arg1 : i32, i32, i32
  }
  func.func @transform_2(%arg0: i32, %arg1: i32) -> (i32, i32) {
    %c0_i32 = arith.constant 0 : i32
    %c0_i32_0 = arith.constant 0 : i32
    return %c0_i32, %arg1 : i32, i32
  }
  func.func @transform_3(%arg0: i32, %arg1: i32) -> (i32, i32, i32, i32) {
    %c0_i32 = arith.constant 0 : i32
    %c0_i32_0 = arith.constant 0 : i32
    %c0_i32_1 = arith.constant 0 : i32
    return %arg0, %c0_i32, %c0_i32_0, %arg1 : i32, i32, i32, i32
  }
}

</mosaic_0001>

<bundles_post_ra>
// kernel: _lambda_.5
= control target key start
LH: loop header
LB: loop body
LE: loop exit
PB: predicated region body
PF: predicated region fallthrough
CT: control target
= control target key end

     0   :  { %8 = vsyncpa [#allocation3], 0  ;;  %s2504_s0 = inlined_call_operand.hbm [shape: bf16[2,68,17,6], index: 0, kind: input, shape index: {}]   ;;  %s2505_s1 = inlined_call_operand.hbm [shape: bf16[16,6,128], index: 1, kind: input, shape index: {}]   ;;  %s2506_s2 = inlined_call_operand.hbm [shape: f32[1,128], index: 2, kind: input, shape index: {}]   ;;  %s2507_s3 = inlined_call_operand.hbm [shape: bf16[2,16,16,128], index: 3, kind: output, shape index: {}]  }
   0x1   :  { %10 = vsyncpa [#allocation3 + $0x1], 0 }
   0x2   :  { %11 = vsyncpa [#allocation6], 0 }
   0x3   :  { %12 = vsyncpa [#allocation4], 0 }
   0x4   :  { %14 = vsyncpa [#allocation4 + $0x1], 0  ;;  %s2108_s12 = smov 0   ;;  %s2110_s13 = smov 0  }
   0x5   :  { %s2112_s14 = smov 0   ;;  %s2114_s15 = smov 0  }
   0x6   :  { %s2116_s16 = smov 0   ;;  %s2118_s17 = smov 0  }
   0x7 LB: > { %s1523_s18 = sadd.s32 4294967295, %s2072_s17   ;;  %s1524_s19 = sadd.s32 4294967294, %s2072_s17   ;;  %s2072_s17 = sphi %s2118_s17, %s20_s17   ;;  %s2068_s16 = sphi %s2116_s16, %s2529_s16   ;;  %s2064_s15 = sphi %s2114_s15, %s2528_s15   ;;  %s2060_s14 = sphi %s2112_s14, %s2527_s14   ;;  %s2056_s13 = sphi %s2110_s13, %s2526_s13   ;;  %s2052_s12 = sphi %s2108_s12, %s2525_s12  }
   0x8   : > { %p52_p0 = scmp.ne.s32.totalorder %s2056_s13, %s2052_s12  ;;  %p2142_p1 = scmp.eq.s32.totalorder %s1523_s18, 0 }
   0x9   : > { %p2146_p2 = scmp.eq.s32.totalorder %s1523_s18, 1  ;;  %p136_p3 = scmp.eq.s32.totalorder %s1524_s19, 1 }
   0xa   : > { %s2512_s20 = scalar_select %p2142_p1, 1, 0 }
   0xb   : > { %p2152_p4 = por %p2142_p1, %p52_p0  ;;  %p1525_p5 = scmp.ge.s32.totalorder %s2072_s17, 1 }
   0xc   : > { %p2157_p6 = por %p136_p3, %p52_p0  ;;  %p143_p7 = scmp.lt.s32.totalorder %s2072_s17, 3 }
   0xd   : > { %s2514_s22 = scalar_select %p2152_p4, 1, 0 }
   0xe   : > { %s2515_s23 = scalar_select %p2157_p6, 1, 0 }
   0xf   : > { %p2162_p8 = pnand %p1525_p5, %p143_p7  ;;  %s2078_s25 = smov [#allocation5]  }
  0x10   : > { %s157_s26 = sshll.u32 %s2078_s25, 4  ;;  %s2079_s28 = smov [#allocation7]   ;;  %s2166_s26 = int_to_ptr.vmem [resolvable:$true] %s157_s26 }
  0x11   : > { %p1787_p9 = pneg %p2162_p8  ;;  %s173_s29 = sshll.u32 %s2079_s28, 4  ;;  %s2177_s29 = int_to_ptr.vmem [resolvable:$true] %s173_s29 }
  0x12   : > { %s1896_s5 = scalar_lea.hbm %s2505_s1, 1024 }
  0x13   : > { %p2173_p11 = pnand %p1787_p9, %p2142_p1  ;;  %p1897_p12 = scmp.ne.s32.totalorder %s2505_s1, %s1896_s5 }
  0x14   : > { %p1903_p5 = scmp.lt.u32.totalorder %s1896_s5, %s2505_s1 }
  0x15   : > { %p1898_p13 = pneg %p2173_p11 }
  0x17   : > { %p1899_p0 = pnand %p1898_p13, %p1897_p12 }
  0x19   : > { %p1900_p3 = pneg %p1899_p0 }
  0x1b   : > { %p1905_p7 = pnand %p1903_p5, %p1900_p3 }
  0x1d   : > { %1908 = shalt.err (!%p1905_p7)
}
  0x1e   : > { %s1909_s10 = scalar_lea.vmem %s2166_s26, 1024  ;;  %p1917_p1 = scmp.lt.s32.totalorder %s2166_s26, %s2166_s26 }
  0x1f   : > { %p1910_p9 = scmp.ne.s32.totalorder %s2166_s26, %s1909_s10  ;;  %p1918_p12 = scmp.lt.s32.totalorder %s1909_s10, %s1909_s10 }
  0x21   : > { %p1912_p10 = pnand %p1910_p9, %p1898_p13  ;;  %p1919_p0 = por %p1918_p12, %p1917_p1 }
  0x23   : > { %p1913_p6 = pneg %p1912_p10 }
  0x25   : > { %p1920_p4 = pnand %p1919_p0, %p1913_p6 }
  0x27   : > { %1923 = shalt.err (!%p1920_p4)
}
  0x28   : > { %s2080_s11 = smov 64   ;;  %s2081_s18 = smov 4  }
  0x29   : > { %1790 = dma.hbm_to_vmem [thread:$0]  (!%p2173_p11), %s2505_s1, 1024, %s2166_s26, [#allocation6], %s2080_s11, %s2080_s11, %s2081_s18  }
  0x2a   : > { %s1924_s4 = scalar_lea.hbm %s2506_s2, 16 }
  0x2b   : > { %p1925_p1 = scmp.ne.s32.totalorder %s2506_s2, %s1924_s4  ;;  %p1931_p10 = scmp.lt.u32.totalorder %s1924_s4, %s2506_s2 }
  0x2d   : > { %p1927_p4 = pnand %p1925_p1, %p1898_p13 }
  0x2f   : > { %p1928_p6 = pneg %p1927_p4 }
  0x31   : > { %p1933_p3 = pnand %p1931_p10, %p1928_p6 }
  0x33   : > { %1936 = shalt.err (!%p1933_p3)
}
  0x34   : > { %s1937_s26 = scalar_lea.vmem %s2177_s29, 16  ;;  %s1944_s9 = scalar_lea.vmem %s2177_s29, 32 }
  0x35   : > { %p1938_p5 = scmp.ne.s32.totalorder %s2177_s29, %s1937_s26  ;;  %p1945_p12 = scmp.lt.s32.totalorder %s2177_s29, %s2177_s29 }
  0x36   : > { %p1946_p0 = scmp.lt.s32.totalorder %s1944_s9, %s1937_s26 }
  0x37   : > { %p1940_p7 = pnand %p1938_p5, %p1898_p13 }
  0x38   : > { %p1947_p1 = por %p1946_p0, %p1945_p12 }
  0x39   : > { %p1941_p9 = pneg %p1940_p7 }
  0x3b   : > { %p1948_p4 = pnand %p1947_p1, %p1941_p9 }
  0x3d   : > { %1951 = shalt.err (!%p1948_p4)
}
  0x3e   : > { %1793 = dma.hbm_to_vmem [thread:$0]  (!%p2173_p11), %s2506_s2, 16, %s2177_s29, [#allocation6]  }
  0x3f   : > { %s32_s25 = sadd.s32 1, %s2068_s16  ;;  %s39_s28 = sadd.s32 1, %s2060_s14 }
  0x40   : > { %p34_p13 = scmp.ge.s32.totalorder %s32_s25, 2  ;;  %p46_p6 = scmp.ne.s32.totalorder %s2060_s14, %s2056_s13 }
  0x41   : > { %p47_p10 = scmp.eq.s32.totalorder %s2072_s17, 0  ;;  %p1804_p3 = scmp.lt.s32.totalorder %s2072_s17, 2 }
  0x42   : > { %s2531_s25 = smov (%p34_p13, %s32_s25), 0  ;;  %p2245_p7 = por %p2146_p2, %p46_p6 }
  0x43   : > { %p48_p5 = por %p47_p10, %p46_p6  ;;  %s36_s30 = ssub.s32 %s2068_s16, %s2531_s25 }
  0x44   : > { %s2518_s27 = scalar_select %p2245_p7, 1, 0 }
  0x45   : > { %s184_s4 = sand.u32 1, %s2060_s14   ;;  %p37_p9 = scmp.eq.s32.totalorder %s36_s30, 0 }
  0x46   : > { %s1772_s29 = smul.u32 816, %s184_s4  ;;  %p2252_p11 = pnand %p1804_p3, %p48_p5 }
  0x47   : > { %s2257_s6 = scalar_select %p37_p9, %s2060_s14, %s39_s28  }
  0x48   : > { %s1773_s7 = smul.u32 13056, %s2068_s16  ;;  %s188_s8 = scalar_lea.vmem [#allocation2], %s1772_s29 }
  0x49   : > { %s195_s26 = sshll.u32 %s188_s8, 4  ;;  %s2267_s19 = scalar_lea.sflag [#allocation3], %s184_s4  ;;  %s2265_s26 = int_to_ptr.vmem [resolvable:$true] %s195_s26 }
  0x4a   : > { %s2263_s10 = scalar_lea.hbm %s2504_s0, %s1773_s7  ;;  %p1954_p12 = pneg %p2252_p11 }
  0x4b   : > { %s1952_s30 = scalar_lea.hbm %s2263_s10, 13056  ;;  %s1957_s7 = scalar_lea.hbm %s2504_s0, 26112 }
  0x4c   : > { %p1953_p2 = scmp.ne.s32.totalorder %s2263_s10, %s1952_s30  ;;  %p1958_p4 = scmp.lt.u32.totalorder %s2263_s10, %s2504_s0 }
  0x4d   : > { %p1959_p13 = scmp.lt.u32.totalorder %s1957_s7, %s1952_s30  ;;  %p1961_p10 = scmp.lt.u32.totalorder %s1952_s30, %s2263_s10 }
  0x4e   : > { %p1955_p0 = pnand %p1954_p12, %p1953_p2 }
  0x4f   : > { %p1960_p6 = por %p1959_p13, %p1958_p4 }
  0x50   : > { %p1956_p1 = pneg %p1955_p0 }
  0x51   : > { %p1962_p3 = por %p1961_p10, %p1960_p6 }
  0x53   : > { %p1963_p5 = pnand %p1962_p3, %p1956_p1 }
  0x55   : > { %1966 = shalt.err (!%p1963_p5)
}
  0x56   : > { %s1967_s4 = scalar_lea.vmem %s2265_s26, 13056  ;;  %s2082_s9 = smov [#allocation2]  }
  0x57   : > { %p1968_p9 = scmp.ne.s32.totalorder %s2265_s26, %s1967_s4  ;;  %s1972_s28 = sshll.u32 %s2082_s9, 4  ;;  %s1973_s28 = int_to_ptr.vmem [resolvable:$false] %s1972_s28 }
  0x58   : > { %s1974_s29 = scalar_lea.vmem %s1973_s28, 26112  ;;  %p1975_p7 = scmp.lt.s32.totalorder %s2265_s26, %s1973_s28 }
  0x59   : > { %p1970_p2 = pnand %p1968_p9, %p1954_p12  ;;  %p1976_p4 = scmp.lt.s32.totalorder %s1974_s29, %s1967_s4 }
  0x5b   : > { %p1971_p0 = pneg %p1970_p2  ;;  %p1977_p13 = por %p1976_p4, %p1975_p7 }
  0x5d   : > { %p1978_p6 = pnand %p1977_p13, %p1971_p0 }
  0x5f   : > { %1981 = shalt.err (!%p1978_p6)
}
  0x60   : > { %1797 = dma.hbm_to_vmem [thread:$0]  (!%p2252_p11), %s2263_s10, 13056, %s2265_s26, %s2267_s19, %s2080_s11, %s2080_s11, %s2081_s18  }
  0x61   : > { %207 = sbr.rel (%p2162_p8) target bundleno = 411 (0x19b), region = 32  ;;  %s2301_s30 = sand.u32 (!%p2162_p8), 1, %s2056_s13  }
  0x62   : > { %s1774_s7 = smul.u32 (!%p2162_p8), 816, %s2301_s30  ;;  %s210_s8 = scalar_lea.sflag (!%p2162_p8), [#allocation3], %s2301_s30 }
  0x63   : > { %p2520_p7 = scmp.ne.s32.totalorder (!%p2162_p8), %s2514_s22, 0 }
  0x64   : > { %s2305_s21 = scalar_lea.vmem (!%p2162_p8), [#allocation2], %s1774_s7 }
  0x68   : > { %2039 = dma.done.wait (%p2520_p7), %s210_s8, 13056  }
  0x69   : > { %2041 = vsyncadd (%p2520_p7), %s210_s8, 4294954240  ;;  %p2521_p11 = scmp.ne.s32.totalorder %s2512_s20, 0 }
  0x6b   : > { %2043 = dma.done.wait (%p2521_p11), [#allocation6], 1040  }
  0x6c   : > { %2045 = vsyncadd (%p2521_p11), [#allocation6], 4294966256  ;;  %s1533_s24 = sshll.u32 %s2301_s30, 7  ;;  %v2316_v0 = vld [vmem:[#allocation7] ss:$0 sm:$0xff]  ;;  %s2320_s18 = smov 0  }
  0x6d   : > { %s2318_s11 = scalar_lea.vmem [#allocation8], %s1533_s24 }
  0x6e LB: >> { %v272_v1 = vld [vmem:[#allocation5 + $0x4] sm:$0x7]  ;;  %vm282_vm0 = vcmask 1042432   ;;  %v264_v2 = vld [vmem:[#allocation5] sm:$0x7]  ;;  %v2083_v3 = vmov 0.0   ;;  %s2076_s18 = sphi %s2320_s18, %s257_s18  }
  0x6f   : >> { %1676 = vmatprep.subr.bf16.mxu0 %v2083_v3  ;;  %v284_v4 = vsel %vm282_vm0, %v272_v1, 0  ;;  %1682 = vmatprep.subr.bf16.mxu1 %v2083_v3  ;;  %v336_v5 = vsel %vm282_vm0, %v264_v2, 0  ;;  %s1634_s20 = smul.u32 48, %s2076_s18  ;;  %v383_v6 = vld [vmem:[#allocation5 + $0x8] sm:$0x7]  ;;  %vm2084_vm1 = vmmov 0  }
  0x70   : >> { %1677 = vmatpush3.bf16.msra.mxu0 %v284_v4  ;;  %1683 = vmatpush3.bf16.msra.mxu1 %v336_v5  ;;  %v458_v7 = vld [vmem:[#allocation5 + $0xc] sm:$0x7]  ;;  %vm278_vm2 = vcmask 48128   ;;  %v409_v9 = vsel %vm282_vm0, %v383_v6, 0  ;;  %vm392_vm3 = vsmask.f32 7424 }
  0x71   : >> { %1678 = vmatprep.mubr.msk.bf16.mxu0 %vm2084_vm1, %v2083_v3  ;;  %1684 = vmatprep.mubr.msk.bf16.mxu1 %vm2084_vm1, %v2083_v3  ;;  %s2336_s22 = scalar_lea.vmem %s2305_s21, %s1634_s20 [#allocation2]  ;;  %v483_v11 = vsel %vm282_vm0, %v458_v7, 0  ;;  %v535_v19 = vld [vmem:[#allocation5 + $0x10] sm:$0x7]  ;;  %v597_v22 = vld [vmem:[#allocation5 + $0x14] sm:$0x7]  ;;  %s1637_s5 = sshll.u32 %s2076_s18, 3 }
  0x72   : >> { %1688 = vmatprep.subr.bf16.mxu0 %v2083_v3  ;;  %1694 = vmatprep.subr.bf16.mxu1 %v2083_v3  ;;  %v1872_v8 = vld [vmem:[%s2336_s22 + $0xc] sm:$0xff]   ;;  %v1873_v10 = vld [vmem:[%s2336_s22] sm:$0xff]   ;;  %v1875_v13 = vld [vmem:[%s2336_s22 + $0x8] ss:$0 sps:$4 sm:$0x11]   ;;  %v545_v31 = vsel %vm282_vm0, %v535_v19, 0  ;;  %s1363_s26 = scalar_lea.vmem %s2318_s11, %s1637_s5 [#allocation8] }
  0x73   : >> { %1679 = vmatmul.mubr.msk.bf16.vlgmr.msra.gmra.mrb[0].mxu0 %vm278_vm2, %v1872_v8  ;;  %1685 = vmatmul.mubr.msk.bf16.vlgmr.msra.gmra.mrb[0].mxu1 %vm278_vm2, %v1873_v10  ;;  %v1874_v12 = vld [vmem:[%s2336_s22] sm:$0xff]   ;;  %v1876_v14 = vld [vmem:[%s2336_s22 + $0xc] sm:$0xff]   ;;  %v401_v17 = vshll.u32 %v1875_v13, 16  ;;  %v1877_v18 = vld [vmem:[%s2336_s22 + $0x14] ss:$0 sps:$4 sm:$0x11]  }
  0x74   : >> { %1689 = vmatpush3.bf16.msra.mxu0 %v409_v9  ;;  %1695 = vmatpush3.bf16.msra.mxu1 %v483_v11  ;;  %v394_v15 = vshrl.u32 %v1874_v12, 16  ;;  %v396_v16 = vshll.u32 %v1874_v12, 16  ;;  %v468_v20 = vshrl.u32 %v1876_v14, 16  ;;  %v470_v21 = vshll.u32 %v1876_v14, 16  ;;  %v1880_v29 = vld [vmem:[%s2336_s22 + $0x18] sm:$0xff]   ;;  %v1882_v32 = vld [vmem:[%s2336_s22 + $0x24] sm:$0xff]  }
  0x75   : >> { %1690 = vmatprep.mubr.msk.bf16.mxu0 %vm2084_vm1, %v2083_v3  ;;  %1696 = vmatprep.mubr.msk.bf16.mxu1 %vm2084_vm1, %v2083_v3  ;;  %v403_v24 = vrot.slane %v401_v17, 1  ;;  %v475_v25 = vshll.u32 %v1877_v18, 16  ;;  %v607_v34 = vsel %vm282_vm0, %v597_v22, 0  ;;  %v656_v36 = vld [vmem:[#allocation5 + $0x18] sm:$0x7]  ;;  %v668_v38 = vshll.u32 %v1880_v29, 16 }
  0x76   : >> { %1700 = vmatprep.subr.bf16.mxu0 %v2083_v3  ;;  %1706 = vmatprep.subr.bf16.mxu1 %v2083_v3  ;;  %v398_v23 = vrot.slane %v396_v16, 1  ;;  %v472_v26 = vrot.slane %v470_v21, 1  ;;  %v1881_v37 = vld [vmem:[%s2336_s22 + $0x20] ss:$0 sps:$4 sm:$0x11]   ;;  %v742_v40 = vshll.u32 %v1882_v32, 16 }
  0x77   : >> { %v477_v28 = vrot.slane %v475_v25, 1  ;;  %v1883_v39 = vld [vmem:[%s2336_s22 + $0x2c] ss:$0 sps:$4 sm:$0x11]   ;;  %v730_v41 = vld [vmem:[#allocation5 + $0x1c] sm:$0x7] }
  0x78   : >> { %v399_v27 = vor.u32 %v398_v23, %v394_v15  ;;  %v473_v30 = vor.u32 %v472_v26, %v468_v20  ;;  %v1878_v42 = vld [vmem:[%s2336_s22 + $0x18] sm:$0xff]   ;;  %v1879_v43 = vld [vmem:[%s2336_s22 + $0x24] sm:$0xff]   ;;  %v681_v44 = vsel %vm282_vm0, %v656_v36, 0  ;;  %v666_v45 = vshrl.u32 %v1880_v29, 16  ;;  %v808_v56 = vld [vmem:[#allocation5 + $0x20] sm:$0x7] }
  0x79   : >> { %v670_v46 = vrot.slane %v668_v38, 1  ;;  %v673_v47 = vshll.u32 %v1881_v37, 16  ;;  %v740_v48 = vshrl.u32 %v1882_v32, 16  ;;  %v744_v49 = vrot.slane %v742_v40, 1  ;;  %v870_v57 = vld [vmem:[#allocation5 + $0x24] sm:$0x7] }
  0x7a   : >> { %v404_v33 = vsel %vm392_vm3, %v399_v27, %v403_v24  ;;  %v478_v35 = vsel %vm392_vm3, %v473_v30, %v477_v28  ;;  %v747_v50 = vshll.u32 %v1883_v39, 16  ;;  %v755_v51 = vsel %vm282_vm0, %v730_v41, 0  ;;  %v1886_v59 = vld [vmem:[%s2336_s22 + $0x30] sm:$0xff]   ;;  %v1888_v62 = vld [vmem:[%s2336_s22 + $0x3c] sm:$0xff]   ;;  %v929_v6 = vld [vmem:[#allocation5 + $0x28] sm:$0x7] }
  0x7b   : >> { %1691 = vmatmul.mubr.msk.bf16.vlgmr.msra.gmra.mrb[4].mxu0 %vm278_vm2, %v404_v33  ;;  %1697 = vmatmul.mubr.msk.bf16.vlgmr.msra.gmra.mrb[4].mxu1 %vm278_vm2, %v478_v35  ;;  %v671_v52 = vor.u32 %v670_v46, %v666_v45  ;;  %v675_v53 = vrot.slane %v673_v47, 1  ;;  %v745_v54 = vor.u32 %v744_v49, %v740_v48  ;;  %v818_v61 = vsel %vm282_vm0, %v808_v56, 0  ;;  %v1887_v1 = vld [vmem:[%s2336_s22 + $0x38] ss:$0 sps:$4 sm:$0x11]   ;;  %v1884_v7 = vld [vmem:[%s2336_s22 + $0x30] sm:$0xff]  }
  0x7c   : >> { %1701 = vmatpush3.bf16.msra.mxu0 %v545_v31  ;;  %1707 = vmatpush3.bf16.msra.mxu1 %v607_v34  ;;  %v749_v55 = vrot.slane %v747_v50, 1  ;;  %v880_v63 = vsel %vm282_vm0, %v870_v57, 0  ;;  %v941_v2 = vshll.u32 %v1886_v59, 16  ;;  %v1889_v4 = vld [vmem:[%s2336_s22 + $0x44] ss:$0 sps:$4 sm:$0x11]  }
  0x7d   : >> { %1702 = vmatprep.mubr.msk.bf16.mxu0 %vm2084_vm1, %v2083_v3  ;;  %1708 = vmatprep.mubr.msk.bf16.mxu1 %vm2084_vm1, %v2083_v3  ;;  %v676_v58 = vsel %vm392_vm3, %v671_v52, %v675_v53  ;;  %v1015_v5 = vshll.u32 %v1888_v62, 16  ;;  %v1003_v8 = vld [vmem:[#allocation5 + $0x2c] sm:$0x7]  ;;  %v1885_v9 = vld [vmem:[%s2336_s22 + $0x3c] sm:$0xff]   ;;  %v939_v10 = vshrl.u32 %v1886_v59, 16  ;;  %v946_v12 = vshll.u32 %v1887_v1, 16 }
  0x7e   : >> { %1712 = vmatprep.subr.bf16.mxu0 %v2083_v3  ;;  %1718 = vmatprep.subr.bf16.mxu1 %v2083_v3  ;;  %v750_v60 = vsel %vm392_vm3, %v745_v54, %v749_v55  ;;  %v943_v11 = vrot.slane %v941_v2, 1  ;;  %v954_v13 = vsel %vm282_vm0, %v929_v6, 0  ;;  %v1013_v14 = vshrl.u32 %v1888_v62, 16  ;;  %v1080_v22 = vld [vmem:[#allocation5 + $0x30] sm:$0x7]  ;;  %v1892_v25 = vld [vmem:[%s2336_s22 + $0x48] sm:$0xff]  }
  0x7f   : >> { %v1017_v15 = vrot.slane %v1015_v5, 1  ;;  %v1020_v16 = vshll.u32 %v1889_v4, 16  ;;  %v1028_v17 = vsel %vm282_vm0, %v1003_v8, 0  ;;  %v948_v19 = vrot.slane %v946_v12, 1  ;;  %v1142_v23 = vld [vmem:[#allocation5 + $0x34] sm:$0x7] }
  0x80   : >> { %v944_v18 = vor.u32 %v943_v11, %v939_v10  ;;  %v1090_v27 = vsel %vm282_vm0, %v1080_v22, 0  ;;  %v1894_v28 = vld [vmem:[%s2336_s22 + $0x54] sm:$0xff]   ;;  %v1152_v29 = vsel %vm282_vm0, %v1142_v23, 0  ;;  %v1893_v30 = vld [vmem:[%s2336_s22 + $0x50] ss:$0 sps:$4 sm:$0x11]  }
  0x81   : >> { %v1018_v20 = vor.u32 %v1017_v15, %v1013_v14  ;;  %v1022_v21 = vrot.slane %v1020_v16, 1  ;;  %v1213_v31 = vshll.u32 %v1892_v25, 16  ;;  %v1895_v32 = vld [vmem:[%s2336_s22 + $0x5c] ss:$0 sps:$4 sm:$0x11]   ;;  %v1287_v33 = vshll.u32 %v1894_v28, 16 }
  0x82   : >> { %v949_v24 = vsel %vm392_vm3, %v944_v18, %v948_v19  ;;  %v1201_v34 = vld [vmem:[#allocation5 + $0x38] sm:$0x7]  ;;  %v1890_v35 = vld [vmem:[%s2336_s22 + $0x48] sm:$0xff]   ;;  %v1275_v36 = vld [vmem:[#allocation5 + $0x3c] sm:$0x7]  ;;  %v1211_v38 = vshrl.u32 %v1892_v25, 16 }
  0x83   : >> { %1703 = vmatmul.mubr.msk.bf16.vlgmr.msra.gmra.mrb[8].mxu0 %vm278_vm2, %v1878_v42  ;;  %1709 = vmatmul.mubr.msk.bf16.vlgmr.msra.gmra.mrb[8].mxu1 %vm278_vm2, %v1879_v43  ;;  %v1023_v26 = vsel %vm392_vm3, %v1018_v20, %v1022_v21  ;;  %v1891_v37 = vld [vmem:[%s2336_s22 + $0x54] sm:$0xff]   ;;  %v1215_v39 = vrot.slane %v1213_v31, 1  ;;  %v1218_v40 = vshll.u32 %v1893_v30, 16  ;;  %v1226_v41 = vsel %vm282_vm0, %v1201_v34, 0  ;;  %s257_s18 = sadd.s32 1, %s2076_s18  }
  0x84   : >> { %1713 = vmatpush3.bf16.msra.mxu0 %v681_v44  ;;  %1719 = vmatpush3.bf16.msra.mxu1 %v755_v51  ;;  %v1285_v42 = vshrl.u32 %v1894_v28, 16  ;;  %v1289_v43 = vrot.slane %v1287_v33, 1  ;;  %v1292_v44 = vshll.u32 %v1895_v32, 16  ;;  %v1300_v45 = vsel %vm282_vm0, %v1275_v36, 0  ;;  %p254_p8 = scmp.ge.s32.totalorder %s257_s18, 16  }
  0x85   : >> { %1714 = vmatprep.mubr.msk.bf16.mxu0 %vm2084_vm1, %v2083_v3  ;;  %1720 = vmatprep.mubr.msk.bf16.mxu1 %vm2084_vm1, %v2083_v3  ;;  %v1216_v46 = vor.u32 %v1215_v39, %v1211_v38  ;;  %v1220_v47 = vrot.slane %v1218_v40, 1  ;;  %s1638_s10 = sshll.u32 (%p254_p8), %s2064_s15, 11  ;;  %s1381_s28 = sshll.u32 (%p254_p8), %s2318_s11, 4  ;;  %s2455_s28 = int_to_ptr.vmem [resolvable:$true] %s1381_s28 }
  0x86   : >> { %1724 = vmatprep.subr.bf16.mxu0 %v2083_v3  ;;  %1730 = vmatprep.subr.bf16.mxu1 %v2083_v3  ;;  %v1290_v48 = vor.u32 %v1289_v43, %v1285_v42  ;;  %v1294_v49 = vrot.slane %v1292_v44, 1  ;;  %s2452_s9 = scalar_lea.hbm (%p254_p8), %s2507_s3, %s1638_s10  ;;  %s1367_s29 = scalar_lea.sflag (%p254_p8), [#allocation4], %s2301_s30 }
  0x87   : >> { %v1221_v50 = vsel %vm392_vm3, %v1216_v46, %v1220_v47  ;;  %s1982_s7 = scalar_lea.vmem (%p254_p8), %s2455_s28, 2048  ;;  %p2522_p1 = scmp.ne.s32.totalorder (%p254_p8), %s2518_s27, 0 }
  0x88   : >> { %v1295_v51 = vsel %vm392_vm3, %v1290_v48, %v1294_v49  ;;  %p1983_p12 = scmp.ne.s32.totalorder (%p254_p8), %s2455_s28, %s1982_s7  ;;  %s2085_s8 = smov (%p254_p8), [#allocation8]  }
  0x89   : > { %s1986_s21 = sshll.u32 (%p254_p8), %s2085_s8, 4  ;;  %s1987_s21 = int_to_ptr.vmem [resolvable:$false] %s1986_s21 }
  0x8a   : > { %p1984_p10 = pnand (%p254_p8), %p1983_p12, %p2522_p1  ;;  %s1988_s15 = scalar_lea.vmem (%p254_p8), %s1987_s21, 4096 }
  0x8b   : >> { %1715 = vmatmul.mubr.msk.bf16.vlgmr.msra.gmra.mrb[12].mxu0 %vm278_vm2, %v676_v58  ;;  %1721 = vmatmul.mubr.msk.bf16.vlgmr.msra.gmra.mrb[12].mxu1 %vm278_vm2, %v750_v60  ;;  %p1989_p5 = scmp.lt.s32.totalorder (%p254_p8), %s2455_s28, %s1987_s21  ;;  %p1990_p9 = scmp.lt.s32.totalorder (%p254_p8), %s1988_s15, %s1982_s7 }
  0x8c   : >> { %1725 = vmatpush3.bf16.msra.mxu0 %v818_v61  ;;  %1731 = vmatpush3.bf16.msra.mxu1 %v880_v63  ;;  %p1985_p3 = pneg (%p254_p8), %p1984_p10 }
  0x8d   : >> { %1726 = vmatprep.mubr.msk.bf16.mxu0 %vm2084_vm1, %v2083_v3  ;;  %1732 = vmatprep.mubr.msk.bf16.mxu1 %vm2084_vm1, %v2083_v3  ;;  %p1991_p2 = por (%p254_p8), %p1990_p9, %p1989_p5 }
  0x8e   : >> { %1736 = vmatprep.subr.bf16.mxu0 %v2083_v3  ;;  %1742 = vmatprep.subr.bf16.mxu1 %v2083_v3 }
  0x8f   : > { %p1992_p0 = pnand (%p254_p8), %p1991_p2, %p1985_p3 }
  0x93   : >> { %1727 = vmatmul.mubr.msk.bf16.vlgmr.msra.gmra.mrb[16].mxu0 %vm278_vm2, %v1884_v7  ;;  %1733 = vmatmul.mubr.msk.bf16.vlgmr.msra.gmra.mrb[16].mxu1 %vm278_vm2, %v1885_v9 }
  0x94   : >> { %1737 = vmatpush3.bf16.msra.mxu0 %v954_v13  ;;  %1743 = vmatpush3.bf16.msra.mxu1 %v1028_v17 }
  0x95   : >> { %1738 = vmatprep.mubr.msk.bf16.mxu0 %vm2084_vm1, %v2083_v3  ;;  %1744 = vmatprep.mubr.msk.bf16.mxu1 %vm2084_vm1, %v2083_v3 }
  0x96   : >> { %1748 = vmatprep.subr.bf16.mxu0 %v2083_v3  ;;  %1754 = vmatprep.subr.bf16.mxu1 %v2083_v3 }
  0x9b   : >> { %1739 = vmatmul.mubr.msk.bf16.vlgmr.msra.gmra.mrb[20].mxu0 %vm278_vm2, %v949_v24  ;;  %1745 = vmatmul.mubr.msk.bf16.vlgmr.msra.gmra.mrb[20].mxu1 %vm278_vm2, %v1023_v26 }
  0x9c   : >> { %1749 = vmatpush3.bf16.msra.mxu0 %v1090_v27  ;;  %1755 = vmatpush3.bf16.msra.mxu1 %v1152_v29 }
  0x9d   : >> { %1750 = vmatprep.mubr.msk.bf16.mxu0 %vm2084_vm1, %v2083_v3  ;;  %1756 = vmatprep.mubr.msk.bf16.mxu1 %vm2084_vm1, %v2083_v3 }
  0x9e   : >> { %1760 = vmatprep.subr.bf16.mxu0 %v2083_v3  ;;  %1766 = vmatprep.subr.bf16.mxu1 %v2083_v3 }
  0xa3   : >> { %1751 = vmatmul.mubr.msk.bf16.vlgmr.msra.gmra.mrb[24].mxu0 %vm278_vm2, %v1890_v35  ;;  %1757 = vmatmul.mubr.msk.bf16.vlgmr.msra.gmra.mrb[24].mxu1 %vm278_vm2, %v1891_v37 }
  0xa4   : >> { %1761 = vmatpush3.bf16.msra.mxu0 %v1226_v41  ;;  %1767 = vmatpush3.bf16.msra.mxu1 %v1300_v45 }
  0xa5   : >> { %1762 = vmatprep.mubr.msk.bf16.mxu0 %vm2084_vm1, %v2083_v3  ;;  %1768 = vmatprep.mubr.msk.bf16.mxu1 %vm2084_vm1, %v2083_v3 }
  0xab   : >> { %1763 = vmatmul.mubr.msk.bf16.vlgmr.msra.gmra.mrb[28].mxu0 %vm278_vm2, %v1221_v50  ;;  %1769 = vmatmul.mubr.msk.bf16.vlgmr.msra.gmra.mrb[28].mxu1 %vm278_vm2, %v1295_v51 }
 0x146   : >> { %v320_v52 = vpop.f32.mrb[0].mxu0  ;;  %v372_v53 = vpop.f32.mrb[0].mxu1 }
 0x147   : >> { %v1680_v54 = vpop.f32.mrb[1].mxu0  ;;  %v373_v55 = vadd.f32 %v372_v53, %v320_v52  ;;  %v1686_v56 = vpop.f32.mrb[1].mxu1 }
 0x148   : >> { %v323_v57 = vpop.f32.mrb[2].mxu0  ;;  %v375_v58 = vpop.f32.mrb[2].mxu1 }
 0x149   : >> { %v1681_v59 = vpop.f32.mrb[3].mxu0  ;;  %v376_v60 = vadd.f32 %v375_v58, %v323_v57  ;;  %v1687_v61 = vpop.f32.mrb[3].mxu1 }
 0x14e   : >> { %v445_v62 = vpop.f32.mrb[4].mxu0  ;;  %v519_v63 = vpop.f32.mrb[4].mxu1 }
 0x14f   : >> { %v452_v3 = vadd.f32 %v445_v62, %v373_v55  ;;  %v1692_v1 = vpop.f32.mrb[5].mxu0  ;;  %v1698_v2 = vpop.f32.mrb[5].mxu1 }
 0x150   : >> { %v448_v4 = vpop.f32.mrb[6].mxu0  ;;  %v522_v7 = vpop.f32.mrb[6].mxu1 }
 0x151   : >> { %v526_v5 = vadd.f32 %v519_v63, %v452_v3  ;;  %v453_v6 = vadd.f32 %v448_v4, %v376_v60  ;;  %v1693_v8 = vpop.f32.mrb[7].mxu0  ;;  %v1699_v9 = vpop.f32.mrb[7].mxu1 }
 0x153   : >> { %v527_v10 = vadd.f32 %v522_v7, %v453_v6 }
 0x156   : >> { %v581_v11 = vpop.f32.mrb[8].mxu0  ;;  %v643_v13 = vpop.f32.mrb[8].mxu1 }
 0x157   : >> { %v588_v12 = vadd.f32 %v581_v11, %v526_v5  ;;  %v1704_v14 = vpop.f32.mrb[9].mxu0  ;;  %v1710_v15 = vpop.f32.mrb[9].mxu1 }
 0x158   : >> { %v584_v16 = vpop.f32.mrb[10].mxu0  ;;  %v646_v19 = vpop.f32.mrb[10].mxu1 }
 0x159   : >> { %v650_v17 = vadd.f32 %v643_v13, %v588_v12  ;;  %v589_v18 = vadd.f32 %v584_v16, %v527_v10  ;;  %v1705_v20 = vpop.f32.mrb[11].mxu0  ;;  %v1711_v21 = vpop.f32.mrb[11].mxu1 }
 0x15b   : >> { %v651_v22 = vadd.f32 %v646_v19, %v589_v18 }
 0x15e   : >> { %v717_v23 = vpop.f32.mrb[12].mxu0  ;;  %v791_v25 = vpop.f32.mrb[12].mxu1 }
 0x15f   : >> { %v724_v24 = vadd.f32 %v717_v23, %v650_v17  ;;  %v1716_v26 = vpop.f32.mrb[13].mxu0  ;;  %v1722_v27 = vpop.f32.mrb[13].mxu1 }
 0x160   : >> { %v720_v28 = vpop.f32.mrb[14].mxu0  ;;  %v794_v31 = vpop.f32.mrb[14].mxu1 }
 0x161   : >> { %v798_v29 = vadd.f32 %v791_v25, %v724_v24  ;;  %v725_v30 = vadd.f32 %v720_v28, %v651_v22  ;;  %v1717_v32 = vpop.f32.mrb[15].mxu0  ;;  %v1723_v33 = vpop.f32.mrb[15].mxu1 }
 0x163   : >> { %v799_v34 = vadd.f32 %v794_v31, %v725_v30 }
 0x166   : >> { %v854_v35 = vpop.f32.mrb[16].mxu0  ;;  %v916_v37 = vpop.f32.mrb[16].mxu1 }
 0x167   : >> { %v861_v36 = vadd.f32 %v854_v35, %v798_v29  ;;  %v1728_v38 = vpop.f32.mrb[17].mxu0  ;;  %v1734_v39 = vpop.f32.mrb[17].mxu1 }
 0x168   : >> { %v857_v40 = vpop.f32.mrb[18].mxu0  ;;  %v919_v43 = vpop.f32.mrb[18].mxu1 }
 0x169   : >> { %v923_v41 = vadd.f32 %v916_v37, %v861_v36  ;;  %v862_v42 = vadd.f32 %v857_v40, %v799_v34  ;;  %v1729_v44 = vpop.f32.mrb[19].mxu0  ;;  %v1735_v45 = vpop.f32.mrb[19].mxu1 }
 0x16b   : >> { %v924_v46 = vadd.f32 %v919_v43, %v862_v42 }
 0x16e   : >> { %v990_v47 = vpop.f32.mrb[20].mxu0  ;;  %v1064_v49 = vpop.f32.mrb[20].mxu1 }
 0x16f   : >> { %v997_v48 = vadd.f32 %v990_v47, %v923_v41  ;;  %v1740_v50 = vpop.f32.mrb[21].mxu0  ;;  %v1746_v51 = vpop.f32.mrb[21].mxu1 }
 0x170   : >> { %v993_v52 = vpop.f32.mrb[22].mxu0  ;;  %v1067_v55 = vpop.f32.mrb[22].mxu1 }
 0x171   : >> { %v1071_v53 = vadd.f32 %v1064_v49, %v997_v48  ;;  %v998_v54 = vadd.f32 %v993_v52, %v924_v46  ;;  %v1741_v56 = vpop.f32.mrb[23].mxu0  ;;  %v1747_v57 = vpop.f32.mrb[23].mxu1 }
 0x173   : >> { %v1072_v58 = vadd.f32 %v1067_v55, %v998_v54 }
 0x176   : >> { %v1126_v59 = vpop.f32.mrb[24].mxu0  ;;  %v1188_v61 = vpop.f32.mrb[24].mxu1 }
 0x177   : >> { %v1133_v60 = vadd.f32 %v1126_v59, %v1071_v53  ;;  %v1752_v62 = vpop.f32.mrb[25].mxu0  ;;  %v1758_v3 = vpop.f32.mrb[25].mxu1 }
 0x178   : >> { %v1129_v63 = vpop.f32.mrb[26].mxu0  ;;  %v1191_v4 = vpop.f32.mrb[26].mxu1 }
 0x179   : >> { %v1195_v1 = vadd.f32 %v1188_v61, %v1133_v60  ;;  %v1134_v2 = vadd.f32 %v1129_v63, %v1072_v58  ;;  %v1753_v5 = vpop.f32.mrb[27].mxu0  ;;  %v1759_v6 = vpop.f32.mrb[27].mxu1 }
 0x17b   : >> { %v1196_v7 = vadd.f32 %v1191_v4, %v1134_v2 }
 0x17e   : >> { %v1262_v8 = vpop.f32.mrb[28].mxu0  ;;  %v1336_v10 = vpop.f32.mrb[28].mxu1 }
 0x17f   : >> { %v1269_v9 = vadd.f32 %v1262_v8, %v1195_v1  ;;  %v1764_v11 = vpop.f32.mrb[29].mxu0  ;;  %v1770_v12 = vpop.f32.mrb[29].mxu1 }
 0x180   : >> { %v1265_v13 = vpop.f32.mrb[30].mxu0  ;;  %v1339_v16 = vpop.f32.mrb[30].mxu1 }
 0x181   : >> { %v1343_v14 = vadd.f32 %v1336_v10, %v1269_v9  ;;  %v1270_v15 = vadd.f32 %v1265_v13, %v1196_v7  ;;  %v1765_v17 = vpop.f32.mrb[31].mxu0  ;;  %v1771_v18 = vpop.f32.mrb[31].mxu1 }
 0x183   : >> { %v1345_v19 = vadd.f32 %v2316_v0, %v1343_v14  ;;  %v1344_v20 = vadd.f32 %v1339_v16, %v1270_v15 }
 0x185   : >> { %v1349_v21 = vmul.f32 0.2, %v1345_v19  ;;  %v1346_v22 = vadd.f32 %v2316_v0, %v1344_v20  ;;  %vm1347_vm4 = vcmp.ge.f32.partialorder %v1345_v19, 0.0 }
 0x186   : > { %256 = sbr.rel (!%p254_p8) target bundleno = 110 (0x6e), region = 118 }
 0x187   : >> { %vm1348_vm5 = vcmp.ge.f32.partialorder %v1346_v22, 0.0  ;;  %v1350_v23 = vmul.f32 0.2, %v1346_v22  ;;  %v1351_v24 = vsel %vm1347_vm4, %v1345_v19, %v1349_v21 }
 0x189   : >> { %v1352_v25 = vsel %vm1348_vm5, %v1346_v22, %v1350_v23 }
 0x18a   : >> { %v1642_v26 = vpack.c.bf16 %v1352_v25, %v1351_v24 }
 0x18c   : >> { %1643 = vst [vmem:[%s1363_s26] sm:$0xff] %v1642_v26  }
 0x18d   : > { %1995 = shalt.err (!%p1992_p0)
}
 0x18e   : > { %s1996_s24 = scalar_lea.hbm %s2452_s9, 2048  ;;  %s2000_s20 = scalar_lea.hbm %s2507_s3, 4096 }
 0x18f   : > { %p1997_p4 = scmp.ne.s32.totalorder %s2452_s9, %s1996_s24  ;;  %p2001_p7 = scmp.lt.u32.totalorder %s2452_s9, %s2507_s3 }
 0x190   : > { %p2002_p11 = scmp.lt.u32.totalorder %s2000_s20, %s1996_s24  ;;  %p2004_p12 = scmp.lt.u32.totalorder %s1996_s24, %s2452_s9 }
 0x191   : > { %p1998_p13 = pnand %p1997_p4, %p2522_p1 }
 0x192   : > { %p2003_p8 = por %p2002_p11, %p2001_p7 }
 0x193   : > { %p1999_p6 = pneg %p1998_p13 }
 0x194   : > { %p2005_p10 = por %p2004_p12, %p2003_p8 }
 0x196   : > { %p2006_p3 = pnand %p2005_p10, %p1999_p6 }
 0x198   : > { %2009 = shalt.err (!%p2006_p3)
}
 0x199   : > { %s2086_s26 = smov 64   ;;  %s2087_s10 = smov 4  }
 0x19a   : > { %1785 = dma.vmem_to_hbm [thread:$0]  (%p2522_p1), %s2455_s28, 2048, %s2452_s9, %s1367_s29, %s2086_s26, %s2086_s26, %s2087_s10  }
 0x19b PF: > { %s1396_s19 = sand.u32 1, %s2052_s12   ;;  %p2523_p5 = scmp.ne.s32.totalorder %s2515_s23, 0 }
 0x19c   : > { %p2524_p9 = scmp.ge.s32.totalorder %s2072_s17, 2  ;;  %s1397_s4 = scalar_lea.sflag [#allocation4], %s1396_s19 }
 0x19e   : > { %p1799_p2 = pnand %p2524_p9, %p2523_p5 }
 0x1a0   : > { %2047 = dma.done.wait (!%p1799_p2), %s1397_s4, 2048  }
 0x1a1   : > { %2049 = vsyncadd (!%p1799_p2), %s1397_s4, 4294965248  ;;  %s20_s17 = sadd.s32 1, %s2072_s17   ;;  %s2525_s12 = smov %s2056_s13 }
 0x1a2   : > { %p17_p0 = scmp.ge.s32.totalorder %s20_s17, 4   ;;  %s2526_s13 = smov %s2060_s14 }
 0x1a3   : > { %s2527_s14 = smov %s2257_s6  ;;  %s2528_s15 = smov %s2068_s16 }
 0x1a4   : > { %s2529_s16 = smov %s2531_s25  ;;  %19 = sbr.rel (!%p17_p0) target bundleno = 7 (0x7), region = 129 }
 0x1ab   :  { %1402 = vsyncpa [#allocation3], 1 }
 0x1ac   :  { %1404 = vsyncpa [#allocation3 + $0x1], 1 }
 0x1ad   :  { %1405 = vsyncpa [#allocation6], 1 }
 0x1ae   :  { %1406 = vsyncpa [#allocation4], 1 }
 0x1af   :  { %1408 = vsyncpa [#allocation4 + $0x1], 1 }

// kernel: _lambda_.6
= control target key start
LH: loop header
LB: loop body
LE: loop exit
PB: predicated region body
PF: predicated region fallthrough
CT: control target
= control target key end

     0   :  { %7 = vsyncpa [#allocation6], 0  ;;  %s2262_s0 = inlined_call_operand.hbm [shape: bf16[2,36,9,8], index: 0, kind: input, shape index: {}]   ;;  %s2263_s1 = inlined_call_operand.hbm [shape: bf16[16,8,128], index: 1, kind: input, shape index: {}]   ;;  %s2264_s2 = inlined_call_operand.hbm [shape: bf16[2,8,8,128], index: 2, kind: output, shape index: {}]  }
   0x1   :  { %9 = vsyncpa [#allocation6 + $0x1], 0 }
   0x2   :  { %10 = vsyncpa [#allocation9], 0 }
   0x3   :  { %11 = vsyncpa [#allocation7], 0 }
   0x4   :  { %13 = vsyncpa [#allocation7 + $0x1], 0  ;;  %s1927_s9 = smov 0   ;;  %s1929_s10 = smov 0  }
   0x5   :  { %s1931_s11 = smov 0   ;;  %s1933_s12 = smov 0  }
   0x6   :  { %s1935_s13 = smov 0   ;;  %s1937_s14 = smov 0  }
   0x7 LB: > { %s1359_s15 = sadd.s32 4294967295, %s1892_s14   ;;  %s1360_s16 = sadd.s32 4294967294, %s1892_s14   ;;  %s1892_s14 = sphi %s1937_s14, %s19_s14   ;;  %s1888_s13 = sphi %s1935_s13, %s2287_s13   ;;  %s1884_s12 = sphi %s1933_s12, %s2286_s12   ;;  %s1880_s11 = sphi %s1931_s11, %s2285_s11   ;;  %s1876_s10 = sphi %s1929_s10, %s2284_s10   ;;  %s1872_s9 = sphi %s1927_s9, %s2283_s9  }
   0x8   : > { %p51_p0 = scmp.ne.s32.totalorder %s1876_s10, %s1872_s9  ;;  %p1961_p1 = scmp.eq.s32.totalorder %s1359_s15, 0 }
   0x9   : > { %p1965_p2 = scmp.eq.s32.totalorder %s1359_s15, 1  ;;  %p109_p3 = scmp.eq.s32.totalorder %s1360_s16, 1 }
   0xa   : > { %s2269_s17 = scalar_select %p1961_p1, 1, 0 }
   0xb   : > { %s2270_s18 = scalar_select %p1965_p2, 1, 0 }
   0xc   : > { %p1971_p4 = por %p1961_p1, %p51_p0  ;;  %p1361_p5 = scmp.ge.s32.totalorder %s1892_s14, 1 }
   0xd   : > { %p1976_p6 = por %p109_p3, %p51_p0  ;;  %p116_p7 = scmp.lt.s32.totalorder %s1892_s14, 3 }
   0xe   : > { %s2271_s19 = scalar_select %p1971_p4, 1, 0 }
   0xf   : > { %s2272_s20 = scalar_select %p1976_p6, 1, 0 }
  0x10   : > { %p1981_p8 = pnand %p1361_p5, %p116_p7  ;;  %s1902_s22 = smov [#allocation8]  }
  0x11   : > { %s130_s23 = sshll.u32 %s1902_s22, 4  ;;  %s31_s25 = sadd.s32 1, %s1888_s13  ;;  %s131_s23 = int_to_ptr.vmem [resolvable:$true] %s130_s23 }
  0x12   : > { %s2273_s21 = scalar_select %p1981_p8, 1, 0 }
  0x13   : > { %p1642_p9 = pneg %p1981_p8  ;;  %s1740_s28 = scalar_lea.hbm %s2263_s1, 1024 }
  0x14   : > { %p1741_p12 = scmp.ne.s32.totalorder %s2263_s1, %s1740_s28  ;;  %p1747_p5 = scmp.lt.u32.totalorder %s1740_s28, %s2263_s1 }
  0x15   : > { %p1990_p11 = pnand %p1642_p9, %p1961_p1 }
  0x17   : > { %p1742_p13 = pneg %p1990_p11 }
  0x19   : > { %p1743_p0 = pnand %p1742_p13, %p1741_p12 }
  0x1b   : > { %p1744_p3 = pneg %p1743_p0 }
  0x1d   : > { %p1749_p7 = pnand %p1747_p5, %p1744_p3 }
  0x1f   : > { %1752 = shalt.err (!%p1749_p7)
}
  0x20   : > { %s1753_s5 = scalar_lea.vmem %s131_s23, 1024  ;;  %p1761_p1 = scmp.lt.s32.totalorder %s131_s23, %s131_s23 }
  0x21   : > { %p1754_p9 = scmp.ne.s32.totalorder %s131_s23, %s1753_s5  ;;  %p1762_p4 = scmp.lt.s32.totalorder %s1753_s5, %s1753_s5 }
  0x23   : > { %p1756_p10 = pnand %p1754_p9, %p1742_p13  ;;  %p1763_p8 = por %p1762_p4, %p1761_p1 }
  0x25   : > { %p1757_p6 = pneg %p1756_p10 }
  0x27   : > { %p1764_p2 = pnand %p1763_p8, %p1757_p6 }
  0x29   : > { %1767 = shalt.err (!%p1764_p2)
}
  0x2a   : > { %s1903_s6 = smov 64   ;;  %s1904_s7 = smov 4  }
  0x2b   : > { %1645 = dma.hbm_to_vmem [thread:$0]  (!%p1990_p11), %s2263_s1, 1024, %s131_s23, [#allocation9], %s1903_s6, %s1903_s6, %s1904_s7  }
  0x2c   : > { %p33_p1 = scmp.ge.s32.totalorder %s31_s25, 2  ;;  %s38_s16 = sadd.s32 1, %s1880_s11 }
  0x2d   : > { %p45_p2 = scmp.ne.s32.totalorder %s1880_s11, %s1876_s10  ;;  %p46_p4 = scmp.eq.s32.totalorder %s1892_s14, 0 }
  0x2e   : > { %s2289_s25 = smov (%p33_p1, %s31_s25), 0  ;;  %p2275_p8 = scmp.ne.s32.totalorder %s2270_s18, 0 }
  0x2f   : > { %p47_p6 = por %p46_p4, %p45_p2  ;;  %s35_s24 = ssub.s32 %s1888_s13, %s2289_s25 }
  0x30   : > { %p2022_p10 = por %p2275_p8, %p45_p2  ;;  %p1655_p12 = scmp.lt.s32.totalorder %s1892_s14, 2 }
  0x31   : > { %p36_p13 = scmp.eq.s32.totalorder %s35_s24, 0  ;;  %s144_s26 = sand.u32 1, %s1880_s11  }
  0x32   : > { %s1631_s27 = smul.u32 288, %s144_s26  ;;  %p2034_p11 = pnand %p1655_p12, %p47_p6 }
  0x33   : > { %s2031_s28 = scalar_select %p36_p13, %s1880_s11, %s38_s16  }
  0x34   : > { %s1632_s23 = smul.u32 4608, %s1888_s13  ;;  %s148_s29 = scalar_lea.vmem [#allocation5], %s1631_s27 }
  0x35   : > { %s155_s30 = sshll.u32 %s148_s29, 4  ;;  %s2045_s8 = scalar_lea.sflag [#allocation6], %s144_s26  ;;  %s2043_s30 = int_to_ptr.vmem [resolvable:$true] %s155_s30 }
  0x36   : > { %s2041_s5 = scalar_lea.hbm %s2262_s0, %s1632_s23  ;;  %p1770_p3 = pneg %p2034_p11 }
  0x37   : > { %s1768_s15 = scalar_lea.hbm %s2041_s5, 4608  ;;  %s1773_s27 = scalar_lea.hbm %s2262_s0, 9216 }
  0x38   : > { %p1769_p0 = scmp.ne.s32.totalorder %s2041_s5, %s1768_s15  ;;  %p1774_p9 = scmp.lt.u32.totalorder %s2041_s5, %s2262_s0 }
  0x39   : > { %p1775_p1 = scmp.lt.u32.totalorder %s1773_s27, %s1768_s15  ;;  %p1777_p4 = scmp.lt.u32.totalorder %s1768_s15, %s2041_s5 }
  0x3a   : > { %p1771_p5 = pnand %p1770_p3, %p1769_p0 }
  0x3b   : > { %p1776_p2 = por %p1775_p1, %p1774_p9 }
  0x3c   : > { %p1772_p7 = pneg %p1771_p5 }
  0x3d   : > { %p1778_p6 = por %p1777_p4, %p1776_p2 }
  0x3f   : > { %p1779_p8 = pnand %p1778_p6, %p1772_p7 }
  0x41   : > { %1782 = shalt.err (!%p1779_p8)
}
  0x42   : > { %s1783_s26 = scalar_lea.vmem %s2043_s30, 4608  ;;  %s1905_s4 = smov [#allocation5]  }
  0x43   : > { %p1784_p12 = scmp.ne.s32.totalorder %s2043_s30, %s1783_s26  ;;  %s1788_s18 = sshll.u32 %s1905_s4, 4  ;;  %s1789_s18 = int_to_ptr.vmem [resolvable:$false] %s1788_s18 }
  0x44   : > { %s1790_s16 = scalar_lea.vmem %s1789_s18, 9216  ;;  %p1791_p5 = scmp.lt.s32.totalorder %s2043_s30, %s1789_s18 }
  0x45   : > { %p1786_p13 = pnand %p1784_p12, %p1770_p3  ;;  %p1792_p9 = scmp.lt.s32.totalorder %s1790_s16, %s1783_s26 }
  0x47   : > { %p1787_p0 = pneg %p1786_p13  ;;  %p1793_p1 = por %p1792_p9, %p1791_p5 }
  0x49   : > { %p1794_p2 = pnand %p1793_p1, %p1787_p0 }
  0x4b   : > { %1797 = shalt.err (!%p1794_p2)
}
  0x4c   : > { %1649 = dma.hbm_to_vmem [thread:$0]  (!%p2034_p11), %s2041_s5, 4608, %s2043_s30, %s2045_s8, %s1903_s6, %s1903_s6, %s1904_s7  }
  0x4d   : > { %p2278_p3 = scmp.ne.s32.totalorder %s2273_s21, 0 }
  0x4e   : > { %s2079_s15 = sand.u32 (!%p2278_p3), 1, %s1876_s10   ;;  %p2279_p7 = scmp.ne.s32.totalorder (!%p2278_p3), %s2271_s19, 0 }
  0x4f   : > { %167 = sbr.rel (%p2278_p3) target bundleno = 470 (0x1d6), region = 28  ;;  %s170_s27 = scalar_lea.sflag (!%p2278_p3), [#allocation6], %s2079_s15 }
  0x50   : > { %s1633_s24 = smul.u32 (!%p2278_p3), 288, %s2079_s15 }
  0x52   : > { %s2083_s23 = scalar_lea.vmem (!%p2278_p3), [#allocation5], %s1633_s24 }
  0x56   : > { %1859 = dma.done.wait (%p2279_p7), %s170_s27, 4608  }
  0x57   : > { %1861 = vsyncadd (%p2279_p7), %s170_s27, 4294962688  ;;  %p2280_p11 = scmp.ne.s32.totalorder %s2269_s17, 0 }
  0x59   : > { %1863 = dma.done.wait (%p2280_p11), [#allocation9], 1024  }
  0x5a   : > { %1865 = vsyncadd (%p2280_p11), [#allocation9], 4294966272  ;;  %s1367_s21 = sshll.u32 %s2079_s15, 5  ;;  %v1906_v0 = vmov 0.0   ;;  %s2096_s7 = smov 0  }
  0x5b   : > { %199 = vst [vmem:[#allocation3] sm:$0x1] %v1906_v0  ;;  %200 = vst [vmem:[#allocation4] sm:$0x1] %v1906_v0  ;;  %s2094_s6 = scalar_lea.vmem [#allocation10], %s1367_s21 }
  0x5c LB: >> { %v219_v1 = vld [vmem:[#allocation8 + $0x4] sm:$0xf]  ;;  %vm224_vm0 = vcmask 1043456   ;;  %v681_v2 = vld [vmem:[#allocation8 + $0x20] sm:$0xf]  ;;  %v1907_v3 = vmov 0.0   ;;  %s1896_s7 = sphi %s2096_s7, %s206_s7  }
  0x5d   : >> { %1478 = vmatprep.subr.bf16.mxu1 %v1907_v3  ;;  %1526 = vmatprep.subr.bf16.mxu0 %v1907_v3  ;;  %v226_v4 = vsel %vm224_vm0, %v219_v1, 0  ;;  %v686_v5 = vsel %vm224_vm0, %v681_v2, 0  ;;  %v212_v6 = vld [vmem:[#allocation8] sm:$0xf]  ;;  %s1438_s17 = sshll.u32 %s1896_s7, 5  ;;  %vm220_vm1 = vcmask 64512  }
  0x5e   : >> { %1479 = vmatpush3.bf16.msra.mxu1 %v226_v4  ;;  %1527 = vmatpush3.bf16.msra.mxu0 %v686_v5  ;;  %v735_v7 = vld [vmem:[#allocation8 + $0x24] sm:$0xf]  ;;  %vm1908_vm2 = vmmov 0   ;;  %s2111_s19 = scalar_lea.vmem %s2083_s23, %s1438_s17 [#allocation5]  ;;  %v272_v8 = vsel %vm224_vm0, %v212_v6, 0  ;;  %v317_v12 = vld [vmem:[#allocation8 + $0x8] sm:$0xf] }
  0x5f   : >> { %1480 = vmatprep.mubr.msk.bf16.mxu1 %vm1908_vm2, %v1907_v3  ;;  %1528 = vmatprep.mubr.msk.bf16.mxu0 %vm1908_vm2, %v1907_v3  ;;  %v740_v9 = vsel %vm224_vm0, %v735_v7, 0  ;;  %v1373_v10 = vld [vmem:[%s2111_s19 + $0x8] sm:$0xf]  ;;  %v1399_v11 = vld [vmem:[%s2111_s19 + $0x20] sm:$0xf]  ;;  %v334_v18 = vsel %vm224_vm0, %v317_v12, 0 }
  0x60   : >> { %1484 = vmatprep.subr.bf16.mxu1 %v1907_v3  ;;  %1532 = vmatprep.subr.bf16.mxu0 %v1907_v3  ;;  %v786_v13 = vld [vmem:[#allocation8 + $0x28] sm:$0xf]  ;;  %v1730_v14 = vld [vmem:[%s2111_s19] sm:$0x1f]   ;;  %v380_v26 = vld [vmem:[#allocation8 + $0xc] sm:$0xf] }
  0x61   : >> { %1481 = vmatmul.mubr.msk.bf16.vlgmr.msra.gmra.mrb[0].mxu1 %vm220_vm1, %v1373_v10  ;;  %1529 = vmatmul.mubr.msk.bf16.vlgmr.msra.gmra.mrb[0].mxu0 %vm220_vm1, %v1399_v11  ;;  %v1731_v15 = vld [vmem:[%s2111_s19 + $0x20] sm:$0x1f]   ;;  %v1403_v17 = vld [vmem:[%s2111_s19 + $0x28] sm:$0xf]  ;;  %v803_v19 = vsel %vm224_vm0, %v786_v13, 0  ;;  %v326_v20 = vshll.u32 %v1730_v14, 16 }
  0x62   : >> { %1485 = vmatpush3.bf16.msra.mxu1 %v272_v8  ;;  %1533 = vmatpush3.bf16.msra.mxu0 %v740_v9  ;;  %v211_v16 = vld [vmem:[%s2111_s19] sm:$0xf]  ;;  %v795_v21 = vshll.u32 %v1731_v15, 16  ;;  %v324_v22 = vshrl.u32 %v1730_v14, 16  ;;  %v793_v24 = vshrl.u32 %v1731_v15, 16  ;;  %v397_v32 = vsel %vm224_vm0, %v380_v26, 0 }
  0x63   : >> { %1486 = vmatprep.mubr.msk.bf16.mxu1 %vm1908_vm2, %v1907_v3  ;;  %1534 = vmatprep.mubr.msk.bf16.mxu0 %vm1908_vm2, %v1907_v3  ;;  %v328_v23 = vrot.slane %v326_v20, 1  ;;  %v849_v27 = vld [vmem:[#allocation8 + $0x2c] sm:$0xf]  ;;  %v1732_v30 = vld [vmem:[%s2111_s19 + $0x8] sm:$0x1f]   ;;  %s1429_s30 = sshll.u32 %s1896_s7, 3 }
  0x64   : >> { %1490 = vmatprep.subr.bf16.mxu1 %v1907_v3  ;;  %1538 = vmatprep.subr.bf16.mxu0 %v1907_v3  ;;  %v797_v25 = vrot.slane %v795_v21, 1  ;;  %v1733_v31 = vld [vmem:[%s2111_s19 + $0x28] sm:$0x1f]   ;;  %v866_v33 = vsel %vm224_vm0, %v849_v27, 0  ;;  %v389_v34 = vshll.u32 %v1732_v30, 16  ;;  %v387_v36 = vshrl.u32 %v1732_v30, 16 }
  0x65   : >> { %v329_v28 = vor.u32 %v328_v23, %v324_v22  ;;  %v858_v35 = vshll.u32 %v1733_v31, 16  ;;  %v856_v38 = vshrl.u32 %v1733_v31, 16  ;;  %v446_v40 = vld [vmem:[#allocation8 + $0x10] sm:$0xf]  ;;  %v500_v46 = vld [vmem:[#allocation8 + $0x14] sm:$0xf] }
  0x66   : >> { %v798_v29 = vor.u32 %v797_v25, %v793_v24  ;;  %v391_v37 = vrot.slane %v389_v34, 1  ;;  %v915_v41 = vld [vmem:[#allocation8 + $0x30] sm:$0xf]  ;;  %v451_v44 = vsel %vm224_vm0, %v446_v40, 0  ;;  %v969_v47 = vld [vmem:[#allocation8 + $0x34] sm:$0xf] }
  0x67   : >> { %v860_v39 = vrot.slane %v858_v35, 1  ;;  %v920_v45 = vsel %vm224_vm0, %v915_v41, 0  ;;  %v1384_v48 = vld [vmem:[%s2111_s19 + $0x10] sm:$0xf]  ;;  %v505_v50 = vsel %vm224_vm0, %v500_v46, 0  ;;  %v974_v51 = vsel %vm224_vm0, %v969_v47, 0 }
  0x68   : >> { %v392_v42 = vor.u32 %v391_v37, %v387_v36  ;;  %v1415_v49 = vld [vmem:[%s2111_s19 + $0x30] sm:$0xf]  ;;  %v551_v52 = vld [vmem:[#allocation8 + $0x18] sm:$0xf]  ;;  %v614_v2 = vld [vmem:[#allocation8 + $0x1c] sm:$0xf] }
  0x69   : >> { %v861_v43 = vor.u32 %v860_v39, %v856_v38  ;;  %v1020_v53 = vld [vmem:[#allocation8 + $0x38] sm:$0xf]  ;;  %v1734_v54 = vld [vmem:[%s2111_s19 + $0x10] sm:$0x1f]   ;;  %v568_v58 = vsel %vm224_vm0, %v551_v52, 0  ;;  %v631_v9 = vsel %vm224_vm0, %v614_v2, 0 }
  0x6a   : >> { %v1735_v55 = vld [vmem:[%s2111_s19 + $0x30] sm:$0x1f]   ;;  %v1388_v56 = vld [vmem:[%s2111_s19 + $0x18] sm:$0xf]  ;;  %v1037_v59 = vsel %vm224_vm0, %v1020_v53, 0  ;;  %v560_v60 = vshll.u32 %v1734_v54, 16 }
  0x6b   : >> { %v1419_v57 = vld [vmem:[%s2111_s19 + $0x38] sm:$0xf]  ;;  %v1029_v61 = vshll.u32 %v1735_v55, 16  ;;  %v558_v62 = vshrl.u32 %v1734_v54, 16  ;;  %v1027_v0 = vshrl.u32 %v1735_v55, 16  ;;  %s1144_s3 = scalar_lea.vmem [#allocation2], %s1429_s30 }
  0x6c   : >> { %v562_v63 = vrot.slane %v560_v60, 1  ;;  %v1083_v4 = vld [vmem:[#allocation8 + $0x3c] sm:$0xf]  ;;  %v1736_v7 = vld [vmem:[%s2111_s19 + $0x18] sm:$0x1f]   ;;  %s206_s7 = sadd.s32 1, %s1896_s7  }
  0x6d   : >> { %1487 = vmatmul.mubr.msk.bf16.vlgmr.msra.gmra.mrb[0].mxu1 %vm220_vm1, %v211_v16  ;;  %1535 = vmatmul.mubr.msk.bf16.vlgmr.msra.gmra.mrb[0].mxu0 %vm220_vm1, %v1403_v17  ;;  %v1031_v1 = vrot.slane %v1029_v61, 1  ;;  %v1737_v8 = vld [vmem:[%s2111_s19 + $0x38] sm:$0x1f]   ;;  %v1100_v10 = vsel %vm224_vm0, %v1083_v4, 0  ;;  %v623_v11 = vshll.u32 %v1736_v7, 16  ;;  %v621_v13 = vshrl.u32 %v1736_v7, 16 }
  0x6e   : >> { %1491 = vmatpush3.bf16.msra.mxu1 %v334_v18  ;;  %1539 = vmatpush3.bf16.msra.mxu0 %v803_v19  ;;  %v563_v5 = vor.u32 %v562_v63, %v558_v62  ;;  %v1092_v12 = vshll.u32 %v1737_v8, 16  ;;  %v1090_v15 = vshrl.u32 %v1737_v8, 16  ;;  %v1146_v37 = vld [vmem:[#allocation3] sm:$0x1]  ;;  %v1155_v40 = vld [vmem:[#allocation4] sm:$0x1] }
  0x6f   : >> { %1492 = vmatprep.mubr.msk.bf16.mxu1 %vm1908_vm2, %v1907_v3  ;;  %1540 = vmatprep.mubr.msk.bf16.mxu0 %vm1908_vm2, %v1907_v3  ;;  %v1032_v6 = vor.u32 %v1031_v1, %v1027_v0  ;;  %v625_v14 = vrot.slane %v623_v11, 1  ;;  %p203_p4 = scmp.ge.s32.totalorder %s206_s7, 8  }
  0x70   : >> { %1496 = vmatprep.subr.bf16.mxu1 %v1907_v3  ;;  %1544 = vmatprep.subr.bf16.mxu0 %v1907_v3  ;;  %v1094_v16 = vrot.slane %v1092_v12, 1  ;;  %s1898_s5 = smov (%p203_p4), 0  }
  0x71   : >> { %v626_v17 = vor.u32 %v625_v14, %v621_v13 }
  0x72   : >> { %v1095_v18 = vor.u32 %v1094_v16, %v1090_v15 }
  0x79   : >> { %1493 = vmatmul.mubr.msk.bf16.vlgmr.msra.gmra.mrb[0].mxu1 %vm220_vm1, %v329_v28  ;;  %1541 = vmatmul.mubr.msk.bf16.vlgmr.msra.gmra.mrb[0].mxu0 %vm220_vm1, %v798_v29 }
  0x7a   : >> { %1497 = vmatpush3.bf16.msra.mxu1 %v397_v32  ;;  %1545 = vmatpush3.bf16.msra.mxu0 %v866_v33 }
  0x7b   : >> { %1498 = vmatprep.mubr.msk.bf16.mxu1 %vm1908_vm2, %v1907_v3  ;;  %1546 = vmatprep.mubr.msk.bf16.mxu0 %vm1908_vm2, %v1907_v3 }
  0x7c   : >> { %1502 = vmatprep.subr.bf16.mxu1 %v1907_v3  ;;  %1550 = vmatprep.subr.bf16.mxu0 %v1907_v3 }
  0x85   : >> { %1499 = vmatmul.mubr.msk.bf16.vlgmr.msra.gmra.mrb[0].mxu1 %vm220_vm1, %v392_v42  ;;  %1547 = vmatmul.mubr.msk.bf16.vlgmr.msra.gmra.mrb[0].mxu0 %vm220_vm1, %v861_v43 }
  0x86   : >> { %1503 = vmatpush3.bf16.msra.mxu1 %v451_v44  ;;  %1551 = vmatpush3.bf16.msra.mxu0 %v920_v45 }
  0x87   : >> { %1504 = vmatprep.mubr.msk.bf16.mxu1 %vm1908_vm2, %v1907_v3  ;;  %1552 = vmatprep.mubr.msk.bf16.mxu0 %vm1908_vm2, %v1907_v3 }
  0x88   : >> { %1508 = vmatprep.subr.bf16.mxu1 %v1907_v3  ;;  %1556 = vmatprep.subr.bf16.mxu0 %v1907_v3 }
  0x91   : >> { %1505 = vmatmul.mubr.msk.bf16.vlgmr.msra.gmra.mrb[0].mxu1 %vm220_vm1, %v1384_v48  ;;  %1553 = vmatmul.mubr.msk.bf16.vlgmr.msra.gmra.mrb[0].mxu0 %vm220_vm1, %v1415_v49 }
  0x92   : >> { %1509 = vmatpush3.bf16.msra.mxu1 %v505_v50  ;;  %1557 = vmatpush3.bf16.msra.mxu0 %v974_v51 }
  0x93   : >> { %1510 = vmatprep.mubr.msk.bf16.mxu1 %vm1908_vm2, %v1907_v3  ;;  %1558 = vmatprep.mubr.msk.bf16.mxu0 %vm1908_vm2, %v1907_v3 }
  0x94   : >> { %1514 = vmatprep.subr.bf16.mxu1 %v1907_v3  ;;  %1562 = vmatprep.subr.bf16.mxu0 %v1907_v3 }
  0x9d   : >> { %1511 = vmatmul.mubr.msk.bf16.vlgmr.msra.gmra.mrb[0].mxu1 %vm220_vm1, %v1388_v56  ;;  %1559 = vmatmul.mubr.msk.bf16.vlgmr.msra.gmra.mrb[0].mxu0 %vm220_vm1, %v1419_v57 }
  0x9e   : >> { %1515 = vmatpush3.bf16.msra.mxu1 %v568_v58  ;;  %1563 = vmatpush3.bf16.msra.mxu0 %v1037_v59 }
  0x9f   : >> { %1516 = vmatprep.mubr.msk.bf16.mxu1 %vm1908_vm2, %v1907_v3  ;;  %1564 = vmatprep.mubr.msk.bf16.mxu0 %vm1908_vm2, %v1907_v3 }
  0xa0   : >> { %1520 = vmatprep.subr.bf16.mxu1 %v1907_v3  ;;  %1568 = vmatprep.subr.bf16.mxu0 %v1907_v3 }
  0xa9   : >> { %1517 = vmatmul.mubr.msk.bf16.vlgmr.msra.gmra.mrb[0].mxu1 %vm220_vm1, %v563_v5  ;;  %1565 = vmatmul.mubr.msk.bf16.vlgmr.msra.gmra.mrb[0].mxu0 %vm220_vm1, %v1032_v6 }
  0xaa   : >> { %1521 = vmatpush3.bf16.msra.mxu1 %v631_v9  ;;  %1569 = vmatpush3.bf16.msra.mxu0 %v1100_v10 }
  0xab   : >> { %1522 = vmatprep.mubr.msk.bf16.mxu1 %vm1908_vm2, %v1907_v3  ;;  %1570 = vmatprep.mubr.msk.bf16.mxu0 %vm1908_vm2, %v1907_v3 }
  0xb5   : >> { %1523 = vmatmul.mubr.msk.bf16.vlgmr.msra.gmra.mrb[0].mxu1 %vm220_vm1, %v626_v17  ;;  %1571 = vmatmul.mubr.msk.bf16.vlgmr.msra.gmra.mrb[0].mxu0 %vm220_vm1, %v1095_v18 }
 0x188   : >> { %v667_v19 = vpop.f32.mrb[0].mxu1  ;;  %v1136_v20 = vpop.f32.mrb[0].mxu0 }
 0x189   : >> { %v1574_v21 = vadd.f32 %v1136_v20, %v667_v19  ;;  %v1524_v22 = vpop.f32.mrb[1].mxu1  ;;  %v1572_v23 = vpop.f32.mrb[1].mxu0 }
 0x18a   : >> { %v670_v24 = vpop.f32.mrb[2].mxu1  ;;  %v1139_v25 = vpop.f32.mrb[2].mxu0 }
 0x18b   : >> { %1145 = vst [vmem:[%s1144_s3] sm:$0xff] %v1574_v21  ;;  %v1147_v3 = vrot.slane %v1574_v21, 4  ;;  %v1156_v26 = vmul.f32 %v1574_v21, %v1574_v21  ;;  %v1525_v27 = vpop.f32.mrb[3].mxu1  ;;  %v1573_v28 = vpop.f32.mrb[3].mxu0 }
 0x18d   : >> { %v1148_v29 = vadd.f32 %v1574_v21, %v1147_v3  ;;  %v1157_v30 = vrot.slane %v1156_v26, 4 }
 0x18f   : >> { %v1149_v31 = vrot.slane %v1148_v29, 2  ;;  %v1158_v32 = vadd.f32 %v1157_v30, %v1156_v26 }
 0x191   : >> { %v1150_v33 = vadd.f32 %v1149_v31, %v1148_v29  ;;  %v1159_v34 = vrot.slane %v1158_v32, 2 }
 0x193   : >> { %v1151_v35 = vrot.slane %v1150_v33, 1  ;;  %v1160_v36 = vadd.f32 %v1159_v34, %v1158_v32 }
 0x195   : >> { %v1152_v38 = vadd.f32 %v1151_v35, %v1150_v33  ;;  %v1161_v39 = vrot.slane %v1160_v36, 1  ;;  %205 = sbr.rel (!%p203_p4) target bundleno = 92 (0x5c), region = 118 }
 0x197   : >> { %v1153_v41 = vadd.f32 %v1152_v38, %v1146_v37  ;;  %v1162_v42 = vadd.f32 %v1161_v39, %v1160_v36 }
 0x199   : >> { %1154 = vst [vmem:[#allocation3] sm:$0x1] %v1153_v41  ;;  %v1163_v43 = vadd.f32 %v1162_v42, %v1155_v40 }
 0x19b   : >> { %1164 = vst [vmem:[#allocation4] sm:$0x1] %v1163_v43 }
 0x1a0   : > { %v1165_v44 = vld [vmem:[#allocation3] sm:$0x1] }
 0x1a1   : > { %v1166_v46 = vmul.f32 0.015625, %v1165_v44 }
 0x1a2   : > { %v1167_v45 = vld [vmem:[#allocation4] sm:$0x1] }
 0x1a3   : > { %v1168_v47 = vmul.f32 0.015625, %v1167_v45  ;;  %v1169_v48 = vmul.f32 %v1166_v46, %v1166_v46 }
 0x1a5   : > { %v1170_v49 = vsub.f32 %v1168_v47, %v1169_v48 }
 0x1a7   : > { %v1171_v50 = vmax.f32 %v1170_v49, 0.0 }
 0x1a9   : > { %v1172_v51 = vadd.f32 1e-05, %v1171_v50 }
 0x1ab   : > { %1738 = vrsqrt.f32 %v1172_v51 }
 0x1b5   : > { %v1739_v52 = vpop.eup %1738 }
 0x1b6 LB: >> { %v1184_v53 = vlaneseq  ;;  %s1430_s8 = sshll.u32 %s1900_s5, 3  ;;  %s1431_s26 = sshll.u32 %s1900_s5, 2  ;;  %s1900_s5 = sphi %s1898_s5, %s1179_s5  }
 0x1b7   : >> { %s1181_s29 = scalar_lea.vmem [#allocation2], %s1430_s8  ;;  %s1202_s4 = scalar_lea.vmem %s2094_s6, %s1431_s26 [#allocation10] }
 0x1b8   : >> { %v1185_v54 = vshrl.u32 %v1184_v53, 7  ;;  %v1182_v56 = vld [vmem:[%s1181_s29] sm:$0xff]  ;;  %s1179_s5 = sadd.s32 1, %s1900_s5  }
 0x1b9   : >> { %p1176_p6 = scmp.ge.s32.totalorder %s1179_s5, 8  }
 0x1ba   : >> { %v1186_v55 = vsub.s32 0, %v1185_v54  ;;  %s1445_s18 = sshll.u32 (%p1176_p6), %s1884_s12, 9  ;;  %s1219_s23 = sshll.u32 (%p1176_p6), %s2094_s6, 4  ;;  %s2213_s23 = int_to_ptr.vmem [resolvable:$true] %s1219_s23 }
 0x1bb   : > { %s2210_s27 = scalar_lea.hbm (%p1176_p6), %s2264_s2, %s1445_s18  ;;  %s1205_s21 = scalar_lea.sflag (%p1176_p6), [#allocation7], %s2079_s15 }
 0x1bc   : >> { %v1187_v57 = vrot.slane %v1166_v46, %v1186_v55  ;;  %v1194_v58 = vrot.slane %v1739_v52, %v1186_v55  ;;  %s1798_s7 = scalar_lea.vmem (%p1176_p6), %s2213_s23, 512  ;;  %s1909_s17 = smov (%p1176_p6), [#allocation10]  }
 0x1bd   : > { %p1799_p8 = scmp.ne.s32.totalorder (%p1176_p6), %s2213_s23, %s1798_s7  ;;  %s1802_s19 = sshll.u32 (%p1176_p6), %s1909_s17, 4  ;;  %s1803_s19 = int_to_ptr.vmem [resolvable:$false] %s1802_s19 }
 0x1be   : >> { %v1189_v59 = vsub.f32 %v1182_v56, %v1187_v57  ;;  %s1804_s12 = scalar_lea.vmem (%p1176_p6), %s1803_s19, 1024  ;;  %p1805_p0 = scmp.lt.s32.totalorder (%p1176_p6), %s2213_s23, %s1803_s19 }
 0x1bf   : > { %p1800_p12 = pnand (%p1176_p6), %p1799_p8, %p2022_p10  ;;  %p1806_p5 = scmp.lt.s32.totalorder (%p1176_p6), %s1804_s12, %s1798_s7 }
 0x1c0   : >> { %v1196_v60 = vmul.f32 %v1194_v58, %v1189_v59 }
 0x1c1   : > { %1178 = sbr.rel (!%p1176_p6) target bundleno = 438 (0x1b6), region = 129  ;;  %p1801_p13 = pneg (%p1176_p6), %p1800_p12 }
 0x1c2   : >> { %vm1197_vm3 = vcmp.ge.f32.partialorder %v1196_v60, 0.0  ;;  %v1198_v61 = vmul.f32 0.2, %v1196_v60  ;;  %p1807_p9 = por (%p1176_p6), %p1806_p5, %p1805_p0 }
 0x1c4   : >> { %v1199_v62 = vsel %vm1197_vm3, %v1196_v60, %v1198_v61  ;;  %p1808_p1 = pnand (%p1176_p6), %p1807_p9, %p1801_p13 }
 0x1c5   : >> { %v1200_v63 = vpack.c.bf16 %v1199_v62, %v1199_v62 }
 0x1c7   : >> { %1203 = vst [vmem:[%s1202_s4] sm:$0xf] %v1200_v63 }
 0x1c8   : > { %1811 = shalt.err (!%p1808_p1)
}
 0x1c9   : > { %s1812_s6 = scalar_lea.hbm %s2210_s27, 512  ;;  %s1816_s5 = scalar_lea.hbm %s2264_s2, 1024 }
 0x1ca   : > { %p1813_p2 = scmp.ne.s32.totalorder %s2210_s27, %s1812_s6  ;;  %p1817_p11 = scmp.lt.u32.totalorder %s2210_s27, %s2264_s2 }
 0x1cb   : > { %p1818_p4 = scmp.lt.u32.totalorder %s1816_s5, %s1812_s6  ;;  %p1820_p8 = scmp.lt.u32.totalorder %s1812_s6, %s2210_s27 }
 0x1cc   : > { %p1814_p3 = pnand %p1813_p2, %p2022_p10 }
 0x1cd   : > { %p1819_p6 = por %p1818_p4, %p1817_p11 }
 0x1ce   : > { %p1815_p7 = pneg %p1814_p3 }
 0x1cf   : > { %p1821_p12 = por %p1820_p8, %p1819_p6 }
 0x1d1   : > { %p1822_p13 = pnand %p1821_p12, %p1815_p7 }
 0x1d3   : > { %1825 = shalt.err (!%p1822_p13)
}
 0x1d4   : > { %s1910_s26 = smov 64   ;;  %s1911_s4 = smov 4  }
 0x1d5   : > { %1640 = dma.vmem_to_hbm [thread:$0]  (%p2022_p10), %s2213_s23, 512, %s2210_s27, %s1205_s21, %s1910_s26, %s1910_s26, %s1911_s4  }
 0x1d6 PF: > { %s1234_s18 = sand.u32 1, %s1872_s9   ;;  %p2281_p0 = scmp.ne.s32.totalorder %s2272_s20, 0 }
 0x1d7   : > { %p2282_p5 = scmp.ge.s32.totalorder %s1892_s14, 2  ;;  %s1235_s16 = scalar_lea.sflag [#allocation7], %s1234_s18 }
 0x1d9   : > { %p1651_p9 = pnand %p2282_p5, %p2281_p0 }
 0x1db   : > { %1867 = dma.done.wait (!%p1651_p9), %s1235_s16, 512  }
 0x1dc   : > { %1869 = vsyncadd (!%p1651_p9), %s1235_s16, 4294966784  ;;  %s19_s14 = sadd.s32 1, %s1892_s14   ;;  %s2283_s9 = smov %s1876_s10 }
 0x1dd   : > { %p16_p1 = scmp.ge.s32.totalorder %s19_s14, 4   ;;  %s2284_s10 = smov %s1880_s11 }
 0x1de   : > { %s2285_s11 = smov %s2031_s28  ;;  %s2286_s12 = smov %s1888_s13 }
 0x1df   : > { %s2287_s13 = smov %s2289_s25  ;;  %18 = sbr.rel (!%p16_p1) target bundleno = 7 (0x7), region = 140 }
 0x1e6   :  { %1240 = vsyncpa [#allocation6], 1 }
 0x1e7   :  { %1242 = vsyncpa [#allocation6 + $0x1], 1 }
 0x1e8   :  { %1243 = vsyncpa [#allocation9], 1 }
 0x1e9   :  { %1244 = vsyncpa [#allocation7], 1 }
 0x1ea   :  { %1246 = vsyncpa [#allocation7 + $0x1], 1 }

// kernel: _lambda_.7
= control target key start
LH: loop header
LB: loop body
LE: loop exit
PB: predicated region body
PF: predicated region fallthrough
CT: control target
= control target key end

     0   :  { %7 = vsyncpa [#allocation6], 0  ;;  %s2301_s0 = inlined_call_operand.hbm [shape: bf16[2,20,5,16], index: 0, kind: input, shape index: {}]   ;;  %s2302_s1 = inlined_call_operand.hbm [shape: bf16[16,16,128], index: 1, kind: input, shape index: {}]   ;;  %s2303_s2 = inlined_call_operand.hbm [shape: bf16[2,4,4,128], index: 2, kind: output, shape index: {}]  }
   0x1   :  { %9 = vsyncpa [#allocation6 + $0x1], 0 }
   0x2   :  { %10 = vsyncpa [#allocation9], 0 }
   0x3   :  { %11 = vsyncpa [#allocation7], 0 }
   0x4   :  { %13 = vsyncpa [#allocation7 + $0x1], 0  ;;  %s1982_s9 = smov 0   ;;  %s1984_s10 = smov 0  }
   0x5   :  { %s1986_s11 = smov 0   ;;  %s1988_s12 = smov 0  }
   0x6   :  { %s1990_s13 = smov 0   ;;  %s1992_s14 = smov 0  }
   0x7 LB: > { %s1392_s15 = sadd.s32 4294967295, %s1947_s14   ;;  %s1393_s16 = sadd.s32 4294967294, %s1947_s14   ;;  %s1947_s14 = sphi %s1992_s14, %s19_s14   ;;  %s1943_s13 = sphi %s1990_s13, %s2326_s13   ;;  %s1939_s12 = sphi %s1988_s12, %s2325_s12   ;;  %s1935_s11 = sphi %s1986_s11, %s2324_s11   ;;  %s1931_s10 = sphi %s1984_s10, %s2323_s10   ;;  %s1927_s9 = sphi %s1982_s9, %s2322_s9  }
   0x8   : > { %p51_p0 = scmp.ne.s32.totalorder %s1931_s10, %s1927_s9  ;;  %p2016_p1 = scmp.eq.s32.totalorder %s1392_s15, 0 }
   0x9   : > { %p2020_p2 = scmp.eq.s32.totalorder %s1392_s15, 1  ;;  %p109_p3 = scmp.eq.s32.totalorder %s1393_s16, 1 }
   0xa   : > { %s2308_s17 = scalar_select %p2016_p1, 1, 0 }
   0xb   : > { %s2309_s18 = scalar_select %p2020_p2, 1, 0 }
   0xc   : > { %p2026_p4 = por %p2016_p1, %p51_p0  ;;  %p1394_p5 = scmp.ge.s32.totalorder %s1947_s14, 1 }
   0xd   : > { %p2031_p6 = por %p109_p3, %p51_p0  ;;  %p116_p7 = scmp.lt.s32.totalorder %s1947_s14, 3 }
   0xe   : > { %s2310_s19 = scalar_select %p2026_p4, 1, 0 }
   0xf   : > { %s2311_s20 = scalar_select %p2031_p6, 1, 0 }
  0x10   : > { %p2036_p8 = pnand %p1394_p5, %p116_p7  ;;  %s1957_s22 = smov [#allocation8]  }
  0x11   : > { %s130_s23 = sshll.u32 %s1957_s22, 4  ;;  %s31_s25 = sadd.s32 1, %s1943_s13  ;;  %s131_s23 = int_to_ptr.vmem [resolvable:$true] %s130_s23 }
  0x12   : > { %s2312_s21 = scalar_select %p2036_p8, 1, 0 }
  0x13   : > { %p1681_p9 = pneg %p2036_p8  ;;  %s1795_s28 = scalar_lea.hbm %s2302_s1, 2048 }
  0x14   : > { %p1796_p12 = scmp.ne.s32.totalorder %s2302_s1, %s1795_s28  ;;  %p1802_p5 = scmp.lt.u32.totalorder %s1795_s28, %s2302_s1 }
  0x15   : > { %p2045_p11 = pnand %p1681_p9, %p2016_p1 }
  0x17   : > { %p1797_p13 = pneg %p2045_p11 }
  0x19   : > { %p1798_p0 = pnand %p1797_p13, %p1796_p12 }
  0x1b   : > { %p1799_p3 = pneg %p1798_p0 }
  0x1d   : > { %p1804_p7 = pnand %p1802_p5, %p1799_p3 }
  0x1f   : > { %1807 = shalt.err (!%p1804_p7)
}
  0x20   : > { %s1808_s5 = scalar_lea.vmem %s131_s23, 2048  ;;  %p1816_p1 = scmp.lt.s32.totalorder %s131_s23, %s131_s23 }
  0x21   : > { %p1809_p9 = scmp.ne.s32.totalorder %s131_s23, %s1808_s5  ;;  %p1817_p4 = scmp.lt.s32.totalorder %s1808_s5, %s1808_s5 }
  0x23   : > { %p1811_p10 = pnand %p1809_p9, %p1797_p13  ;;  %p1818_p8 = por %p1817_p4, %p1816_p1 }
  0x25   : > { %p1812_p6 = pneg %p1811_p10 }
  0x27   : > { %p1819_p2 = pnand %p1818_p8, %p1812_p6 }
  0x29   : > { %1822 = shalt.err (!%p1819_p2)
}
  0x2a   : > { %s1958_s6 = smov 64   ;;  %s1959_s7 = smov 4  }
  0x2b   : > { %1684 = dma.hbm_to_vmem [thread:$0]  (!%p2045_p11), %s2302_s1, 2048, %s131_s23, [#allocation9], %s1958_s6, %s1958_s6, %s1959_s7  }
  0x2c   : > { %p33_p1 = scmp.ge.s32.totalorder %s31_s25, 2  ;;  %s38_s16 = sadd.s32 1, %s1935_s11 }
  0x2d   : > { %p45_p2 = scmp.ne.s32.totalorder %s1935_s11, %s1931_s10  ;;  %p46_p4 = scmp.eq.s32.totalorder %s1947_s14, 0 }
  0x2e   : > { %s2328_s25 = smov (%p33_p1, %s31_s25), 0  ;;  %p2314_p8 = scmp.ne.s32.totalorder %s2309_s18, 0 }
  0x2f   : > { %p47_p6 = por %p46_p4, %p45_p2  ;;  %s35_s24 = ssub.s32 %s1943_s13, %s2328_s25 }
  0x30   : > { %p2077_p10 = por %p2314_p8, %p45_p2  ;;  %p1694_p12 = scmp.lt.s32.totalorder %s1947_s14, 2 }
  0x31   : > { %p36_p13 = scmp.eq.s32.totalorder %s35_s24, 0  ;;  %s144_s26 = sand.u32 1, %s1935_s11  }
  0x32   : > { %s1670_s27 = smul.u32 80, %s144_s26  ;;  %p2089_p11 = pnand %p1694_p12, %p47_p6 }
  0x33   : > { %s2086_s28 = scalar_select %p36_p13, %s1935_s11, %s38_s16  }
  0x34   : > { %s1671_s23 = smul.u32 1280, %s1943_s13  ;;  %s148_s29 = scalar_lea.vmem [#allocation5], %s1670_s27 }
  0x35   : > { %s155_s30 = sshll.u32 %s148_s29, 4  ;;  %s2100_s8 = scalar_lea.sflag [#allocation6], %s144_s26  ;;  %s2098_s30 = int_to_ptr.vmem [resolvable:$true] %s155_s30 }
  0x36   : > { %s2096_s5 = scalar_lea.hbm %s2301_s0, %s1671_s23  ;;  %p1825_p3 = pneg %p2089_p11 }
  0x37   : > { %s1823_s15 = scalar_lea.hbm %s2096_s5, 1280  ;;  %s1828_s27 = scalar_lea.hbm %s2301_s0, 2560 }
  0x38   : > { %p1824_p0 = scmp.ne.s32.totalorder %s2096_s5, %s1823_s15  ;;  %p1829_p9 = scmp.lt.u32.totalorder %s2096_s5, %s2301_s0 }
  0x39   : > { %p1830_p1 = scmp.lt.u32.totalorder %s1828_s27, %s1823_s15  ;;  %p1832_p4 = scmp.lt.u32.totalorder %s1823_s15, %s2096_s5 }
  0x3a   : > { %p1826_p5 = pnand %p1825_p3, %p1824_p0 }
  0x3b   : > { %p1831_p2 = por %p1830_p1, %p1829_p9 }
  0x3c   : > { %p1827_p7 = pneg %p1826_p5 }
  0x3d   : > { %p1833_p6 = por %p1832_p4, %p1831_p2 }
  0x3f   : > { %p1834_p8 = pnand %p1833_p6, %p1827_p7 }
  0x41   : > { %1837 = shalt.err (!%p1834_p8)
}
  0x42   : > { %s1838_s26 = scalar_lea.vmem %s2098_s30, 1280  ;;  %s1960_s4 = smov [#allocation5]  }
  0x43   : > { %p1839_p12 = scmp.ne.s32.totalorder %s2098_s30, %s1838_s26  ;;  %s1843_s18 = sshll.u32 %s1960_s4, 4  ;;  %s1844_s18 = int_to_ptr.vmem [resolvable:$false] %s1843_s18 }
  0x44   : > { %s1845_s16 = scalar_lea.vmem %s1844_s18, 2560  ;;  %p1846_p5 = scmp.lt.s32.totalorder %s2098_s30, %s1844_s18 }
  0x45   : > { %p1841_p13 = pnand %p1839_p12, %p1825_p3  ;;  %p1847_p9 = scmp.lt.s32.totalorder %s1845_s16, %s1838_s26 }
  0x47   : > { %p1842_p0 = pneg %p1841_p13  ;;  %p1848_p1 = por %p1847_p9, %p1846_p5 }
  0x49   : > { %p1849_p2 = pnand %p1848_p1, %p1842_p0 }
  0x4b   : > { %1852 = shalt.err (!%p1849_p2)
}
  0x4c   : > { %1688 = dma.hbm_to_vmem [thread:$0]  (!%p2089_p11), %s2096_s5, 1280, %s2098_s30, %s2100_s8, %s1958_s6, %s1958_s6, %s1959_s7  }
  0x4d   : > { %p2317_p3 = scmp.ne.s32.totalorder %s2312_s21, 0 }
  0x4e   : > { %s2134_s15 = sand.u32 (!%p2317_p3), 1, %s1931_s10   ;;  %p2318_p7 = scmp.ne.s32.totalorder (!%p2317_p3), %s2310_s19, 0 }
  0x4f   : > { %167 = sbr.rel (%p2317_p3) target bundleno = 472 (0x1d8), region = 28  ;;  %s170_s27 = scalar_lea.sflag (!%p2317_p3), [#allocation6], %s2134_s15 }
  0x50   : > { %s1672_s24 = smul.u32 (!%p2317_p3), 80, %s2134_s15 }
  0x52   : > { %s2138_s23 = scalar_lea.vmem (!%p2317_p3), [#allocation5], %s1672_s24 }
  0x56   : > { %1914 = dma.done.wait (%p2318_p7), %s170_s27, 1280  }
  0x57   : > { %1916 = vsyncadd (%p2318_p7), %s170_s27, 4294966016  ;;  %p2319_p11 = scmp.ne.s32.totalorder %s2308_s17, 0 }
  0x59   : > { %1918 = dma.done.wait (%p2319_p11), [#allocation9], 2048  }
  0x5a   : > { %1920 = vsyncadd (%p2319_p11), [#allocation9], 4294965248  ;;  %s1400_s21 = sshll.u32 %s2134_s15, 3  ;;  %v1961_v0 = vmov 0.0   ;;  %s2151_s7 = smov 0  }
  0x5b   : > { %199 = vst [vmem:[#allocation3] sm:$0x1] %v1961_v0  ;;  %200 = vst [vmem:[#allocation4] sm:$0x1] %v1961_v0  ;;  %s2149_s6 = scalar_lea.vmem [#allocation10], %s1400_s21 }
  0x5c LB: >> { %v1769_v1 = vld [vmem:[#allocation8 + $0x8] sm:$0xff]   ;;  %v1962_v2 = vmov 0.0   ;;  %v1770_v3 = vld [vmem:[#allocation8 + $0x40] sm:$0xff]   ;;  %vm1963_vm0 = vmmov 0   ;;  %s1477_s17 = sshll.u32 %s1951_s7, 4  ;;  %vm226_vm1 = vcmask 130048   ;;  %s1951_s7 = sphi %s2151_s7, %s206_s7  }
  0x5d   : >> { %1517 = vmatprep.subr.bf16.mxu1 %v1962_v2  ;;  %1565 = vmatprep.subr.bf16.mxu0 %v1962_v2  ;;  %s2164_s19 = scalar_lea.vmem %s2138_s23, %s1477_s17 [#allocation5]  ;;  %v1771_v4 = vld [vmem:[#allocation8] sm:$0xff]   ;;  %v1772_v7 = vld [vmem:[#allocation8 + $0x48] sm:$0xff]   ;;  %v1773_v11 = vld [vmem:[#allocation8 + $0x10] sm:$0xff]   ;;  %s1401_s30 = sshll.u32 %s1951_s7, 2  ;;  %vm1177_vm2 = vcmask 1043456  }
  0x5e   : >> { %1518 = vmatpush3.bf16.msra.mxu1 %v1769_v1  ;;  %1519 = vmatprep.mubr.msk.bf16.mxu1 %vm1963_vm0, %v1962_v2  ;;  %v1405_v5 = vld [vmem:[%s2164_s19 + $0x4] sm:$0x3]  ;;  %v1436_v6 = vld [vmem:[%s2164_s19 + $0x10] sm:$0x3]  ;;  %v210_v8 = vld [vmem:[%s2164_s19] sm:$0x3] }
  0x5f   : >> { %1566 = vmatpush3.bf16.msra.mxu0 %v1770_v3  ;;  %1567 = vmatprep.mubr.msk.bf16.mxu0 %vm1963_vm0, %v1962_v2  ;;  %v1441_v9 = vld [vmem:[%s2164_s19 + $0x14] sm:$0x3]  ;;  %v1775_v10 = vld [vmem:[%s2164_s19] ss:$0 sps:$4 sm:$0x77]   ;;  %v1774_v13 = vld [vmem:[#allocation8 + $0x50] sm:$0xff]  }
  0x60   : >> { %1523 = vmatprep.subr.bf16.mxu1 %v1962_v2  ;;  %1571 = vmatprep.subr.bf16.mxu0 %v1962_v2  ;;  %v1776_v12 = vld [vmem:[%s2164_s19 + $0x10] ss:$0 sps:$4 sm:$0x77]   ;;  %v329_v14 = vshll.u32 %v1775_v10, 16  ;;  %v327_v16 = vshrl.u32 %v1775_v10, 16  ;;  %v1781_v34 = vld [vmem:[#allocation8 + $0x20] sm:$0xff]  }
  0x61   : >> { %1520 = vmatmul.mubr.msk.bf16.vlgmr.msra.gmra.mrb[0].mxu1 %vm226_vm1, %v1405_v5  ;;  %v814_v15 = vshll.u32 %v1776_v12, 16  ;;  %v812_v18 = vshrl.u32 %v1776_v12, 16  ;;  %v1779_v20 = vld [vmem:[%s2164_s19 + $0x4] ss:$0 sps:$4 sm:$0x77]   ;;  %v1777_v23 = vld [vmem:[#allocation8 + $0x18] sm:$0xff]  }
  0x62   : >> { %1568 = vmatmul.mubr.msk.bf16.vlgmr.msra.gmra.mrb[0].mxu0 %vm226_vm1, %v1436_v6  ;;  %1524 = vmatpush3.bf16.msra.mxu1 %v1771_v4  ;;  %v331_v17 = vrot.slane %v329_v14, 1  ;;  %v1780_v24 = vld [vmem:[%s2164_s19 + $0x14] ss:$0 sps:$4 sm:$0x77]   ;;  %v1778_v25 = vld [vmem:[#allocation8 + $0x58] sm:$0xff]   ;;  %v393_v26 = vshll.u32 %v1779_v20, 16 }
  0x63   : >> { %1572 = vmatpush3.bf16.msra.mxu0 %v1772_v7  ;;  %1525 = vmatprep.mubr.msk.bf16.mxu1 %vm1963_vm0, %v1962_v2  ;;  %v816_v19 = vrot.slane %v814_v15, 1  ;;  %v878_v27 = vshll.u32 %v1780_v24, 16  ;;  %v391_v28 = vshrl.u32 %v1779_v20, 16  ;;  %v876_v30 = vshrl.u32 %v1780_v24, 16  ;;  %v1782_v35 = vld [vmem:[#allocation8 + $0x60] sm:$0xff]   ;;  %v1783_v37 = vld [vmem:[#allocation8 + $0x28] sm:$0xff]  }
  0x64   : >> { %1573 = vmatprep.mubr.msk.bf16.mxu0 %vm1963_vm0, %v1962_v2  ;;  %1529 = vmatprep.subr.bf16.mxu1 %v1962_v2  ;;  %v332_v21 = vor.u32 %v331_v17, %v327_v16  ;;  %v395_v29 = vrot.slane %v393_v26, 1  ;;  %v1419_v36 = vld [vmem:[%s2164_s19 + $0x8] sm:$0x3]  ;;  %v1454_v38 = vld [vmem:[%s2164_s19 + $0x18] sm:$0x3]  ;;  %v1784_v39 = vld [vmem:[#allocation8 + $0x68] sm:$0xff]  }
  0x65   : >> { %1577 = vmatprep.subr.bf16.mxu0 %v1962_v2  ;;  %v817_v22 = vor.u32 %v816_v19, %v812_v18  ;;  %v880_v31 = vrot.slane %v878_v27, 1  ;;  %v1787_v40 = vld [vmem:[%s2164_s19 + $0x8] ss:$0 sps:$4 sm:$0x77]   ;;  %v1424_v41 = vld [vmem:[%s2164_s19 + $0xc] sm:$0x3] }
  0x66   : >> { %v396_v32 = vor.u32 %v395_v29, %v391_v28  ;;  %v1785_v42 = vld [vmem:[#allocation8 + $0x30] sm:$0xff]   ;;  %v1788_v43 = vld [vmem:[%s2164_s19 + $0x18] ss:$0 sps:$4 sm:$0x77]   ;;  %v1459_v44 = vld [vmem:[%s2164_s19 + $0x1c] sm:$0x3] }
  0x67   : >> { %v881_v33 = vor.u32 %v880_v31, %v876_v30  ;;  %v1786_v45 = vld [vmem:[#allocation8 + $0x70] sm:$0xff]   ;;  %v571_v46 = vshll.u32 %v1787_v40, 16  ;;  %v1056_v47 = vshll.u32 %v1788_v43, 16  ;;  %v569_v48 = vshrl.u32 %v1787_v40, 16  ;;  %v1789_v55 = vld [vmem:[#allocation8 + $0x38] sm:$0xff]   ;;  %s1174_s3 = scalar_lea.vmem [#allocation2], %s1401_s30 }
  0x68   : >> { %v1054_v50 = vshrl.u32 %v1788_v43, 16  ;;  %v1791_v53 = vld [vmem:[%s2164_s19 + $0xc] ss:$0 sps:$4 sm:$0x77]   ;;  %v1187_v26 = vld [vmem:[#allocation4] sm:$0x1] }
  0x69   : >> { %v573_v49 = vrot.slane %v571_v46, 1  ;;  %v1058_v51 = vrot.slane %v1056_v47, 1  ;;  %v1792_v56 = vld [vmem:[%s2164_s19 + $0x1c] ss:$0 sps:$4 sm:$0x77]   ;;  %v1790_v57 = vld [vmem:[#allocation8 + $0x78] sm:$0xff]  }
  0x6a   : >> { %v635_v58 = vshll.u32 %v1791_v53, 16  ;;  %v1120_v59 = vshll.u32 %v1792_v56, 16  ;;  %v633_v60 = vshrl.u32 %v1791_v53, 16  ;;  %v1118_v62 = vshrl.u32 %v1792_v56, 16  ;;  %s206_s7 = sadd.s32 1, %s1951_s7  }
  0x6b   : >> { %v574_v52 = vor.u32 %v573_v49, %v569_v48  ;;  %v1059_v54 = vor.u32 %v1058_v51, %v1054_v50  ;;  %p203_p4 = scmp.ge.s32.totalorder %s206_s7, 4  }
  0x6c   : >> { %v637_v61 = vrot.slane %v635_v58, 1  ;;  %v1122_v63 = vrot.slane %v1120_v59, 1  ;;  %s1953_s5 = smov (%p203_p4), 0  }
  0x6d   : >> { %1526 = vmatmul.mubr.msk.bf16.vlgmr.msra.gmra.mrb[0].mxu1 %vm226_vm1, %v210_v8 }
  0x6e   : >> { %1574 = vmatmul.mubr.msk.bf16.vlgmr.msra.gmra.mrb[0].mxu0 %vm226_vm1, %v1441_v9  ;;  %1530 = vmatpush3.bf16.msra.mxu1 %v1773_v11  ;;  %v638_v0 = vor.u32 %v637_v61, %v633_v60  ;;  %v1123_v1 = vor.u32 %v1122_v63, %v1118_v62 }
  0x6f   : >> { %1578 = vmatpush3.bf16.msra.mxu0 %v1774_v13  ;;  %1531 = vmatprep.mubr.msk.bf16.mxu1 %vm1963_vm0, %v1962_v2 }
  0x70   : >> { %1579 = vmatprep.mubr.msk.bf16.mxu0 %vm1963_vm0, %v1962_v2  ;;  %1535 = vmatprep.subr.bf16.mxu1 %v1962_v2 }
  0x71   : >> { %1583 = vmatprep.subr.bf16.mxu0 %v1962_v2 }
  0x79   : >> { %1532 = vmatmul.mubr.msk.bf16.vlgmr.msra.gmra.mrb[0].mxu1 %vm226_vm1, %v332_v21 }
  0x7a   : >> { %1580 = vmatmul.mubr.msk.bf16.vlgmr.msra.gmra.mrb[0].mxu0 %vm226_vm1, %v817_v22  ;;  %1536 = vmatpush3.bf16.msra.mxu1 %v1777_v23  ;;  %v1176_v23 = vld [vmem:[#allocation3] sm:$0x1] }
  0x7b   : >> { %1584 = vmatpush3.bf16.msra.mxu0 %v1778_v25  ;;  %1537 = vmatprep.mubr.msk.bf16.mxu1 %vm1963_vm0, %v1962_v2 }
  0x7c   : >> { %1585 = vmatprep.mubr.msk.bf16.mxu0 %vm1963_vm0, %v1962_v2  ;;  %1541 = vmatprep.subr.bf16.mxu1 %v1962_v2 }
  0x7d   : >> { %1589 = vmatprep.subr.bf16.mxu0 %v1962_v2 }
  0x85   : >> { %1538 = vmatmul.mubr.msk.bf16.vlgmr.msra.gmra.mrb[0].mxu1 %vm226_vm1, %v396_v32 }
  0x86   : >> { %1586 = vmatmul.mubr.msk.bf16.vlgmr.msra.gmra.mrb[0].mxu0 %vm226_vm1, %v881_v33  ;;  %1542 = vmatpush3.bf16.msra.mxu1 %v1781_v34 }
  0x87   : >> { %1590 = vmatpush3.bf16.msra.mxu0 %v1782_v35  ;;  %1543 = vmatprep.mubr.msk.bf16.mxu1 %vm1963_vm0, %v1962_v2 }
  0x88   : >> { %1591 = vmatprep.mubr.msk.bf16.mxu0 %vm1963_vm0, %v1962_v2  ;;  %1547 = vmatprep.subr.bf16.mxu1 %v1962_v2 }
  0x89   : >> { %1595 = vmatprep.subr.bf16.mxu0 %v1962_v2 }
  0x91   : >> { %1544 = vmatmul.mubr.msk.bf16.vlgmr.msra.gmra.mrb[0].mxu1 %vm226_vm1, %v1419_v36 }
  0x92   : >> { %1592 = vmatmul.mubr.msk.bf16.vlgmr.msra.gmra.mrb[0].mxu0 %vm226_vm1, %v1454_v38  ;;  %1548 = vmatpush3.bf16.msra.mxu1 %v1783_v37 }
  0x93   : >> { %1596 = vmatpush3.bf16.msra.mxu0 %v1784_v39  ;;  %1549 = vmatprep.mubr.msk.bf16.mxu1 %vm1963_vm0, %v1962_v2 }
  0x94   : >> { %1597 = vmatprep.mubr.msk.bf16.mxu0 %vm1963_vm0, %v1962_v2  ;;  %1553 = vmatprep.subr.bf16.mxu1 %v1962_v2 }
  0x95   : >> { %1601 = vmatprep.subr.bf16.mxu0 %v1962_v2 }
  0x9d   : >> { %1550 = vmatmul.mubr.msk.bf16.vlgmr.msra.gmra.mrb[0].mxu1 %vm226_vm1, %v1424_v41 }
  0x9e   : >> { %1598 = vmatmul.mubr.msk.bf16.vlgmr.msra.gmra.mrb[0].mxu0 %vm226_vm1, %v1459_v44  ;;  %1554 = vmatpush3.bf16.msra.mxu1 %v1785_v42 }
  0x9f   : >> { %1602 = vmatpush3.bf16.msra.mxu0 %v1786_v45  ;;  %1555 = vmatprep.mubr.msk.bf16.mxu1 %vm1963_vm0, %v1962_v2 }
  0xa0   : >> { %1603 = vmatprep.mubr.msk.bf16.mxu0 %vm1963_vm0, %v1962_v2  ;;  %1559 = vmatprep.subr.bf16.mxu1 %v1962_v2 }
  0xa1   : >> { %1607 = vmatprep.subr.bf16.mxu0 %v1962_v2 }
  0xa9   : >> { %1556 = vmatmul.mubr.msk.bf16.vlgmr.msra.gmra.mrb[0].mxu1 %vm226_vm1, %v574_v52 }
  0xaa   : >> { %1604 = vmatmul.mubr.msk.bf16.vlgmr.msra.gmra.mrb[0].mxu0 %vm226_vm1, %v1059_v54  ;;  %1560 = vmatpush3.bf16.msra.mxu1 %v1789_v55 }
  0xab   : >> { %1608 = vmatpush3.bf16.msra.mxu0 %v1790_v57  ;;  %1561 = vmatprep.mubr.msk.bf16.mxu1 %vm1963_vm0, %v1962_v2 }
  0xac   : >> { %1609 = vmatprep.mubr.msk.bf16.mxu0 %vm1963_vm0, %v1962_v2 }
  0xb5   : >> { %1562 = vmatmul.mubr.msk.bf16.vlgmr.msra.gmra.mrb[0].mxu1 %vm226_vm1, %v638_v0 }
  0xb6   : >> { %1610 = vmatmul.mubr.msk.bf16.vlgmr.msra.gmra.mrb[0].mxu0 %vm226_vm1, %v1123_v1 }
 0x188   : >> { %v682_v3 = vpop.f32.mrb[0].mxu1 }
 0x189   : >> { %v1167_v4 = vpop.f32.mrb[0].mxu0  ;;  %v1563_v5 = vpop.f32.mrb[1].mxu1 }
 0x18a   : >> { %v1613_v6 = vadd.f32 %v1167_v4, %v682_v3  ;;  %v1611_v7 = vpop.f32.mrb[1].mxu0  ;;  %v685_v8 = vpop.f32.mrb[2].mxu1 }
 0x18b   : >> { %v1170_v9 = vpop.f32.mrb[2].mxu0  ;;  %v1564_v2 = vpop.f32.mrb[3].mxu1 }
 0x18c   : >> { %1175 = vst [vmem:[%s1174_s3] sm:$0xf] %v1613_v6  ;;  %v1178_v10 = vsel %vm1177_vm2, %v1613_v6, 0.0  ;;  %v1188_v11 = vmul.f32 %v1613_v6, %v1613_v6  ;;  %v1612_v12 = vpop.f32.mrb[3].mxu0 }
 0x18d   : >> { %v1179_v13 = vrot.slane %v1178_v10, 4 }
 0x18e   : >> { %v1189_v14 = vsel %vm1177_vm2, %v1188_v11, 0.0 }
 0x18f   : >> { %v1180_v15 = vadd.f32 %v1179_v13, %v1178_v10  ;;  %v1190_v16 = vrot.slane %v1189_v14, 4 }
 0x191   : >> { %v1181_v17 = vrot.slane %v1180_v15, 2  ;;  %v1191_v18 = vadd.f32 %v1190_v16, %v1189_v14 }
 0x193   : >> { %v1182_v19 = vadd.f32 %v1181_v17, %v1180_v15  ;;  %v1192_v20 = vrot.slane %v1191_v18, 2 }
 0x195   : >> { %v1183_v21 = vrot.slane %v1182_v19, 1  ;;  %v1193_v22 = vadd.f32 %v1192_v20, %v1191_v18 }
 0x197   : >> { %v1184_v24 = vadd.f32 %v1183_v21, %v1182_v19  ;;  %v1194_v25 = vrot.slane %v1193_v22, 1  ;;  %205 = sbr.rel (!%p203_p4) target bundleno = 92 (0x5c), region = 118 }
 0x199   : >> { %v1185_v27 = vadd.f32 %v1184_v24, %v1176_v23  ;;  %v1195_v28 = vadd.f32 %v1194_v25, %v1193_v22 }
 0x19b   : >> { %1186 = vst [vmem:[#allocation3] sm:$0x1] %v1185_v27  ;;  %v1196_v29 = vadd.f32 %v1195_v28, %v1187_v26 }
 0x19d   : >> { %1197 = vst [vmem:[#allocation4] sm:$0x1] %v1196_v29 }
 0x1a2   : > { %v1198_v30 = vld [vmem:[#allocation3] sm:$0x1] }
 0x1a3   : > { %v1199_v32 = vmul.f32 0.0625, %v1198_v30 }
 0x1a4   : > { %v1200_v31 = vld [vmem:[#allocation4] sm:$0x1] }
 0x1a5   : > { %v1201_v33 = vmul.f32 0.0625, %v1200_v31  ;;  %v1202_v34 = vmul.f32 %v1199_v32, %v1199_v32 }
 0x1a7   : > { %v1203_v35 = vsub.f32 %v1201_v33, %v1202_v34 }
 0x1a9   : > { %v1204_v36 = vmax.f32 %v1203_v35, 0.0 }
 0x1ab   : > { %v1205_v37 = vadd.f32 1e-05, %v1204_v36 }
 0x1ad   : > { %1793 = vrsqrt.f32 %v1205_v37 }
 0x1b7   : > { %v1794_v38 = vpop.eup %1793 }
 0x1b8 LB: >> { %v1217_v39 = vlaneseq  ;;  %s1470_s8 = sshll.u32 %s1955_s5, 2  ;;  %s1471_s26 = sshll.u32 %s1955_s5, 1  ;;  %s1955_s5 = sphi %s1953_s5, %s1212_s5  }
 0x1b9   : >> { %s1214_s29 = scalar_lea.vmem [#allocation2], %s1470_s8  ;;  %s1235_s4 = scalar_lea.vmem %s2149_s6, %s1471_s26 [#allocation10] }
 0x1ba   : >> { %v1218_v40 = vshrl.u32 %v1217_v39, 7  ;;  %v1215_v42 = vld [vmem:[%s1214_s29] sm:$0xf]  ;;  %s1212_s5 = sadd.s32 1, %s1955_s5  }
 0x1bb   : >> { %p1209_p6 = scmp.ge.s32.totalorder %s1212_s5, 4  }
 0x1bc   : >> { %v1219_v41 = vsub.s32 0, %v1218_v40  ;;  %s1484_s18 = sshll.u32 (%p1209_p6), %s1939_s12, 7  ;;  %s1252_s23 = sshll.u32 (%p1209_p6), %s2149_s6, 4  ;;  %s2252_s23 = int_to_ptr.vmem [resolvable:$true] %s1252_s23 }
 0x1bd   : > { %s2249_s27 = scalar_lea.hbm (%p1209_p6), %s2303_s2, %s1484_s18  ;;  %s1238_s21 = scalar_lea.sflag (%p1209_p6), [#allocation7], %s2134_s15 }
 0x1be   : >> { %v1220_v43 = vrot.slane %v1199_v32, %v1219_v41  ;;  %v1227_v44 = vrot.slane %v1794_v38, %v1219_v41  ;;  %s1853_s7 = scalar_lea.vmem (%p1209_p6), %s2252_s23, 128  ;;  %s1964_s17 = smov (%p1209_p6), [#allocation10]  }
 0x1bf   : > { %p1854_p8 = scmp.ne.s32.totalorder (%p1209_p6), %s2252_s23, %s1853_s7  ;;  %s1857_s19 = sshll.u32 (%p1209_p6), %s1964_s17, 4  ;;  %s1858_s19 = int_to_ptr.vmem [resolvable:$false] %s1857_s19 }
 0x1c0   : >> { %v1222_v45 = vsub.f32 %v1215_v42, %v1220_v43  ;;  %s1859_s12 = scalar_lea.vmem (%p1209_p6), %s1858_s19, 256  ;;  %p1860_p0 = scmp.lt.s32.totalorder (%p1209_p6), %s2252_s23, %s1858_s19 }
 0x1c1   : > { %p1855_p12 = pnand (%p1209_p6), %p1854_p8, %p2077_p10  ;;  %p1861_p5 = scmp.lt.s32.totalorder (%p1209_p6), %s1859_s12, %s1853_s7 }
 0x1c2   : >> { %v1229_v46 = vmul.f32 %v1227_v44, %v1222_v45 }
 0x1c3   : > { %1211 = sbr.rel (!%p1209_p6) target bundleno = 440 (0x1b8), region = 129  ;;  %p1856_p13 = pneg (%p1209_p6), %p1855_p12 }
 0x1c4   : >> { %vm1230_vm3 = vcmp.ge.f32.partialorder %v1229_v46, 0.0  ;;  %v1231_v47 = vmul.f32 0.2, %v1229_v46  ;;  %p1862_p9 = por (%p1209_p6), %p1861_p5, %p1860_p0 }
 0x1c6   : >> { %v1232_v48 = vsel %vm1230_vm3, %v1229_v46, %v1231_v47  ;;  %p1863_p1 = pnand (%p1209_p6), %p1862_p9, %p1856_p13 }
 0x1c7   : >> { %v1233_v49 = vpack.c.bf16 %v1232_v48, %v1232_v48 }
 0x1c9   : >> { %1236 = vst [vmem:[%s1235_s4] sm:$0x3] %v1233_v49 }
 0x1ca   : > { %1866 = shalt.err (!%p1863_p1)
}
 0x1cb   : > { %s1867_s6 = scalar_lea.hbm %s2249_s27, 128  ;;  %s1871_s5 = scalar_lea.hbm %s2303_s2, 256 }
 0x1cc   : > { %p1868_p2 = scmp.ne.s32.totalorder %s2249_s27, %s1867_s6  ;;  %p1872_p11 = scmp.lt.u32.totalorder %s2249_s27, %s2303_s2 }
 0x1cd   : > { %p1873_p4 = scmp.lt.u32.totalorder %s1871_s5, %s1867_s6  ;;  %p1875_p8 = scmp.lt.u32.totalorder %s1867_s6, %s2249_s27 }
 0x1ce   : > { %p1869_p3 = pnand %p1868_p2, %p2077_p10 }
 0x1cf   : > { %p1874_p6 = por %p1873_p4, %p1872_p11 }
 0x1d0   : > { %p1870_p7 = pneg %p1869_p3 }
 0x1d1   : > { %p1876_p12 = por %p1875_p8, %p1874_p6 }
 0x1d3   : > { %p1877_p13 = pnand %p1876_p12, %p1870_p7 }
 0x1d5   : > { %1880 = shalt.err (!%p1877_p13)
}
 0x1d6   : > { %s1965_s26 = smov 32   ;;  %s1966_s4 = smov 2  }
 0x1d7   : > { %1679 = dma.vmem_to_hbm [thread:$0]  (%p2077_p10), %s2252_s23, 128, %s2249_s27, %s1238_s21, %s1965_s26, %s1965_s26, %s1966_s4  }
 0x1d8 PF: > { %s1267_s18 = sand.u32 1, %s1927_s9   ;;  %p2320_p0 = scmp.ne.s32.totalorder %s2311_s20, 0 }
 0x1d9   : > { %p2321_p5 = scmp.ge.s32.totalorder %s1947_s14, 2  ;;  %s1268_s16 = scalar_lea.sflag [#allocation7], %s1267_s18 }
 0x1db   : > { %p1690_p9 = pnand %p2321_p5, %p2320_p0 }
 0x1dd   : > { %1922 = dma.done.wait (!%p1690_p9), %s1268_s16, 128  }
 0x1de   : > { %1924 = vsyncadd (!%p1690_p9), %s1268_s16, 4294967168  ;;  %s19_s14 = sadd.s32 1, %s1947_s14   ;;  %s2322_s9 = smov %s1931_s10 }
 0x1df   : > { %p16_p1 = scmp.ge.s32.totalorder %s19_s14, 4   ;;  %s2323_s10 = smov %s1935_s11 }
 0x1e0   : > { %s2324_s11 = smov %s2086_s28  ;;  %s2325_s12 = smov %s1943_s13 }
 0x1e1   : > { %s2326_s13 = smov %s2328_s25  ;;  %18 = sbr.rel (!%p16_p1) target bundleno = 7 (0x7), region = 140 }
 0x1e8   :  { %1273 = vsyncpa [#allocation6], 1 }
 0x1e9   :  { %1275 = vsyncpa [#allocation6 + $0x1], 1 }
 0x1ea   :  { %1276 = vsyncpa [#allocation9], 1 }
 0x1eb   :  { %1277 = vsyncpa [#allocation7], 1 }
 0x1ec   :  { %1279 = vsyncpa [#allocation7 + $0x1], 1 }

// kernel: _lambda_.8
= control target key start
LH: loop header
LB: loop body
LE: loop exit
PB: predicated region body
PF: predicated region fallthrough
CT: control target
= control target key end

     0   :  { %7 = vsyncpa [#allocation6], 0  ;;  %s2472_s0 = inlined_call_operand.hbm [shape: bf16[2,6,6,32], index: 0, kind: input, shape index: {}]   ;;  %s2473_s1 = inlined_call_operand.hbm [shape: bf16[16,32,128], index: 1, kind: input, shape index: {}]   ;;  %s2474_s2 = inlined_call_operand.hbm [shape: bf16[2,3,3,128], index: 2, kind: output, shape index: {}]  }
   0x1   :  { %9 = vsyncpa [#allocation6 + $0x1], 0 }
   0x2   :  { %10 = vsyncpa [#allocation9], 0 }
   0x3   :  { %11 = vsyncpa [#allocation7], 0 }
   0x4   :  { %13 = vsyncpa [#allocation7 + $0x1], 0  ;;  %s2137_s9 = smov 0   ;;  %s2139_s10 = smov 0  }
   0x5   :  { %s2141_s11 = smov 0   ;;  %s2143_s12 = smov 0  }
   0x6   :  { %s2145_s13 = smov 0   ;;  %s2147_s14 = smov 0  }
   0x7 LB: > { %s1494_s15 = sadd.s32 4294967295, %s2102_s14   ;;  %s1495_s16 = sadd.s32 4294967294, %s2102_s14   ;;  %s2102_s14 = sphi %s2147_s14, %s19_s14   ;;  %s2098_s13 = sphi %s2145_s13, %s2497_s13   ;;  %s2094_s12 = sphi %s2143_s12, %s2496_s12   ;;  %s2090_s11 = sphi %s2141_s11, %s2495_s11   ;;  %s2086_s10 = sphi %s2139_s10, %s2494_s10   ;;  %s2082_s9 = sphi %s2137_s9, %s2493_s9  }
   0x8   : > { %p51_p0 = scmp.ne.s32.totalorder %s2086_s10, %s2082_s9  ;;  %p2171_p1 = scmp.eq.s32.totalorder %s1494_s15, 0 }
   0x9   : > { %p2175_p2 = scmp.eq.s32.totalorder %s1494_s15, 1  ;;  %p109_p3 = scmp.eq.s32.totalorder %s1495_s16, 1 }
   0xa   : > { %s2479_s17 = scalar_select %p2171_p1, 1, 0 }
   0xb   : > { %s2480_s18 = scalar_select %p2175_p2, 1, 0 }
   0xc   : > { %p2181_p4 = por %p2171_p1, %p51_p0  ;;  %p1496_p5 = scmp.ge.s32.totalorder %s2102_s14, 1 }
   0xd   : > { %p2186_p6 = por %p109_p3, %p51_p0  ;;  %p116_p7 = scmp.lt.s32.totalorder %s2102_s14, 3 }
   0xe   : > { %s2481_s19 = scalar_select %p2181_p4, 1, 0 }
   0xf   : > { %s2482_s20 = scalar_select %p2186_p6, 1, 0 }
  0x10   : > { %p2191_p8 = pnand %p1496_p5, %p116_p7  ;;  %s2112_s22 = smov [#allocation8]  }
  0x11   : > { %s130_s23 = sshll.u32 %s2112_s22, 4  ;;  %s31_s25 = sadd.s32 1, %s2098_s13  ;;  %s131_s23 = int_to_ptr.vmem [resolvable:$true] %s130_s23 }
  0x12   : > { %s2483_s21 = scalar_select %p2191_p8, 1, 0 }
  0x13   : > { %p1820_p9 = pneg %p2191_p8  ;;  %s1950_s28 = scalar_lea.hbm %s2473_s1, 4096 }
  0x14   : > { %p1951_p12 = scmp.ne.s32.totalorder %s2473_s1, %s1950_s28  ;;  %p1957_p5 = scmp.lt.u32.totalorder %s1950_s28, %s2473_s1 }
  0x15   : > { %p2200_p11 = pnand %p1820_p9, %p2171_p1 }
  0x17   : > { %p1952_p13 = pneg %p2200_p11 }
  0x19   : > { %p1953_p0 = pnand %p1952_p13, %p1951_p12 }
  0x1b   : > { %p1954_p3 = pneg %p1953_p0 }
  0x1d   : > { %p1959_p7 = pnand %p1957_p5, %p1954_p3 }
  0x1f   : > { %1962 = shalt.err (!%p1959_p7)
}
  0x20   : > { %s1963_s5 = scalar_lea.vmem %s131_s23, 4096  ;;  %p1971_p1 = scmp.lt.s32.totalorder %s131_s23, %s131_s23 }
  0x21   : > { %p1964_p9 = scmp.ne.s32.totalorder %s131_s23, %s1963_s5  ;;  %p1972_p4 = scmp.lt.s32.totalorder %s1963_s5, %s1963_s5 }
  0x23   : > { %p1966_p10 = pnand %p1964_p9, %p1952_p13  ;;  %p1973_p8 = por %p1972_p4, %p1971_p1 }
  0x25   : > { %p1967_p6 = pneg %p1966_p10 }
  0x27   : > { %p1974_p2 = pnand %p1973_p8, %p1967_p6 }
  0x29   : > { %1977 = shalt.err (!%p1974_p2)
}
  0x2a   : > { %s2113_s6 = smov 64   ;;  %s2114_s7 = smov 4  }
  0x2b   : > { %1823 = dma.hbm_to_vmem [thread:$0]  (!%p2200_p11), %s2473_s1, 4096, %s131_s23, [#allocation9], %s2113_s6, %s2113_s6, %s2114_s7  }
  0x2c   : > { %p33_p1 = scmp.ge.s32.totalorder %s31_s25, 2  ;;  %s38_s16 = sadd.s32 1, %s2090_s11 }
  0x2d   : > { %p45_p2 = scmp.ne.s32.totalorder %s2090_s11, %s2086_s10  ;;  %p46_p4 = scmp.eq.s32.totalorder %s2102_s14, 0 }
  0x2e   : > { %s2499_s25 = smov (%p33_p1, %s31_s25), 0  ;;  %p2485_p8 = scmp.ne.s32.totalorder %s2480_s18, 0 }
  0x2f   : > { %p47_p6 = por %p46_p4, %p45_p2  ;;  %s35_s24 = ssub.s32 %s2098_s13, %s2499_s25 }
  0x30   : > { %p2232_p10 = por %p2485_p8, %p45_p2  ;;  %p1833_p12 = scmp.lt.s32.totalorder %s2102_s14, 2 }
  0x31   : > { %p36_p13 = scmp.eq.s32.totalorder %s35_s24, 0  ;;  %s144_s26 = sand.u32 1, %s2090_s11  }
  0x32   : > { %s1807_s27 = smul.u32 24, %s144_s26  ;;  %p2244_p11 = pnand %p1833_p12, %p47_p6 }
  0x33   : > { %s2241_s28 = scalar_select %p36_p13, %s2090_s11, %s38_s16  }
  0x34   : > { %s1808_s23 = smul.u32 384, %s2098_s13  ;;  %s148_s29 = scalar_lea.vmem [#allocation5], %s1807_s27 }
  0x35   : > { %s155_s30 = sshll.u32 %s148_s29, 4  ;;  %s2255_s8 = scalar_lea.sflag [#allocation6], %s144_s26  ;;  %s2253_s30 = int_to_ptr.vmem [resolvable:$true] %s155_s30 }
  0x36   : > { %s2251_s5 = scalar_lea.hbm %s2472_s0, %s1808_s23  ;;  %p1980_p3 = pneg %p2244_p11 }
  0x37   : > { %s1978_s15 = scalar_lea.hbm %s2251_s5, 384  ;;  %s1983_s27 = scalar_lea.hbm %s2472_s0, 768 }
  0x38   : > { %p1979_p0 = scmp.ne.s32.totalorder %s2251_s5, %s1978_s15  ;;  %p1984_p9 = scmp.lt.u32.totalorder %s2251_s5, %s2472_s0 }
  0x39   : > { %p1985_p1 = scmp.lt.u32.totalorder %s1983_s27, %s1978_s15  ;;  %p1987_p4 = scmp.lt.u32.totalorder %s1978_s15, %s2251_s5 }
  0x3a   : > { %p1981_p5 = pnand %p1980_p3, %p1979_p0 }
  0x3b   : > { %p1986_p2 = por %p1985_p1, %p1984_p9 }
  0x3c   : > { %p1982_p7 = pneg %p1981_p5 }
  0x3d   : > { %p1988_p6 = por %p1987_p4, %p1986_p2 }
  0x3f   : > { %p1989_p8 = pnand %p1988_p6, %p1982_p7 }
  0x41   : > { %1992 = shalt.err (!%p1989_p8)
}
  0x42   : > { %s1993_s26 = scalar_lea.vmem %s2253_s30, 384  ;;  %s2115_s4 = smov [#allocation5]  }
  0x43   : > { %p1994_p12 = scmp.ne.s32.totalorder %s2253_s30, %s1993_s26  ;;  %s1998_s18 = sshll.u32 %s2115_s4, 4  ;;  %s1999_s18 = int_to_ptr.vmem [resolvable:$false] %s1998_s18 }
  0x44   : > { %s2000_s16 = scalar_lea.vmem %s1999_s18, 768  ;;  %p2001_p5 = scmp.lt.s32.totalorder %s2253_s30, %s1999_s18 }
  0x45   : > { %p1996_p13 = pnand %p1994_p12, %p1980_p3  ;;  %p2002_p9 = scmp.lt.s32.totalorder %s2000_s16, %s1993_s26 }
  0x47   : > { %p1997_p0 = pneg %p1996_p13  ;;  %p2003_p1 = por %p2002_p9, %p2001_p5 }
  0x49   : > { %p2004_p2 = pnand %p2003_p1, %p1997_p0 }
  0x4b   : > { %2007 = shalt.err (!%p2004_p2)
}
  0x4c   : > { %1827 = dma.hbm_to_vmem [thread:$0]  (!%p2244_p11), %s2251_s5, 384, %s2253_s30, %s2255_s8, %s2113_s6, %s2113_s6, %s2114_s7  }
  0x4d   : > { %p2488_p3 = scmp.ne.s32.totalorder %s2483_s21, 0 }
  0x4e   : > { %s2289_s15 = sand.u32 (!%p2488_p3), 1, %s2086_s10   ;;  %p2489_p7 = scmp.ne.s32.totalorder (!%p2488_p3), %s2481_s19, 0 }
  0x4f   : > { %167 = sbr.rel (%p2488_p3) target bundleno = 479 (0x1df), region = 28  ;;  %s170_s27 = scalar_lea.sflag (!%p2488_p3), [#allocation6], %s2289_s15 }
  0x50   : > { %s1809_s24 = smul.u32 (!%p2488_p3), 24, %s2289_s15 }
  0x52   : > { %s2293_s23 = scalar_lea.vmem (!%p2488_p3), [#allocation5], %s1809_s24 }
  0x56   : > { %2069 = dma.done.wait (%p2489_p7), %s170_s27, 384  }
  0x57   : > { %2071 = vsyncadd (%p2489_p7), %s170_s27, 4294966912  ;;  %p2490_p11 = scmp.ne.s32.totalorder %s2479_s17, 0 }
  0x59   : > { %2073 = dma.done.wait (%p2490_p11), [#allocation9], 4096  }
  0x5a   : > { %2075 = vsyncadd (%p2490_p11), [#allocation9], 4294963200  ;;  %s1810_s21 = smul.u32 6, %s2289_s15  ;;  %v2116_v0 = vmov 0.0   ;;  %s2306_s7 = smov 0  }
  0x5b   : > { %199 = vst [vmem:[#allocation3] sm:$0x1] %v2116_v0  ;;  %200 = vst [vmem:[#allocation4] sm:$0x1] %v2116_v0 }
  0x5c   : > { %s2304_s6 = scalar_lea.vmem [#allocation10], %s1810_s21 }
  0x5d LB: >> { %v1908_v1 = vld [vmem:[#allocation8 + $0x80] sm:$0xff]   ;;  %v2117_v2 = vmov 0.0   ;;  %v1909_v3 = vld [vmem:[#allocation8 + $0x10] sm:$0xff]   ;;  %v1910_v4 = vld [vmem:[#allocation8 + $0x88] sm:$0xff]   ;;  %vm2118_vm0 = vmmov 0   ;;  %s1502_s17 = sshll.u32 %s2106_s7, 2  ;;  %s2106_s7 = sphi %s2306_s7, %s206_s7  }
  0x5e   : >> { %1686 = vmatprep.subr.bf16.mxu0 %v2117_v2  ;;  %1622 = vmatprep.subr.bf16.mxu1 %v2117_v2  ;;  %v1911_v5 = vld [vmem:[#allocation8 + $0x18] sm:$0xff]   ;;  %s2320_s19 = scalar_lea.vmem %s2293_s23, %s1502_s17 [#allocation5]  ;;  %vm241_vm1 = vcmask 261120   ;;  %v1915_v10 = vld [vmem:[#allocation8 + $0x90] sm:$0xff]   ;;  %v1914_v15 = vld [vmem:[#allocation8] sm:$0xff]   ;;  %vm1292_vm2 = vcmask 1042432   ;;  %s1289_s30 = scalar_lea.vmem [#allocation2], %s1502_s17 }
  0x5f   : >> { %1687 = vmatpush3.bf16.msra.mxu0 %v1908_v1  ;;  %1690 = vmatprep.mubr.msk.bf16.mxu0 %vm2118_vm0, %v2117_v2  ;;  %v1535_v6 = vld [vmem:[%s2320_s19 + $0x8] sm:$0x3]  ;;  %v209_v7 = vld [vmem:[%s2320_s19] sm:$0x3]  ;;  %v1917_v16 = vld [vmem:[#allocation8 + $0x98] sm:$0xff]   ;;  %s206_s7 = sadd.s32 1, %s2106_s7  }
  0x60   : >> { %1623 = vmatpush3.bf16.msra.mxu1 %v1909_v3  ;;  %1688 = vmatprep.subr.bf16.mxu0 %v2117_v2  ;;  %v1539_v8 = vcombine.low %v1535_v6, %v1535_v6  ;;  %v1503_v9 = vcombine.low %v209_v7, %v209_v7  ;;  %v1916_v20 = vld [vmem:[#allocation8 + $0x8] sm:$0xff]   ;;  %v1919_v22 = vld [vmem:[#allocation8 + $0xa0] sm:$0xff]   ;;  %v1925_v29 = vld [vmem:[#allocation8 + $0xb0] sm:$0xff]   ;;  %p203_p4 = scmp.ge.s32.totalorder %s206_s7, 3  }
  0x61   : >> { %1624 = vmatprep.subr.bf16.mxu1 %v2117_v2  ;;  %1626 = vmatprep.mubr.msk.bf16.mxu1 %vm2118_vm0, %v2117_v2  ;;  %v1918_v23 = vld [vmem:[#allocation8 + $0x20] sm:$0xff]   ;;  %v1921_v24 = vld [vmem:[#allocation8 + $0xa8] sm:$0xff]   ;;  %v1924_v33 = vld [vmem:[#allocation8 + $0x30] sm:$0xff]   ;;  %s2410_s3 = smov (%p203_p4), 0  }
  0x62   : >> { %v223_v11 = vshrl.u32 %v1503_v9, 16  ;;  %v225_v12 = vshll.u32 %v1503_v9, 16  ;;  %v822_v13 = vshll.u32 %v1539_v8, 16  ;;  %v820_v18 = vshrl.u32 %v1539_v8, 16  ;;  %v1920_v26 = vld [vmem:[#allocation8 + $0x28] sm:$0xff]   ;;  %v1927_v34 = vld [vmem:[#allocation8 + $0xb8] sm:$0xff]  }
  0x63   : >> { %1689 = vmatpush3.bf16.msra.mxu0 %v1910_v4  ;;  %v1922_v25 = vld [vmem:[%s2320_s19 + $0x8] ss:$0 sps:$4 sm:$0x66]   ;;  %v1923_v28 = vld [vmem:[%s2320_s19] ss:$0 sps:$4 sm:$0x66]  }
  0x64   : >> { %1625 = vmatpush3.bf16.msra.mxu1 %v1911_v5  ;;  %1694 = vmatprep.subr.bf16.mxu0 %v2117_v2  ;;  %v227_v14 = vrot.slane %v225_v12, 1  ;;  %v824_v19 = vrot.slane %v822_v13, 1  ;;  %v891_v27 = vrot.slane %v1922_v25, 1  ;;  %v954_v30 = vshrl.u32 %v1922_v25, 16  ;;  %v1926_v39 = vld [vmem:[#allocation8 + $0x38] sm:$0xff]   ;;  %v1929_v43 = vld [vmem:[#allocation8 + $0xc0] sm:$0xff]  }
  0x65   : >> { %1630 = vmatprep.subr.bf16.mxu1 %v2117_v2  ;;  %v957_v31 = vshll.u32 %v1922_v25, 16  ;;  %v349_v32 = vrot.slane %v1923_v28, 1  ;;  %v412_v35 = vshrl.u32 %v1923_v28, 16  ;;  %v415_v36 = vshll.u32 %v1923_v28, 16  ;;  %v1928_v45 = vld [vmem:[#allocation8 + $0x40] sm:$0xff]   ;;  %v1931_v46 = vld [vmem:[#allocation8 + $0xc8] sm:$0xff]  }
  0x66   : >> { %1691 = vmatmul.mubr.msk.bf16.vlgmr.msra.gmra.mrb[0].mxu0 %vm241_vm1, %v1535_v6  ;;  %v228_v17 = vor.u32 %v227_v14, %v223_v11  ;;  %v825_v21 = vor.u32 %v824_v19, %v820_v18  ;;  %v956_v37 = vrot.slane %v954_v30, 1  ;;  %v1930_v47 = vld [vmem:[#allocation8 + $0x48] sm:$0xff]   ;;  %v1935_v50 = vld [vmem:[#allocation8 + $0xd0] sm:$0xff]   ;;  %v1518_v51 = vld [vmem:[%s2320_s19 + $0x4] sm:$0x3] }
  0x67   : >> { %1695 = vmatpush3.bf16.msra.mxu0 %v1915_v10  ;;  %1698 = vmatprep.mubr.msk.bf16.mxu0 %vm2118_vm0, %v2117_v2  ;;  %v959_v38 = vrot.slane %v957_v31, 2  ;;  %v414_v41 = vrot.slane %v412_v35, 1  ;;  %v417_v42 = vrot.slane %v415_v36, 2  ;;  %v1552_v48 = vld [vmem:[%s2320_s19 + $0xc] sm:$0x3]  ;;  %v1522_v53 = vcombine.low %v1518_v51, %v1518_v51  ;;  %v1934_v54 = vld [vmem:[#allocation8 + $0x50] sm:$0xff]  }
  0x68   : >> { %1696 = vmatprep.subr.bf16.mxu0 %v2117_v2  ;;  %1627 = vmatmul.mubr.msk.bf16.vlgmr.msra.gmra.mrb[0].mxu1 %vm241_vm1, %v228_v17  ;;  %v1556_v49 = vcombine.low %v1552_v48, %v1552_v48  ;;  %v1937_v55 = vld [vmem:[#allocation8 + $0xd8] sm:$0xff]   ;;  %v1939_v63 = vld [vmem:[#allocation8 + $0xe0] sm:$0xff]   ;;  %v1941_v3 = vld [vmem:[#allocation8 + $0xe8] sm:$0xff]  }
  0x69   : >> { %1631 = vmatpush3.bf16.msra.mxu1 %v1914_v15  ;;  %1634 = vmatprep.mubr.msk.bf16.mxu1 %vm2118_vm0, %v2117_v2  ;;  %v960_v40 = vor.u32 %v959_v38, %v956_v37  ;;  %v418_v44 = vor.u32 %v417_v42, %v414_v41  ;;  %v551_v58 = vshll.u32 %v1522_v53, 16  ;;  %v1936_v59 = vld [vmem:[#allocation8 + $0x58] sm:$0xff]   ;;  %v549_v61 = vshrl.u32 %v1522_v53, 16  ;;  %v1938_v1 = vld [vmem:[#allocation8 + $0x60] sm:$0xff]   ;;  %v1940_v5 = vld [vmem:[#allocation8 + $0x68] sm:$0xff]  }
  0x6a   : >> { %1632 = vmatprep.subr.bf16.mxu1 %v2117_v2  ;;  %v1093_v52 = vshll.u32 %v1556_v49, 16  ;;  %v1091_v56 = vshrl.u32 %v1556_v49, 16  ;;  %v1942_v4 = vld [vmem:[%s2320_s19 + $0xc] ss:$0 sps:$4 sm:$0x66]   ;;  %v1945_v8 = vld [vmem:[#allocation8 + $0xf0] sm:$0xff]  }
  0x6b   : >> { %1697 = vmatpush3.bf16.msra.mxu0 %v1917_v16  ;;  %v553_v62 = vrot.slane %v551_v58, 1  ;;  %v1162_v6 = vrot.slane %v1942_v4, 1  ;;  %v1225_v10 = vshrl.u32 %v1942_v4, 16  ;;  %v1228_v11 = vshll.u32 %v1942_v4, 16  ;;  %v1944_v12 = vld [vmem:[#allocation8 + $0x70] sm:$0xff]   ;;  %v1947_v13 = vld [vmem:[#allocation8 + $0xf8] sm:$0xff]  }
  0x6c   : >> { %1702 = vmatprep.subr.bf16.mxu0 %v2117_v2  ;;  %v1095_v57 = vrot.slane %v1093_v52, 1  ;;  %v1946_v18 = vld [vmem:[#allocation8 + $0x78] sm:$0xff]  }
  0x6d   : >> { %1633 = vmatpush3.bf16.msra.mxu1 %v1916_v20  ;;  %v554_v0 = vor.u32 %v553_v62, %v549_v61  ;;  %v1227_v14 = vrot.slane %v1225_v10, 1  ;;  %v1230_v15 = vrot.slane %v1228_v11, 2 }
  0x6e   : >> { %1638 = vmatprep.subr.bf16.mxu1 %v2117_v2  ;;  %v1096_v60 = vor.u32 %v1095_v57, %v1091_v56 }
  0x6f   : >> { %v1231_v19 = vor.u32 %v1230_v15, %v1227_v14 }
  0x72   : >> { %1699 = vmatmul.mubr.msk.bf16.vlgmr.msra.gmra.mrb[0].mxu0 %vm241_vm1, %v825_v21 }
  0x73   : >> { %1703 = vmatpush3.bf16.msra.mxu0 %v1919_v22  ;;  %1706 = vmatprep.mubr.msk.bf16.mxu0 %vm2118_vm0, %v2117_v2 }
  0x74   : >> { %1704 = vmatprep.subr.bf16.mxu0 %v2117_v2  ;;  %1635 = vmatmul.mubr.msk.bf16.vlgmr.msra.gmra.mrb[0].mxu1 %vm241_vm1, %v209_v7  ;;  %v1943_v7 = vld [vmem:[%s2320_s19 + $0x4] ss:$0 sps:$4 sm:$0x66]  }
  0x75   : >> { %1639 = vmatpush3.bf16.msra.mxu1 %v1918_v23  ;;  %1642 = vmatprep.mubr.msk.bf16.mxu1 %vm2118_vm0, %v2117_v2  ;;  %v620_v9 = vrot.slane %v1943_v7, 1  ;;  %v683_v16 = vshrl.u32 %v1943_v7, 16  ;;  %v686_v17 = vshll.u32 %v1943_v7, 16 }
  0x76   : >> { %1640 = vmatprep.subr.bf16.mxu1 %v2117_v2 }
  0x77   : >> { %1705 = vmatpush3.bf16.msra.mxu0 %v1921_v24  ;;  %v685_v20 = vrot.slane %v683_v16, 1  ;;  %v688_v21 = vrot.slane %v686_v17, 2 }
  0x78   : >> { %1710 = vmatprep.subr.bf16.mxu0 %v2117_v2 }
  0x79   : >> { %1641 = vmatpush3.bf16.msra.mxu1 %v1920_v26  ;;  %v689_v22 = vor.u32 %v688_v21, %v685_v20 }
  0x7a   : >> { %1646 = vmatprep.subr.bf16.mxu1 %v2117_v2 }
  0x7e   : >> { %1707 = vmatmul.mubr.msk.bf16.vlgmr.msra.gmra.mrb[0].mxu0 %vm241_vm1, %v891_v27 }
  0x7f   : >> { %1711 = vmatpush3.bf16.msra.mxu0 %v1925_v29  ;;  %1714 = vmatprep.mubr.msk.bf16.mxu0 %vm2118_vm0, %v2117_v2 }
  0x80   : >> { %1712 = vmatprep.subr.bf16.mxu0 %v2117_v2  ;;  %1643 = vmatmul.mubr.msk.bf16.vlgmr.msra.gmra.mrb[0].mxu1 %vm241_vm1, %v349_v32 }
  0x81   : >> { %1647 = vmatpush3.bf16.msra.mxu1 %v1924_v33  ;;  %1650 = vmatprep.mubr.msk.bf16.mxu1 %vm2118_vm0, %v2117_v2 }
  0x82   : >> { %1648 = vmatprep.subr.bf16.mxu1 %v2117_v2 }
  0x83   : >> { %1713 = vmatpush3.bf16.msra.mxu0 %v1927_v34 }
  0x84   : >> { %1718 = vmatprep.subr.bf16.mxu0 %v2117_v2 }
  0x85   : >> { %1649 = vmatpush3.bf16.msra.mxu1 %v1926_v39 }
  0x86   : >> { %1654 = vmatprep.subr.bf16.mxu1 %v2117_v2 }
  0x8a   : >> { %1715 = vmatmul.mubr.msk.bf16.vlgmr.msra.gmra.mrb[0].mxu0 %vm241_vm1, %v960_v40 }
  0x8b   : >> { %1719 = vmatpush3.bf16.msra.mxu0 %v1929_v43  ;;  %1722 = vmatprep.mubr.msk.bf16.mxu0 %vm2118_vm0, %v2117_v2  ;;  %v1291_v43 = vld [vmem:[#allocation3] sm:$0x1] }
  0x8c   : >> { %1720 = vmatprep.subr.bf16.mxu0 %v2117_v2  ;;  %1651 = vmatmul.mubr.msk.bf16.vlgmr.msra.gmra.mrb[0].mxu1 %vm241_vm1, %v418_v44 }
  0x8d   : >> { %1655 = vmatpush3.bf16.msra.mxu1 %v1928_v45  ;;  %1658 = vmatprep.mubr.msk.bf16.mxu1 %vm2118_vm0, %v2117_v2 }
  0x8e   : >> { %1656 = vmatprep.subr.bf16.mxu1 %v2117_v2 }
  0x8f   : >> { %1721 = vmatpush3.bf16.msra.mxu0 %v1931_v46  ;;  %v1302_v46 = vld [vmem:[#allocation4] sm:$0x1] }
  0x90   : >> { %1726 = vmatprep.subr.bf16.mxu0 %v2117_v2 }
  0x91   : >> { %1657 = vmatpush3.bf16.msra.mxu1 %v1930_v47 }
  0x92   : >> { %1662 = vmatprep.subr.bf16.mxu1 %v2117_v2 }
  0x96   : >> { %1723 = vmatmul.mubr.msk.bf16.vlgmr.msra.gmra.mrb[0].mxu0 %vm241_vm1, %v1552_v48 }
  0x97   : >> { %1727 = vmatpush3.bf16.msra.mxu0 %v1935_v50  ;;  %1730 = vmatprep.mubr.msk.bf16.mxu0 %vm2118_vm0, %v2117_v2 }
  0x98   : >> { %1728 = vmatprep.subr.bf16.mxu0 %v2117_v2  ;;  %1659 = vmatmul.mubr.msk.bf16.vlgmr.msra.gmra.mrb[0].mxu1 %vm241_vm1, %v1518_v51 }
  0x99   : >> { %1663 = vmatpush3.bf16.msra.mxu1 %v1934_v54  ;;  %1666 = vmatprep.mubr.msk.bf16.mxu1 %vm2118_vm0, %v2117_v2 }
  0x9a   : >> { %1664 = vmatprep.subr.bf16.mxu1 %v2117_v2 }
  0x9b   : >> { %1729 = vmatpush3.bf16.msra.mxu0 %v1937_v55 }
  0x9c   : >> { %1734 = vmatprep.subr.bf16.mxu0 %v2117_v2 }
  0x9d   : >> { %1665 = vmatpush3.bf16.msra.mxu1 %v1936_v59 }
  0x9e   : >> { %1670 = vmatprep.subr.bf16.mxu1 %v2117_v2 }
  0xa2   : >> { %1731 = vmatmul.mubr.msk.bf16.vlgmr.msra.gmra.mrb[0].mxu0 %vm241_vm1, %v1096_v60 }
  0xa3   : >> { %1735 = vmatpush3.bf16.msra.mxu0 %v1939_v63  ;;  %1738 = vmatprep.mubr.msk.bf16.mxu0 %vm2118_vm0, %v2117_v2 }
  0xa4   : >> { %1736 = vmatprep.subr.bf16.mxu0 %v2117_v2  ;;  %1667 = vmatmul.mubr.msk.bf16.vlgmr.msra.gmra.mrb[0].mxu1 %vm241_vm1, %v554_v0 }
  0xa5   : >> { %1671 = vmatpush3.bf16.msra.mxu1 %v1938_v1  ;;  %1674 = vmatprep.mubr.msk.bf16.mxu1 %vm2118_vm0, %v2117_v2 }
  0xa6   : >> { %1672 = vmatprep.subr.bf16.mxu1 %v2117_v2 }
  0xa7   : >> { %1737 = vmatpush3.bf16.msra.mxu0 %v1941_v3 }
  0xa8   : >> { %1742 = vmatprep.subr.bf16.mxu0 %v2117_v2 }
  0xa9   : >> { %1673 = vmatpush3.bf16.msra.mxu1 %v1940_v5 }
  0xaa   : >> { %1678 = vmatprep.subr.bf16.mxu1 %v2117_v2 }
  0xae   : >> { %1739 = vmatmul.mubr.msk.bf16.vlgmr.msra.gmra.mrb[0].mxu0 %vm241_vm1, %v1162_v6 }
  0xaf   : >> { %1743 = vmatpush3.bf16.msra.mxu0 %v1945_v8  ;;  %1746 = vmatprep.mubr.msk.bf16.mxu0 %vm2118_vm0, %v2117_v2 }
  0xb0   : >> { %1744 = vmatprep.subr.bf16.mxu0 %v2117_v2  ;;  %1675 = vmatmul.mubr.msk.bf16.vlgmr.msra.gmra.mrb[0].mxu1 %vm241_vm1, %v620_v9 }
  0xb1   : >> { %1679 = vmatpush3.bf16.msra.mxu1 %v1944_v12  ;;  %1682 = vmatprep.mubr.msk.bf16.mxu1 %vm2118_vm0, %v2117_v2 }
  0xb2   : >> { %1680 = vmatprep.subr.bf16.mxu1 %v2117_v2 }
  0xb3   : >> { %1745 = vmatpush3.bf16.msra.mxu0 %v1947_v13 }
  0xb5   : >> { %1681 = vmatpush3.bf16.msra.mxu1 %v1946_v18 }
  0xba   : >> { %1747 = vmatmul.mubr.msk.bf16.vlgmr.msra.gmra.mrb[0].mxu0 %vm241_vm1, %v1231_v19 }
  0xbc   : >> { %1683 = vmatmul.mubr.msk.bf16.vlgmr.msra.gmra.mrb[0].mxu1 %vm241_vm1, %v689_v22 }
 0x18d   : >> { %v1281_v23 = vpop.f32.mrb[0].mxu0 }
 0x18e   : >> { %v1748_v24 = vpop.f32.mrb[1].mxu0 }
 0x18f   : >> { %v1284_v25 = vpop.f32.mrb[2].mxu0  ;;  %v739_v27 = vpop.f32.mrb[0].mxu1 }
 0x190   : >> { %v1749_v26 = vpop.f32.mrb[3].mxu0  ;;  %v1750_v28 = vadd.f32 %v1281_v23, %v739_v27  ;;  %v1684_v29 = vpop.f32.mrb[1].mxu1 }
 0x191   : >> { %v742_v30 = vpop.f32.mrb[2].mxu1 }
 0x192   : >> { %1290 = vst [vmem:[%s1289_s30] sm:$0x7] %v1750_v28  ;;  %v1293_v2 = vsel %vm1292_vm2, %v1750_v28, 0.0  ;;  %v1303_v31 = vmul.f32 %v1750_v28, %v1750_v28  ;;  %v1685_v32 = vpop.f32.mrb[3].mxu1 }
 0x193   : >> { %v1294_v33 = vrot.slane %v1293_v2, 4 }
 0x194   : >> { %v1304_v34 = vsel %vm1292_vm2, %v1303_v31, 0.0 }
 0x195   : >> { %v1295_v35 = vadd.f32 %v1294_v33, %v1293_v2  ;;  %v1305_v36 = vrot.slane %v1304_v34, 4 }
 0x197   : >> { %v1296_v37 = vrot.slane %v1295_v35, 2  ;;  %v1306_v38 = vadd.f32 %v1305_v36, %v1304_v34 }
 0x199   : >> { %v1297_v39 = vadd.f32 %v1296_v37, %v1295_v35  ;;  %v1307_v40 = vrot.slane %v1306_v38, 2 }
 0x19b   : >> { %v1298_v41 = vrot.slane %v1297_v39, 1  ;;  %v1308_v42 = vadd.f32 %v1307_v40, %v1306_v38 }
 0x19d   : >> { %v1299_v44 = vadd.f32 %v1298_v41, %v1297_v39  ;;  %v1309_v45 = vrot.slane %v1308_v42, 1  ;;  %205 = sbr.rel (!%p203_p4) target bundleno = 93 (0x5d), region = 114 }
 0x19f   : >> { %v1300_v47 = vadd.f32 %v1299_v44, %v1291_v43  ;;  %v1310_v48 = vadd.f32 %v1309_v45, %v1308_v42 }
 0x1a1   : >> { %1301 = vst [vmem:[#allocation3] sm:$0x1] %v1300_v47  ;;  %v1311_v49 = vadd.f32 %v1310_v48, %v1302_v46 }
 0x1a3   : >> { %1312 = vst [vmem:[#allocation4] sm:$0x1] %v1311_v49 }
 0x1a8   : > { %v1313_v50 = vld [vmem:[#allocation3] sm:$0x1] }
 0x1a9   : > { %v1314_v52 = vmul.f32 0.11111111, %v1313_v50 }
 0x1aa   : > { %v1315_v51 = vld [vmem:[#allocation4] sm:$0x1] }
 0x1ab   : > { %v1316_v53 = vmul.f32 0.11111111, %v1315_v51  ;;  %v1317_v54 = vmul.f32 %v1314_v52, %v1314_v52 }
 0x1ad   : > { %v1318_v55 = vsub.f32 %v1316_v53, %v1317_v54 }
 0x1af   : > { %v1319_v56 = vmax.f32 %v1318_v55, 0.0 }
 0x1b1   : > { %v1320_v57 = vadd.f32 1e-05, %v1319_v56 }
 0x1b3   : > { %1948 = vrsqrt.f32 %v1320_v57 }
 0x1bd   : > { %v1949_v58 = vpop.eup %1948 }
 0x1be LB: >> { %v1332_v59 = vlaneseq  ;;  %s1569_s5 = sshll.u32 %s2110_s3, 2  ;;  %s1570_s29 = sshll.u32 %s2110_s3, 1  ;;  %vm1351_vm3 = vcmask 1041408   ;;  %vm1352_vm4 = vsmask.f32 1280  ;;  %s2110_s3 = sphi %s2410_s3, %s1327_s3  }
 0x1bf   : >> { %s1329_s8 = scalar_lea.vmem [#allocation2], %s1569_s5  ;;  %s1350_s26 = scalar_lea.vmem %s2304_s6, %s1570_s29 [#allocation10]  ;;  %vm1353_vm6 = vmand %vm1351_vm3, %vm1352_vm4 }
 0x1c0   : >> { %v1333_v60 = vshrl.u32 %v1332_v59, 7  ;;  %v1330_v62 = vld [vmem:[%s1329_s8] sm:$0x7]  ;;  %s1327_s3 = sadd.s32 1, %s2110_s3  }
 0x1c1   : >> { %v1354_v6 = vld [vmem:[%s1350_s26] sm:$0x3]  ;;  %p1324_p6 = scmp.ge.s32.totalorder %s1327_s3, 3  }
 0x1c2   : >> { %v1334_v61 = vsub.s32 0, %v1333_v60  ;;  %s1811_s4 = smul.u32 (%p1324_p6), 96, %s2094_s12  ;;  %s1372_s18 = sshll.u32 (%p1324_p6), %s2304_s6, 4  ;;  %s2423_s18 = int_to_ptr.vmem [resolvable:$true] %s1372_s18 }
 0x1c3   : > { %s1358_s23 = scalar_lea.sflag (%p1324_p6), [#allocation7], %s2289_s15  ;;  %s2008_s21 = scalar_lea.vmem (%p1324_p6), %s2423_s18, 96 }
 0x1c4   : >> { %v1335_v63 = vrot.slane %v1314_v52, %v1334_v61  ;;  %v1342_v0 = vrot.slane %v1949_v58, %v1334_v61  ;;  %s2421_s27 = scalar_lea.hbm (%p1324_p6), %s2474_s2, %s1811_s4  ;;  %p2009_p8 = scmp.ne.s32.totalorder (%p1324_p6), %s2423_s18, %s2008_s21 }
 0x1c5   : > { %s2119_s7 = smov (%p1324_p6), [#allocation10]  }
 0x1c6   : >> { %v1337_v1 = vsub.f32 %v1330_v62, %v1335_v63  ;;  %p2010_p12 = pnand (%p1324_p6), %p2009_p8, %p2232_p10  ;;  %s2012_s17 = sshll.u32 (%p1324_p6), %s2119_s7, 4  ;;  %s2013_s17 = int_to_ptr.vmem [resolvable:$false] %s2012_s17 }
 0x1c7   : > { %s2014_s12 = scalar_lea.vmem (%p1324_p6), %s2013_s17, 192  ;;  %p2015_p0 = scmp.lt.s32.totalorder (%p1324_p6), %s2423_s18, %s2013_s17 }
 0x1c8   : >> { %v1344_v3 = vmul.f32 %v1342_v0, %v1337_v1  ;;  %p2011_p13 = pneg (%p1324_p6), %p2010_p12  ;;  %p2016_p5 = scmp.lt.s32.totalorder (%p1324_p6), %s2014_s12, %s2008_s21 }
 0x1ca   : >> { %vm1345_vm5 = vcmp.ge.f32.partialorder %v1344_v3, 0.0  ;;  %v1346_v4 = vmul.f32 0.2, %v1344_v3  ;;  %1326 = sbr.rel (!%p1324_p6) target bundleno = 446 (0x1be), region = 125  ;;  %p2017_p9 = por (%p1324_p6), %p2016_p5, %p2015_p0 }
 0x1cc   : >> { %v1347_v5 = vsel %vm1345_vm5, %v1344_v3, %v1346_v4  ;;  %p2018_p1 = pnand (%p1324_p6), %p2017_p9, %p2011_p13 }
 0x1cd   : >> { %v1348_v7 = vpack.c.bf16 %v1347_v5, %v1347_v5 }
 0x1cf   : >> { %v1355_v8 = vsel %vm1353_vm6, %v1348_v7, %v1354_v6 }
 0x1d0   : >> { %1356 = vst [vmem:[%s1350_s26] sm:$0x3] %v1355_v8 }
 0x1d1   : > { %2021 = shalt.err (!%p2018_p1)
}
 0x1d2   : > { %s2022_s6 = scalar_lea.hbm %s2421_s27, 96  ;;  %s2026_s3 = scalar_lea.hbm %s2474_s2, 192 }
 0x1d3   : > { %p2023_p2 = scmp.ne.s32.totalorder %s2421_s27, %s2022_s6  ;;  %p2027_p11 = scmp.lt.u32.totalorder %s2421_s27, %s2474_s2 }
 0x1d4   : > { %p2028_p4 = scmp.lt.u32.totalorder %s2026_s3, %s2022_s6  ;;  %p2030_p8 = scmp.lt.u32.totalorder %s2022_s6, %s2421_s27 }
 0x1d5   : > { %p2024_p3 = pnand %p2023_p2, %p2232_p10 }
 0x1d6   : > { %p2029_p6 = por %p2028_p4, %p2027_p11 }
 0x1d7   : > { %p2025_p7 = pneg %p2024_p3 }
 0x1d8   : > { %p2031_p12 = por %p2030_p8, %p2029_p6 }
 0x1da   : > { %p2032_p13 = pnand %p2031_p12, %p2025_p7 }
 0x1dc   : > { %2035 = shalt.err (!%p2032_p13)
}
 0x1dd   : > { %s2120_s29 = smov 32   ;;  %s2121_s26 = smov 2  }
 0x1de   : > { %1818 = dma.vmem_to_hbm [thread:$0]  (%p2232_p10), %s2423_s18, 96, %s2421_s27, %s1358_s23, %s2120_s29, %s2120_s29, %s2121_s26  }
 0x1df PF: > { %s1387_s4 = sand.u32 1, %s2082_s9   ;;  %p2491_p0 = scmp.ne.s32.totalorder %s2482_s20, 0 }
 0x1e0   : > { %p2492_p5 = scmp.ge.s32.totalorder %s2102_s14, 2  ;;  %s1388_s16 = scalar_lea.sflag [#allocation7], %s1387_s4 }
 0x1e2   : > { %p1829_p9 = pnand %p2492_p5, %p2491_p0 }
 0x1e4   : > { %2077 = dma.done.wait (!%p1829_p9), %s1388_s16, 96  }
 0x1e5   : > { %2079 = vsyncadd (!%p1829_p9), %s1388_s16, 4294967200  ;;  %s19_s14 = sadd.s32 1, %s2102_s14   ;;  %s2493_s9 = smov %s2086_s10 }
 0x1e6   : > { %p16_p1 = scmp.ge.s32.totalorder %s19_s14, 4   ;;  %s2494_s10 = smov %s2090_s11 }
 0x1e7   : > { %s2495_s11 = smov %s2241_s28  ;;  %s2496_s12 = smov %s2098_s13 }
 0x1e8   : > { %s2497_s13 = smov %s2499_s25  ;;  %18 = sbr.rel (!%p16_p1) target bundleno = 7 (0x7), region = 136 }
 0x1ef   :  { %1393 = vsyncpa [#allocation6], 1 }
 0x1f0   :  { %1395 = vsyncpa [#allocation6 + $0x1], 1 }
 0x1f1   :  { %1396 = vsyncpa [#allocation9], 1 }
 0x1f2   :  { %1397 = vsyncpa [#allocation7], 1 }
 0x1f3   :  { %1399 = vsyncpa [#allocation7 + $0x1], 1 }

// kernel: _lambda_.9
= control target key start
LH: loop header
LB: loop body
LE: loop exit
PB: predicated region body
PF: predicated region fallthrough
CT: control target
= control target key end

     0   :  { %8 = vsyncpa [#allocation3], 0  ;;  %s2954_s0 = inlined_call_operand.hbm [shape: bf16[2,5,5,64], index: 0, kind: input, shape index: {}]   ;;  %s2955_s1 = inlined_call_operand.hbm [shape: bf16[16,64,128], index: 1, kind: input, shape index: {}]   ;;  %s2956_s2 = inlined_call_operand.hbm [shape: f32[1,128], index: 2, kind: input, shape index: {}]   ;;  %s2957_s3 = inlined_call_operand.hbm [shape: bf16[2,2,2,128], index: 3, kind: output, shape index: {}]  }
   0x1   :  { %10 = vsyncpa [#allocation3 + $0x1], 0 }
   0x2   :  { %11 = vsyncpa [#allocation6], 0 }
   0x3   :  { %12 = vsyncpa [#allocation4], 0 }
   0x4   :  { %14 = vsyncpa [#allocation4 + $0x1], 0  ;;  %s2543_s12 = smov 0   ;;  %s2545_s13 = smov 0  }
   0x5   :  { %s2547_s14 = smov 0   ;;  %s2549_s15 = smov 0  }
   0x6   :  { %s2551_s16 = smov 0   ;;  %s2553_s17 = smov 0  }
   0x7 LB: > { %s1757_s18 = sadd.s32 4294967295, %s2507_s17   ;;  %s1758_s19 = sadd.s32 4294967294, %s2507_s17   ;;  %s2507_s17 = sphi %s2553_s17, %s20_s17   ;;  %s2503_s16 = sphi %s2551_s16, %s2979_s16   ;;  %s2499_s15 = sphi %s2549_s15, %s2978_s15   ;;  %s2495_s14 = sphi %s2547_s14, %s2977_s14   ;;  %s2491_s13 = sphi %s2545_s13, %s2976_s13   ;;  %s2487_s12 = sphi %s2543_s12, %s2975_s12  }
   0x8   : > { %p52_p0 = scmp.ne.s32.totalorder %s2491_s13, %s2487_s12  ;;  %p2577_p1 = scmp.eq.s32.totalorder %s1757_s18, 0 }
   0x9   : > { %p2581_p2 = scmp.eq.s32.totalorder %s1757_s18, 1  ;;  %p136_p3 = scmp.eq.s32.totalorder %s1758_s19, 1 }
   0xa   : > { %s2962_s20 = scalar_select %p2577_p1, 1, 0 }
   0xb   : > { %p2587_p4 = por %p2577_p1, %p52_p0  ;;  %p1759_p5 = scmp.ge.s32.totalorder %s2507_s17, 1 }
   0xc   : > { %p2592_p6 = por %p136_p3, %p52_p0  ;;  %p143_p7 = scmp.lt.s32.totalorder %s2507_s17, 3 }
   0xd   : > { %s2964_s22 = scalar_select %p2587_p4, 1, 0 }
   0xe   : > { %s2965_s23 = scalar_select %p2592_p6, 1, 0 }
   0xf   : > { %p2597_p8 = pnand %p1759_p5, %p143_p7  ;;  %s2513_s25 = smov [#allocation5]  }
  0x10   : > { %s157_s26 = sshll.u32 %s2513_s25, 4  ;;  %s2514_s28 = smov [#allocation7]   ;;  %s2601_s26 = int_to_ptr.vmem [resolvable:$true] %s157_s26 }
  0x11   : > { %p2170_p9 = pneg %p2597_p8  ;;  %s173_s29 = sshll.u32 %s2514_s28, 4  ;;  %s2612_s29 = int_to_ptr.vmem [resolvable:$true] %s173_s29 }
  0x12   : > { %s2331_s5 = scalar_lea.hbm %s2955_s1, 8192 }
  0x13   : > { %p2608_p11 = pnand %p2170_p9, %p2577_p1  ;;  %p2332_p12 = scmp.ne.s32.totalorder %s2955_s1, %s2331_s5 }
  0x14   : > { %p2338_p5 = scmp.lt.u32.totalorder %s2331_s5, %s2955_s1 }
  0x15   : > { %p2333_p13 = pneg %p2608_p11 }
  0x17   : > { %p2334_p0 = pnand %p2333_p13, %p2332_p12 }
  0x19   : > { %p2335_p3 = pneg %p2334_p0 }
  0x1b   : > { %p2340_p7 = pnand %p2338_p5, %p2335_p3 }
  0x1d   : > { %2343 = shalt.err (!%p2340_p7)
}
  0x1e   : > { %s2344_s10 = scalar_lea.vmem %s2601_s26, 8192  ;;  %p2352_p1 = scmp.lt.s32.totalorder %s2601_s26, %s2601_s26 }
  0x1f   : > { %p2345_p9 = scmp.ne.s32.totalorder %s2601_s26, %s2344_s10  ;;  %p2353_p12 = scmp.lt.s32.totalorder %s2344_s10, %s2344_s10 }
  0x21   : > { %p2347_p10 = pnand %p2345_p9, %p2333_p13  ;;  %p2354_p0 = por %p2353_p12, %p2352_p1 }
  0x23   : > { %p2348_p6 = pneg %p2347_p10 }
  0x25   : > { %p2355_p4 = pnand %p2354_p0, %p2348_p6 }
  0x27   : > { %2358 = shalt.err (!%p2355_p4)
}
  0x28   : > { %s2515_s11 = smov 64   ;;  %s2516_s18 = smov 4  }
  0x29   : > { %2173 = dma.hbm_to_vmem [thread:$0]  (!%p2608_p11), %s2955_s1, 8192, %s2601_s26, [#allocation6], %s2515_s11, %s2515_s11, %s2516_s18  }
  0x2a   : > { %s2359_s4 = scalar_lea.hbm %s2956_s2, 16 }
  0x2b   : > { %p2360_p1 = scmp.ne.s32.totalorder %s2956_s2, %s2359_s4  ;;  %p2366_p10 = scmp.lt.u32.totalorder %s2359_s4, %s2956_s2 }
  0x2d   : > { %p2362_p4 = pnand %p2360_p1, %p2333_p13 }
  0x2f   : > { %p2363_p6 = pneg %p2362_p4 }
  0x31   : > { %p2368_p3 = pnand %p2366_p10, %p2363_p6 }
  0x33   : > { %2371 = shalt.err (!%p2368_p3)
}
  0x34   : > { %s2372_s26 = scalar_lea.vmem %s2612_s29, 16  ;;  %s2379_s9 = scalar_lea.vmem %s2612_s29, 32 }
  0x35   : > { %p2373_p5 = scmp.ne.s32.totalorder %s2612_s29, %s2372_s26  ;;  %p2380_p12 = scmp.lt.s32.totalorder %s2612_s29, %s2612_s29 }
  0x36   : > { %p2381_p0 = scmp.lt.s32.totalorder %s2379_s9, %s2372_s26 }
  0x37   : > { %p2375_p7 = pnand %p2373_p5, %p2333_p13 }
  0x38   : > { %p2382_p1 = por %p2381_p0, %p2380_p12 }
  0x39   : > { %p2376_p9 = pneg %p2375_p7 }
  0x3b   : > { %p2383_p4 = pnand %p2382_p1, %p2376_p9 }
  0x3d   : > { %2386 = shalt.err (!%p2383_p4)
}
  0x3e   : > { %2176 = dma.hbm_to_vmem [thread:$0]  (!%p2608_p11), %s2956_s2, 16, %s2612_s29, [#allocation6]  }
  0x3f   : > { %s32_s25 = sadd.s32 1, %s2503_s16  ;;  %s39_s28 = sadd.s32 1, %s2495_s14 }
  0x40   : > { %p34_p13 = scmp.ge.s32.totalorder %s32_s25, 2  ;;  %p46_p6 = scmp.ne.s32.totalorder %s2495_s14, %s2491_s13 }
  0x41   : > { %p47_p10 = scmp.eq.s32.totalorder %s2507_s17, 0  ;;  %p2187_p3 = scmp.lt.s32.totalorder %s2507_s17, 2 }
  0x42   : > { %s2981_s25 = smov (%p34_p13, %s32_s25), 0  ;;  %p2680_p7 = por %p2581_p2, %p46_p6 }
  0x43   : > { %p48_p5 = por %p47_p10, %p46_p6  ;;  %s36_s30 = ssub.s32 %s2503_s16, %s2981_s25 }
  0x44   : > { %s2968_s27 = scalar_select %p2680_p7, 1, 0 }
  0x45   : > { %s184_s4 = sand.u32 1, %s2495_s14   ;;  %p37_p9 = scmp.eq.s32.totalorder %s36_s30, 0 }
  0x46   : > { %s2155_s29 = smul.u32 20, %s184_s4  ;;  %p2687_p11 = pnand %p2187_p3, %p48_p5 }
  0x47   : > { %s2692_s6 = scalar_select %p37_p9, %s2495_s14, %s39_s28  }
  0x48   : > { %s2156_s7 = smul.u32 320, %s2503_s16  ;;  %s188_s8 = scalar_lea.vmem [#allocation2], %s2155_s29 }
  0x49   : > { %s195_s26 = sshll.u32 %s188_s8, 4  ;;  %s2702_s19 = scalar_lea.sflag [#allocation3], %s184_s4  ;;  %s2700_s26 = int_to_ptr.vmem [resolvable:$true] %s195_s26 }
  0x4a   : > { %s2698_s10 = scalar_lea.hbm %s2954_s0, %s2156_s7  ;;  %p2389_p12 = pneg %p2687_p11 }
  0x4b   : > { %s2387_s30 = scalar_lea.hbm %s2698_s10, 320  ;;  %s2392_s7 = scalar_lea.hbm %s2954_s0, 640 }
  0x4c   : > { %p2388_p2 = scmp.ne.s32.totalorder %s2698_s10, %s2387_s30  ;;  %p2393_p4 = scmp.lt.u32.totalorder %s2698_s10, %s2954_s0 }
  0x4d   : > { %p2394_p13 = scmp.lt.u32.totalorder %s2392_s7, %s2387_s30  ;;  %p2396_p10 = scmp.lt.u32.totalorder %s2387_s30, %s2698_s10 }
  0x4e   : > { %p2390_p0 = pnand %p2389_p12, %p2388_p2 }
  0x4f   : > { %p2395_p6 = por %p2394_p13, %p2393_p4 }
  0x50   : > { %p2391_p1 = pneg %p2390_p0 }
  0x51   : > { %p2397_p3 = por %p2396_p10, %p2395_p6 }
  0x53   : > { %p2398_p5 = pnand %p2397_p3, %p2391_p1 }
  0x55   : > { %2401 = shalt.err (!%p2398_p5)
}
  0x56   : > { %s2402_s4 = scalar_lea.vmem %s2700_s26, 320  ;;  %s2517_s9 = smov [#allocation2]  }
  0x57   : > { %p2403_p9 = scmp.ne.s32.totalorder %s2700_s26, %s2402_s4  ;;  %s2407_s28 = sshll.u32 %s2517_s9, 4  ;;  %s2408_s28 = int_to_ptr.vmem [resolvable:$false] %s2407_s28 }
  0x58   : > { %s2409_s29 = scalar_lea.vmem %s2408_s28, 640  ;;  %p2410_p7 = scmp.lt.s32.totalorder %s2700_s26, %s2408_s28 }
  0x59   : > { %p2405_p2 = pnand %p2403_p9, %p2389_p12  ;;  %p2411_p4 = scmp.lt.s32.totalorder %s2409_s29, %s2402_s4 }
  0x5b   : > { %p2406_p0 = pneg %p2405_p2  ;;  %p2412_p13 = por %p2411_p4, %p2410_p7 }
  0x5d   : > { %p2413_p6 = pnand %p2412_p13, %p2406_p0 }
  0x5f   : > { %2416 = shalt.err (!%p2413_p6)
}
  0x60   : > { %2180 = dma.hbm_to_vmem [thread:$0]  (!%p2687_p11), %s2698_s10, 320, %s2700_s26, %s2702_s19, %s2515_s11, %s2515_s11, %s2516_s18  }
  0x61   : > { %207 = sbr.rel (%p2597_p8) target bundleno = 474 (0x1da), region = 32  ;;  %s2736_s30 = sand.u32 (!%p2597_p8), 1, %s2491_s13  }
  0x62   : > { %s2157_s7 = smul.u32 (!%p2597_p8), 20, %s2736_s30  ;;  %s210_s8 = scalar_lea.sflag (!%p2597_p8), [#allocation3], %s2736_s30 }
  0x63   : > { %p2970_p7 = scmp.ne.s32.totalorder (!%p2597_p8), %s2964_s22, 0 }
  0x64   : > { %s2740_s21 = scalar_lea.vmem (!%p2597_p8), [#allocation2], %s2157_s7 }
  0x68   : > { %2474 = dma.done.wait (%p2970_p7), %s210_s8, 320  }
  0x69   : > { %2476 = vsyncadd (%p2970_p7), %s210_s8, 4294966976  ;;  %p2971_p11 = scmp.ne.s32.totalorder %s2962_s20, 0 }
  0x6b   : > { %2478 = dma.done.wait (%p2971_p11), [#allocation6], 8208  }
  0x6c   : > { %2480 = vsyncadd (%p2971_p11), [#allocation6], 4294959088  ;;  %s1767_s24 = sshll.u32 %s2736_s30, 1  ;;  %v2751_v0 = vld [vmem:[#allocation7] ss:$0 sm:$0xff]  ;;  %s2755_s18 = smov 0  }
  0x6d   : > { %s2753_s11 = scalar_lea.vmem [#allocation8], %s1767_s24 }
  0x6e LB: >> { %v2255_v1 = vld [vmem:[#allocation5 + $0x20] sm:$0xff]   ;;  %v2518_v2 = vmov 0.0   ;;  %v2257_v4 = vld [vmem:[#allocation5 + $0x28] sm:$0xff]   ;;  %vm2519_vm0 = vmmov 0   ;;  %s1769_s20 = sshll.u32 %s2511_s18, 2  ;;  %v2259_v6 = vld [vmem:[#allocation5 + $0x30] sm:$0xff]   ;;  %s1617_s5 = scalar_lea.vmem %s2753_s11, %s2511_s18 [#allocation8]  ;;  %s2511_s18 = sphi %s2755_s18, %s257_s18  }
  0x6f   : >> { %1963 = vmatprep.subr.bf16.mxu0 %v2518_v2  ;;  %1975 = vmatprep.subr.bf16.mxu1 %v2518_v2  ;;  %v2256_v3 = vld [vmem:[#allocation5] sm:$0xff]   ;;  %v2258_v5 = vld [vmem:[#allocation5 + $0x8] sm:$0xff]   ;;  %s2770_s22 = scalar_lea.vmem %s2740_s21, %s1769_s20 [#allocation2]  ;;  %v2260_v7 = vld [vmem:[#allocation5 + $0x10] sm:$0xff]   ;;  %vm313_vm1 = vcmask 523264   ;;  %s257_s18 = sadd.s32 1, %s2511_s18  }
  0x70   : >> { %1964 = vmatpush3.bf16.msra.mxu0 %v2255_v1  ;;  %1971 = vmatprep.mubr.msk.bf16.mxu0 %vm2519_vm0, %v2518_v2  ;;  %v2263_v8 = vld [vmem:[%s2770_s22] ss:$0 sps:$4 sm:$0x33]   ;;  %v2264_v14 = vld [vmem:[#allocation5 + $0x40] sm:$0xff]   ;;  %v2266_v18 = vld [vmem:[#allocation5 + $0x48] sm:$0xff]   ;;  %p254_p8 = scmp.ge.s32.totalorder %s257_s18, 2  }
  0x71   : >> { %1976 = vmatpush3.bf16.msra.mxu1 %v2256_v3  ;;  %1965 = vmatprep.subr.bf16.mxu0 %v2518_v2  ;;  %v2261_v9 = vld [vmem:[#allocation5 + $0x38] sm:$0xff]   ;;  %v283_v10 = vshrl.u32 %v2263_v8, 16  ;;  %v285_v11 = vshll.u32 %v2263_v8, 16  ;;  %v2265_v17 = vld [vmem:[#allocation5 + $0x60] sm:$0xff]   ;;  %v2267_v20 = vld [vmem:[#allocation5 + $0x68] sm:$0xff]   ;;  %s1882_s26 = sshll.u32 (%p254_p8), %s2499_s15, 5 }
  0x72   : >> { %1977 = vmatprep.subr.bf16.mxu1 %v2518_v2  ;;  %1983 = vmatprep.mubr.msk.bf16.mxu1 %vm2519_vm0, %v2518_v2  ;;  %v2262_v12 = vld [vmem:[#allocation5 + $0x18] sm:$0xff]   ;;  %v2268_v21 = vld [vmem:[#allocation5 + $0x50] sm:$0xff]   ;;  %v2274_v32 = vld [vmem:[#allocation5 + $0x80] sm:$0xff]   ;;  %s2902_s4 = scalar_lea.hbm (%p254_p8), %s2957_s3, %s1882_s26  ;;  %s1634_s9 = sshll.u32 (%p254_p8), %s2753_s11, 4  ;;  %s2905_s9 = int_to_ptr.vmem [resolvable:$true] %s1634_s9 }
  0x73   : >> { %v287_v13 = vrot.slane %v285_v11, 1  ;;  %v260_v16 = vld [vmem:[%s2770_s22] sm:$0x1]  ;;  %v2269_v25 = vld [vmem:[#allocation5 + $0x70] sm:$0xff]   ;;  %v2275_v33 = vld [vmem:[#allocation5 + $0xa0] sm:$0xff]   ;;  %s1620_s28 = scalar_lea.sflag (%p254_p8), [#allocation4], %s2736_s30 }
  0x74   : >> { %1966 = vmatpush3.bf16.msra.mxu0 %v2257_v4  ;;  %v2273_v19 = vld [vmem:[%s2770_s22] ss:$0 sps:$4 sm:$0x66]   ;;  %v2282_v34 = vld [vmem:[%s2770_s22 + $0x4] ss:$0 sps:$4 sm:$0x33]  }
  0x75   : >> { %1978 = vmatpush3.bf16.msra.mxu1 %v2258_v5  ;;  %1967 = vmatprep.subr.bf16.mxu0 %v2518_v2  ;;  %v288_v15 = vor.u32 %v287_v13, %v283_v10  ;;  %v2272_v22 = vld [vmem:[%s2770_s22] ss:$0 sps:$4 sm:$0x22]   ;;  %v520_v23 = vshrl.u32 %v2273_v19, 16  ;;  %v523_v24 = vshll.u32 %v2273_v19, 16  ;;  %v2276_v35 = vld [vmem:[#allocation5 + $0x88] sm:$0xff]  }
  0x76   : >> { %1979 = vmatprep.subr.bf16.mxu1 %v2518_v2  ;;  %v2270_v26 = vld [vmem:[#allocation5 + $0x58] sm:$0xff]   ;;  %v437_v30 = vrot.slane %v2272_v22, 1  ;;  %v2277_v36 = vld [vmem:[#allocation5 + $0xa8] sm:$0xff]   ;;  %v2278_v37 = vld [vmem:[#allocation5 + $0x90] sm:$0xff]   ;;  %v692_v38 = vshll.u32 %v2282_v34, 16  ;;  %v690_v41 = vshrl.u32 %v2282_v34, 16 }
  0x77   : >> { %v522_v27 = vrot.slane %v520_v23, 1  ;;  %v525_v28 = vrot.slane %v523_v24, 2  ;;  %v2271_v29 = vld [vmem:[#allocation5 + $0x78] sm:$0xff]   ;;  %v2279_v39 = vld [vmem:[#allocation5 + $0xb0] sm:$0xff]   ;;  %v2283_v46 = vld [vmem:[#allocation5 + $0xc0] sm:$0xff]   ;;  %s2417_s29 = scalar_lea.vmem (%p254_p8), %s2905_s9, 32 }
  0x78   : >> { %1968 = vmatpush3.bf16.msra.mxu0 %v2259_v6  ;;  %v2280_v40 = vld [vmem:[#allocation5 + $0x98] sm:$0xff]   ;;  %v694_v42 = vrot.slane %v692_v38, 1  ;;  %v2284_v47 = vld [vmem:[#allocation5 + $0xe0] sm:$0xff]   ;;  %v2285_v48 = vld [vmem:[#allocation5 + $0xc8] sm:$0xff]   ;;  %p2418_p12 = scmp.ne.s32.totalorder (%p254_p8), %s2905_s9, %s2417_s29  ;;  %p2972_p1 = scmp.ne.s32.totalorder (%p254_p8), %s2968_s27, 0 }
  0x79   : >> { %1980 = vmatpush3.bf16.msra.mxu1 %v2260_v7  ;;  %1969 = vmatprep.subr.bf16.mxu0 %v2518_v2  ;;  %v526_v31 = vor.u32 %v525_v28, %v522_v27  ;;  %v2281_v43 = vld [vmem:[#allocation5 + $0xb8] sm:$0xff]   ;;  %v2286_v50 = vld [vmem:[#allocation5 + $0xe8] sm:$0xff]   ;;  %v2287_v51 = vld [vmem:[#allocation5 + $0xd0] sm:$0xff]   ;;  %s2520_s7 = smov (%p254_p8), [#allocation8]  }
  0x7a   : >> { %1981 = vmatprep.subr.bf16.mxu1 %v2518_v2  ;;  %v1794_v44 = vld [vmem:[%s2770_s22 + $0x4] sm:$0x1]  ;;  %v695_v45 = vor.u32 %v694_v42, %v690_v41  ;;  %v2288_v54 = vld [vmem:[#allocation5 + $0xf0] sm:$0xff]   ;;  %v2293_v62 = vld [vmem:[#allocation5 + $0x100] sm:$0xff]   ;;  %p2419_p10 = pnand (%p254_p8), %p2418_p12, %p2972_p1  ;;  %s2421_s8 = sshll.u32 (%p254_p8), %s2520_s7, 4  ;;  %s2422_s8 = int_to_ptr.vmem [resolvable:$false] %s2421_s8 }
  0x7b   : >> { %v2292_v49 = vld [vmem:[%s2770_s22 + $0x4] ss:$0 sps:$4 sm:$0x66]   ;;  %v2294_v63 = vld [vmem:[#allocation5 + $0x120] sm:$0xff]   ;;  %v2295_v1 = vld [vmem:[#allocation5 + $0x108] sm:$0xff]   ;;  %s2423_s15 = scalar_lea.vmem (%p254_p8), %s2422_s8, 64  ;;  %p2424_p5 = scmp.lt.s32.totalorder (%p254_p8), %s2905_s9, %s2422_s8 }
  0x7c   : >> { %1970 = vmatpush3.bf16.msra.mxu0 %v2261_v9  ;;  %v860_v52 = vshrl.u32 %v2292_v49, 16  ;;  %v863_v53 = vshll.u32 %v2292_v49, 16  ;;  %v2291_v55 = vld [vmem:[%s2770_s22 + $0x4] ss:$0 sps:$4 sm:$0x22]   ;;  %v2296_v3 = vld [vmem:[#allocation5 + $0x128] sm:$0xff]   ;;  %p2420_p3 = pneg (%p254_p8), %p2419_p10  ;;  %p2425_p9 = scmp.lt.s32.totalorder (%p254_p8), %s2423_s15, %s2417_s29 }
  0x7d   : >> { %1982 = vmatpush3.bf16.msra.mxu1 %v2262_v12  ;;  %1987 = vmatprep.subr.bf16.mxu0 %v2518_v2  ;;  %v2289_v56 = vld [vmem:[#allocation5 + $0xd8] sm:$0xff]   ;;  %v777_v60 = vrot.slane %v2291_v55, 1  ;;  %v2301_v4 = vld [vmem:[%s2770_s22 + $0x8] ss:$0 sps:$4 sm:$0x33]   ;;  %v2297_v5 = vld [vmem:[#allocation5 + $0x110] sm:$0xff]  }
  0x7e   : >> { %1999 = vmatprep.subr.bf16.mxu1 %v2518_v2  ;;  %v862_v57 = vrot.slane %v860_v52, 1  ;;  %v865_v58 = vrot.slane %v863_v53, 2  ;;  %v2290_v59 = vld [vmem:[#allocation5 + $0xf8] sm:$0xff]   ;;  %v1032_v6 = vshll.u32 %v2301_v4, 16  ;;  %v2298_v7 = vld [vmem:[#allocation5 + $0x130] sm:$0xff]   ;;  %v1030_v9 = vshrl.u32 %v2301_v4, 16  ;;  %p2426_p2 = por (%p254_p8), %p2425_p9, %p2424_p5 }
  0x7f   : >> { %1972 = vmatmul.mubr.msk.bf16.vlgmr.msra.gmra.mrb[0].mxu0 %vm313_vm1, %v288_v15  ;;  %v2299_v8 = vld [vmem:[#allocation5 + $0x118] sm:$0xff]   ;;  %v1822_v12 = vld [vmem:[%s2770_s22 + $0x8] sm:$0x1]  ;;  %v2306_v19 = vld [vmem:[#allocation5 + $0x150] sm:$0xff]  }
  0x80   : >> { %1984 = vmatmul.mubr.msk.bf16.vlgmr.msra.gmra.mrb[0].mxu1 %vm313_vm1, %v260_v16  ;;  %1988 = vmatpush3.bf16.msra.mxu0 %v2264_v14  ;;  %v866_v61 = vor.u32 %v865_v58, %v862_v57  ;;  %v1034_v10 = vrot.slane %v1032_v6, 1  ;;  %v2300_v11 = vld [vmem:[#allocation5 + $0x138] sm:$0xff]   ;;  %v2302_v14 = vld [vmem:[#allocation5 + $0x140] sm:$0xff]   ;;  %v2304_v16 = vld [vmem:[#allocation5 + $0x148] sm:$0xff]   ;;  %p2427_p0 = pnand (%p254_p8), %p2426_p2, %p2420_p3 }
  0x81   : >> { %2000 = vmatpush3.bf16.msra.mxu1 %v2265_v17  ;;  %1989 = vmatprep.subr.bf16.mxu0 %v2518_v2  ;;  %v2303_v15 = vld [vmem:[#allocation5 + $0x160] sm:$0xff]   ;;  %v2307_v22 = vld [vmem:[#allocation5 + $0x170] sm:$0xff]   ;;  %v2308_v24 = vld [vmem:[#allocation5 + $0x158] sm:$0xff]  }
  0x82   : >> { %2001 = vmatprep.subr.bf16.mxu1 %v2518_v2  ;;  %1995 = vmatprep.mubr.msk.bf16.mxu0 %vm2519_vm0, %v2518_v2  ;;  %v1035_v13 = vor.u32 %v1034_v10, %v1030_v9  ;;  %v2311_v17 = vld [vmem:[%s2770_s22 + $0x8] ss:$0 sps:$4 sm:$0x66]   ;;  %v2309_v27 = vld [vmem:[#allocation5 + $0x178] sm:$0xff]   ;;  %v2315_v34 = vld [vmem:[#allocation5 + $0x1a8] sm:$0xff]  }
  0x83   : >> { %2007 = vmatprep.mubr.msk.bf16.mxu1 %vm2519_vm0, %v2518_v2  ;;  %v2310_v23 = vld [vmem:[%s2770_s22 + $0x8] ss:$0 sps:$4 sm:$0x22]   ;;  %v2318_v38 = vld [vmem:[#allocation5 + $0x198] sm:$0xff]   ;;  %v1850_v42 = vld [vmem:[%s2770_s22 + $0xc] sm:$0x1] }
  0x84   : >> { %1990 = vmatpush3.bf16.msra.mxu0 %v2266_v18  ;;  %v2305_v18 = vld [vmem:[#allocation5 + $0x168] sm:$0xff]   ;;  %v1117_v28 = vrot.slane %v2310_v23, 1  ;;  %v2319_v41 = vld [vmem:[#allocation5 + $0x1b8] sm:$0xff]   ;;  %v2325_v49 = vld [vmem:[#allocation5 + $0x1d0] sm:$0xff]  }
  0x85   : >> { %2002 = vmatpush3.bf16.msra.mxu1 %v2267_v20  ;;  %1991 = vmatprep.subr.bf16.mxu0 %v2518_v2  ;;  %v1200_v20 = vshrl.u32 %v2311_v17, 16  ;;  %v2326_v52 = vld [vmem:[#allocation5 + $0x1f0] sm:$0xff]   ;;  %v2329_v53 = vld [vmem:[%s2770_s22 + $0xc] ss:$0 sps:$4 sm:$0x22]   ;;  %v2328_v57 = vld [vmem:[#allocation5 + $0x1f8] sm:$0xff]  }
  0x86   : >> { %2003 = vmatprep.subr.bf16.mxu1 %v2518_v2  ;;  %v1457_v58 = vrot.slane %v2329_v53, 1 }
  0x88   : >> { %1992 = vmatpush3.bf16.msra.mxu0 %v2268_v21  ;;  %v1203_v21 = vshll.u32 %v2311_v17, 16 }
  0x89   : >> { %2004 = vmatpush3.bf16.msra.mxu1 %v2269_v25  ;;  %1993 = vmatprep.subr.bf16.mxu0 %v2518_v2  ;;  %v1202_v25 = vrot.slane %v1200_v20, 1 }
  0x8a   : >> { %2005 = vmatprep.subr.bf16.mxu1 %v2518_v2 }
  0x8c   : >> { %1994 = vmatpush3.bf16.msra.mxu0 %v2270_v26  ;;  %v1205_v26 = vrot.slane %v1203_v21, 2 }
  0x8d   : >> { %2006 = vmatpush3.bf16.msra.mxu1 %v2271_v29  ;;  %2011 = vmatprep.subr.bf16.mxu0 %v2518_v2 }
  0x8e   : >> { %2023 = vmatprep.subr.bf16.mxu1 %v2518_v2  ;;  %v1206_v29 = vor.u32 %v1205_v26, %v1202_v25 }
  0x8f   : >> { %1996 = vmatmul.mubr.msk.bf16.vlgmr.msra.gmra.mrb[4].mxu0 %vm313_vm1, %v437_v30  ;;  %v2312_v30 = vld [vmem:[#allocation5 + $0x180] sm:$0xff]  }
  0x90   : >> { %2008 = vmatmul.mubr.msk.bf16.vlgmr.msra.gmra.mrb[4].mxu1 %vm313_vm1, %v526_v31  ;;  %2012 = vmatpush3.bf16.msra.mxu0 %v2274_v32  ;;  %v2313_v31 = vld [vmem:[#allocation5 + $0x1a0] sm:$0xff]   ;;  %v2314_v32 = vld [vmem:[#allocation5 + $0x188] sm:$0xff]  }
  0x91   : >> { %2024 = vmatpush3.bf16.msra.mxu1 %v2275_v33  ;;  %2013 = vmatprep.subr.bf16.mxu0 %v2518_v2  ;;  %v2320_v33 = vld [vmem:[%s2770_s22 + $0xc] ss:$0 sps:$4 sm:$0x33]  }
  0x92   : >> { %2025 = vmatprep.subr.bf16.mxu1 %v2518_v2  ;;  %2019 = vmatprep.mubr.msk.bf16.mxu0 %vm2519_vm0, %v2518_v2 }
  0x93   : >> { %2031 = vmatprep.mubr.msk.bf16.mxu1 %vm2519_vm0, %v2518_v2 }
  0x94   : >> { %2014 = vmatpush3.bf16.msra.mxu0 %v2276_v35  ;;  %v2316_v35 = vld [vmem:[#allocation5 + $0x190] sm:$0xff]  }
  0x95   : >> { %2026 = vmatpush3.bf16.msra.mxu1 %v2277_v36  ;;  %2015 = vmatprep.subr.bf16.mxu0 %v2518_v2  ;;  %v1372_v36 = vshll.u32 %v2320_v33, 16 }
  0x96   : >> { %2027 = vmatprep.subr.bf16.mxu1 %v2518_v2 }
  0x98   : >> { %2016 = vmatpush3.bf16.msra.mxu0 %v2278_v37  ;;  %v2317_v37 = vld [vmem:[#allocation5 + $0x1b0] sm:$0xff]  }
  0x99   : >> { %2028 = vmatpush3.bf16.msra.mxu1 %v2279_v39  ;;  %2017 = vmatprep.subr.bf16.mxu0 %v2518_v2  ;;  %v1370_v39 = vshrl.u32 %v2320_v33, 16 }
  0x9a   : >> { %2029 = vmatprep.subr.bf16.mxu1 %v2518_v2 }
  0x9c   : >> { %2018 = vmatpush3.bf16.msra.mxu0 %v2280_v40  ;;  %v1374_v40 = vrot.slane %v1372_v36, 1 }
  0x9d   : >> { %2030 = vmatpush3.bf16.msra.mxu1 %v2281_v43  ;;  %2035 = vmatprep.subr.bf16.mxu0 %v2518_v2 }
  0x9e   : >> { %2047 = vmatprep.subr.bf16.mxu1 %v2518_v2  ;;  %v1375_v43 = vor.u32 %v1374_v40, %v1370_v39 }
  0x9f   : >> { %2020 = vmatmul.mubr.msk.bf16.vlgmr.msra.gmra.mrb[8].mxu0 %vm313_vm1, %v1794_v44  ;;  %v2321_v44 = vld [vmem:[#allocation5 + $0x1c0] sm:$0xff]  }
  0xa0   : >> { %2032 = vmatmul.mubr.msk.bf16.vlgmr.msra.gmra.mrb[8].mxu1 %vm313_vm1, %v695_v45  ;;  %2036 = vmatpush3.bf16.msra.mxu0 %v2283_v46  ;;  %v2322_v45 = vld [vmem:[#allocation5 + $0x1e0] sm:$0xff]   ;;  %v2323_v46 = vld [vmem:[#allocation5 + $0x1c8] sm:$0xff]  }
  0xa1   : >> { %2048 = vmatpush3.bf16.msra.mxu1 %v2284_v47  ;;  %2037 = vmatprep.subr.bf16.mxu0 %v2518_v2  ;;  %v2330_v47 = vld [vmem:[%s2770_s22 + $0xc] ss:$0 sps:$4 sm:$0x66]  }
  0xa2   : >> { %2049 = vmatprep.subr.bf16.mxu1 %v2518_v2  ;;  %2043 = vmatprep.mubr.msk.bf16.mxu0 %vm2519_vm0, %v2518_v2 }
  0xa3   : >> { %2055 = vmatprep.mubr.msk.bf16.mxu1 %vm2519_vm0, %v2518_v2 }
  0xa4   : >> { %2038 = vmatpush3.bf16.msra.mxu0 %v2285_v48  ;;  %v2324_v48 = vld [vmem:[#allocation5 + $0x1e8] sm:$0xff]  }
  0xa5   : >> { %2050 = vmatpush3.bf16.msra.mxu1 %v2286_v50  ;;  %2039 = vmatprep.subr.bf16.mxu0 %v2518_v2  ;;  %v1540_v50 = vshrl.u32 %v2330_v47, 16 }
  0xa6   : >> { %2051 = vmatprep.subr.bf16.mxu1 %v2518_v2 }
  0xa7   : >> { %v1542_v55 = vrot.slane %v1540_v50, 1 }
  0xa8   : >> { %2040 = vmatpush3.bf16.msra.mxu0 %v2287_v51  ;;  %v1543_v51 = vshll.u32 %v2330_v47, 16 }
  0xa9   : >> { %2052 = vmatpush3.bf16.msra.mxu1 %v2288_v54  ;;  %2041 = vmatprep.subr.bf16.mxu0 %v2518_v2  ;;  %v2327_v54 = vld [vmem:[#allocation5 + $0x1d8] sm:$0xff]  }
  0xaa   : >> { %2053 = vmatprep.subr.bf16.mxu1 %v2518_v2 }
  0xac   : >> { %2042 = vmatpush3.bf16.msra.mxu0 %v2289_v56  ;;  %v1545_v56 = vrot.slane %v1543_v51, 2 }
  0xad   : >> { %2054 = vmatpush3.bf16.msra.mxu1 %v2290_v59  ;;  %2059 = vmatprep.subr.bf16.mxu0 %v2518_v2 }
  0xae   : >> { %2071 = vmatprep.subr.bf16.mxu1 %v2518_v2  ;;  %v1546_v59 = vor.u32 %v1545_v56, %v1542_v55 }
  0xaf   : >> { %2044 = vmatmul.mubr.msk.bf16.vlgmr.msra.gmra.mrb[12].mxu0 %vm313_vm1, %v777_v60 }
  0xb0   : >> { %2056 = vmatmul.mubr.msk.bf16.vlgmr.msra.gmra.mrb[12].mxu1 %vm313_vm1, %v866_v61  ;;  %2060 = vmatpush3.bf16.msra.mxu0 %v2293_v62 }
  0xb1   : >> { %2072 = vmatpush3.bf16.msra.mxu1 %v2294_v63  ;;  %2061 = vmatprep.subr.bf16.mxu0 %v2518_v2 }
  0xb2   : >> { %2073 = vmatprep.subr.bf16.mxu1 %v2518_v2  ;;  %2067 = vmatprep.mubr.msk.bf16.mxu0 %vm2519_vm0, %v2518_v2 }
  0xb3   : >> { %2079 = vmatprep.mubr.msk.bf16.mxu1 %vm2519_vm0, %v2518_v2 }
  0xb4   : >> { %2062 = vmatpush3.bf16.msra.mxu0 %v2295_v1 }
  0xb5   : >> { %2074 = vmatpush3.bf16.msra.mxu1 %v2296_v3  ;;  %2063 = vmatprep.subr.bf16.mxu0 %v2518_v2 }
  0xb6   : >> { %2075 = vmatprep.subr.bf16.mxu1 %v2518_v2 }
  0xb8   : >> { %2064 = vmatpush3.bf16.msra.mxu0 %v2297_v5 }
  0xb9   : >> { %2076 = vmatpush3.bf16.msra.mxu1 %v2298_v7  ;;  %2065 = vmatprep.subr.bf16.mxu0 %v2518_v2 }
  0xba   : >> { %2077 = vmatprep.subr.bf16.mxu1 %v2518_v2 }
  0xbc   : >> { %2066 = vmatpush3.bf16.msra.mxu0 %v2299_v8 }
  0xbd   : >> { %2078 = vmatpush3.bf16.msra.mxu1 %v2300_v11  ;;  %2083 = vmatprep.subr.bf16.mxu0 %v2518_v2 }
  0xbe   : >> { %2095 = vmatprep.subr.bf16.mxu1 %v2518_v2 }
  0xbf   : >> { %2068 = vmatmul.mubr.msk.bf16.vlgmr.msra.gmra.mrb[16].mxu0 %vm313_vm1, %v1822_v12 }
  0xc0   : >> { %2080 = vmatmul.mubr.msk.bf16.vlgmr.msra.gmra.mrb[16].mxu1 %vm313_vm1, %v1035_v13  ;;  %2084 = vmatpush3.bf16.msra.mxu0 %v2302_v14 }
  0xc1   : >> { %2096 = vmatpush3.bf16.msra.mxu1 %v2303_v15  ;;  %2085 = vmatprep.subr.bf16.mxu0 %v2518_v2 }
  0xc2   : >> { %2097 = vmatprep.subr.bf16.mxu1 %v2518_v2  ;;  %2091 = vmatprep.mubr.msk.bf16.mxu0 %vm2519_vm0, %v2518_v2 }
  0xc3   : >> { %2103 = vmatprep.mubr.msk.bf16.mxu1 %vm2519_vm0, %v2518_v2 }
  0xc4   : >> { %2086 = vmatpush3.bf16.msra.mxu0 %v2304_v16 }
  0xc5   : >> { %2098 = vmatpush3.bf16.msra.mxu1 %v2305_v18  ;;  %2087 = vmatprep.subr.bf16.mxu0 %v2518_v2 }
  0xc6   : >> { %2099 = vmatprep.subr.bf16.mxu1 %v2518_v2 }
  0xc8   : >> { %2088 = vmatpush3.bf16.msra.mxu0 %v2306_v19 }
  0xc9   : >> { %2100 = vmatpush3.bf16.msra.mxu1 %v2307_v22  ;;  %2089 = vmatprep.subr.bf16.mxu0 %v2518_v2 }
  0xca   : >> { %2101 = vmatprep.subr.bf16.mxu1 %v2518_v2 }
  0xcc   : >> { %2090 = vmatpush3.bf16.msra.mxu0 %v2308_v24 }
  0xcd   : >> { %2102 = vmatpush3.bf16.msra.mxu1 %v2309_v27  ;;  %2107 = vmatprep.subr.bf16.mxu0 %v2518_v2 }
  0xce   : >> { %2119 = vmatprep.subr.bf16.mxu1 %v2518_v2 }
  0xcf   : >> { %2092 = vmatmul.mubr.msk.bf16.vlgmr.msra.gmra.mrb[20].mxu0 %vm313_vm1, %v1117_v28 }
  0xd0   : >> { %2104 = vmatmul.mubr.msk.bf16.vlgmr.msra.gmra.mrb[20].mxu1 %vm313_vm1, %v1206_v29  ;;  %2108 = vmatpush3.bf16.msra.mxu0 %v2312_v30 }
  0xd1   : >> { %2120 = vmatpush3.bf16.msra.mxu1 %v2313_v31  ;;  %2109 = vmatprep.subr.bf16.mxu0 %v2518_v2 }
  0xd2   : >> { %2121 = vmatprep.subr.bf16.mxu1 %v2518_v2  ;;  %2115 = vmatprep.mubr.msk.bf16.mxu0 %vm2519_vm0, %v2518_v2 }
  0xd3   : >> { %2127 = vmatprep.mubr.msk.bf16.mxu1 %vm2519_vm0, %v2518_v2 }
  0xd4   : >> { %2110 = vmatpush3.bf16.msra.mxu0 %v2314_v32 }
  0xd5   : >> { %2122 = vmatpush3.bf16.msra.mxu1 %v2315_v34  ;;  %2111 = vmatprep.subr.bf16.mxu0 %v2518_v2 }
  0xd6   : >> { %2123 = vmatprep.subr.bf16.mxu1 %v2518_v2 }
  0xd8   : >> { %2112 = vmatpush3.bf16.msra.mxu0 %v2316_v35 }
  0xd9   : >> { %2124 = vmatpush3.bf16.msra.mxu1 %v2317_v37  ;;  %2113 = vmatprep.subr.bf16.mxu0 %v2518_v2 }
  0xda   : >> { %2125 = vmatprep.subr.bf16.mxu1 %v2518_v2 }
  0xdc   : >> { %2114 = vmatpush3.bf16.msra.mxu0 %v2318_v38 }
  0xdd   : >> { %2126 = vmatpush3.bf16.msra.mxu1 %v2319_v41  ;;  %2131 = vmatprep.subr.bf16.mxu0 %v2518_v2 }
  0xde   : >> { %2143 = vmatprep.subr.bf16.mxu1 %v2518_v2 }
  0xdf   : >> { %2116 = vmatmul.mubr.msk.bf16.vlgmr.msra.gmra.mrb[24].mxu0 %vm313_vm1, %v1850_v42 }
  0xe0   : >> { %2128 = vmatmul.mubr.msk.bf16.vlgmr.msra.gmra.mrb[24].mxu1 %vm313_vm1, %v1375_v43  ;;  %2132 = vmatpush3.bf16.msra.mxu0 %v2321_v44 }
  0xe1   : >> { %2144 = vmatpush3.bf16.msra.mxu1 %v2322_v45  ;;  %2133 = vmatprep.subr.bf16.mxu0 %v2518_v2 }
  0xe2   : >> { %2145 = vmatprep.subr.bf16.mxu1 %v2518_v2  ;;  %2139 = vmatprep.mubr.msk.bf16.mxu0 %vm2519_vm0, %v2518_v2 }
  0xe3   : >> { %2151 = vmatprep.mubr.msk.bf16.mxu1 %vm2519_vm0, %v2518_v2 }
  0xe4   : >> { %2134 = vmatpush3.bf16.msra.mxu0 %v2323_v46 }
  0xe5   : >> { %2146 = vmatpush3.bf16.msra.mxu1 %v2324_v48  ;;  %2135 = vmatprep.subr.bf16.mxu0 %v2518_v2 }
  0xe6   : >> { %2147 = vmatprep.subr.bf16.mxu1 %v2518_v2 }
  0xe8   : >> { %2136 = vmatpush3.bf16.msra.mxu0 %v2325_v49 }
  0xe9   : >> { %2148 = vmatpush3.bf16.msra.mxu1 %v2326_v52  ;;  %2137 = vmatprep.subr.bf16.mxu0 %v2518_v2 }
  0xea   : >> { %2149 = vmatprep.subr.bf16.mxu1 %v2518_v2 }
  0xec   : >> { %2138 = vmatpush3.bf16.msra.mxu0 %v2327_v54 }
  0xed   : >> { %2150 = vmatpush3.bf16.msra.mxu1 %v2328_v57 }
  0xef   : >> { %2140 = vmatmul.mubr.msk.bf16.vlgmr.msra.gmra.mrb[28].mxu0 %vm313_vm1, %v1457_v58 }
  0xf0   : >> { %2152 = vmatmul.mubr.msk.bf16.vlgmr.msra.gmra.mrb[28].mxu1 %vm313_vm1, %v1546_v59 }
 0x152   : >> { %v351_v60 = vpop.f32.mrb[0].mxu0 }
 0x153   : >> { %v418_v61 = vpop.f32.mrb[0].mxu1  ;;  %v1973_v62 = vpop.f32.mrb[1].mxu0 }
 0x154   : >> { %v419_v63 = vadd.f32 %v418_v61, %v351_v60  ;;  %v1985_v1 = vpop.f32.mrb[1].mxu1  ;;  %v354_v3 = vpop.f32.mrb[2].mxu0 }
 0x155   : >> { %v421_v4 = vpop.f32.mrb[2].mxu1  ;;  %v1974_v5 = vpop.f32.mrb[3].mxu0 }
 0x156   : >> { %v1986_v6 = vpop.f32.mrb[3].mxu1 }
 0x162   : >> { %v499_v7 = vpop.f32.mrb[4].mxu0 }
 0x163   : >> { %v505_v8 = vadd.f32 %v499_v7, %v419_v63  ;;  %v588_v2 = vpop.f32.mrb[4].mxu1  ;;  %v1997_v9 = vpop.f32.mrb[5].mxu0 }
 0x164   : >> { %v2009_v10 = vpop.f32.mrb[5].mxu1  ;;  %v502_v11 = vpop.f32.mrb[6].mxu0 }
 0x165   : >> { %v594_v12 = vadd.f32 %v588_v2, %v505_v8  ;;  %v591_v13 = vpop.f32.mrb[6].mxu1  ;;  %v1998_v14 = vpop.f32.mrb[7].mxu0 }
 0x166   : >> { %v2010_v15 = vpop.f32.mrb[7].mxu1 }
 0x172   : >> { %v669_v16 = vpop.f32.mrb[8].mxu0 }
 0x173   : >> { %v675_v17 = vadd.f32 %v669_v16, %v594_v12  ;;  %v757_v18 = vpop.f32.mrb[8].mxu1  ;;  %v2021_v19 = vpop.f32.mrb[9].mxu0 }
 0x174   : >> { %v2033_v20 = vpop.f32.mrb[9].mxu1  ;;  %v672_v21 = vpop.f32.mrb[10].mxu0 }
 0x175   : >> { %v763_v22 = vadd.f32 %v757_v18, %v675_v17  ;;  %v760_v23 = vpop.f32.mrb[10].mxu1  ;;  %v2022_v24 = vpop.f32.mrb[11].mxu0 }
 0x176   : >> { %v2034_v25 = vpop.f32.mrb[11].mxu1 }
 0x182   : >> { %v839_v26 = vpop.f32.mrb[12].mxu0 }
 0x183   : >> { %v845_v27 = vadd.f32 %v839_v26, %v763_v22  ;;  %v928_v28 = vpop.f32.mrb[12].mxu1  ;;  %v2045_v29 = vpop.f32.mrb[13].mxu0 }
 0x184   : >> { %v2057_v30 = vpop.f32.mrb[13].mxu1  ;;  %v842_v31 = vpop.f32.mrb[14].mxu0 }
 0x185   : >> { %v934_v32 = vadd.f32 %v928_v28, %v845_v27  ;;  %v931_v33 = vpop.f32.mrb[14].mxu1  ;;  %v2046_v34 = vpop.f32.mrb[15].mxu0 }
 0x186   : >> { %v2058_v35 = vpop.f32.mrb[15].mxu1 }
 0x192   : >> { %v1009_v36 = vpop.f32.mrb[16].mxu0 }
 0x193   : >> { %v1015_v37 = vadd.f32 %v1009_v36, %v934_v32  ;;  %v1097_v38 = vpop.f32.mrb[16].mxu1  ;;  %v2069_v39 = vpop.f32.mrb[17].mxu0 }
 0x194   : >> { %v2081_v40 = vpop.f32.mrb[17].mxu1  ;;  %v1012_v41 = vpop.f32.mrb[18].mxu0 }
 0x195   : >> { %v1103_v42 = vadd.f32 %v1097_v38, %v1015_v37  ;;  %v1100_v43 = vpop.f32.mrb[18].mxu1  ;;  %v2070_v44 = vpop.f32.mrb[19].mxu0 }
 0x196   : >> { %v2082_v45 = vpop.f32.mrb[19].mxu1 }
 0x1a2   : >> { %v1179_v46 = vpop.f32.mrb[20].mxu0 }
 0x1a3   : >> { %v1185_v47 = vadd.f32 %v1179_v46, %v1103_v42  ;;  %v1268_v48 = vpop.f32.mrb[20].mxu1  ;;  %v2093_v49 = vpop.f32.mrb[21].mxu0 }
 0x1a4   : >> { %v2105_v50 = vpop.f32.mrb[21].mxu1  ;;  %v1182_v51 = vpop.f32.mrb[22].mxu0 }
 0x1a5   : >> { %v1274_v52 = vadd.f32 %v1268_v48, %v1185_v47  ;;  %v1271_v53 = vpop.f32.mrb[22].mxu1  ;;  %v2094_v54 = vpop.f32.mrb[23].mxu0 }
 0x1a6   : >> { %v2106_v55 = vpop.f32.mrb[23].mxu1 }
 0x1b2   : >> { %v1349_v56 = vpop.f32.mrb[24].mxu0 }
 0x1b3   : >> { %v1355_v57 = vadd.f32 %v1349_v56, %v1274_v52  ;;  %v1437_v58 = vpop.f32.mrb[24].mxu1  ;;  %v2117_v59 = vpop.f32.mrb[25].mxu0 }
 0x1b4   : >> { %v2129_v60 = vpop.f32.mrb[25].mxu1  ;;  %v1352_v61 = vpop.f32.mrb[26].mxu0 }
 0x1b5   : >> { %v1443_v62 = vadd.f32 %v1437_v58, %v1355_v57  ;;  %v1440_v63 = vpop.f32.mrb[26].mxu1  ;;  %v2118_v1 = vpop.f32.mrb[27].mxu0 }
 0x1b6   : >> { %v2130_v3 = vpop.f32.mrb[27].mxu1 }
 0x1c2   : >> { %v1519_v4 = vpop.f32.mrb[28].mxu0 }
 0x1c3   : >> { %v1525_v5 = vadd.f32 %v1519_v4, %v1443_v62  ;;  %v1608_v6 = vpop.f32.mrb[28].mxu1  ;;  %v2141_v7 = vpop.f32.mrb[29].mxu0 }
 0x1c4   : >> { %v2153_v8 = vpop.f32.mrb[29].mxu1  ;;  %v1522_v2 = vpop.f32.mrb[30].mxu0 }
 0x1c5   : >> { %v1614_v9 = vadd.f32 %v1608_v6, %v1525_v5  ;;  %v1611_v10 = vpop.f32.mrb[30].mxu1  ;;  %v2142_v11 = vpop.f32.mrb[31].mxu0  ;;  %256 = sbr.rel (!%p254_p8) target bundleno = 110 (0x6e), region = 114 }
 0x1c6   : >> { %v2154_v12 = vpop.f32.mrb[31].mxu1 }
 0x1c7   : >> { %v1615_v13 = vadd.f32 %v2751_v0, %v1614_v9 }
 0x1c9   : >> { %v1616_v14 = vpack.c.bf16 %v1615_v13, %v1615_v13 }
 0x1cb   : >> { %1618 = vst [vmem:[%s1617_s5] sm:$0x1] %v1616_v14 }
 0x1cc   : > { %2430 = shalt.err (!%p2427_p0)
}
 0x1cd   : > { %s2431_s21 = scalar_lea.hbm %s2902_s4, 32  ;;  %s2435_s18 = scalar_lea.hbm %s2957_s3, 64 }
 0x1ce   : > { %p2432_p4 = scmp.ne.s32.totalorder %s2902_s4, %s2431_s21  ;;  %p2436_p7 = scmp.lt.u32.totalorder %s2902_s4, %s2957_s3 }
 0x1cf   : > { %p2437_p11 = scmp.lt.u32.totalorder %s2435_s18, %s2431_s21  ;;  %p2439_p12 = scmp.lt.u32.totalorder %s2431_s21, %s2902_s4 }
 0x1d0   : > { %p2433_p13 = pnand %p2432_p4, %p2972_p1 }
 0x1d1   : > { %p2438_p8 = por %p2437_p11, %p2436_p7 }
 0x1d2   : > { %p2434_p6 = pneg %p2433_p13 }
 0x1d3   : > { %p2440_p10 = por %p2439_p12, %p2438_p8 }
 0x1d5   : > { %p2441_p3 = pnand %p2440_p10, %p2434_p6 }
 0x1d7   : > { %2444 = shalt.err (!%p2441_p3)
}
 0x1d8   : > { %s2521_s5 = smov 16   ;;  %s2522_s26 = smov 1  }
 0x1d9   : > { %2168 = dma.vmem_to_hbm [thread:$0]  (%p2972_p1), %s2905_s9, 32, %s2902_s4, %s1620_s28, %s2521_s5, %s2521_s5, %s2522_s26  }
 0x1da PF: > { %s1649_s10 = sand.u32 1, %s2487_s12   ;;  %p2973_p5 = scmp.ne.s32.totalorder %s2965_s23, 0 }
 0x1db   : > { %p2974_p9 = scmp.ge.s32.totalorder %s2507_s17, 2  ;;  %s1650_s19 = scalar_lea.sflag [#allocation4], %s1649_s10 }
 0x1dd   : > { %p2182_p2 = pnand %p2974_p9, %p2973_p5 }
 0x1df   : > { %2482 = dma.done.wait (!%p2182_p2), %s1650_s19, 32  }
 0x1e0   : > { %2484 = vsyncadd (!%p2182_p2), %s1650_s19, 4294967264  ;;  %s20_s17 = sadd.s32 1, %s2507_s17   ;;  %s2975_s12 = smov %s2491_s13 }
 0x1e1   : > { %p17_p0 = scmp.ge.s32.totalorder %s20_s17, 4   ;;  %s2976_s13 = smov %s2495_s14 }
 0x1e2   : > { %s2977_s14 = smov %s2692_s6  ;;  %s2978_s15 = smov %s2503_s16 }
 0x1e3   : > { %s2979_s16 = smov %s2981_s25  ;;  %19 = sbr.rel (!%p17_p0) target bundleno = 7 (0x7), region = 125 }
 0x1ea   :  { %1655 = vsyncpa [#allocation3], 1 }
 0x1eb   :  { %1657 = vsyncpa [#allocation3 + $0x1], 1 }
 0x1ec   :  { %1658 = vsyncpa [#allocation6], 1 }
 0x1ed   :  { %1659 = vsyncpa [#allocation4], 1 }
 0x1ee   :  { %1661 = vsyncpa [#allocation4 + $0x1], 1 }

</bundles_post_ra>
